<compile_context>
chip_gen: v7x
topology: tpu7x:2x2x1
jax: 0.10.0
libtpu: 0.0.40
codegen_flags: <defaults>
</compile_context>

<pallas_src>
import numpy as np
import jax
import jax.numpy as jnp
from jax import lax
from jax.experimental import pallas as pl
from jax.experimental.pallas import tpu as pltpu

# Model dims (from the PyTorch module)
C_IN = 21       # input features per timestep
C_CONV = 32     # conv1 out channels
H_LSTM = 64     # LSTM hidden size
H_FC1 = 32      # fc1 out features
BN_EPS = 1e-5
K_IM2COL = 3 * C_IN     # 63
K_PAD = 64              # sublane-aligned contraction dim for the conv matmul
SUBLANE = 8             # f32 sublane group

# Mosaic dot_general lowering supports only DEFAULT / HIGHEST; HIGHEST keeps
# the 1e-4 numerical check tight through the recurrence.
_PREC = lax.Precision.HIGHEST


def convlstm_kernel(xim_ref,            # (T*BP, K_PAD)   im2col'd conv input, time-major
                    cw_ref, cb_ref,     # (K_PAD, C_CONV), (1, C_CONV)   BN1 folded in
                    wih0_ref, b0_ref,   # (C_CONV, 4H), (1, 4H)          gate cols (i,f,o,g)
                    wrec_ref,           # (H, 8H) = [whh0 | whh1]        fused recurrent weights
                    wih1_ref, b1_ref,   # (H, 4H), (1, 4H)
                    fw1_ref, fb1_ref,   # (H, H_FC1), (1, H_FC1)         BN2 folded in
                    fw2_ref, fb2_ref,   # (1, H_FC1), (1, 1)
                    y_ref):             # (BP, 1)
    BP = y_ref.shape[0]
    T = xim_ref.shape[0] // BP
    H = H_LSTM
    G3 = 3 * H
    G4 = 4 * H

    def mm(a, b):
        return jnp.dot(a, b, preferred_element_type=jnp.float32, precision=_PREC)

    def cell(g, c_prev):
        # gate columns pre-ordered (i, f, o, g): one contiguous sigmoid + one tanh
        s = jax.nn.sigmoid(g[:, :G3])
        gg = jnp.tanh(g[:, G3:])
        c = s[:, H:2 * H] * c_prev + s[:, :H] * gg
        h = s[:, 2 * H:G3] * jnp.tanh(c)
        return h, c

    # ---- Conv1d(k=3, pad=1) + BN1(eval, folded) + ReLU: ONE fused matmul ----
    h = jnp.maximum(mm(xim_ref[...], cw_ref[...]) + cb_ref[...], 0.0)      # (T*BP, C_CONV)

    # ---- Hoisted layer-0 input projection over ALL timesteps (one matmul) ----
    # Kept as an SSA value; every per-step slice below is static & tile-aligned.
    gin = mm(h, wih0_ref[...]) + b0_ref[...]                               # (T*BP, 4H)

    b1b = jnp.broadcast_to(b1_ref[...], (BP, G4))   # hoisted out of the unrolled loop

    zH = jnp.zeros((BP, H), jnp.float32)

    # ---- t = 0 (zero initial state -> recurrent terms vanish) ----
    h0, c0 = cell(gin[0:BP, :], zH)
    h1, c1 = cell(mm(h0, wih1_ref[...]) + b1b, zH)

    # ---- remaining timesteps: one fused recurrent matmul per step ----
    # TODO(synk): train-mode inter-layer dropout (p=0.5) is not implemented
    # (eval semantics, matching eval-mode BatchNorm).
    for t in range(1, T):   # static unroll; T is known at trace time
        hstk = jnp.concatenate([h0, h1], axis=0)          # (2*BP, H), sublane-aligned stack
        rec = mm(hstk, wrec_ref[...])                     # (2*BP, 8H): both layers' recurrences
        h0, c0 = cell(gin[t * BP:(t + 1) * BP, :] + rec[0:BP, 0:G4], c0)
        h1, c1 = cell(mm(h0, wih1_ref[...]) + rec[BP:, G4:] + b1b, c1)

    # ---- Head: fc1 (BN2 folded) -> ReLU -> fc2 ----
    z = jnp.maximum(mm(h1, fw1_ref[...]) + fb1_ref[...], 0.0)              # (BP, H_FC1)
    y_ref[...] = jnp.sum(z * fw2_ref[...], axis=1, keepdims=True) + fb2_ref[...]


def _reorder_gates(w, axis=0):
    """PyTorch gate order (i, f, g, o) -> kernel order (i, f, o, g)."""
    i, f, g, o = jnp.split(w, 4, axis=axis)
    return jnp.concatenate([i, f, o, g], axis=axis)


def conv_lstm1_forward(x, p):
    """x: (B, T, 21), matching the PyTorch module's input. Returns (B, 1)."""
    B, T, _ = x.shape
    BP = -(-B // SUBLANE) * SUBLANE      # batch padded to a full f32 sublane group

    # Host-side im2col: time-major, channels-last, 3 taps concatenated, K padded to 64.
    x_tm = jnp.transpose(x, (1, 0, 2))                                   # (T, B, C_IN)
    x_tm = jnp.pad(x_tm, ((0, 0), (0, BP - B), (0, 0)))                  # (T, BP, C_IN)
    xp = jnp.pad(x_tm, ((1, 1), (0, 0), (0, 0)))                         # pad=1 in time
    xim = jnp.concatenate([xp[0:T], xp[1:T + 1], xp[2:T + 2]], -1)       # (T, BP, 3*C_IN)
    xim = jnp.pad(xim.reshape(T * BP, K_IM2COL), ((0, 0), (0, K_PAD - K_IM2COL)))

    # Fold BatchNorm (eval) host-side: BN1 into the conv matmul, BN2 into fc1.
    s1 = p['bn1_gamma'] / jnp.sqrt(p['bn1_var'] + BN_EPS)
    sh1 = p['bn1_beta'] - p['bn1_mean'] * s1
    s2 = p['bn2_gamma'] / jnp.sqrt(p['bn2_var'] + BN_EPS)
    sh2 = p['bn2_beta'] - p['bn2_mean'] * s2

    cw = jnp.transpose(p['conv_w'], (2, 1, 0)).reshape(K_IM2COL, C_CONV)  # tap-major rows
    cw = jnp.pad(cw, ((0, K_PAD - K_IM2COL), (0, 0))) * s1[None, :]
    cb = (p['conv_b'] * s1 + sh1).reshape(1, C_CONV)

    fw1 = p['fc1_w'].T * s2[None, :]
    fb1 = (p['fc1_b'] * s2 + sh2).reshape(1, H_FC1)

    def prep_lstm(w_ih, w_hh, b_ih, b_hh):
        wih = _reorder_gates(w_ih, axis=0).T                 # (in, 4H), columns (i,f,o,g)
        whh = _reorder_gates(w_hh, axis=0).T                 # (H, 4H)
        b = _reorder_gates(b_ih + b_hh, axis=0).reshape(1, 4 * H_LSTM)
        return wih, whh, b

    wih0, whh0, b0 = prep_lstm(p['w_ih_l0'], p['w_hh_l0'], p['b_ih_l0'], p['b_hh_l0'])
    wih1, whh1, b1 = prep_lstm(p['w_ih_l1'], p['w_hh_l1'], p['b_ih_l1'], p['b_hh_l1'])
    w_rec = jnp.concatenate([whh0, whh1], axis=1)            # (H, 8H): both recurrences fused

    inputs = (
        xim, cw, cb,
        wih0, b0,
        w_rec,
        wih1, b1,
        fw1, fb1,
        p['fc2_w'], p['fc2_b'].reshape(1, 1),
    )

    # No grid at this size: one invocation, ~300 KiB of VMEM operands.
    # TODO(synk): at large batch add a "parallel" batch grid axis (feeds v7x's
    # second TensorCore) and tile the batch so gin stays under v7x's 64 MiB VMEM.
    y = pl.pallas_call(
        convlstm_kernel,
        out_shape=jax.ShapeDtypeStruct((BP, 1), jnp.float32),
        in_specs=[pl.BlockSpec(memory_space=pltpu.MemorySpace.VMEM)] * len(inputs),
        out_specs=pl.BlockSpec(memory_space=pltpu.MemorySpace.VMEM),
    )(*inputs)
    return y[:B]


def reference_forward(x, p):
    """Plain-JAX replica of ConvLSTM1.forward (eval-mode BN, no dropout)."""
    B, T, _ = x.shape
    xin = jnp.transpose(x, (0, 2, 1))                               # (B, 21, T) == x.permute(0,2,1)
    xin_p = jnp.pad(xin, ((0, 0), (0, 0), (1, 1)))
    conv = jnp.zeros((B, C_CONV, T), jnp.float32)
    for k in range(3):
        conv = conv + jnp.einsum('oc,bct->bot', p['conv_w'][:, :, k], xin_p[:, :, k:k + T])
    conv = conv + p['conv_b'][None, :, None]
    s1 = p['bn1_gamma'] / jnp.sqrt(p['bn1_var'] + BN_EPS)
    sh1 = p['bn1_beta'] - p['bn1_mean'] * s1
    h = jax.nn.relu(conv * s1[None, :, None] + sh1[None, :, None])
    h = jnp.transpose(h, (0, 2, 1))                                 # (B, T, 32)

    def cell(x_t, hp, cp, wih, whh, bih, bhh):
        g = x_t @ wih.T + hp @ whh.T + bih + bhh
        i, f, gg, o = jnp.split(g, 4, axis=-1)
        c = jax.nn.sigmoid(f) * cp + jax.nn.sigmoid(i) * jnp.tanh(gg)
        return jax.nn.sigmoid(o) * jnp.tanh(c), c

    h0 = c0 = h1 = c1 = jnp.zeros((B, H_LSTM), jnp.float32)
    for t in range(T):
        h0, c0 = cell(h[:, t], h0, c0, p['w_ih_l0'], p['w_hh_l0'], p['b_ih_l0'], p['b_hh_l0'])
        h1, c1 = cell(h0, h1, c1, p['w_ih_l1'], p['w_hh_l1'], p['b_ih_l1'], p['b_hh_l1'])

    z = h1 @ p['fc1_w'].T + p['fc1_b']
    s2 = p['bn2_gamma'] / jnp.sqrt(p['bn2_var'] + BN_EPS)
    sh2 = p['bn2_beta'] - p['bn2_mean'] * s2
    z = jax.nn.relu(z * s2 + sh2)
    return z @ p['fc2_w'].T + p['fc2_b']


def init_params(key):
    ks = jax.random.split(key, 24)

    def n(i, shape, scale=0.1):
        return scale * jax.random.normal(ks[i], shape, jnp.float32)

    return {
        'conv_w': n(0, (C_CONV, C_IN, 3)),
        'conv_b': n(1, (C_CONV,)),
        'bn1_gamma': 1.0 + 0.1 * jax.random.normal(ks[2], (C_CONV,), jnp.float32),
        'bn1_beta': n(3, (C_CONV,)),
        'bn1_mean': n(4, (C_CONV,)),
        'bn1_var': jax.random.uniform(ks[5], (C_CONV,), jnp.float32, 0.5, 1.5),
        'w_ih_l0': n(6, (4 * H_LSTM, C_CONV)),
        'w_hh_l0': n(7, (4 * H_LSTM, H_LSTM)),
        'b_ih_l0': n(8, (4 * H_LSTM,)),
        'b_hh_l0': n(9, (4 * H_LSTM,)),
        'w_ih_l1': n(10, (4 * H_LSTM, H_LSTM)),
        'w_hh_l1': n(11, (4 * H_LSTM, H_LSTM)),
        'b_ih_l1': n(12, (4 * H_LSTM,)),
        'b_hh_l1': n(13, (4 * H_LSTM,)),
        'fc1_w': n(14, (H_FC1, H_LSTM)),
        'fc1_b': n(15, (H_FC1,)),
        'bn2_gamma': 1.0 + 0.1 * jax.random.normal(ks[16], (H_FC1,), jnp.float32),
        'bn2_beta': n(17, (H_FC1,)),
        'bn2_mean': n(18, (H_FC1,)),
        'bn2_var': jax.random.uniform(ks[19], (H_FC1,), jnp.float32, 0.5, 1.5),
        'fc2_w': n(20, (1, H_FC1)),
        'fc2_b': n(21, (1,)),
    }


if __name__ == "__main__":
    # The kernel sets matmul precision explicitly at each dot; this config only
    # keeps the plain-JAX reference numerically aligned with it.
    jax.config.update("jax_default_matmul_precision", "float32")

    key = jax.random.PRNGKey(0)
    k_x, k_p = jax.random.split(key)
    B, T = 2, 8
    x = jax.random.normal(k_x, (B, T, C_IN), jnp.float32)
    params = init_params(k_p)

    y = conv_lstm1_forward(x, params)
    y = jax.block_until_ready(y)

    y_ref = jax.block_until_ready(reference_forward(x, params))
    np.testing.assert_allclose(np.asarray(y), np.asarray(y_ref), rtol=1e-3, atol=1e-4)
    assert y.shape == (B, 1)

    print("KERNEL_OK")
</pallas_src>

<mosaic_0001>
module attributes {stable_mosaic.version = 11 : i64} {
  func.func @convlstm_kernel(%arg0: memref<64x64xf32, #tpu.memory_space<vmem>>, %arg1: memref<64x32xf32, #tpu.memory_space<vmem>>, %arg2: memref<1x32xf32, #tpu.memory_space<vmem>>, %arg3: memref<32x256xf32, #tpu.memory_space<vmem>>, %arg4: memref<1x256xf32, #tpu.memory_space<vmem>>, %arg5: memref<64x512xf32, #tpu.memory_space<vmem>>, %arg6: memref<64x256xf32, #tpu.memory_space<vmem>>, %arg7: memref<1x256xf32, #tpu.memory_space<vmem>>, %arg8: memref<64x32xf32, #tpu.memory_space<vmem>>, %arg9: memref<1x32xf32, #tpu.memory_space<vmem>>, %arg10: memref<1x32xf32, #tpu.memory_space<vmem>>, %arg11: memref<1x1xf32, #tpu.memory_space<vmem>>, %arg12: memref<8x1xf32, #tpu.memory_space<vmem>>) attributes {dimension_semantics = [], scalar_prefetch = 0 : i64, scratch_operands = 0 : i64, tpu.core_type = #tpu.core_type<tc>} {
    %c0 = arith.constant 0 : index
    %c0_0 = arith.constant 0 : index
    %0 = vector.load %arg0[%c0, %c0_0] : memref<64x64xf32, #tpu.memory_space<vmem>>, vector<64x64xf32>
    %c0_1 = arith.constant 0 : index
    %c0_2 = arith.constant 0 : index
    %1 = vector.load %arg1[%c0_1, %c0_2] : memref<64x32xf32, #tpu.memory_space<vmem>>, vector<64x32xf32>
    %cst = arith.constant dense<0.000000e+00> : vector<64x32xf32>
    %2 = tpu.matmul %0, %1, %cst {dimension_numbers = #tpu.dot_dimension_numbers<[1], [0], [0], [1], [0, 0, 1, 1], [], []>, precision = #tpu.contract_precision<fp32>} : vector<64x64xf32>, vector<64x32xf32>, vector<64x32xf32> -> vector<64x32xf32>
    %c0_3 = arith.constant 0 : index
    %c0_4 = arith.constant 0 : index
    %3 = vector.load %arg2[%c0_3, %c0_4] : memref<1x32xf32, #tpu.memory_space<vmem>>, vector<1x32xf32>
    %4 = vector.broadcast %3 : vector<1x32xf32> to vector<64x32xf32>
    %5 = arith.addf %2, %4 : vector<64x32xf32>
    %cst_5 = arith.constant 0.000000e+00 : f32
    %6 = vector.broadcast %cst_5 : f32 to vector<64x32xf32>
    %7 = arith.maximumf %5, %6 : vector<64x32xf32>
    %c0_6 = arith.constant 0 : index
    %c0_7 = arith.constant 0 : index
    %8 = vector.load %arg3[%c0_6, %c0_7] : memref<32x256xf32, #tpu.memory_space<vmem>>, vector<32x256xf32>
    %cst_8 = arith.constant dense<0.000000e+00> : vector<64x256xf32>
    %9 = tpu.matmul %7, %8, %cst_8 {dimension_numbers = #tpu.dot_dimension_numbers<[1], [0], [0], [1], [0, 0, 1, 1], [], []>, precision = #tpu.contract_precision<fp32>} : vector<64x32xf32>, vector<32x256xf32>, vector<64x256xf32> -> vector<64x256xf32>
    %c0_9 = arith.constant 0 : index
    %c0_10 = arith.constant 0 : index
    %10 = vector.load %arg4[%c0_9, %c0_10] : memref<1x256xf32, #tpu.memory_space<vmem>>, vector<1x256xf32>
    %11 = vector.broadcast %10 : vector<1x256xf32> to vector<64x256xf32>
    %12 = arith.addf %9, %11 : vector<64x256xf32>
    %c0_11 = arith.constant 0 : index
    %c0_12 = arith.constant 0 : index
    %13 = vector.load %arg7[%c0_11, %c0_12] : memref<1x256xf32, #tpu.memory_space<vmem>>, vector<1x256xf32>
    %14 = vector.shape_cast %13 : vector<1x256xf32> to vector<1x256xf32>
    %15 = vector.broadcast %14 : vector<1x256xf32> to vector<8x256xf32>
    %cst_13 = arith.constant 0.000000e+00 : f32
    %16 = vector.broadcast %cst_13 : f32 to vector<8x64xf32>
    %17 = vector.extract_strided_slice %12 {offsets = [0, 0], sizes = [8, 256], strides = [1, 1]} : vector<64x256xf32> to vector<8x256xf32>
    %18 = vector.extract_strided_slice %17 {offsets = [0, 0], sizes = [8, 192], strides = [1, 1]} : vector<8x256xf32> to vector<8x192xf32>
    %19 = arith.negf %18 : vector<8x192xf32>
    %20 = math.exp %19 : vector<8x192xf32>
    %cst_14 = arith.constant 1.000000e+00 : f32
    %21 = vector.broadcast %cst_14 : f32 to vector<8x192xf32>
    %22 = arith.addf %21, %20 : vector<8x192xf32>
    %23 = arith.divf %21, %22 : vector<8x192xf32>
    %24 = vector.extract_strided_slice %17 {offsets = [0, 192], sizes = [8, 64], strides = [1, 1]} : vector<8x256xf32> to vector<8x64xf32>
    %25 = math.tanh %24 : vector<8x64xf32>
    %26 = vector.extract_strided_slice %23 {offsets = [0, 64], sizes = [8, 64], strides = [1, 1]} : vector<8x192xf32> to vector<8x64xf32>
    %27 = arith.mulf %26, %16 : vector<8x64xf32>
    %28 = vector.extract_strided_slice %23 {offsets = [0, 0], sizes = [8, 64], strides = [1, 1]} : vector<8x192xf32> to vector<8x64xf32>
    %29 = arith.mulf %28, %25 : vector<8x64xf32>
    %30 = arith.addf %27, %29 : vector<8x64xf32>
    %31 = vector.extract_strided_slice %23 {offsets = [0, 128], sizes = [8, 64], strides = [1, 1]} : vector<8x192xf32> to vector<8x64xf32>
    %32 = math.tanh %30 : vector<8x64xf32>
    %33 = arith.mulf %31, %32 : vector<8x64xf32>
    %c0_15 = arith.constant 0 : index
    %c0_16 = arith.constant 0 : index
    %34 = vector.load %arg6[%c0_15, %c0_16] : memref<64x256xf32, #tpu.memory_space<vmem>>, vector<64x256xf32>
    %cst_17 = arith.constant dense<0.000000e+00> : vector<8x256xf32>
    %35 = tpu.matmul %33, %34, %cst_17 {dimension_numbers = #tpu.dot_dimension_numbers<[1], [0], [0], [1], [0, 0, 1, 1], [], []>, precision = #tpu.contract_precision<fp32>} : vector<8x64xf32>, vector<64x256xf32>, vector<8x256xf32> -> vector<8x256xf32>
    %36 = arith.addf %35, %15 : vector<8x256xf32>
    %37 = vector.extract_strided_slice %36 {offsets = [0, 0], sizes = [8, 192], strides = [1, 1]} : vector<8x256xf32> to vector<8x192xf32>
    %38 = arith.negf %37 : vector<8x192xf32>
    %39 = math.exp %38 : vector<8x192xf32>
    %cst_18 = arith.constant 1.000000e+00 : f32
    %40 = vector.broadcast %cst_18 : f32 to vector<8x192xf32>
    %41 = arith.addf %40, %39 : vector<8x192xf32>
    %42 = arith.divf %40, %41 : vector<8x192xf32>
    %43 = vector.extract_strided_slice %36 {offsets = [0, 192], sizes = [8, 64], strides = [1, 1]} : vector<8x256xf32> to vector<8x64xf32>
    %44 = math.tanh %43 : vector<8x64xf32>
    %45 = vector.extract_strided_slice %42 {offsets = [0, 64], sizes = [8, 64], strides = [1, 1]} : vector<8x192xf32> to vector<8x64xf32>
    %46 = arith.mulf %45, %16 : vector<8x64xf32>
    %47 = vector.extract_strided_slice %42 {offsets = [0, 0], sizes = [8, 64], strides = [1, 1]} : vector<8x192xf32> to vector<8x64xf32>
    %48 = arith.mulf %47, %44 : vector<8x64xf32>
    %49 = arith.addf %46, %48 : vector<8x64xf32>
    %50 = vector.extract_strided_slice %42 {offsets = [0, 128], sizes = [8, 64], strides = [1, 1]} : vector<8x192xf32> to vector<8x64xf32>
    %51 = math.tanh %49 : vector<8x64xf32>
    %52 = arith.mulf %50, %51 : vector<8x64xf32>
    %53 = tpu.concatenate %33, %52 in 0 : vector<8x64xf32>, vector<8x64xf32> -> vector<16x64xf32>
    %c0_19 = arith.constant 0 : index
    %c0_20 = arith.constant 0 : index
    %54 = vector.load %arg5[%c0_19, %c0_20] : memref<64x512xf32, #tpu.memory_space<vmem>>, vector<64x512xf32>
    %cst_21 = arith.constant dense<0.000000e+00> : vector<16x512xf32>
    %55 = tpu.matmul %53, %54, %cst_21 {dimension_numbers = #tpu.dot_dimension_numbers<[1], [0], [0], [1], [0, 0, 1, 1], [], []>, precision = #tpu.contract_precision<fp32>} : vector<16x64xf32>, vector<64x512xf32>, vector<16x512xf32> -> vector<16x512xf32>
    %56 = vector.extract_strided_slice %12 {offsets = [8, 0], sizes = [8, 256], strides = [1, 1]} : vector<64x256xf32> to vector<8x256xf32>
    %57 = vector.extract_strided_slice %55 {offsets = [0, 0], sizes = [8, 256], strides = [1, 1]} : vector<16x512xf32> to vector<8x256xf32>
    %58 = arith.addf %56, %57 : vector<8x256xf32>
    %59 = vector.extract_strided_slice %58 {offsets = [0, 0], sizes = [8, 192], strides = [1, 1]} : vector<8x256xf32> to vector<8x192xf32>
    %60 = arith.negf %59 : vector<8x192xf32>
    %61 = math.exp %60 : vector<8x192xf32>
    %cst_22 = arith.constant 1.000000e+00 : f32
    %62 = vector.broadcast %cst_22 : f32 to vector<8x192xf32>
    %63 = arith.addf %62, %61 : vector<8x192xf32>
    %64 = arith.divf %62, %63 : vector<8x192xf32>
    %65 = vector.extract_strided_slice %58 {offsets = [0, 192], sizes = [8, 64], strides = [1, 1]} : vector<8x256xf32> to vector<8x64xf32>
    %66 = math.tanh %65 : vector<8x64xf32>
    %67 = vector.extract_strided_slice %64 {offsets = [0, 64], sizes = [8, 64], strides = [1, 1]} : vector<8x192xf32> to vector<8x64xf32>
    %68 = arith.mulf %67, %30 : vector<8x64xf32>
    %69 = vector.extract_strided_slice %64 {offsets = [0, 0], sizes = [8, 64], strides = [1, 1]} : vector<8x192xf32> to vector<8x64xf32>
    %70 = arith.mulf %69, %66 : vector<8x64xf32>
    %71 = arith.addf %68, %70 : vector<8x64xf32>
    %72 = vector.extract_strided_slice %64 {offsets = [0, 128], sizes = [8, 64], strides = [1, 1]} : vector<8x192xf32> to vector<8x64xf32>
    %73 = math.tanh %71 : vector<8x64xf32>
    %74 = arith.mulf %72, %73 : vector<8x64xf32>
    %c0_23 = arith.constant 0 : index
    %c0_24 = arith.constant 0 : index
    %75 = vector.load %arg6[%c0_23, %c0_24] : memref<64x256xf32, #tpu.memory_space<vmem>>, vector<64x256xf32>
    %cst_25 = arith.constant dense<0.000000e+00> : vector<8x256xf32>
    %76 = tpu.matmul %74, %75, %cst_25 {dimension_numbers = #tpu.dot_dimension_numbers<[1], [0], [0], [1], [0, 0, 1, 1], [], []>, precision = #tpu.contract_precision<fp32>} : vector<8x64xf32>, vector<64x256xf32>, vector<8x256xf32> -> vector<8x256xf32>
    %77 = vector.extract_strided_slice %55 {offsets = [8, 256], sizes = [8, 256], strides = [1, 1]} : vector<16x512xf32> to vector<8x256xf32>
    %78 = arith.addf %76, %77 : vector<8x256xf32>
    %79 = arith.addf %78, %15 : vector<8x256xf32>
    %80 = vector.extract_strided_slice %79 {offsets = [0, 0], sizes = [8, 192], strides = [1, 1]} : vector<8x256xf32> to vector<8x192xf32>
    %81 = arith.negf %80 : vector<8x192xf32>
    %82 = math.exp %81 : vector<8x192xf32>
    %cst_26 = arith.constant 1.000000e+00 : f32
    %83 = vector.broadcast %cst_26 : f32 to vector<8x192xf32>
    %84 = arith.addf %83, %82 : vector<8x192xf32>
    %85 = arith.divf %83, %84 : vector<8x192xf32>
    %86 = vector.extract_strided_slice %79 {offsets = [0, 192], sizes = [8, 64], strides = [1, 1]} : vector<8x256xf32> to vector<8x64xf32>
    %87 = math.tanh %86 : vector<8x64xf32>
    %88 = vector.extract_strided_slice %85 {offsets = [0, 64], sizes = [8, 64], strides = [1, 1]} : vector<8x192xf32> to vector<8x64xf32>
    %89 = arith.mulf %88, %49 : vector<8x64xf32>
    %90 = vector.extract_strided_slice %85 {offsets = [0, 0], sizes = [8, 64], strides = [1, 1]} : vector<8x192xf32> to vector<8x64xf32>
    %91 = arith.mulf %90, %87 : vector<8x64xf32>
    %92 = arith.addf %89, %91 : vector<8x64xf32>
    %93 = vector.extract_strided_slice %85 {offsets = [0, 128], sizes = [8, 64], strides = [1, 1]} : vector<8x192xf32> to vector<8x64xf32>
    %94 = math.tanh %92 : vector<8x64xf32>
    %95 = arith.mulf %93, %94 : vector<8x64xf32>
    %96 = tpu.concatenate %74, %95 in 0 : vector<8x64xf32>, vector<8x64xf32> -> vector<16x64xf32>
    %c0_27 = arith.constant 0 : index
    %c0_28 = arith.constant 0 : index
    %97 = vector.load %arg5[%c0_27, %c0_28] : memref<64x512xf32, #tpu.memory_space<vmem>>, vector<64x512xf32>
    %cst_29 = arith.constant dense<0.000000e+00> : vector<16x512xf32>
    %98 = tpu.matmul %96, %97, %cst_29 {dimension_numbers = #tpu.dot_dimension_numbers<[1], [0], [0], [1], [0, 0, 1, 1], [], []>, precision = #tpu.contract_precision<fp32>} : vector<16x64xf32>, vector<64x512xf32>, vector<16x512xf32> -> vector<16x512xf32>
    %99 = vector.extract_strided_slice %12 {offsets = [16, 0], sizes = [8, 256], strides = [1, 1]} : vector<64x256xf32> to vector<8x256xf32>
    %100 = vector.extract_strided_slice %98 {offsets = [0, 0], sizes = [8, 256], strides = [1, 1]} : vector<16x512xf32> to vector<8x256xf32>
    %101 = arith.addf %99, %100 : vector<8x256xf32>
    %102 = vector.extract_strided_slice %101 {offsets = [0, 0], sizes = [8, 192], strides = [1, 1]} : vector<8x256xf32> to vector<8x192xf32>
    %103 = arith.negf %102 : vector<8x192xf32>
    %104 = math.exp %103 : vector<8x192xf32>
    %cst_30 = arith.constant 1.000000e+00 : f32
    %105 = vector.broadcast %cst_30 : f32 to vector<8x192xf32>
    %106 = arith.addf %105, %104 : vector<8x192xf32>
    %107 = arith.divf %105, %106 : vector<8x192xf32>
    %108 = vector.extract_strided_slice %101 {offsets = [0, 192], sizes = [8, 64], strides = [1, 1]} : vector<8x256xf32> to vector<8x64xf32>
    %109 = math.tanh %108 : vector<8x64xf32>
    %110 = vector.extract_strided_slice %107 {offsets = [0, 64], sizes = [8, 64], strides = [1, 1]} : vector<8x192xf32> to vector<8x64xf32>
    %111 = arith.mulf %110, %71 : vector<8x64xf32>
    %112 = vector.extract_strided_slice %107 {offsets = [0, 0], sizes = [8, 64], strides = [1, 1]} : vector<8x192xf32> to vector<8x64xf32>
    %113 = arith.mulf %112, %109 : vector<8x64xf32>
    %114 = arith.addf %111, %113 : vector<8x64xf32>
    %115 = vector.extract_strided_slice %107 {offsets = [0, 128], sizes = [8, 64], strides = [1, 1]} : vector<8x192xf32> to vector<8x64xf32>
    %116 = math.tanh %114 : vector<8x64xf32>
    %117 = arith.mulf %115, %116 : vector<8x64xf32>
    %c0_31 = arith.constant 0 : index
    %c0_32 = arith.constant 0 : index
    %118 = vector.load %arg6[%c0_31, %c0_32] : memref<64x256xf32, #tpu.memory_space<vmem>>, vector<64x256xf32>
    %cst_33 = arith.constant dense<0.000000e+00> : vector<8x256xf32>
    %119 = tpu.matmul %117, %118, %cst_33 {dimension_numbers = #tpu.dot_dimension_numbers<[1], [0], [0], [1], [0, 0, 1, 1], [], []>, precision = #tpu.contract_precision<fp32>} : vector<8x64xf32>, vector<64x256xf32>, vector<8x256xf32> -> vector<8x256xf32>
    %120 = vector.extract_strided_slice %98 {offsets = [8, 256], sizes = [8, 256], strides = [1, 1]} : vector<16x512xf32> to vector<8x256xf32>
    %121 = arith.addf %119, %120 : vector<8x256xf32>
    %122 = arith.addf %121, %15 : vector<8x256xf32>
    %123 = vector.extract_strided_slice %122 {offsets = [0, 0], sizes = [8, 192], strides = [1, 1]} : vector<8x256xf32> to vector<8x192xf32>
    %124 = arith.negf %123 : vector<8x192xf32>
    %125 = math.exp %124 : vector<8x192xf32>
    %cst_34 = arith.constant 1.000000e+00 : f32
    %126 = vector.broadcast %cst_34 : f32 to vector<8x192xf32>
    %127 = arith.addf %126, %125 : vector<8x192xf32>
    %128 = arith.divf %126, %127 : vector<8x192xf32>
    %129 = vector.extract_strided_slice %122 {offsets = [0, 192], sizes = [8, 64], strides = [1, 1]} : vector<8x256xf32> to vector<8x64xf32>
    %130 = math.tanh %129 : vector<8x64xf32>
    %131 = vector.extract_strided_slice %128 {offsets = [0, 64], sizes = [8, 64], strides = [1, 1]} : vector<8x192xf32> to vector<8x64xf32>
    %132 = arith.mulf %131, %92 : vector<8x64xf32>
    %133 = vector.extract_strided_slice %128 {offsets = [0, 0], sizes = [8, 64], strides = [1, 1]} : vector<8x192xf32> to vector<8x64xf32>
    %134 = arith.mulf %133, %130 : vector<8x64xf32>
    %135 = arith.addf %132, %134 : vector<8x64xf32>
    %136 = vector.extract_strided_slice %128 {offsets = [0, 128], sizes = [8, 64], strides = [1, 1]} : vector<8x192xf32> to vector<8x64xf32>
    %137 = math.tanh %135 : vector<8x64xf32>
    %138 = arith.mulf %136, %137 : vector<8x64xf32>
    %139 = tpu.concatenate %117, %138 in 0 : vector<8x64xf32>, vector<8x64xf32> -> vector<16x64xf32>
    %c0_35 = arith.constant 0 : index
    %c0_36 = arith.constant 0 : index
    %140 = vector.load %arg5[%c0_35, %c0_36] : memref<64x512xf32, #tpu.memory_space<vmem>>, vector<64x512xf32>
    %cst_37 = arith.constant dense<0.000000e+00> : vector<16x512xf32>
    %141 = tpu.matmul %139, %140, %cst_37 {dimension_numbers = #tpu.dot_dimension_numbers<[1], [0], [0], [1], [0, 0, 1, 1], [], []>, precision = #tpu.contract_precision<fp32>} : vector<16x64xf32>, vector<64x512xf32>, vector<16x512xf32> -> vector<16x512xf32>
    %142 = vector.extract_strided_slice %12 {offsets = [24, 0], sizes = [8, 256], strides = [1, 1]} : vector<64x256xf32> to vector<8x256xf32>
    %143 = vector.extract_strided_slice %141 {offsets = [0, 0], sizes = [8, 256], strides = [1, 1]} : vector<16x512xf32> to vector<8x256xf32>
    %144 = arith.addf %142, %143 : vector<8x256xf32>
    %145 = vector.extract_strided_slice %144 {offsets = [0, 0], sizes = [8, 192], strides = [1, 1]} : vector<8x256xf32> to vector<8x192xf32>
    %146 = arith.negf %145 : vector<8x192xf32>
    %147 = math.exp %146 : vector<8x192xf32>
    %cst_38 = arith.constant 1.000000e+00 : f32
    %148 = vector.broadcast %cst_38 : f32 to vector<8x192xf32>
    %149 = arith.addf %148, %147 : vector<8x192xf32>
    %150 = arith.divf %148, %149 : vector<8x192xf32>
    %151 = vector.extract_strided_slice %144 {offsets = [0, 192], sizes = [8, 64], strides = [1, 1]} : vector<8x256xf32> to vector<8x64xf32>
    %152 = math.tanh %151 : vector<8x64xf32>
    %153 = vector.extract_strided_slice %150 {offsets = [0, 64], sizes = [8, 64], strides = [1, 1]} : vector<8x192xf32> to vector<8x64xf32>
    %154 = arith.mulf %153, %114 : vector<8x64xf32>
    %155 = vector.extract_strided_slice %150 {offsets = [0, 0], sizes = [8, 64], strides = [1, 1]} : vector<8x192xf32> to vector<8x64xf32>
    %156 = arith.mulf %155, %152 : vector<8x64xf32>
    %157 = arith.addf %154, %156 : vector<8x64xf32>
    %158 = vector.extract_strided_slice %150 {offsets = [0, 128], sizes = [8, 64], strides = [1, 1]} : vector<8x192xf32> to vector<8x64xf32>
    %159 = math.tanh %157 : vector<8x64xf32>
    %160 = arith.mulf %158, %159 : vector<8x64xf32>
    %c0_39 = arith.constant 0 : index
    %c0_40 = arith.constant 0 : index
    %161 = vector.load %arg6[%c0_39, %c0_40] : memref<64x256xf32, #tpu.memory_space<vmem>>, vector<64x256xf32>
    %cst_41 = arith.constant dense<0.000000e+00> : vector<8x256xf32>
    %162 = tpu.matmul %160, %161, %cst_41 {dimension_numbers = #tpu.dot_dimension_numbers<[1], [0], [0], [1], [0, 0, 1, 1], [], []>, precision = #tpu.contract_precision<fp32>} : vector<8x64xf32>, vector<64x256xf32>, vector<8x256xf32> -> vector<8x256xf32>
    %163 = vector.extract_strided_slice %141 {offsets = [8, 256], sizes = [8, 256], strides = [1, 1]} : vector<16x512xf32> to vector<8x256xf32>
    %164 = arith.addf %162, %163 : vector<8x256xf32>
    %165 = arith.addf %164, %15 : vector<8x256xf32>
    %166 = vector.extract_strided_slice %165 {offsets = [0, 0], sizes = [8, 192], strides = [1, 1]} : vector<8x256xf32> to vector<8x192xf32>
    %167 = arith.negf %166 : vector<8x192xf32>
    %168 = math.exp %167 : vector<8x192xf32>
    %cst_42 = arith.constant 1.000000e+00 : f32
    %169 = vector.broadcast %cst_42 : f32 to vector<8x192xf32>
    %170 = arith.addf %169, %168 : vector<8x192xf32>
    %171 = arith.divf %169, %170 : vector<8x192xf32>
    %172 = vector.extract_strided_slice %165 {offsets = [0, 192], sizes = [8, 64], strides = [1, 1]} : vector<8x256xf32> to vector<8x64xf32>
    %173 = math.tanh %172 : vector<8x64xf32>
    %174 = vector.extract_strided_slice %171 {offsets = [0, 64], sizes = [8, 64], strides = [1, 1]} : vector<8x192xf32> to vector<8x64xf32>
    %175 = arith.mulf %174, %135 : vector<8x64xf32>
    %176 = vector.extract_strided_slice %171 {offsets = [0, 0], sizes = [8, 64], strides = [1, 1]} : vector<8x192xf32> to vector<8x64xf32>
    %177 = arith.mulf %176, %173 : vector<8x64xf32>
    %178 = arith.addf %175, %177 : vector<8x64xf32>
    %179 = vector.extract_strided_slice %171 {offsets = [0, 128], sizes = [8, 64], strides = [1, 1]} : vector<8x192xf32> to vector<8x64xf32>
    %180 = math.tanh %178 : vector<8x64xf32>
    %181 = arith.mulf %179, %180 : vector<8x64xf32>
    %182 = tpu.concatenate %160, %181 in 0 : vector<8x64xf32>, vector<8x64xf32> -> vector<16x64xf32>
    %c0_43 = arith.constant 0 : index
    %c0_44 = arith.constant 0 : index
    %183 = vector.load %arg5[%c0_43, %c0_44] : memref<64x512xf32, #tpu.memory_space<vmem>>, vector<64x512xf32>
    %cst_45 = arith.constant dense<0.000000e+00> : vector<16x512xf32>
    %184 = tpu.matmul %182, %183, %cst_45 {dimension_numbers = #tpu.dot_dimension_numbers<[1], [0], [0], [1], [0, 0, 1, 1], [], []>, precision = #tpu.contract_precision<fp32>} : vector<16x64xf32>, vector<64x512xf32>, vector<16x512xf32> -> vector<16x512xf32>
    %185 = vector.extract_strided_slice %12 {offsets = [32, 0], sizes = [8, 256], strides = [1, 1]} : vector<64x256xf32> to vector<8x256xf32>
    %186 = vector.extract_strided_slice %184 {offsets = [0, 0], sizes = [8, 256], strides = [1, 1]} : vector<16x512xf32> to vector<8x256xf32>
    %187 = arith.addf %185, %186 : vector<8x256xf32>
    %188 = vector.extract_strided_slice %187 {offsets = [0, 0], sizes = [8, 192], strides = [1, 1]} : vector<8x256xf32> to vector<8x192xf32>
    %189 = arith.negf %188 : vector<8x192xf32>
    %190 = math.exp %189 : vector<8x192xf32>
    %cst_46 = arith.constant 1.000000e+00 : f32
    %191 = vector.broadcast %cst_46 : f32 to vector<8x192xf32>
    %192 = arith.addf %191, %190 : vector<8x192xf32>
    %193 = arith.divf %191, %192 : vector<8x192xf32>
    %194 = vector.extract_strided_slice %187 {offsets = [0, 192], sizes = [8, 64], strides = [1, 1]} : vector<8x256xf32> to vector<8x64xf32>
    %195 = math.tanh %194 : vector<8x64xf32>
    %196 = vector.extract_strided_slice %193 {offsets = [0, 64], sizes = [8, 64], strides = [1, 1]} : vector<8x192xf32> to vector<8x64xf32>
    %197 = arith.mulf %196, %157 : vector<8x64xf32>
    %198 = vector.extract_strided_slice %193 {offsets = [0, 0], sizes = [8, 64], strides = [1, 1]} : vector<8x192xf32> to vector<8x64xf32>
    %199 = arith.mulf %198, %195 : vector<8x64xf32>
    %200 = arith.addf %197, %199 : vector<8x64xf32>
    %201 = vector.extract_strided_slice %193 {offsets = [0, 128], sizes = [8, 64], strides = [1, 1]} : vector<8x192xf32> to vector<8x64xf32>
    %202 = math.tanh %200 : vector<8x64xf32>
    %203 = arith.mulf %201, %202 : vector<8x64xf32>
    %c0_47 = arith.constant 0 : index
    %c0_48 = arith.constant 0 : index
    %204 = vector.load %arg6[%c0_47, %c0_48] : memref<64x256xf32, #tpu.memory_space<vmem>>, vector<64x256xf32>
    %cst_49 = arith.constant dense<0.000000e+00> : vector<8x256xf32>
    %205 = tpu.matmul %203, %204, %cst_49 {dimension_numbers = #tpu.dot_dimension_numbers<[1], [0], [0], [1], [0, 0, 1, 1], [], []>, precision = #tpu.contract_precision<fp32>} : vector<8x64xf32>, vector<64x256xf32>, vector<8x256xf32> -> vector<8x256xf32>
    %206 = vector.extract_strided_slice %184 {offsets = [8, 256], sizes = [8, 256], strides = [1, 1]} : vector<16x512xf32> to vector<8x256xf32>
    %207 = arith.addf %205, %206 : vector<8x256xf32>
    %208 = arith.addf %207, %15 : vector<8x256xf32>
    %209 = vector.extract_strided_slice %208 {offsets = [0, 0], sizes = [8, 192], strides = [1, 1]} : vector<8x256xf32> to vector<8x192xf32>
    %210 = arith.negf %209 : vector<8x192xf32>
    %211 = math.exp %210 : vector<8x192xf32>
    %cst_50 = arith.constant 1.000000e+00 : f32
    %212 = vector.broadcast %cst_50 : f32 to vector<8x192xf32>
    %213 = arith.addf %212, %211 : vector<8x192xf32>
    %214 = arith.divf %212, %213 : vector<8x192xf32>
    %215 = vector.extract_strided_slice %208 {offsets = [0, 192], sizes = [8, 64], strides = [1, 1]} : vector<8x256xf32> to vector<8x64xf32>
    %216 = math.tanh %215 : vector<8x64xf32>
    %217 = vector.extract_strided_slice %214 {offsets = [0, 64], sizes = [8, 64], strides = [1, 1]} : vector<8x192xf32> to vector<8x64xf32>
    %218 = arith.mulf %217, %178 : vector<8x64xf32>
    %219 = vector.extract_strided_slice %214 {offsets = [0, 0], sizes = [8, 64], strides = [1, 1]} : vector<8x192xf32> to vector<8x64xf32>
    %220 = arith.mulf %219, %216 : vector<8x64xf32>
    %221 = arith.addf %218, %220 : vector<8x64xf32>
    %222 = vector.extract_strided_slice %214 {offsets = [0, 128], sizes = [8, 64], strides = [1, 1]} : vector<8x192xf32> to vector<8x64xf32>
    %223 = math.tanh %221 : vector<8x64xf32>
    %224 = arith.mulf %222, %223 : vector<8x64xf32>
    %225 = tpu.concatenate %203, %224 in 0 : vector<8x64xf32>, vector<8x64xf32> -> vector<16x64xf32>
    %c0_51 = arith.constant 0 : index
    %c0_52 = arith.constant 0 : index
    %226 = vector.load %arg5[%c0_51, %c0_52] : memref<64x512xf32, #tpu.memory_space<vmem>>, vector<64x512xf32>
    %cst_53 = arith.constant dense<0.000000e+00> : vector<16x512xf32>
    %227 = tpu.matmul %225, %226, %cst_53 {dimension_numbers = #tpu.dot_dimension_numbers<[1], [0], [0], [1], [0, 0, 1, 1], [], []>, precision = #tpu.contract_precision<fp32>} : vector<16x64xf32>, vector<64x512xf32>, vector<16x512xf32> -> vector<16x512xf32>
    %228 = vector.extract_strided_slice %12 {offsets = [40, 0], sizes = [8, 256], strides = [1, 1]} : vector<64x256xf32> to vector<8x256xf32>
    %229 = vector.extract_strided_slice %227 {offsets = [0, 0], sizes = [8, 256], strides = [1, 1]} : vector<16x512xf32> to vector<8x256xf32>
    %230 = arith.addf %228, %229 : vector<8x256xf32>
    %231 = vector.extract_strided_slice %230 {offsets = [0, 0], sizes = [8, 192], strides = [1, 1]} : vector<8x256xf32> to vector<8x192xf32>
    %232 = arith.negf %231 : vector<8x192xf32>
    %233 = math.exp %232 : vector<8x192xf32>
    %cst_54 = arith.constant 1.000000e+00 : f32
    %234 = vector.broadcast %cst_54 : f32 to vector<8x192xf32>
    %235 = arith.addf %234, %233 : vector<8x192xf32>
    %236 = arith.divf %234, %235 : vector<8x192xf32>
    %237 = vector.extract_strided_slice %230 {offsets = [0, 192], sizes = [8, 64], strides = [1, 1]} : vector<8x256xf32> to vector<8x64xf32>
    %238 = math.tanh %237 : vector<8x64xf32>
    %239 = vector.extract_strided_slice %236 {offsets = [0, 64], sizes = [8, 64], strides = [1, 1]} : vector<8x192xf32> to vector<8x64xf32>
    %240 = arith.mulf %239, %200 : vector<8x64xf32>
    %241 = vector.extract_strided_slice %236 {offsets = [0, 0], sizes = [8, 64], strides = [1, 1]} : vector<8x192xf32> to vector<8x64xf32>
    %242 = arith.mulf %241, %238 : vector<8x64xf32>
    %243 = arith.addf %240, %242 : vector<8x64xf32>
    %244 = vector.extract_strided_slice %236 {offsets = [0, 128], sizes = [8, 64], strides = [1, 1]} : vector<8x192xf32> to vector<8x64xf32>
    %245 = math.tanh %243 : vector<8x64xf32>
    %246 = arith.mulf %244, %245 : vector<8x64xf32>
    %c0_55 = arith.constant 0 : index
    %c0_56 = arith.constant 0 : index
    %247 = vector.load %arg6[%c0_55, %c0_56] : memref<64x256xf32, #tpu.memory_space<vmem>>, vector<64x256xf32>
    %cst_57 = arith.constant dense<0.000000e+00> : vector<8x256xf32>
    %248 = tpu.matmul %246, %247, %cst_57 {dimension_numbers = #tpu.dot_dimension_numbers<[1], [0], [0], [1], [0, 0, 1, 1], [], []>, precision = #tpu.contract_precision<fp32>} : vector<8x64xf32>, vector<64x256xf32>, vector<8x256xf32> -> vector<8x256xf32>
    %249 = vector.extract_strided_slice %227 {offsets = [8, 256], sizes = [8, 256], strides = [1, 1]} : vector<16x512xf32> to vector<8x256xf32>
    %250 = arith.addf %248, %249 : vector<8x256xf32>
    %251 = arith.addf %250, %15 : vector<8x256xf32>
    %252 = vector.extract_strided_slice %251 {offsets = [0, 0], sizes = [8, 192], strides = [1, 1]} : vector<8x256xf32> to vector<8x192xf32>
    %253 = arith.negf %252 : vector<8x192xf32>
    %254 = math.exp %253 : vector<8x192xf32>
    %cst_58 = arith.constant 1.000000e+00 : f32
    %255 = vector.broadcast %cst_58 : f32 to vector<8x192xf32>
    %256 = arith.addf %255, %254 : vector<8x192xf32>
    %257 = arith.divf %255, %256 : vector<8x192xf32>
    %258 = vector.extract_strided_slice %251 {offsets = [0, 192], sizes = [8, 64], strides = [1, 1]} : vector<8x256xf32> to vector<8x64xf32>
    %259 = math.tanh %258 : vector<8x64xf32>
    %260 = vector.extract_strided_slice %257 {offsets = [0, 64], sizes = [8, 64], strides = [1, 1]} : vector<8x192xf32> to vector<8x64xf32>
    %261 = arith.mulf %260, %221 : vector<8x64xf32>
    %262 = vector.extract_strided_slice %257 {offsets = [0, 0], sizes = [8, 64], strides = [1, 1]} : vector<8x192xf32> to vector<8x64xf32>
    %263 = arith.mulf %262, %259 : vector<8x64xf32>
    %264 = arith.addf %261, %263 : vector<8x64xf32>
    %265 = vector.extract_strided_slice %257 {offsets = [0, 128], sizes = [8, 64], strides = [1, 1]} : vector<8x192xf32> to vector<8x64xf32>
    %266 = math.tanh %264 : vector<8x64xf32>
    %267 = arith.mulf %265, %266 : vector<8x64xf32>
    %268 = tpu.concatenate %246, %267 in 0 : vector<8x64xf32>, vector<8x64xf32> -> vector<16x64xf32>
    %c0_59 = arith.constant 0 : index
    %c0_60 = arith.constant 0 : index
    %269 = vector.load %arg5[%c0_59, %c0_60] : memref<64x512xf32, #tpu.memory_space<vmem>>, vector<64x512xf32>
    %cst_61 = arith.constant dense<0.000000e+00> : vector<16x512xf32>
    %270 = tpu.matmul %268, %269, %cst_61 {dimension_numbers = #tpu.dot_dimension_numbers<[1], [0], [0], [1], [0, 0, 1, 1], [], []>, precision = #tpu.contract_precision<fp32>} : vector<16x64xf32>, vector<64x512xf32>, vector<16x512xf32> -> vector<16x512xf32>
    %271 = vector.extract_strided_slice %12 {offsets = [48, 0], sizes = [8, 256], strides = [1, 1]} : vector<64x256xf32> to vector<8x256xf32>
    %272 = vector.extract_strided_slice %270 {offsets = [0, 0], sizes = [8, 256], strides = [1, 1]} : vector<16x512xf32> to vector<8x256xf32>
    %273 = arith.addf %271, %272 : vector<8x256xf32>
    %274 = vector.extract_strided_slice %273 {offsets = [0, 0], sizes = [8, 192], strides = [1, 1]} : vector<8x256xf32> to vector<8x192xf32>
    %275 = arith.negf %274 : vector<8x192xf32>
    %276 = math.exp %275 : vector<8x192xf32>
    %cst_62 = arith.constant 1.000000e+00 : f32
    %277 = vector.broadcast %cst_62 : f32 to vector<8x192xf32>
    %278 = arith.addf %277, %276 : vector<8x192xf32>
    %279 = arith.divf %277, %278 : vector<8x192xf32>
    %280 = vector.extract_strided_slice %273 {offsets = [0, 192], sizes = [8, 64], strides = [1, 1]} : vector<8x256xf32> to vector<8x64xf32>
    %281 = math.tanh %280 : vector<8x64xf32>
    %282 = vector.extract_strided_slice %279 {offsets = [0, 64], sizes = [8, 64], strides = [1, 1]} : vector<8x192xf32> to vector<8x64xf32>
    %283 = arith.mulf %282, %243 : vector<8x64xf32>
    %284 = vector.extract_strided_slice %279 {offsets = [0, 0], sizes = [8, 64], strides = [1, 1]} : vector<8x192xf32> to vector<8x64xf32>
    %285 = arith.mulf %284, %281 : vector<8x64xf32>
    %286 = arith.addf %283, %285 : vector<8x64xf32>
    %287 = vector.extract_strided_slice %279 {offsets = [0, 128], sizes = [8, 64], strides = [1, 1]} : vector<8x192xf32> to vector<8x64xf32>
    %288 = math.tanh %286 : vector<8x64xf32>
    %289 = arith.mulf %287, %288 : vector<8x64xf32>
    %c0_63 = arith.constant 0 : index
    %c0_64 = arith.constant 0 : index
    %290 = vector.load %arg6[%c0_63, %c0_64] : memref<64x256xf32, #tpu.memory_space<vmem>>, vector<64x256xf32>
    %cst_65 = arith.constant dense<0.000000e+00> : vector<8x256xf32>
    %291 = tpu.matmul %289, %290, %cst_65 {dimension_numbers = #tpu.dot_dimension_numbers<[1], [0], [0], [1], [0, 0, 1, 1], [], []>, precision = #tpu.contract_precision<fp32>} : vector<8x64xf32>, vector<64x256xf32>, vector<8x256xf32> -> vector<8x256xf32>
    %292 = vector.extract_strided_slice %270 {offsets = [8, 256], sizes = [8, 256], strides = [1, 1]} : vector<16x512xf32> to vector<8x256xf32>
    %293 = arith.addf %291, %292 : vector<8x256xf32>
    %294 = arith.addf %293, %15 : vector<8x256xf32>
    %295 = vector.extract_strided_slice %294 {offsets = [0, 0], sizes = [8, 192], strides = [1, 1]} : vector<8x256xf32> to vector<8x192xf32>
    %296 = arith.negf %295 : vector<8x192xf32>
    %297 = math.exp %296 : vector<8x192xf32>
    %cst_66 = arith.constant 1.000000e+00 : f32
    %298 = vector.broadcast %cst_66 : f32 to vector<8x192xf32>
    %299 = arith.addf %298, %297 : vector<8x192xf32>
    %300 = arith.divf %298, %299 : vector<8x192xf32>
    %301 = vector.extract_strided_slice %294 {offsets = [0, 192], sizes = [8, 64], strides = [1, 1]} : vector<8x256xf32> to vector<8x64xf32>
    %302 = math.tanh %301 : vector<8x64xf32>
    %303 = vector.extract_strided_slice %300 {offsets = [0, 64], sizes = [8, 64], strides = [1, 1]} : vector<8x192xf32> to vector<8x64xf32>
    %304 = arith.mulf %303, %264 : vector<8x64xf32>
    %305 = vector.extract_strided_slice %300 {offsets = [0, 0], sizes = [8, 64], strides = [1, 1]} : vector<8x192xf32> to vector<8x64xf32>
    %306 = arith.mulf %305, %302 : vector<8x64xf32>
    %307 = arith.addf %304, %306 : vector<8x64xf32>
    %308 = vector.extract_strided_slice %300 {offsets = [0, 128], sizes = [8, 64], strides = [1, 1]} : vector<8x192xf32> to vector<8x64xf32>
    %309 = math.tanh %307 : vector<8x64xf32>
    %310 = arith.mulf %308, %309 : vector<8x64xf32>
    %311 = tpu.concatenate %289, %310 in 0 : vector<8x64xf32>, vector<8x64xf32> -> vector<16x64xf32>
    %c0_67 = arith.constant 0 : index
    %c0_68 = arith.constant 0 : index
    %312 = vector.load %arg5[%c0_67, %c0_68] : memref<64x512xf32, #tpu.memory_space<vmem>>, vector<64x512xf32>
    %cst_69 = arith.constant dense<0.000000e+00> : vector<16x512xf32>
    %313 = tpu.matmul %311, %312, %cst_69 {dimension_numbers = #tpu.dot_dimension_numbers<[1], [0], [0], [1], [0, 0, 1, 1], [], []>, precision = #tpu.contract_precision<fp32>} : vector<16x64xf32>, vector<64x512xf32>, vector<16x512xf32> -> vector<16x512xf32>
    %314 = vector.extract_strided_slice %12 {offsets = [56, 0], sizes = [8, 256], strides = [1, 1]} : vector<64x256xf32> to vector<8x256xf32>
    %315 = vector.extract_strided_slice %313 {offsets = [0, 0], sizes = [8, 256], strides = [1, 1]} : vector<16x512xf32> to vector<8x256xf32>
    %316 = arith.addf %314, %315 : vector<8x256xf32>
    %317 = vector.extract_strided_slice %316 {offsets = [0, 0], sizes = [8, 192], strides = [1, 1]} : vector<8x256xf32> to vector<8x192xf32>
    %318 = arith.negf %317 : vector<8x192xf32>
    %319 = math.exp %318 : vector<8x192xf32>
    %cst_70 = arith.constant 1.000000e+00 : f32
    %320 = vector.broadcast %cst_70 : f32 to vector<8x192xf32>
    %321 = arith.addf %320, %319 : vector<8x192xf32>
    %322 = arith.divf %320, %321 : vector<8x192xf32>
    %323 = vector.extract_strided_slice %316 {offsets = [0, 192], sizes = [8, 64], strides = [1, 1]} : vector<8x256xf32> to vector<8x64xf32>
    %324 = math.tanh %323 : vector<8x64xf32>
    %325 = vector.extract_strided_slice %322 {offsets = [0, 64], sizes = [8, 64], strides = [1, 1]} : vector<8x192xf32> to vector<8x64xf32>
    %326 = arith.mulf %325, %286 : vector<8x64xf32>
    %327 = vector.extract_strided_slice %322 {offsets = [0, 0], sizes = [8, 64], strides = [1, 1]} : vector<8x192xf32> to vector<8x64xf32>
    %328 = arith.mulf %327, %324 : vector<8x64xf32>
    %329 = arith.addf %326, %328 : vector<8x64xf32>
    %330 = vector.extract_strided_slice %322 {offsets = [0, 128], sizes = [8, 64], strides = [1, 1]} : vector<8x192xf32> to vector<8x64xf32>
    %331 = math.tanh %329 : vector<8x64xf32>
    %332 = arith.mulf %330, %331 : vector<8x64xf32>
    %c0_71 = arith.constant 0 : index
    %c0_72 = arith.constant 0 : index
    %333 = vector.load %arg6[%c0_71, %c0_72] : memref<64x256xf32, #tpu.memory_space<vmem>>, vector<64x256xf32>
    %cst_73 = arith.constant dense<0.000000e+00> : vector<8x256xf32>
    %334 = tpu.matmul %332, %333, %cst_73 {dimension_numbers = #tpu.dot_dimension_numbers<[1], [0], [0], [1], [0, 0, 1, 1], [], []>, precision = #tpu.contract_precision<fp32>} : vector<8x64xf32>, vector<64x256xf32>, vector<8x256xf32> -> vector<8x256xf32>
    %335 = vector.extract_strided_slice %313 {offsets = [8, 256], sizes = [8, 256], strides = [1, 1]} : vector<16x512xf32> to vector<8x256xf32>
    %336 = arith.addf %334, %335 : vector<8x256xf32>
    %337 = arith.addf %336, %15 : vector<8x256xf32>
    %338 = vector.extract_strided_slice %337 {offsets = [0, 0], sizes = [8, 192], strides = [1, 1]} : vector<8x256xf32> to vector<8x192xf32>
    %339 = arith.negf %338 : vector<8x192xf32>
    %340 = math.exp %339 : vector<8x192xf32>
    %cst_74 = arith.constant 1.000000e+00 : f32
    %341 = vector.broadcast %cst_74 : f32 to vector<8x192xf32>
    %342 = arith.addf %341, %340 : vector<8x192xf32>
    %343 = arith.divf %341, %342 : vector<8x192xf32>
    %344 = vector.extract_strided_slice %337 {offsets = [0, 192], sizes = [8, 64], strides = [1, 1]} : vector<8x256xf32> to vector<8x64xf32>
    %345 = math.tanh %344 : vector<8x64xf32>
    %346 = vector.extract_strided_slice %343 {offsets = [0, 64], sizes = [8, 64], strides = [1, 1]} : vector<8x192xf32> to vector<8x64xf32>
    %347 = arith.mulf %346, %307 : vector<8x64xf32>
    %348 = vector.extract_strided_slice %343 {offsets = [0, 0], sizes = [8, 64], strides = [1, 1]} : vector<8x192xf32> to vector<8x64xf32>
    %349 = arith.mulf %348, %345 : vector<8x64xf32>
    %350 = arith.addf %347, %349 : vector<8x64xf32>
    %351 = vector.extract_strided_slice %343 {offsets = [0, 128], sizes = [8, 64], strides = [1, 1]} : vector<8x192xf32> to vector<8x64xf32>
    %352 = math.tanh %350 : vector<8x64xf32>
    %353 = arith.mulf %351, %352 : vector<8x64xf32>
    %c0_75 = arith.constant 0 : index
    %c0_76 = arith.constant 0 : index
    %354 = vector.load %arg8[%c0_75, %c0_76] : memref<64x32xf32, #tpu.memory_space<vmem>>, vector<64x32xf32>
    %cst_77 = arith.constant dense<0.000000e+00> : vector<8x32xf32>
    %355 = tpu.matmul %353, %354, %cst_77 {dimension_numbers = #tpu.dot_dimension_numbers<[1], [0], [0], [1], [0, 0, 1, 1], [], []>, precision = #tpu.contract_precision<fp32>} : vector<8x64xf32>, vector<64x32xf32>, vector<8x32xf32> -> vector<8x32xf32>
    %c0_78 = arith.constant 0 : index
    %c0_79 = arith.constant 0 : index
    %356 = vector.load %arg9[%c0_78, %c0_79] : memref<1x32xf32, #tpu.memory_space<vmem>>, vector<1x32xf32>
    %357 = vector.broadcast %356 : vector<1x32xf32> to vector<8x32xf32>
    %358 = arith.addf %355, %357 : vector<8x32xf32>
    %cst_80 = arith.constant 0.000000e+00 : f32
    %359 = vector.broadcast %cst_80 : f32 to vector<8x32xf32>
    %360 = arith.maximumf %358, %359 : vector<8x32xf32>
    %c0_81 = arith.constant 0 : index
    %c0_82 = arith.constant 0 : index
    %361 = vector.load %arg10[%c0_81, %c0_82] : memref<1x32xf32, #tpu.memory_space<vmem>>, vector<1x32xf32>
    %362 = vector.broadcast %361 : vector<1x32xf32> to vector<8x32xf32>
    %363 = arith.mulf %360, %362 : vector<8x32xf32>
    %cst_83 = arith.constant dense<0.000000e+00> : vector<8xf32>
    %364 = vector.multi_reduction <add>, %363, %cst_83 [1] : vector<8x32xf32> to vector<8xf32>
    %365 = vector.shape_cast %364 : vector<8xf32> to vector<8x1xf32>
    %c0_84 = arith.constant 0 : index
    %c0_85 = arith.constant 0 : index
    %366 = vector.load %arg11[%c0_84, %c0_85] : memref<1x1xf32, #tpu.memory_space<vmem>>, vector<1x1xf32>
    %367 = vector.broadcast %366 : vector<1x1xf32> to vector<8x1xf32>
    %368 = arith.addf %365, %367 : vector<8x1xf32>
    %c0_86 = arith.constant 0 : index
    %c0_87 = arith.constant 0 : index
    %369 = vector.load %arg12[%c0_86, %c0_87] : memref<8x1xf32, #tpu.memory_space<vmem>>, vector<8x1xf32>
    tpu.vector_store %arg12[%c0_86, %c0_87], %368 {strides = array<i32>} : memref<8x1xf32, #tpu.memory_space<vmem>>, vector<8x1xf32>,
    return
  }
}

</mosaic_0001>

<bundles_post_ra>
// kernel: tpu_custom_call.1
= control target key start
LH: loop header
LB: loop body
LE: loop exit
PB: predicated region body
PF: predicated region fallthrough
CT: control target
= control target key end

     0   :  { %s24934_s0 = inlined_call_operand.vmem [shape: f32[64,64], index: 0, kind: input, shape index: {}]   ;;  %s24935_s1 = inlined_call_operand.vmem [shape: f32[64,32], index: 1, kind: input, shape index: {}]   ;;  %s24936_s2 = inlined_call_operand.hbm [shape: f32[1,32], index: 2, kind: input, shape index: {}]   ;;  %s24937_s3 = inlined_call_operand.hbm [shape: f32[32,256], index: 3, kind: input, shape index: {}]   ;;  %s24938_s4 = inlined_call_operand.vmem [shape: f32[1,256], index: 4, kind: input, shape index: {}]   ;;  %s24939_s5 = inlined_call_operand.hbm [shape: f32[64,512], index: 5, kind: input, shape index: {}]   ;;  %s24940_s6 = inlined_call_operand.vmem [shape: f32[64,256], index: 6, kind: input, shape index: {}]   ;;  %s24941_s7 = inlined_call_operand.hbm [shape: f32[1,256], index: 7, kind: input, shape index: {}]   ;;  %s24942_s8 = inlined_call_operand.vmem [shape: f32[64,32], index: 8, kind: input, shape index: {}]   ;;  %s24943_s9 = inlined_call_operand.vmem [shape: f32[1,32], index: 9, kind: input, shape index: {}]   ;;  %s24944_s10 = inlined_call_operand.vmem [shape: f32[1,32], index: 10, kind: input, shape index: {}]   ;;  %s24945_s11 = inlined_call_operand.<no memory space> [shape: f32[1,1], index: 11, kind: input, shape index: {}]   ;;  %s24946_s12 = inlined_call_operand.vmem [shape: f32[8,1], index: 12, kind: output, shape index: {}]  }
   0x1   :  { %v17_v0 = vstv %s24945_s11 }
   0x2   :  { %18 = vst [vmem:[#allocation2] sm:$0x1] %v17_v0 }
   0x3   :  { %19 = vsyncpa [#allocation4], 0 }
   0x4   :  { %20 = vsyncpa [#allocation6], 0 }
   0x5   :  { %21 = vsyncpa [#allocation9], 0  ;;  %s21367_s23 = smov [#allocation5]   ;;  %s21273_s27 = scalar_lea.hbm %s24937_s3, 1024 }
   0x6   :  { %s41_s24 = sshll.u32 %s21367_s23, 4  ;;  %p21274_p0 = scmp.ne.s32.totalorder %s24937_s3, %s21273_s27  ;;  %s42_s24 = int_to_ptr.vmem [resolvable:$true] %s41_s24 }
   0x7   :  { %p21277_p1 = scmp.lt.u32.totalorder %s21273_s27, %s24937_s3 }
   0x9   :  { %p21279_p2 = pnand %p21277_p1, %p21274_p0 }
   0xb   :  { %21282 = shalt.err (!%p21279_p2)
}
   0xc   :  { %s21283_s11 = scalar_lea.vmem %s42_s24, 1024  ;;  %p21288_p4 = scmp.lt.s32.totalorder %s42_s24, %s42_s24 }
   0xd   :  { %p21284_p3 = scmp.ne.s32.totalorder %s42_s24, %s21283_s11  ;;  %p21289_p5 = scmp.lt.s32.totalorder %s21283_s11, %s21283_s11 }
   0xf   :  { %p21290_p6 = por %p21289_p5, %p21288_p4 }
  0x11   :  { %p21291_p7 = pnand %p21290_p6, %p21284_p3 }
  0x13   :  { %21294 = shalt.err (!%p21291_p7)
}
  0x14   :  { %s21368_s14 = smov 256   ;;  %s21369_s15 = smov 16  }
  0x15   :  { %47 = dma.hbm_to_vmem [thread:$0]  %s24937_s3, 1024, %s42_s24, [#allocation6], %s21368_s14, %s21368_s14, %s21369_s15  }
  0x16   :  { %s21370_s18 = smov [#allocation3]   ;;  %s21371_s20 = smov [#allocation7]  }
  0x17   :  { %s32_s19 = sshll.u32 %s21370_s18, 4  ;;  %s55_s21 = sshll.u32 %s21371_s20, 4  ;;  %s33_s19 = int_to_ptr.vmem [resolvable:$true] %s32_s19  ;;  %s56_s21 = int_to_ptr.vmem [resolvable:$true] %s55_s21 }
  0x18   :  { %s21295_s25 = scalar_lea.hbm %s24936_s2, 16 }
  0x19   :  { %p21296_p8 = scmp.ne.s32.totalorder %s24936_s2, %s21295_s25  ;;  %p21299_p9 = scmp.lt.u32.totalorder %s21295_s25, %s24936_s2 }
  0x1b   :  { %p21301_p10 = pnand %p21299_p9, %p21296_p8 }
  0x1d   :  { %21304 = shalt.err (!%p21301_p10)
}
  0x1e   :  { %s21305_s3 = scalar_lea.vmem %s33_s19, 16  ;;  %s21309_s24 = scalar_lea.vmem %s33_s19, 32 }
  0x1f   :  { %p21306_p11 = scmp.ne.s32.totalorder %s33_s19, %s21305_s3  ;;  %p21310_p12 = scmp.lt.s32.totalorder %s33_s19, %s33_s19 }
  0x20   :  { %p21311_p13 = scmp.lt.s32.totalorder %s21309_s24, %s21305_s3 }
  0x22   :  { %p21312_p0 = por %p21311_p13, %p21310_p12 }
  0x24   :  { %p21313_p1 = pnand %p21312_p0, %p21306_p11 }
  0x26   :  { %21316 = shalt.err (!%p21313_p1)
}
  0x27   :  { %35 = dma.hbm_to_vmem [thread:$0]  %s24936_s2, 16, %s33_s19, [#allocation4]  }
  0x28   :  { %s21317_s15 = scalar_lea.hbm %s24939_s5, 4096 }
  0x29   :  { %p21318_p2 = scmp.ne.s32.totalorder %s24939_s5, %s21317_s15  ;;  %p21321_p3 = scmp.lt.u32.totalorder %s21317_s15, %s24939_s5 }
  0x2b   :  { %p21323_p4 = pnand %p21321_p3, %p21318_p2 }
  0x2d   :  { %21326 = shalt.err (!%p21323_p4)
}
  0x2e   :  { %s21327_s22 = scalar_lea.vmem %s56_s21, 4096  ;;  %p21332_p6 = scmp.lt.s32.totalorder %s56_s21, %s56_s21 }
  0x2f   :  { %p21328_p5 = scmp.ne.s32.totalorder %s56_s21, %s21327_s22  ;;  %p21333_p7 = scmp.lt.s32.totalorder %s21327_s22, %s21327_s22 }
  0x31   :  { %p21334_p8 = por %p21333_p7, %p21332_p6 }
  0x33   :  { %p21335_p9 = pnand %p21334_p8, %p21328_p5 }
  0x35   :  { %21338 = shalt.err (!%p21335_p9)
}
  0x36   :  { %s21372_s2 = smov 512   ;;  %s21373_s19 = smov 32  }
  0x37   :  { %61 = dma.hbm_to_vmem [thread:$0]  %s24939_s5, 4096, %s56_s21, [#allocation6], %s21372_s2, %s21372_s2, %s21373_s19  }
  0x38   :  { %s21374_s26 = smov [#allocation8]   ;;  %s21339_s3 = scalar_lea.hbm %s24941_s7, 32 }
  0x39   :  { %s70_s27 = sshll.u32 %s21374_s26, 4  ;;  %p21340_p10 = scmp.ne.s32.totalorder %s24941_s7, %s21339_s3  ;;  %s71_s27 = int_to_ptr.vmem [resolvable:$true] %s70_s27 }
  0x3a   :  { %p21343_p11 = scmp.lt.u32.totalorder %s21339_s3, %s24941_s7 }
  0x3c   :  { %p21345_p12 = pnand %p21343_p11, %p21340_p10 }
  0x3e   :  { %21348 = shalt.err (!%p21345_p12)
}
  0x3f   :  { %s21349_s14 = scalar_lea.vmem %s71_s27, 32  ;;  %p21354_p0 = scmp.lt.s32.totalorder %s71_s27, %s71_s27 }
  0x40   :  { %p21350_p13 = scmp.ne.s32.totalorder %s71_s27, %s21349_s14  ;;  %p21355_p1 = scmp.lt.s32.totalorder %s21349_s14, %s21349_s14 }
  0x42   :  { %p21356_p2 = por %p21355_p1, %p21354_p0 }
  0x44   :  { %p21357_p3 = pnand %p21356_p2, %p21350_p13 }
  0x46   :  { %21360 = shalt.err (!%p21357_p3)
}
  0x47   :  { %73 = dma.hbm_to_vmem [thread:$0]  %s24941_s7, 32, %s71_s27, [#allocation9]  }
  0x48   :  { %21361 = dma.done.wait [#allocation4], 16  }
  0x49   :  { %21362 = vsyncadd [#allocation4], 4294967280 }
  0x4a   :  { %21363 = dma.done.wait [#allocation6], 5120  }
  0x4b   :  { %21364 = vsyncadd [#allocation6], 4294962176 }
  0x4c   :  { %21365 = dma.done.wait [#allocation9], 32  }
  0x4d   :  { %21366 = vsyncadd [#allocation9], 4294967264  ;;  %v102_v1 = vld [vmem:[%s24935_s1] sm:$0xff]  ;;  %v103_v2 = vld [vmem:[%s24935_s1 + $0x8] sm:$0xff]  ;;  %vm117_vm0 = vcmask 523264   ;;  %vm1008_vm1 = vcmask 261120  }
  0x4e   :  { %v104_v3 = vld [vmem:[%s24935_s1 + $0x10] sm:$0xff]  ;;  %v143_v4 = vand.u32 4294901760, %v102_v1  ;;  %v146_v5 = vand.u32 4294901760, %v103_v2  ;;  %v105_v6 = vld [vmem:[%s24935_s1 + $0x18] sm:$0xff]  ;;  %v21510_v8 = vld [vmem:[%s24935_s1 + $0x20] sm:$0xff]  ;;  %s21376_s23 = smov 64  }
  0x4f   :  { %v149_v7 = vand.u32 4294901760, %v104_v3  ;;  %v21515_v9 = vld [vmem:[%s24935_s1 + $0x28] sm:$0xff]  ;;  %v152_v10 = vand.u32 4294901760, %v105_v6  ;;  %v155_v11 = vand.u32 4294901760, %v21510_v8  ;;  %v21522_v13 = vld [vmem:[%s24935_s1 + $0x30] sm:$0xff]  ;;  %v21527_v14 = vld [vmem:[%s24935_s1 + $0x38] sm:$0xff] }
  0x50   :  { %v158_v12 = vand.u32 4294901760, %v21515_v9  ;;  %v94_v15 = vld [vmem:[%s24934_s0] sm:$0xff]  ;;  %v21532_v16 = vpack.c.bf16 %v146_v5, %v143_v4  ;;  %v161_v17 = vand.u32 4294901760, %v21522_v13  ;;  %v164_v18 = vand.u32 4294901760, %v21527_v14  ;;  %v95_v20 = vld [vmem:[%s24934_s0 + $0x8] sm:$0xff]  ;;  %v96_v21 = vld [vmem:[%s24934_s0 + $0x10] sm:$0xff] }
  0x51   :  { %v119_v19 = vsel %vm117_vm0, %v94_v15, 0  ;;  %v97_v22 = vld [vmem:[%s24934_s0 + $0x18] sm:$0xff]  ;;  %v21546_v23 = vpack.c.bf16 %v152_v10, %v149_v7  ;;  %v122_v26 = vsel %vm117_vm0, %v95_v20, 0  ;;  %v21566_v29 = vsub.f32 %v102_v1, %v143_v4  ;;  %v98_v51 = vld [vmem:[%s24934_s0 + $0x20] sm:$0xff]  ;;  %v99_v56 = vld [vmem:[%s24934_s0 + $0x28] sm:$0xff] }
  0x52   :  { %v21552_v24 = vpack.c.bf16 %v158_v12, %v155_v11  ;;  %v21554_v25 = vand.u32 4294901760, %v119_v19  ;;  %18337 = vmatprep.subr.bf16.mxu0 %v21532_v16  ;;  %v21562_v27 = vpack.c.bf16 %v164_v18, %v161_v17  ;;  %v21564_v28 = vand.u32 4294901760, %v122_v26  ;;  %v100_v1 = vld [vmem:[%s24934_s0 + $0x30] sm:$0xff] }
  0x53   :  { %v21568_v30 = vsub.f32 %v103_v2, %v146_v5  ;;  %18339 = vmatpush3.bf16.msra.mxu0 %v21532_v16  ;;  %v125_v32 = vsel %vm117_vm0, %v96_v21, 0  ;;  %v128_v33 = vsel %vm117_vm0, %v97_v22, 0  ;;  %v21576_v34 = vsub.f32 %v104_v3, %v149_v7 }
  0x54   :  { %v21572_v31 = vsub.f32 %v119_v19, %v21554_v25  ;;  %18341 = vmatprep.subr.bf16.mxu0 %v21546_v23  ;;  %v21580_v35 = vsub.f32 %v122_v26, %v21564_v28  ;;  %v298_v36 = vand.u32 4294901760, %v21566_v29  ;;  %v21584_v38 = vand.u32 4294901760, %v125_v32  ;;  %v101_v19 = vld [vmem:[%s24934_s0 + $0x38] sm:$0xff] }
  0x55   :  { %v305_v37 = vand.u32 4294901760, %v21568_v30  ;;  %v21587_v40 = vand.u32 4294901760, %v128_v33  ;;  %v312_v41 = vand.u32 4294901760, %v21576_v34  ;;  %v21590_v42 = vsub.f32 %v105_v6, %v152_v10 }
  0x56   :  { %v217_v39 = vand.u32 4294901760, %v21572_v31  ;;  %v227_v43 = vand.u32 4294901760, %v21580_v35  ;;  %v299_v44 = vsub.f32 %v21566_v29, %v298_v36  ;;  %v21600_v46 = vsub.f32 %v125_v32, %v21584_v38 }
  0x57   :  { %v306_v45 = vsub.f32 %v21568_v30, %v305_v37  ;;  %18343 = vmatpush3.bf16.msra.mxu0 %v21546_v23  ;;  %v21607_v48 = vsub.f32 %v128_v33, %v21587_v40  ;;  %v313_v49 = vsub.f32 %v21576_v34, %v312_v41  ;;  %v319_v50 = vand.u32 4294901760, %v21590_v42 }
  0x58   :  { %v218_v47 = vsub.f32 %v21572_v31, %v217_v39  ;;  %18345 = vmatprep.subr.bf16.mxu0 %v21552_v24  ;;  %v228_v52 = vsub.f32 %v21580_v35, %v227_v43  ;;  %v300_v53 = vand.u32 4294901760, %v299_v44  ;;  %v237_v55 = vand.u32 4294901760, %v21600_v46 }
  0x59   :  { %v307_v54 = vand.u32 4294901760, %v306_v45  ;;  %v247_v58 = vand.u32 4294901760, %v21607_v48  ;;  %v314_v59 = vand.u32 4294901760, %v313_v49  ;;  %v320_v60 = vsub.f32 %v21590_v42, %v319_v50 }
  0x5a   :  { %v219_v57 = vand.u32 4294901760, %v218_v47  ;;  %v229_v61 = vand.u32 4294901760, %v228_v52  ;;  %v238_v63 = vsub.f32 %v21600_v46, %v237_v55  ;;  %v131_v0 = vsel %vm117_vm0, %v98_v51, 0 }
  0x5b   :  { %v18352_v62 = vpack.c.bf16 %v307_v54, %v300_v53  ;;  %18347 = vmatpush3.bf16.msra.mxu0 %v21552_v24  ;;  %v248_v2 = vsub.f32 %v21607_v48, %v247_v58  ;;  %v321_v3 = vand.u32 4294901760, %v320_v60  ;;  %v21639_v4 = vand.u32 4294901760, %v131_v0 }
  0x5c   :  { %18070 = vmatprep.mubr.f32.mxu0 %v219_v57  ;;  %v134_v5 = vsel %vm117_vm0, %v99_v56, 0  ;;  %18349 = vmatprep.subr.bf16.mxu0 %v21562_v27  ;;  %v239_v6 = vand.u32 4294901760, %v238_v63  ;;  %v21648_v10 = vsub.f32 %v21510_v8, %v155_v11  ;;  %v21653_v15 = vsub.f32 %v21515_v9, %v158_v12 }
  0x5d   :  { %v21643_v7 = vand.u32 4294901760, %v134_v5  ;;  %v249_v20 = vand.u32 4294901760, %v248_v2  ;;  %v18356_v21 = vpack.c.bf16 %v321_v3, %v314_v59  ;;  %v21659_v22 = vsub.f32 %v131_v0, %v21639_v4 }
  0x5e   :  { %v137_v26 = vsel %vm117_vm0, %v100_v1, 0  ;;  %v326_v8 = vand.u32 4294901760, %v21648_v10  ;;  %v333_v11 = vand.u32 4294901760, %v21653_v15  ;;  %v140_v33 = vsel %vm117_vm0, %v101_v19, 0 }
  0x5f   :  { %v21663_v32 = vsub.f32 %v134_v5, %v21643_v7  ;;  %v21667_v9 = vand.u32 4294901760, %v137_v26  ;;  %18351 = vmatpush3.bf16.msra.mxu0 %v21562_v27  ;;  %v257_v12 = vand.u32 4294901760, %v21659_v22  ;;  %v21675_v44 = vsub.f32 %v21522_v13, %v161_v17 }
  0x60   :  { %v21680_v45 = vsub.f32 %v21527_v14, %v164_v18  ;;  %18353 = vmatprep.subr.bf16.mxu0 %v18352_v62  ;;  %v327_v49 = vsub.f32 %v21648_v10, %v326_v8  ;;  %v334_v51 = vsub.f32 %v21653_v15, %v333_v11  ;;  %v21695_v14 = vand.u32 4294901760, %v140_v33 }
  0x61   :  { %v267_v47 = vand.u32 4294901760, %v21663_v32  ;;  %v21690_v52 = vsub.f32 %v137_v26, %v21667_v9  ;;  %v258_v13 = vsub.f32 %v21659_v22, %v257_v12  ;;  %v340_v17 = vand.u32 4294901760, %v21675_v44 }
  0x62   :  { %v347_v18 = vand.u32 4294901760, %v21680_v45  ;;  %18071 = vmatmul.mubr.f32.vlgmr.msra.gmra.mrb[0].mxu0 %v229_v61  ;;  %v328_v54 = vand.u32 4294901760, %v327_v49  ;;  %v335_v56 = vand.u32 4294901760, %v334_v51  ;;  %v21704_v60 = vsub.f32 %v140_v33, %v21695_v14 }
  0x63   :  { %v268_v53 = vsub.f32 %v21663_v32, %v267_v47  ;;  %v277_v57 = vand.u32 4294901760, %v21690_v52  ;;  %18355 = vmatpush3.bf16.msra.mxu0 %v18352_v62  ;;  %18073 = vmatprep.mubr.f32.mxu0 %v239_v6  ;;  %v259_v59 = vand.u32 4294901760, %v258_v13  ;;  %v341_v63 = vsub.f32 %v21675_v44, %v340_v17 }
  0x64   :  { %v348_v61 = vsub.f32 %v21680_v45, %v347_v18  ;;  %18357 = vmatprep.subr.bf16.mxu0 %v18356_v21  ;;  %v18360_v0 = vpack.c.bf16 %v335_v56, %v328_v54  ;;  %v287_v62 = vand.u32 4294901760, %v21704_v60  ;;  %v18368_v49 = vpack.c.bf16 %v21568_v30, %v21566_v29 }
  0x65   :  { %v278_v1 = vsub.f32 %v21690_v52, %v277_v57  ;;  %v342_v2 = vand.u32 4294901760, %v341_v63  ;;  %v269_v5 = vand.u32 4294901760, %v268_v53  ;;  %v18380_v51 = vpack.c.bf16 %v21680_v45, %v21675_v44 }
  0x66   :  { %v349_v3 = vand.u32 4294901760, %v348_v61  ;;  %18074 = vmatmul.mubr.f32.gmra.mrb[2].mxu0 %v249_v20  ;;  %v288_v19 = vsub.f32 %v21704_v60, %v287_v62  ;;  %v18372_v20 = vpack.c.bf16 %v21590_v42, %v21576_v34  ;;  %v18400_v13 = vpack.c.bf16 %v305_v37, %v298_v36  ;;  %v993_v37 = vld [vmem:[#allocation5 + $0x28] sm:$0xff]  ;;  %v994_v42 = vld [vmem:[#allocation5 + $0x30] sm:$0xff] }
  0x67   :  { %18359 = vmatpush3.bf16.msra.mxu0 %v18356_v21  ;;  %18076 = vmatprep.mubr.f32.mxu0 %v259_v59  ;;  %v279_v6 = vand.u32 4294901760, %v278_v1  ;;  %v18376_v21 = vpack.c.bf16 %v21653_v15, %v21648_v10  ;;  %v18404_v53 = vpack.c.bf16 %v319_v50, %v312_v41  ;;  %v18408_v29 = vpack.c.bf16 %v333_v11, %v326_v8  ;;  %v992_v41 = vld [vmem:[#allocation5 + $0x20] sm:$0xff] }
  0x68   :  { %18361 = vmatprep.subr.bf16.mxu0 %v18360_v0  ;;  %v18364_v26 = vpack.c.bf16 %v349_v3, %v342_v2  ;;  %v289_v33 = vand.u32 4294901760, %v288_v19  ;;  %v18412_v30 = vpack.c.bf16 %v347_v18, %v340_v17  ;;  %vm21378_vm2 = vmmov 0  }
  0x69   :  { %vm17859_vm3 = vcmask 7168  }
  0x6a   :  { %18077 = vmatmul.mubr.f32.gmra.mrb[4].mxu0 %v269_v5 }
  0x6b   :  { %18363 = vmatpush3.bf16.msra.mxu0 %v18360_v0  ;;  %18079 = vmatprep.mubr.f32.mxu0 %v279_v6 }
  0x6c   :  { %18365 = vmatprep.subr.bf16.mxu0 %v18364_v26 }
  0x6e   :  { %18080 = vmatmul.mubr.f32.gmra.mrb[6].mxu0 %v289_v33 }
  0x6f   :  { %18367 = vmatpush3.bf16.msra.mxu0 %v18364_v26  ;;  %18098 = vmatprep.mubr.f32.mxu0 %v21554_v25 }
  0x70   :  { %18369 = vmatprep.subr.bf16.mxu0 %v18368_v49 }
  0x72   :  { %18099 = vmatmul.mubr.f32.vlgmr.msra.gmra.mrb[0].mxu0 %v21564_v28 }
  0x73   :  { %18371 = vmatpush3.bf16.msra.mxu0 %v18368_v49  ;;  %18101 = vmatprep.mubr.f32.mxu0 %v21584_v38 }
  0x74   :  { %18373 = vmatprep.subr.bf16.mxu0 %v18372_v20 }
  0x76   :  { %18102 = vmatmul.mubr.f32.gmra.mrb[2].mxu0 %v21587_v40 }
  0x77   :  { %18375 = vmatpush3.bf16.msra.mxu0 %v18372_v20  ;;  %18104 = vmatprep.mubr.f32.mxu0 %v21639_v4 }
  0x78   :  { %18377 = vmatprep.subr.bf16.mxu0 %v18376_v21 }
  0x7a   :  { %18105 = vmatmul.mubr.f32.gmra.mrb[4].mxu0 %v21643_v7 }
  0x7b   :  { %18379 = vmatpush3.bf16.msra.mxu0 %v18376_v21  ;;  %18107 = vmatprep.mubr.f32.mxu0 %v21667_v9 }
  0x7c   :  { %18381 = vmatprep.subr.bf16.mxu0 %v18380_v51 }
  0x7e   :  { %18108 = vmatmul.mubr.f32.gmra.mrb[6].mxu0 %v21695_v14 }
  0x7f   :  { %18383 = vmatpush3.bf16.msra.mxu0 %v18380_v51  ;;  %18126 = vmatprep.mubr.f32.mxu0 %v21572_v31  ;;  %v988_v31 = vld [vmem:[#allocation5] sm:$0xff] }
  0x80   :  { %18385 = vmatprep.subr.bf16.mxu0 %v21532_v16  ;;  %v1035_v34 = vand.u32 4294901760, %v988_v31 }
  0x82   :  { %18127 = vmatmul.mubr.f32.vlgmr.msra.gmra.mrb[0].mxu0 %v21580_v35 }
  0x83   :  { %18387 = vmatpush3.bf16.msra.mxu0 %v21532_v16  ;;  %18129 = vmatprep.mubr.f32.mxu0 %v21600_v46  ;;  %v1047_v46 = vand.u32 4294901760, %v994_v42 }
  0x84   :  { %18389 = vmatprep.subr.bf16.mxu0 %v21546_v23 }
  0x85   :  { %v21835_v8 = vsub.f32 %v994_v42, %v1047_v46 }
  0x86   :  { %18130 = vmatmul.mubr.f32.gmra.mrb[2].mxu0 %v21607_v48 }
  0x87   :  { %18391 = vmatpush3.bf16.msra.mxu0 %v21546_v23  ;;  %18132 = vmatprep.mubr.f32.mxu0 %v21659_v22  ;;  %v1238_v0 = vand.u32 4294901760, %v21835_v8 }
  0x88   :  { %18393 = vmatprep.subr.bf16.mxu0 %v21552_v24 }
  0x89   :  { %v1239_v3 = vsub.f32 %v21835_v8, %v1238_v0 }
  0x8a   :  { %18133 = vmatmul.mubr.f32.gmra.mrb[4].mxu0 %v21663_v32 }
  0x8b   :  { %18395 = vmatpush3.bf16.msra.mxu0 %v21552_v24  ;;  %18135 = vmatprep.mubr.f32.mxu0 %v21690_v52  ;;  %v1240_v26 = vand.u32 4294901760, %v1239_v3 }
  0x8c   :  { %18397 = vmatprep.subr.bf16.mxu0 %v21562_v27 }
  0x8e   :  { %18136 = vmatmul.mubr.f32.gmra.mrb[6].mxu0 %v21704_v60 }
  0x8f   :  { %18399 = vmatpush3.bf16.msra.mxu0 %v21562_v27  ;;  %18154 = vmatprep.mubr.f32.mxu0 %v217_v39  ;;  %v1041_v39 = vand.u32 4294901760, %v993_v37 }
  0x90   :  { %18401 = vmatprep.subr.bf16.mxu0 %v18400_v13 }
  0x91   :  { %v21829_v15 = vsub.f32 %v993_v37, %v1041_v39 }
  0x92   :  { %18155 = vmatmul.mubr.f32.vlgmr.msra.gmra.mrb[0].mxu0 %v227_v43  ;;  %v1043_v43 = vand.u32 4294901760, %v992_v41 }
  0x93   :  { %18403 = vmatpush3.bf16.msra.mxu0 %v18400_v13  ;;  %18157 = vmatprep.mubr.f32.mxu0 %v237_v55  ;;  %v24961_v55 = vmov 0.0   ;;  %v1220_v60 = vand.u32 4294901760, %v21829_v15 }
  0x94   :  { %18405 = vmatprep.subr.bf16.mxu0 %v18404_v53  ;;  %v21815_v50 = vpack.c.bf16 %v1047_v46, %v1043_v43  ;;  %1105 = vmatprep.mubr.f32.mxu1 %v24961_v55  ;;  %v21833_v32 = vsub.f32 %v992_v41, %v1043_v43 }
  0x95   :  { %v1221_v1 = vsub.f32 %v21829_v15, %v1220_v60 }
  0x96   :  { %18158 = vmatmul.mubr.f32.gmra.mrb[2].mxu0 %v247_v58  ;;  %v21821_v58 = vsub.f32 %v988_v31, %v1035_v34  ;;  %v1226_v61 = vand.u32 4294901760, %v21833_v32  ;;  %v18454_v13 = vpack.c.bf16 %v21835_v8, %v21833_v32 }
  0x97   :  { %18407 = vmatpush3.bf16.msra.mxu0 %v18404_v53  ;;  %18160 = vmatprep.mubr.f32.mxu0 %v257_v12  ;;  %v1222_v5 = vand.u32 4294901760, %v1221_v1  ;;  %v17868_v53 = vld [vmem:[#allocation3] ss:$0 sm:$0xff] }
  0x98   :  { %18409 = vmatprep.subr.bf16.mxu0 %v18408_v29  ;;  %v1202_v12 = vand.u32 4294901760, %v21821_v58  ;;  %v1227_v2 = vsub.f32 %v21833_v32, %v1226_v61 }
  0x9a   :  { %18161 = vmatmul.mubr.f32.gmra.mrb[4].mxu0 %v267_v47  ;;  %v1203_v52 = vsub.f32 %v21821_v58, %v1202_v12  ;;  %v1228_v19 = vand.u32 4294901760, %v1227_v2 }
  0x9b   :  { %18411 = vmatpush3.bf16.msra.mxu0 %v18408_v29  ;;  %18163 = vmatprep.mubr.f32.mxu0 %v277_v57 }
  0x9c   :  { %18413 = vmatprep.subr.bf16.mxu0 %v18412_v30  ;;  %v1204_v54 = vand.u32 4294901760, %v1203_v52  ;;  %v21871_v49 = vpack.c.bf16 %v1240_v26, %v1228_v19 }
  0x9e   :  { %18164 = vmatmul.mubr.f32.gmra.mrb[6].mxu0 %v287_v62 }
  0x9f   :  { %18415 = vmatpush3.bf16.msra.mxu0 %v18412_v30  ;;  %18182 = vmatprep.mubr.f32.mxu0 %v21554_v25 }
  0xa0   :  { %18417 = vmatprep.subr.bf16.mxu0 %v21532_v16 }
  0xa2   :  { %18183 = vmatmul.mubr.f32.vlgmr.msra.gmra.mrb[0].mxu0 %v21564_v28 }
  0xa3   :  { %18419 = vmatpush3.bf16.msra.mxu0 %v21532_v16  ;;  %18185 = vmatprep.mubr.f32.mxu0 %v21584_v38  ;;  %v989_v16 = vld [vmem:[#allocation5 + $0x8] sm:$0xff] }
  0xa4   :  { %18421 = vmatprep.subr.bf16.mxu0 %v21546_v23 }
  0xa6   :  { %18186 = vmatmul.mubr.f32.gmra.mrb[2].mxu0 %v21587_v40 }
  0xa7   :  { %18423 = vmatpush3.bf16.msra.mxu0 %v21546_v23  ;;  %18188 = vmatprep.mubr.f32.mxu0 %v21639_v4  ;;  %v991_v23 = vld [vmem:[#allocation5 + $0x18] sm:$0xff] }
  0xa8   :  { %18425 = vmatprep.subr.bf16.mxu0 %v21552_v24 }
  0xaa   :  { %18189 = vmatmul.mubr.f32.gmra.mrb[4].mxu0 %v21643_v7 }
  0xab   :  { %18427 = vmatpush3.bf16.msra.mxu0 %v21552_v24  ;;  %18191 = vmatprep.mubr.f32.mxu0 %v21667_v9  ;;  %v1033_v24 = vand.u32 4294901760, %v989_v16 }
  0xac   :  { %18429 = vmatprep.subr.bf16.mxu0 %v21562_v27 }
  0xae   :  { %18192 = vmatmul.mubr.f32.gmra.mrb[6].mxu0 %v21695_v14 }
  0xaf   :  { %18431 = vmatpush3.bf16.msra.mxu0 %v21562_v27  ;;  %18210 = vmatprep.mubr.f32.mxu0 %v21554_v25  ;;  %v1037_v27 = vand.u32 4294901760, %v991_v23  ;;  %v990_v25 = vld [vmem:[#allocation5 + $0x10] sm:$0xff] }
  0xb1   :  { %v21807_v35 = vpack.c.bf16 %v1037_v27, %v1033_v24  ;;  %v21827_v10 = vsub.f32 %v991_v23, %v1037_v27 }
  0xb2   :  { %18211 = vmatmul.mubr.f32.vlgmr.msra.gmra.mrb[0].mxu0 %v21564_v28  ;;  %v1039_v28 = vand.u32 4294901760, %v990_v25 }
  0xb3   :  { %18213 = vmatprep.mubr.f32.mxu0 %v21584_v38  ;;  %v995_v38 = vld [vmem:[#allocation5 + $0x38] sm:$0xff]  ;;  %18433 = vmatprep.subr.bf16.mxu1 %v21807_v35 }
  0xb4   :  { %v21809_v36 = vpack.c.bf16 %v1039_v28, %v1035_v34 }
  0xb6   :  { %18214 = vmatmul.mubr.f32.gmra.mrb[2].mxu0 %v21587_v40  ;;  %v1045_v40 = vand.u32 4294901760, %v995_v38  ;;  %18435 = vmatpush1.bf16.msra.mxu1 %v21809_v36 }
  0xb7   :  { %18216 = vmatprep.mubr.f32.mxu0 %v21639_v4  ;;  %v21823_v4 = vsub.f32 %v990_v25, %v1039_v28 }
  0xb8   :  { %v21813_v48 = vpack.c.bf16 %v1045_v40, %v1041_v39  ;;  %v21831_v22 = vsub.f32 %v995_v38, %v1045_v40 }
  0xb9   :  { %v1214_v44 = vand.u32 4294901760, %v21823_v4  ;;  %v18450_v21 = vpack.c.bf16 %v21823_v4, %v21821_v58 }
  0xba   :  { %18217 = vmatmul.mubr.f32.gmra.mrb[4].mxu0 %v21643_v7  ;;  %18437 = vmatprep.subr.bf16.mxu1 %v21813_v48  ;;  %v21825_v7 = vsub.f32 %v989_v16, %v1033_v24  ;;  %v1232_v63 = vand.u32 4294901760, %v21831_v22  ;;  %v18452_v51 = vpack.c.bf16 %v21831_v22, %v21829_v15 }
  0xbb   :  { %18219 = vmatprep.mubr.f32.mxu0 %v21667_v9  ;;  %18439 = vmatpush1.bf16.msra.mxu1 %v21815_v50  ;;  %v1208_v9 = vand.u32 4294901760, %v21827_v10 }
  0xbc   :  { %v1196_v11 = vand.u32 4294901760, %v21825_v7  ;;  %v1233_v62 = vsub.f32 %v21831_v22, %v1232_v63  ;;  %v18448_v20 = vpack.c.bf16 %v21827_v10, %v21825_v7 }
  0xbd   :  { %v1209_v47 = vsub.f32 %v21827_v10, %v1208_v9  ;;  %v18468_v10 = vpack.c.bf16 %v1232_v63, %v1220_v60 }
  0xbe   :  { %18220 = vmatmul.mubr.f32.gmra.mrb[6].mxu0 %v21695_v14  ;;  %v1197_v45 = vsub.f32 %v21825_v7, %v1196_v11  ;;  %v1215_v14 = vsub.f32 %v21823_v4, %v1214_v44  ;;  %v1234_v6 = vand.u32 4294901760, %v1233_v62  ;;  %v18466_v7 = vpack.c.bf16 %v1214_v44, %v1202_v12 }
  0xbf   :  { %2060 = vmatprep.mubr.f32.mxu0 %v24961_v55  ;;  %v1210_v18 = vand.u32 4294901760, %v1209_v47 }
  0xc0   :  { %v1198_v17 = vand.u32 4294901760, %v1197_v45  ;;  %v1216_v56 = vand.u32 4294901760, %v1215_v14  ;;  %v18444_v33 = vpack.c.bf16 %v1234_v6, %v1222_v5 }
  0xc2   :  { %v18440_v57 = vpack.c.bf16 %v1210_v18, %v1198_v17  ;;  %v21853_v59 = vpack.c.bf16 %v1216_v56, %v1204_v54 }
  0xc4   :  { %18441 = vmatprep.subr.bf16.mxu1 %v18440_v57 }
 0x185   :  { %v18212_v29 = vpop.f32.mrb[0].mxu0 }
 0x186   :  { %v20664_v30 = vadd.f32 %v18212_v29, %v17868_v53  ;;  %v934_v16 = vpop.f32.mrb[1].mxu0 }
 0x187   :  { %v20665_v23 = vadd.f32 %v17868_v53, %v934_v16 }
 0x188   :  { %v981_v24 = vmax.f32 %v20664_v30, 0.0 }
 0x189   :  { %v980_v27 = vmax.f32 %v20665_v23, 0.0  ;;  %v18215_v31 = vpop.f32.mrb[2].mxu0 }
 0x18a   :  { %v1013_v25 = vsel %vm1008_vm1, %v981_v24, 0  ;;  %v20666_v34 = vadd.f32 %v18215_v31, %v17868_v53  ;;  %v946_v28 = vpop.f32.mrb[3].mxu0 }
 0x18b   :  { %v21882_v37 = vand.u32 4294901760, %v1013_v25  ;;  %v1010_v38 = vsel %vm1008_vm1, %v980_v27, 0  ;;  %v20667_v39 = vadd.f32 %v17868_v53, %v946_v28 }
 0x18c   :  { %v21885_v40 = vand.u32 4294901760, %v1010_v38  ;;  %v983_v41 = vmax.f32 %v20666_v34, 0.0 }
 0x18d   :  { %v21888_v42 = vsub.f32 %v1013_v25, %v21882_v37  ;;  %v982_v43 = vmax.f32 %v20667_v39, 0.0  ;;  %v18218_v46 = vpop.f32.mrb[4].mxu0 }
 0x18e   :  { %v21891_v45 = vsub.f32 %v1010_v38, %v21885_v40  ;;  %v1019_v47 = vsel %vm1008_vm1, %v983_v41, 0  ;;  %v20668_v52 = vadd.f32 %v18218_v46, %v17868_v53  ;;  %v958_v14 = vpop.f32.mrb[5].mxu0 }
 0x18f   :  { %v21894_v17 = vand.u32 4294901760, %v1019_v47  ;;  %v1016_v18 = vsel %vm1008_vm1, %v982_v43, 0  ;;  %v20669_v54 = vadd.f32 %v17868_v53, %v958_v14  ;;  %v1119_v56 = vand.u32 4294901760, %v21888_v42 }
 0x190   :  { %v21898_v57 = vand.u32 4294901760, %v1016_v18  ;;  %v985_v1 = vmax.f32 %v20668_v52, 0.0  ;;  %v1108_v62 = vand.u32 4294901760, %v21891_v45 }
 0x191   :  { %v984_v2 = vmax.f32 %v20669_v54, 0.0  ;;  %v18221_v3 = vpop.f32.mrb[6].mxu0  ;;  %v21902_v5 = vsub.f32 %v1019_v47, %v21894_v17  ;;  %v1120_v23 = vsub.f32 %v21888_v42, %v1119_v56 }
 0x192   :  { %v21905_v6 = vsub.f32 %v1016_v18, %v21898_v57  ;;  %v970_v19 = vpop.f32.mrb[7].mxu0  ;;  %v1109_v26 = vsub.f32 %v21891_v45, %v1108_v62  ;;  %v20670_v30 = vadd.f32 %v18221_v3, %v17868_v53  ;;  %v1025_v24 = vsel %vm1008_vm1, %v985_v1, 0 }
 0x193   :  { %v1022_v29 = vsel %vm1008_vm1, %v984_v2, 0  ;;  %v20671_v16 = vadd.f32 %v17868_v53, %v970_v19  ;;  %v21918_v28 = vand.u32 4294901760, %v1025_v24  ;;  %v1121_v39 = vand.u32 4294901760, %v1120_v23 }
 0x194   :  { %v21915_v27 = vand.u32 4294901760, %v1022_v29  ;;  %v1110_v31 = vand.u32 4294901760, %v1109_v26  ;;  %v1130_v25 = vand.u32 4294901760, %v21905_v6  ;;  %v987_v38 = vmax.f32 %v20670_v30, 0.0 }
 0x195   :  { %v986_v34 = vmax.f32 %v20671_v16, 0.0  ;;  %v1141_v43 = vand.u32 4294901760, %v21902_v5  ;;  %v21931_v47 = vsub.f32 %v1025_v24, %v21918_v28 }
 0x196   :  { %1111 = vmatmul.mubr.f32.vlgmr.msra.gmra.mrb[0].mxu1 %v1110_v31  ;;  %v21923_v53 = vsub.f32 %v1022_v29, %v21915_v27  ;;  %v1131_v41 = vsub.f32 %v21905_v6, %v1130_v25 }
 0x197   :  { %18443 = vmatpush1.bf16.msra.mxu1 %v21853_v59  ;;  %1116 = vmatprep.mubr.f32.mxu1 %v24961_v55  ;;  %v1028_v46 = vsel %vm1008_vm1, %v986_v34, 0  ;;  %v1031_v59 = vsel %vm1008_vm1, %v987_v38, 0  ;;  %v1142_v18 = vsub.f32 %v21902_v5, %v1141_v43  ;;  %v1163_v3 = vand.u32 4294901760, %v21931_v47 }
 0x198   :  { %18445 = vmatprep.subr.bf16.mxu1 %v18444_v33  ;;  %v21936_v52 = vand.u32 4294901760, %v1028_v46  ;;  %v1132_v14 = vand.u32 4294901760, %v1131_v41  ;;  %v1152_v33 = vand.u32 4294901760, %v21923_v53  ;;  %v21945_v54 = vand.u32 4294901760, %v1031_v59 }
 0x199   :  { %v1143_v1 = vand.u32 4294901760, %v1142_v18  ;;  %v1164_v26 = vsub.f32 %v21931_v47, %v1163_v3 }
 0x19a   :  { %1122 = vmatmul.mubr.f32.gmra.mrb[2].mxu1 %v1121_v39  ;;  %v1153_v2 = vsub.f32 %v21923_v53, %v1152_v33 }
 0x19b   :  { %1127 = vmatprep.mubr.f32.mxu1 %v24961_v55  ;;  %18447 = vmatpush1.bf16.msra.mxu1 %v21871_v49  ;;  %v21949_v49 = vsub.f32 %v1028_v46, %v21936_v52  ;;  %v1165_v30 = vand.u32 4294901760, %v1164_v26  ;;  %v22210_v26 = vld [vmem:[#allocation7 + $0x40] sm:$0xff] }
 0x19c   :  { %18449 = vmatprep.subr.bf16.mxu1 %v18448_v20  ;;  %v21957_v20 = vsub.f32 %v1031_v59, %v21945_v54  ;;  %v1154_v19 = vand.u32 4294901760, %v1153_v2  ;;  %v22189_v59 = vld [vmem:[%s24940_s6 + $0x38] sm:$0xff]  ;;  %25291 = vst [vmem:[#allocation19_spill] sm:$0xff] %v22210_v26 }
 0x19d   :  { %v1174_v29 = vand.u32 4294901760, %v21949_v49  ;;  %v1992_v18 = vand.u32 4294901760, %v22189_v59 }
 0x19e   :  { %1133 = vmatmul.mubr.f32.gmra.mrb[4].mxu1 %v1132_v14  ;;  %v1185_v23 = vand.u32 4294901760, %v21957_v20 }
 0x19f   :  { %1138 = vmatprep.mubr.f32.mxu1 %v24961_v55  ;;  %v1175_v16 = vsub.f32 %v21949_v49, %v1174_v29 }
 0x1a0   :  { %v1186_v31 = vsub.f32 %v21957_v20, %v1185_v23 }
 0x1a1   :  { %v1176_v24 = vand.u32 4294901760, %v1175_v16 }
 0x1a2   :  { %1144 = vmatmul.mubr.f32.gmra.mrb[6].mxu1 %v1143_v1  ;;  %v1187_v34 = vand.u32 4294901760, %v1186_v31 }
 0x1a3   :  { %1149 = vmatprep.mubr.f32.mxu1 %v24961_v55 }
 0x1a6   :  { %1155 = vmatmul.mubr.f32.gmra.mrb[8].mxu1 %v1154_v19 }
 0x1a7   :  { %1160 = vmatprep.mubr.f32.mxu1 %v24961_v55 }
 0x1aa   :  { %1166 = vmatmul.mubr.f32.gmra.mrb[10].mxu1 %v1165_v30 }
 0x1ab   :  { %1171 = vmatprep.mubr.f32.mxu1 %v24961_v55 }
 0x1ae   :  { %1177 = vmatmul.mubr.f32.gmra.mrb[12].mxu1 %v1176_v24  ;;  %v24948_v24 = vand.u32 4294901760, %v22210_v26 }
 0x1af   :  { %1182 = vmatprep.mubr.f32.mxu1 %v24961_v55 }
 0x1b2   :  { %1188 = vmatmul.mubr.f32.gmra.mrb[14].mxu1 %v1187_v34 }
 0x1b3   :  { %1298 = vmatprep.mubr.f32.mxu1 %v24961_v55 }
 0x1b6   :  { %1300 = vmatmul.mubr.f32.vlgmr.msra.gmra.mrb[0].mxu1 %v21885_v40 }
 0x1b7   :  { %18451 = vmatpush1.bf16.msra.mxu1 %v18450_v21  ;;  %1305 = vmatprep.mubr.f32.mxu1 %v24961_v55  ;;  %v18464_v21 = vpack.c.bf16 %v1208_v9, %v1196_v11  ;;  %v18470_v11 = vpack.c.bf16 %v1238_v0, %v1226_v61 }
 0x1b8   :  { %18453 = vmatprep.subr.bf16.mxu1 %v18452_v51 }
 0x1ba   :  { %1307 = vmatmul.mubr.f32.gmra.mrb[2].mxu1 %v21882_v37 }
 0x1bb   :  { %1312 = vmatprep.mubr.f32.mxu1 %v24961_v55  ;;  %18455 = vmatpush1.bf16.msra.mxu1 %v18454_v13  ;;  %v22120_v13 = vld [vmem:[%s24940_s6 + $0x8] sm:$0xff] }
 0x1bc   :  { %18457 = vmatprep.subr.bf16.mxu1 %v21807_v35 }
 0x1be   :  { %1314 = vmatmul.mubr.f32.gmra.mrb[4].mxu1 %v21898_v57 }
 0x1bf   :  { %1319 = vmatprep.mubr.f32.mxu1 %v24961_v55 }
 0x1c2   :  { %1321 = vmatmul.mubr.f32.gmra.mrb[6].mxu1 %v21894_v17 }
 0x1c3   :  { %1326 = vmatprep.mubr.f32.mxu1 %v24961_v55 }
 0x1c6   :  { %1328 = vmatmul.mubr.f32.gmra.mrb[8].mxu1 %v21915_v27 }
 0x1c7   :  { %1333 = vmatprep.mubr.f32.mxu1 %v24961_v55 }
 0x1ca   :  { %1335 = vmatmul.mubr.f32.gmra.mrb[10].mxu1 %v21918_v28 }
 0x1cb   :  { %1340 = vmatprep.mubr.f32.mxu1 %v24961_v55 }
 0x1ce   :  { %1342 = vmatmul.mubr.f32.gmra.mrb[12].mxu1 %v21936_v52 }
 0x1cf   :  { %1347 = vmatprep.mubr.f32.mxu1 %v24961_v55 }
 0x1d2   :  { %1349 = vmatmul.mubr.f32.gmra.mrb[14].mxu1 %v21945_v54 }
 0x1d3   :  { %1435 = vmatprep.mubr.f32.mxu1 %v24961_v55 }
 0x1d6   :  { %1438 = vmatmul.mubr.f32.vlgmr.msra.gmra.mrb[0].mxu1 %v21891_v45 }
 0x1d7   :  { %18459 = vmatpush1.bf16.msra.mxu1 %v21809_v36  ;;  %1443 = vmatprep.mubr.f32.mxu1 %v24961_v55 }
 0x1d8   :  { %18461 = vmatprep.subr.bf16.mxu1 %v21813_v48 }
 0x1da   :  { %1446 = vmatmul.mubr.f32.gmra.mrb[2].mxu1 %v21888_v42  ;;  %v1980_v42 = vand.u32 4294901760, %v22120_v13 }
 0x1db   :  { %1451 = vmatprep.mubr.f32.mxu1 %v24961_v55  ;;  %18463 = vmatpush1.bf16.msra.mxu1 %v21815_v50 }
 0x1dc   :  { %18465 = vmatprep.subr.bf16.mxu1 %v18464_v21  ;;  %v22234_v21 = vld [vmem:[%s24940_s6 + $0x48] sm:$0xff] }
 0x1de   :  { %1454 = vmatmul.mubr.f32.gmra.mrb[4].mxu1 %v21905_v6 }
 0x1df   :  { %1459 = vmatprep.mubr.f32.mxu1 %v24961_v55 }
 0x1e2   :  { %1462 = vmatmul.mubr.f32.gmra.mrb[6].mxu1 %v21902_v5 }
 0x1e3   :  { %1467 = vmatprep.mubr.f32.mxu1 %v24961_v55 }
 0x1e6   :  { %1470 = vmatmul.mubr.f32.gmra.mrb[8].mxu1 %v21923_v53 }
 0x1e7   :  { %1475 = vmatprep.mubr.f32.mxu1 %v24961_v55 }
 0x1ea   :  { %1478 = vmatmul.mubr.f32.gmra.mrb[10].mxu1 %v21931_v47  ;;  %v22184_v47 = vld [vmem:[%s24940_s6 + $0x28] sm:$0xff] }
 0x1eb   :  { %1483 = vmatprep.mubr.f32.mxu1 %v24961_v55  ;;  %v1988_v14 = vand.u32 4294901760, %v22184_v47 }
 0x1ed   :  { %v22220_v16 = vpack.c.bf16 %v1992_v18, %v1988_v14 }
 0x1ee   :  { %1486 = vmatmul.mubr.f32.gmra.mrb[12].mxu1 %v21949_v49  ;;  %v22203_v49 = vld [vmem:[#allocation7 + $0x48] sm:$0xff] }
 0x1ef   :  { %1491 = vmatprep.mubr.f32.mxu1 %v24961_v55  ;;  %v24950_v19 = vand.u32 4294901760, %v22203_v49  ;;  %25294 = vst [vmem:[#allocation22_spill] sm:$0xff] %v22220_v16 }
 0x1f2   :  { %1494 = vmatmul.mubr.f32.gmra.mrb[14].mxu1 %v21957_v20  ;;  %v22207_v20 = vld [vmem:[#allocation7 + $0x68] sm:$0xff] }
 0x1f3   :  { %1572 = vmatprep.mubr.f32.mxu1 %v24961_v55 }
 0x1f6   :  { %1576 = vmatmul.mubr.f32.vlgmr.msra.gmra.mrb[0].mxu1 %v1108_v62  ;;  %v22142_v62 = vld [vmem:[#allocation7 + $0x28] sm:$0xff] }
 0x1f7   :  { %18467 = vmatpush1.bf16.msra.mxu1 %v18466_v7  ;;  %1581 = vmatprep.mubr.f32.mxu1 %v24961_v55  ;;  %v22239_v7 = vld [vmem:[%s24940_s6 + $0x58] sm:$0xff] }
 0x1f8   :  { %18469 = vmatprep.subr.bf16.mxu1 %v18468_v10 }
 0x1fa   :  { %1585 = vmatmul.mubr.f32.gmra.mrb[2].mxu1 %v1119_v56 }
 0x1fb   :  { %1590 = vmatprep.mubr.f32.mxu1 %v24961_v55  ;;  %18471 = vmatpush1.bf16.msra.mxu1 %v18470_v11  ;;  %v24968_v11 = vand.u32 4294901760, %v22234_v21 }
 0x1fc   :  { %18473 = vmatprep.subr.bf16.mxu1 %v21807_v35  ;;  %v998_v35 = vlaneseq }
 0x1fe   :  { %1594 = vmatmul.mubr.f32.gmra.mrb[4].mxu1 %v1130_v25  ;;  %v22147_v25 = vld [vmem:[#allocation7] sm:$0xff] }
 0x1ff   :  { %1599 = vmatprep.mubr.f32.mxu1 %v24961_v55  ;;  %v24952_v53 = vand.u32 4294901760, %v22147_v25 }
 0x202   :  { %1603 = vmatmul.mubr.f32.gmra.mrb[6].mxu1 %v1141_v43 }
 0x203   :  { %1608 = vmatprep.mubr.f32.mxu1 %v24961_v55 }
 0x206   :  { %1612 = vmatmul.mubr.f32.gmra.mrb[8].mxu1 %v1152_v33  ;;  %v22196_v33 = vld [vmem:[%s24940_s6 + $0x20] sm:$0xff] }
 0x207   :  { %1617 = vmatprep.mubr.f32.mxu1 %v24961_v55  ;;  %v24971_v2 = vand.u32 4294901760, %v22196_v33 }
 0x20a   :  { %1621 = vmatmul.mubr.f32.gmra.mrb[10].mxu1 %v1163_v3 }
 0x20b   :  { %1626 = vmatprep.mubr.f32.mxu1 %v24961_v55 }
 0x20e   :  { %1630 = vmatmul.mubr.f32.gmra.mrb[12].mxu1 %v1174_v29  ;;  %v22212_v29 = vld [vmem:[#allocation7 + $0x60] sm:$0xff] }
 0x20f   :  { %1635 = vmatprep.mubr.f32.mxu1 %v24961_v55  ;;  %25292 = vst [vmem:[#allocation20_spill] sm:$0xff] %v22212_v29  ;;  %v24947_v34 = vand.u32 4294901760, %v22212_v29 }
 0x212   :  { %1639 = vmatmul.mubr.f32.gmra.mrb[14].mxu1 %v1185_v23  ;;  %v24949_v23 = vand.u32 4294901760, %v22207_v20 }
 0x213   :  { %1733 = vmatprep.mubr.f32.mxu1 %v24961_v55 }
 0x214   :  { %v22247_v10 = vpack.c.bf16 %v24949_v23, %v24950_v19  ;;  %v22299_v23 = vld [vmem:[%s24940_s6 + $0x68] sm:$0xff]  ;;  %v22304_v19 = vld [vmem:[%s24940_s6 + $0x78] sm:$0xff] }
 0x216   :  { %1735 = vmatmul.mubr.f32.vlgmr.msra.gmra.mrb[0].mxu1 %v21885_v40  ;;  %25296 = vst [vmem:[#allocation24_spill] sm:$0xff] %v22247_v10 }
 0x217   :  { %18475 = vmatpush1.bf16.msra.mxu1 %v21809_v36  ;;  %1740 = vmatprep.mubr.f32.mxu1 %v24961_v55  ;;  %v22095_v36 = vshrl.u32 %v998_v35, 7  ;;  %v24967_v35 = vand.u32 4294901760, %v22239_v7 }
 0x218   :  { %18477 = vmatprep.subr.bf16.mxu1 %v21813_v48 }
 0x219   :  { %v24960_v48 = vsub.s32 1, %v22095_v36  ;;  %v24959_v8 = vsub.s32 0, %v22095_v36 }
 0x21a   :  { %1742 = vmatmul.mubr.f32.gmra.mrb[2].mxu1 %v21882_v37 }
 0x21b   :  { %1747 = vmatprep.mubr.f32.mxu1 %v24961_v55  ;;  %18479 = vmatpush1.bf16.msra.mxu1 %v21815_v50  ;;  %v996_v50 = vld [vmem:[%s24938_s4] sm:$0x3] }
 0x21c   :  { %v22103_v58 = vrot.slane %v996_v50, %v24960_v48  ;;  %v22113_v9 = vrot.slane %v996_v50, %v24959_v8  ;;  %v22254_v50 = vld [vmem:[%s24940_s6 + $0x40] sm:$0xff] }
 0x21d   :  { %v22349_v48 = vld [vmem:[#allocation7 + $0xc0] sm:$0xff] }
 0x21e   :  { %1749 = vmatmul.mubr.f32.gmra.mrb[4].mxu1 %v21898_v57  ;;  %25285 = vst [vmem:[#allocation13_spill] sm:$0xff] %v22103_v58  ;;  %25286 = vst [vmem:[#allocation14_spill] sm:$0xff] %v22113_v9 }
 0x21f   :  { %1754 = vmatprep.mubr.f32.mxu1 %v24961_v55  ;;  %25308 = vst [vmem:[#allocation36_spill] sm:$0xff] %v22349_v48 }
 0x222   :  { %1756 = vmatmul.mubr.f32.gmra.mrb[6].mxu1 %v21894_v17 }
 0x223   :  { %1761 = vmatprep.mubr.f32.mxu1 %v24961_v55 }
 0x226   :  { %1763 = vmatmul.mubr.f32.gmra.mrb[8].mxu1 %v21915_v27 }
 0x227   :  { %1768 = vmatprep.mubr.f32.mxu1 %v24961_v55 }
 0x22a   :  { %1770 = vmatmul.mubr.f32.gmra.mrb[10].mxu1 %v21918_v28 }
 0x22b   :  { %1775 = vmatprep.mubr.f32.mxu1 %v24961_v55 }
 0x22e   :  { %1777 = vmatmul.mubr.f32.gmra.mrb[12].mxu1 %v21936_v52 }
 0x22f   :  { %1782 = vmatprep.mubr.f32.mxu1 %v24961_v55 }
 0x232   :  { %1784 = vmatmul.mubr.f32.gmra.mrb[14].mxu1 %v21945_v54 }
 0x233   :  { %1862 = vmatprep.mubr.f32.mxu1 %v24961_v55 }
 0x236   :  { %1864 = vmatmul.mubr.f32.vlgmr.msra.gmra.mrb[0].mxu1 %v21885_v40  ;;  %v22130_v40 = vld [vmem:[%s24940_s6] sm:$0xff] }
 0x237   :  { %1869 = vmatprep.mubr.f32.mxu1 %v24961_v55  ;;  %v24964_v56 = vand.u32 4294901760, %v22130_v40 }
 0x23a   :  { %1871 = vmatmul.mubr.f32.gmra.mrb[2].mxu1 %v21882_v37  ;;  %v22125_v37 = vld [vmem:[%s24940_s6 + $0x18] sm:$0xff] }
 0x23b   :  { %1876 = vmatprep.mubr.f32.mxu1 %v24961_v55  ;;  %v1984_v45 = vand.u32 4294901760, %v22125_v37 }
 0x23d   :  { %v22155_v38 = vpack.c.bf16 %v1984_v45, %v1980_v42 }
 0x23e   :  { %1878 = vmatmul.mubr.f32.gmra.mrb[4].mxu1 %v21898_v57  ;;  %v22140_v57 = vld [vmem:[#allocation7 + $0x8] sm:$0xff] }
 0x23f   :  { %1883 = vmatprep.mubr.f32.mxu1 %v24961_v55  ;;  %v24954_v6 = vand.u32 4294901760, %v22140_v57  ;;  %25287 = vst [vmem:[#allocation15_spill] sm:$0xff] %v22155_v38  ;;  %18481 = vmatprep.subr.bf16.mxu0 %v22155_v38 }
 0x242   :  { %1885 = vmatmul.mubr.f32.gmra.mrb[6].mxu1 %v21894_v17  ;;  %v22137_v17 = vld [vmem:[%s24940_s6 + $0x10] sm:$0xff] }
 0x243   :  { %1890 = vmatprep.mubr.f32.mxu1 %v24961_v55  ;;  %v24963_v5 = vand.u32 4294901760, %v22137_v17 }
 0x245   :  { %v22163_v41 = vpack.c.bf16 %v24963_v5, %v24964_v56 }
 0x246   :  { %1892 = vmatmul.mubr.f32.gmra.mrb[8].mxu1 %v21915_v27  ;;  %v24953_v27 = vand.u32 4294901760, %v22142_v62 }
 0x247   :  { %1897 = vmatprep.mubr.f32.mxu1 %v24961_v55  ;;  %25288 = vst [vmem:[#allocation16_spill] sm:$0xff] %v22163_v41  ;;  %18483 = vmatpush1.bf16.msra.mxu0 %v22163_v41 }
 0x248   :  { %v22169_v43 = vpack.c.bf16 %v24953_v27, %v24954_v6  ;;  %18485 = vmatprep.subr.bf16.mxu0 %v22220_v16 }
 0x24a   :  { %1899 = vmatmul.mubr.f32.gmra.mrb[10].mxu1 %v21918_v28  ;;  %v22149_v28 = vld [vmem:[#allocation7 + $0x20] sm:$0xff]  ;;  %25289 = vst [vmem:[#allocation17_spill] sm:$0xff] %v22169_v43  ;;  %18577 = vmatprep.subr.bf16.mxu1 %v22169_v43 }
 0x24b   :  { %1904 = vmatprep.mubr.f32.mxu1 %v24961_v55  ;;  %v24951_v39 = vand.u32 4294901760, %v22149_v28 }
 0x24d   :  { %v22176_v46 = vpack.c.bf16 %v24951_v39, %v24952_v53  ;;  %v22309_v39 = vsub.f32 %v22120_v13, %v1980_v42  ;;  %v22314_v53 = vsub.f32 %v22125_v37, %v1984_v45  ;;  %v2004_v13 = vand.u32 4294901760, %v22299_v23  ;;  %v22334_v37 = vld [vmem:[%s24940_s6 + $0x60] sm:$0xff]  ;;  %v22339_v45 = vld [vmem:[%s24940_s6 + $0x70] sm:$0xff] }
 0x24e   :  { %1906 = vmatmul.mubr.f32.gmra.mrb[12].mxu1 %v21936_v52  ;;  %v24970_v42 = vand.u32 4294901760, %v22304_v19 }
 0x24f   :  { %1911 = vmatprep.mubr.f32.mxu1 %v24961_v55  ;;  %25290 = vst [vmem:[#allocation18_spill] sm:$0xff] %v22176_v46  ;;  %18579 = vmatpush1.bf16.msra.mxu1 %v22176_v46 }
 0x250   :  { %18581 = vmatprep.subr.bf16.mxu1 %v22247_v10  ;;  %v22356_v5 = vpack.c.bf16 %v24970_v42, %v2004_v13 }
 0x252   :  { %1913 = vmatmul.mubr.f32.gmra.mrb[14].mxu1 %v21945_v54  ;;  %v22201_v54 = vld [vmem:[%s24940_s6 + $0x30] sm:$0xff]  ;;  %25310 = vst [vmem:[#allocation38_spill] sm:$0xff] %v22356_v5 }
 0x253   :  { %2772 = vmatprep.mubr.f32.mxu1 %v24961_v55  ;;  %v24969_v3 = vand.u32 4294901760, %v22201_v54  ;;  %v22351_v55 = vld [vmem:[#allocation7 + $0xe0] sm:$0xff] }
 0x254   :  { %25309 = vst [vmem:[#allocation37_spill] sm:$0xff] %v22351_v55 }
 0x255   :  { %v22228_v31 = vpack.c.bf16 %v24969_v3, %v24971_v2  ;;  %v24980_v3 = vand.u32 4294901760, %v22314_v53 }
 0x257   :  { %25295 = vst [vmem:[#allocation23_spill] sm:$0xff] %v22228_v31  ;;  %18487 = vmatpush1.bf16.msra.mxu0 %v22228_v31 }
 0x309   :  { %v1865_v4 = vpop.f32.mrb[0].mxu1 }
 0x30a   :  { %v1867_v15 = vpop.f32.mrb[1].mxu1  ;;  %v20672_v12 = vadd.f32 %v1865_v4, %v22113_v9  ;;  %v22259_v4 = vld [vmem:[%s24940_s6 + $0x50] sm:$0xff] }
 0x30b   :  { %v22106_v22 = vadd.f32 %v1867_v15, %v22103_v58  ;;  %v22261_v15 = vld [vmem:[#allocation7 + $0x88] sm:$0xff] }
 0x30c   :  { %v17869_v44 = vmul.f32 -1.442695, %v20672_v12  ;;  %25297 = vst [vmem:[#allocation25_spill] sm:$0xff] %v22261_v15  ;;  %v24966_v12 = vand.u32 4294901760, %v22254_v50 }
 0x30d   :  { %21081 = vtanh.f32 %v22106_v22 }
 0x30e   :  { %21083 = vpow2.f32 %v17869_v44  ;;  %v24965_v44 = vand.u32 4294901760, %v22259_v4 }
 0x317   :  { %v21082_v32 = vpop.eup %21081 }
 0x318   :  { %1946 = vrot.lane.b32.xlu0 %v21082_v32, %s21376_s23  ;;  %v21084_v60 = vpop.eup %21083  ;;  %v22268_v32 = vpack.c.bf16 %v24947_v34, %v24948_v24  ;;  %v22294_v24 = vpack.c.bf16 %v24965_v44, %v24966_v12  ;;  %v24976_v44 = vand.u32 4294901760, %v22349_v48  ;;  %v24975_v12 = vand.u32 4294901760, %v22351_v55 }
 0x319   :  { %v1937_v63 = vadd.f32 1.0, %v21084_v60  ;;  %v22272_v60 = vld [vmem:[#allocation7 + $0xa8] sm:$0xff] }
 0x31a   :  { %25298 = vst [vmem:[#allocation26_spill] sm:$0xff] %v22268_v32  ;;  %25299 = vst [vmem:[#allocation27_spill] sm:$0xff] %v22272_v60  ;;  %18583 = vmatpush1.bf16.msra.mxu1 %v22268_v32  ;;  %v22381_v2 = vpack.c.bf16 %v24975_v12, %v24976_v44  ;;  %v22398_v12 = vsub.f32 %v22189_v59, %v1992_v18 }
 0x31b   :  { %21085 = vrcp.f32 %v1937_v63  ;;  %v24958_v63 = vand.u32 4294901760, %v22261_v15  ;;  %25303 = vst [vmem:[#allocation31_spill] sm:$0xff] %v22294_v24 }
 0x31c   :  { %25313 = vst [vmem:[#allocation41_spill] sm:$0xff] %v22381_v2 }
 0x325   :  { %v21086_v61 = vpop.eup %21085 }
 0x326   :  { %v1944_v52 = vmul.f32 0.0, %v21086_v61 }
 0x38a   :  { %v1947_v0 = vpop.permute.xlu0 %1946 }
 0x38b   :  { %v1949_v51 = vmul.f32 %v21086_v61, %v1947_v0  ;;  %v22275_v61 = vld [vmem:[#allocation7 + $0x80] sm:$0xff] }
 0x38c   :  { %25300 = vst [vmem:[#allocation28_spill] sm:$0xff] %v22275_v61  ;;  %v22277_v0 = vld [vmem:[#allocation7 + $0xa0] sm:$0xff] }
 0x38d   :  { %1951 = vrot.lane.b32.xlu0 %v1949_v51, %s21376_s23  ;;  %25301 = vst [vmem:[#allocation29_spill] sm:$0xff] %v22277_v0  ;;  %v22284_v51 = vpack.c.bf16 %v24967_v35, %v24968_v11  ;;  %v24956_v34 = vand.u32 4294901760, %v22277_v0  ;;  %v24978_v11 = vand.u32 4294901760, %v22309_v39 }
 0x38f   :  { %25302 = vst [vmem:[#allocation30_spill] sm:$0xff] %v22284_v51  ;;  %18489 = vmatprep.subr.bf16.mxu0 %v22284_v51 }
 0x390   :  { %18491 = vmatpush1.bf16.msra.mxu0 %v22294_v24 }
 0x391   :  { %18493 = vmatprep.subr.bf16.mxu0 %v22356_v5 }
 0x3ff   :  { %v1952_v1 = vpop.permute.xlu0 %1951 }
 0x400   :  { %v22214_v30 = vadd.f32 %v1952_v1, %v1944_v52  ;;  %v24955_v52 = vand.u32 4294901760, %v22272_v60  ;;  %v24957_v1 = vand.u32 4294901760, %v22275_v61 }
 0x402   :  { %25293 = vst [vmem:[#allocation21_spill] sm:$0xff] %v22214_v30  ;;  %21087 = vtanh.f32 %v22214_v30  ;;  %v22321_v27 = vpack.c.bf16 %v24955_v52, %v24958_v63  ;;  %v22327_v6 = vpack.c.bf16 %v24956_v34, %v24957_v1  ;;  %v22341_v52 = vld [vmem:[#allocation7 + $0xc8] sm:$0xff]  ;;  %v24973_v34 = vand.u32 4294901760, %v22334_v37 }
 0x403   :  { %25306 = vst [vmem:[#allocation34_spill] sm:$0xff] %v22341_v52  ;;  %v24972_v1 = vand.u32 4294901760, %v22339_v45  ;;  %v22346_v63 = vld [vmem:[#allocation7 + $0xe8] sm:$0xff]  ;;  %v24977_v8 = vand.u32 4294901760, %v22341_v52 }
 0x404   :  { %25304 = vst [vmem:[#allocation32_spill] sm:$0xff] %v22321_v27  ;;  %25305 = vst [vmem:[#allocation33_spill] sm:$0xff] %v22327_v6  ;;  %18585 = vmatprep.subr.bf16.mxu1 %v22321_v27  ;;  %v24974_v56 = vand.u32 4294901760, %v22346_v63  ;;  %v25319_v27 = vand.u32 4294901760, %v22254_v50 }
 0x405   :  { %25307 = vst [vmem:[#allocation35_spill] sm:$0xff] %v22346_v63  ;;  %18587 = vmatpush1.bf16.msra.mxu1 %v22327_v6  ;;  %v22366_v35 = vpack.c.bf16 %v24972_v1, %v24973_v34  ;;  %v22386_v1 = vsub.f32 %v22184_v47, %v1988_v14  ;;  %v2075_v34 = vsub.f32 %v22309_v39, %v24978_v11  ;;  %v25314_v14 = vand.u32 4294901760, %v22196_v33 }
 0x406   :  { %v22375_v42 = vpack.c.bf16 %v24974_v56, %v24977_v8  ;;  %v2087_v56 = vsub.f32 %v22314_v53, %v24980_v3  ;;  %v25315_v11 = vand.u32 4294901760, %v22201_v54  ;;  %v2110_v3 = vand.u32 4294901760, %v22398_v12 }
 0x407   :  { %25311 = vst [vmem:[#allocation39_spill] sm:$0xff] %v22366_v35  ;;  %18495 = vmatpush1.bf16.msra.mxu0 %v22366_v35  ;;  %v24989_v47 = vand.u32 4294901760, %v22386_v1  ;;  %v22405_v8 = vsub.f32 %v22196_v33, %v25314_v14  ;;  %v2076_v59 = vand.u32 4294901760, %v2075_v34  ;;  %v2127_v32 = vsub.f32 %v22254_v50, %v25319_v27 }
 0x408   :  { %25312 = vst [vmem:[#allocation40_spill] sm:$0xff] %v22375_v42  ;;  %18589 = vmatprep.subr.bf16.mxu1 %v22375_v42  ;;  %v22410_v30 = vsub.f32 %v22201_v54, %v25315_v11  ;;  %v2088_v18 = vand.u32 4294901760, %v2087_v56  ;;  %v2111_v54 = vsub.f32 %v22398_v12, %v2110_v3  ;;  %v25317_v11 = vand.u32 4294901760, %v22234_v21 }
 0x409   :  { %18591 = vmatpush1.bf16.msra.mxu1 %v22381_v2  ;;  %v2099_v9 = vsub.f32 %v22386_v1, %v24989_v47  ;;  %v2104_v33 = vand.u32 4294901760, %v22405_v8  ;;  %v25318_v56 = vand.u32 4294901760, %v22239_v7  ;;  %v25323_v63 = vand.u32 4294901760, %v22304_v19 }
 0x40a   :  { %v2116_v14 = vand.u32 4294901760, %v22410_v30  ;;  %v22420_v58 = vpack.c.bf16 %v2088_v18, %v2076_v59  ;;  %v2112_v6 = vand.u32 4294901760, %v2111_v54 }
 0x40b   :  { %v2133_v34 = vsub.f32 %v22239_v7, %v25318_v56  ;;  %v2100_v2 = vand.u32 4294901760, %v2099_v9  ;;  %v2105_v42 = vsub.f32 %v22405_v8, %v2104_v33  ;;  %v2145_v9 = vsub.f32 %v22299_v23, %v2004_v13 }
 0x40c   :  { %v21088_v44 = vpop.eup %21087  ;;  %25316 = vst [vmem:[#allocation42_spill] sm:$0xff] %v22420_v58  ;;  %v2117_v47 = vsub.f32 %v22410_v30, %v2116_v14  ;;  %18497 = vmatprep.subr.bf16.mxu0 %v22420_v58  ;;  %v2128_v58 = vand.u32 4294901760, %v2127_v32  ;;  %v2157_v27 = vsub.f32 %v22304_v19, %v25323_v63 }
 0x40d   :  { %1957 = vrot.lane.b32.xlu1 %v21088_v44, %s21376_s23  ;;  %v2121_v44 = vsub.f32 %v22234_v21, %v25317_v11  ;;  %v2134_v18 = vand.u32 4294901760, %v2133_v34  ;;  %v2106_v10 = vand.u32 4294901760, %v2105_v42  ;;  %v25320_v11 = vand.u32 4294901760, %v22259_v4 }
 0x40e   :  { %v2118_v21 = vand.u32 4294901760, %v2117_v47  ;;  %v22439_v56 = vpack.c.bf16 %v2112_v6, %v2100_v2  ;;  %v2146_v48 = vand.u32 4294901760, %v2145_v9  ;;  %v2129_v47 = vsub.f32 %v2127_v32, %v2128_v58 }
 0x40f   :  { %v2122_v59 = vand.u32 4294901760, %v2121_v44  ;;  %v2139_v7 = vsub.f32 %v22259_v4, %v25320_v11  ;;  %v2135_v43 = vsub.f32 %v2133_v34, %v2134_v18  ;;  %v25324_v4 = vand.u32 4294901760, %v22334_v37 }
 0x410   :  { %25321 = vst [vmem:[#allocation43_spill] sm:$0xff] %v22439_v56  ;;  %v22441_v54 = vpack.c.bf16 %v2118_v21, %v2106_v10  ;;  %v2147_v2 = vsub.f32 %v2145_v9, %v2146_v48  ;;  %v2158_v13 = vand.u32 4294901760, %v2157_v27  ;;  %v25325_v11 = vand.u32 4294901760, %v22339_v45 }
 0x411   :  { %v2123_v46 = vsub.f32 %v2121_v44, %v2122_v59  ;;  %v2140_v55 = vand.u32 4294901760, %v2139_v7  ;;  %v2136_v42 = vand.u32 4294901760, %v2135_v43  ;;  %v2151_v23 = vsub.f32 %v22334_v37, %v25324_v4 }
 0x412   :  { %25322 = vst [vmem:[#allocation44_spill] sm:$0xff] %v22441_v54  ;;  %v2163_v10 = vsub.f32 %v22339_v45, %v25325_v11  ;;  %v2130_v52 = vand.u32 4294901760, %v2129_v47  ;;  %v2148_v19 = vand.u32 4294901760, %v2147_v2  ;;  %v22460_v45 = vpack.c.bf16 %v22314_v53, %v22309_v39 }
 0x413   :  { %v2124_v50 = vand.u32 4294901760, %v2123_v46  ;;  %v2141_v6 = vsub.f32 %v2139_v7, %v2140_v55  ;;  %v2152_v0 = vand.u32 4294901760, %v2151_v23  ;;  %v2159_v46 = vsub.f32 %v2157_v27, %v2158_v13 }
 0x414   :  { %v2164_v43 = vand.u32 4294901760, %v2163_v10  ;;  %25329 = vst [vmem:[#allocation48_spill] sm:$0xff] %v22460_v45  ;;  %v22474_v47 = vpack.c.bf16 %v2139_v7, %v2127_v32  ;;  %v25337_v2 = vand.u32 4294901760, %v22309_v39  ;;  %v22494_v32 = vpack.c.bf16 %v2140_v55, %v2128_v58 }
 0x415   :  { %v22452_v21 = vpack.c.bf16 %v2136_v42, %v2124_v50  ;;  %v2142_v61 = vand.u32 4294901760, %v2141_v6  ;;  %v2153_v63 = vsub.f32 %v2151_v23, %v2152_v0  ;;  %v2160_v15 = vand.u32 4294901760, %v2159_v46 }
 0x416   :  { %v2165_v37 = vsub.f32 %v2163_v10, %v2164_v43  ;;  %v22466_v42 = vpack.c.bf16 %v22398_v12, %v22386_v1  ;;  %25334 = vst [vmem:[#allocation53_spill] sm:$0xff] %v22474_v47  ;;  %v22478_v6 = vpack.c.bf16 %v2163_v10, %v2151_v23  ;;  %v25340_v12 = vand.u32 4294901760, %v22386_v1  ;;  %25344 = vst [vmem:[#allocation60_spill] sm:$0xff] %v22494_v32 }
 0x417   :  { %25326 = vst [vmem:[#allocation45_spill] sm:$0xff] %v22452_v21  ;;  %v22454_v60 = vpack.c.bf16 %v2142_v61, %v2130_v52  ;;  %v2154_v4 = vand.u32 4294901760, %v2153_v63  ;;  %v22456_v29 = vpack.c.bf16 %v2160_v15, %v2148_v19  ;;  %v22470_v61 = vpack.c.bf16 %v22410_v30, %v22405_v8 }
 0x418   :  { %v2166_v26 = vand.u32 4294901760, %v2165_v37  ;;  %25331 = vst [vmem:[#allocation50_spill] sm:$0xff] %v22466_v42  ;;  %v22472_v52 = vpack.c.bf16 %v2133_v34, %v2121_v44  ;;  %v22476_v15 = vpack.c.bf16 %v2157_v27, %v2145_v9  ;;  %25336 = vst [vmem:[#allocation55_spill] sm:$0xff] %v22478_v6  ;;  %v22488_v19 = vpack.c.bf16 %v2110_v3, %v25340_v12 }
 0x419   :  { %25327 = vst [vmem:[#allocation46_spill] sm:$0xff] %v22454_v60  ;;  %25328 = vst [vmem:[#allocation47_spill] sm:$0xff] %v22456_v29  ;;  %v22490_v8 = vpack.c.bf16 %v2116_v14, %v2104_v33  ;;  %v22492_v30 = vpack.c.bf16 %v2134_v18, %v2122_v59  ;;  %v22496_v44 = vpack.c.bf16 %v2158_v13, %v2146_v48  ;;  %v17870_v39 = vmul.f32 -1.442695, %v22106_v22 }
 0x41a   :  { %v22462_v50 = vpack.c.bf16 %v2166_v26, %v2154_v4  ;;  %25332 = vst [vmem:[#allocation51_spill] sm:$0xff] %v22470_v61  ;;  %25333 = vst [vmem:[#allocation52_spill] sm:$0xff] %v22472_v52  ;;  %v25338_v26 = vand.u32 4294901760, %v22314_v53  ;;  %v22498_v34 = vpack.c.bf16 %v2164_v43, %v2152_v0  ;;  %v25347_v1 = vand.u32 4294901760, %v22130_v40 }
 0x41b   :  { %25335 = vst [vmem:[#allocation54_spill] sm:$0xff] %v22476_v15  ;;  %25341 = vst [vmem:[#allocation57_spill] sm:$0xff] %v22488_v19  ;;  %21089 = vpow2.f32 %v17870_v39  ;;  %v25348_v33 = vand.u32 4294901760, %v22137_v17  ;;  %v25351_v63 = vmov 0.0  }
 0x41c   :  { %25330 = vst [vmem:[#allocation49_spill] sm:$0xff] %v22462_v50  ;;  %v22484_v11 = vpack.c.bf16 %v25338_v26, %v25337_v2  ;;  %25342 = vst [vmem:[#allocation58_spill] sm:$0xff] %v22490_v8  ;;  %v2079_v3 = vsub.f32 %v22130_v40, %v25347_v1  ;;  %v22572_v2 = vld [vmem:[#allocation7 + $0x18] sm:$0xff] }
 0x41d   :  { %25343 = vst [vmem:[#allocation59_spill] sm:$0xff] %v22492_v30  ;;  %25345 = vst [vmem:[#allocation61_spill] sm:$0xff] %v22496_v44  ;;  %v2091_v14 = vsub.f32 %v22137_v17, %v25348_v33  ;;  %v22574_v26 = vld [vmem:[#allocation7 + $0x38] sm:$0xff]  ;;  %v25025_v12 = vand.u32 4294901760, %v22572_v2 }
 0x41e   :  { %25339 = vst [vmem:[#allocation56_spill] sm:$0xff] %v22484_v11  ;;  %25346 = vst [vmem:[#allocation62_spill] sm:$0xff] %v22498_v34  ;;  %v2080_v55 = vand.u32 4294901760, %v2079_v3  ;;  %v25024_v39 = vand.u32 4294901760, %v22574_v26  ;;  %v22584_v1 = vld [vmem:[#allocation7 + $0x58] sm:$0xff] }
 0x41f   :  { %v2092_v58 = vand.u32 4294901760, %v2091_v14  ;;  %v22533_v37 = vpack.c.bf16 %v2091_v14, %v2079_v3 }
 0x420   :  { %v2081_v22 = vsub.f32 %v2079_v3, %v2080_v55  ;;  %v22586_v3 = vld [vmem:[#allocation7 + $0x78] sm:$0xff] }
 0x421   :  { %v2093_v9 = vsub.f32 %v2091_v14, %v2092_v58  ;;  %25352 = vst [vmem:[#allocation65_spill] sm:$0xff] %v22533_v37  ;;  %v22555_v4 = vpack.c.bf16 %v2092_v58, %v2080_v55  ;;  %v22596_v55 = vpack.c.bf16 %v25024_v39, %v25025_v12  ;;  %v25031_v58 = vand.u32 4294901760, %v22584_v1 }
 0x422   :  { %v2082_v13 = vand.u32 4294901760, %v2081_v22  ;;  %v22606_v22 = vld [vmem:[#allocation7 + $0xb8] sm:$0xff] }
 0x423   :  { %v2094_v40 = vand.u32 4294901760, %v2093_v9  ;;  %25353 = vst [vmem:[#allocation66_spill] sm:$0xff] %v22555_v4 }
 0x425   :  { %v21090_v53 = vpop.eup %21089  ;;  %v22518_v46 = vpack.c.bf16 %v2094_v40, %v2082_v13  ;;  %v22632_v13 = vld [vmem:[#allocation7 + $0xf8] sm:$0xff] }
 0x426   :  { %v1938_v7 = vadd.f32 1.0, %v21090_v53  ;;  %v22580_v53 = vld [vmem:[#allocation7 + $0x10] sm:$0xff] }
 0x427   :  { %25350 = vst [vmem:[#allocation64_spill] sm:$0xff] %v22518_v46  ;;  %v25029_v33 = vand.u32 4294901760, %v22580_v53 }
 0x428   :  { %21091 = vrcp.f32 %v1938_v7  ;;  %v22582_v7 = vld [vmem:[#allocation7 + $0x30] sm:$0xff] }
 0x429   :  { %v25028_v14 = vand.u32 4294901760, %v22582_v7 }
 0x42b   :  { %v22613_v9 = vpack.c.bf16 %v25028_v14, %v25029_v33  ;;  %v22628_v14 = vld [vmem:[#allocation7 + $0xb0] sm:$0xff]  ;;  %v22630_v33 = vld [vmem:[#allocation7 + $0xd8] sm:$0xff] }
 0x42c   :  { %v25046_v39 = vand.u32 4294901760, %v22628_v14 }
 0x42d   :  { %25354 = vst [vmem:[#allocation67_spill] sm:$0xff] %v22613_v9 }
 0x432   :  { %v21092_v48 = vpop.eup %21091 }
 0x47f   :  { %v1958_v59 = vpop.permute.xlu1 %1957 }
 0x480   :  { %v1960_v0 = vmul.f32 %v21092_v48, %v1958_v59  ;;  %v25030_v48 = vand.u32 4294901760, %v22586_v3  ;;  %v22600_v59 = vld [vmem:[#allocation7 + $0x50] sm:$0xff] }
 0x481   :  { %v25356_v40 = vand.u32 4294901760, %v22600_v59 }
 0x482   :  { %v1978_v18 = vsel %vm117_vm0, %v1960_v0, 0  ;;  %v22602_v0 = vld [vmem:[#allocation7 + $0x70] sm:$0xff] }
 0x483   :  { %v22508_v27 = vand.u32 4294901760, %v1978_v18 }
 0x485   :  { %v22511_v23 = vsub.f32 %v1978_v18, %v22508_v27  ;;  %v22604_v18 = vld [vmem:[#allocation7 + $0x98] sm:$0xff] }
 0x487   :  { %v22514_v10 = vand.u32 4294901760, %v22511_v23 }
 0x489   :  { %25349 = vst [vmem:[#allocation63_spill] sm:$0xff] %v22514_v10  ;;  %v2064_v17 = vsub.f32 %v22511_v23, %v22514_v10 }
 0x48b   :  { %v22520_v43 = vand.u32 4294901760, %v2064_v17  ;;  %v22622_v17 = vpack.c.bf16 %v25030_v48, %v25031_v58  ;;  %v25357_v48 = vand.u32 4294901760, %v22602_v0 }
 0x48d   :  { %2066 = vmatmul.mubr.f32.vlgmr.msra.gmra.mrb[8].mxu0 %v22520_v43  ;;  %2778 = vmatmul.mubr.f32.vlgmr.msra.gmra.mrb[2].mxu1 %v22520_v43  ;;  %25355 = vst [vmem:[#allocation68_spill] sm:$0xff] %v22622_v17  ;;  %v22640_v58 = vpack.c.bf16 %v25357_v48, %v25356_v40  ;;  %v22654_v48 = vld [vmem:[#allocation7 + $0xd0] sm:$0xff] }
 0x48e   :  { %18499 = vmatpush1.bf16.msra.mxu0 %v22518_v46  ;;  %2216 = vmatprep.mubr.f32.mxu0 %v25351_v63  ;;  %v22656_v40 = vld [vmem:[#allocation7 + $0xf0] sm:$0xff] }
 0x48f   :  { %18501 = vmatprep.subr.bf16.mxu0 %v22439_v56  ;;  %2783 = vmatprep.mubr.f32.mxu1 %v25351_v63  ;;  %25358 = vst [vmem:[#allocation69_spill] sm:$0xff] %v22640_v58 }
 0x492   :  { %18503 = vmatpush1.bf16.msra.mxu0 %v22441_v54 }
 0x493   :  { %18505 = vmatprep.subr.bf16.mxu0 %v22452_v21 }
 0x496   :  { %18507 = vmatpush1.bf16.msra.mxu0 %v22454_v60 }
 0x497   :  { %18509 = vmatprep.subr.bf16.mxu0 %v22456_v29 }
 0x49a   :  { %18511 = vmatpush1.bf16.msra.mxu0 %v22462_v50 }
 0x49b   :  { %18513 = vmatprep.subr.bf16.mxu0 %v22460_v45 }
 0x49d   :  { %2218 = vmatmul.mubr.f32.vlgmr.msra.gmra.mrb[8].mxu0 %v22508_v27 }
 0x49e   :  { %18515 = vmatpush1.bf16.msra.mxu0 %v22533_v37  ;;  %2320 = vmatprep.mubr.f32.mxu0 %v25351_v63 }
 0x49f   :  { %18517 = vmatprep.subr.bf16.mxu0 %v22466_v42 }
 0x4a2   :  { %18519 = vmatpush1.bf16.msra.mxu0 %v22470_v61 }
 0x4a3   :  { %18521 = vmatprep.subr.bf16.mxu0 %v22472_v52 }
 0x4a6   :  { %18523 = vmatpush1.bf16.msra.mxu0 %v22474_v47 }
 0x4a7   :  { %18525 = vmatprep.subr.bf16.mxu0 %v22476_v15 }
 0x4aa   :  { %18527 = vmatpush1.bf16.msra.mxu0 %v22478_v6 }
 0x4ab   :  { %18529 = vmatprep.subr.bf16.mxu0 %v22155_v38 }
 0x4ad   :  { %2323 = vmatmul.mubr.f32.vlgmr.msra.gmra.mrb[8].mxu0 %v22511_v23 }
 0x4ae   :  { %18531 = vmatpush1.bf16.msra.mxu0 %v22163_v41  ;;  %2409 = vmatprep.mubr.f32.mxu0 %v25351_v63 }
 0x4af   :  { %18533 = vmatprep.subr.bf16.mxu0 %v22220_v16 }
 0x4b2   :  { %18535 = vmatpush1.bf16.msra.mxu0 %v22228_v31 }
 0x4b3   :  { %18537 = vmatprep.subr.bf16.mxu0 %v22284_v51 }
 0x4b6   :  { %18539 = vmatpush1.bf16.msra.mxu0 %v22294_v24 }
 0x4b7   :  { %18541 = vmatprep.subr.bf16.mxu0 %v22356_v5 }
 0x4ba   :  { %18543 = vmatpush1.bf16.msra.mxu0 %v22366_v35 }
 0x4bb   :  { %18545 = vmatprep.subr.bf16.mxu0 %v22484_v11  ;;  %v25057_v11 = vand.u32 4294901760, %v22654_v48 }
 0x4bd   :  { %2413 = vmatmul.mubr.f32.vlgmr.msra.gmra.mrb[8].mxu0 %v22514_v10 }
 0x4be   :  { %18547 = vmatpush1.bf16.msra.mxu0 %v22555_v4  ;;  %2531 = vmatprep.mubr.f32.mxu0 %v25351_v63 }
 0x4bf   :  { %18549 = vmatprep.subr.bf16.mxu0 %v22488_v19  ;;  %v25048_v19 = vand.u32 4294901760, %v22632_v13 }
 0x4c2   :  { %18551 = vmatpush1.bf16.msra.mxu0 %v22490_v8  ;;  %v25049_v8 = vand.u32 4294901760, %v22630_v33 }
 0x4c3   :  { %18553 = vmatprep.subr.bf16.mxu0 %v22492_v30 }
 0x4c6   :  { %18555 = vmatpush1.bf16.msra.mxu0 %v22494_v32  ;;  %v25360_v32 = vand.u32 4294901760, %v22606_v22 }
 0x4c7   :  { %18557 = vmatprep.subr.bf16.mxu0 %v22496_v44  ;;  %v25359_v44 = vand.u32 4294901760, %v22604_v18 }
 0x4c9   :  { %v22650_v30 = vpack.c.bf16 %v25360_v32, %v25359_v44  ;;  %v25056_v32 = vand.u32 4294901760, %v22656_v40  ;;  %v22672_v44 = vpack.c.bf16 %v25048_v19, %v25049_v8  ;;  %v25365_v19 = vsub.s32 1, %v22095_v36 }
 0x4ca   :  { %18559 = vmatpush1.bf16.msra.mxu0 %v22498_v34  ;;  %v22626_v34 = vld [vmem:[#allocation7 + $0x90] sm:$0xff] }
 0x4cb   :  { %18561 = vmatprep.subr.bf16.mxu0 %v22155_v38  ;;  %v25047_v12 = vand.u32 4294901760, %v22626_v34  ;;  %25361 = vst [vmem:[#allocation70_spill] sm:$0xff] %v22650_v30  ;;  %25363 = vst [vmem:[#allocation72_spill] sm:$0xff] %v22672_v44 }
 0x4cd   :  { %2533 = vmatmul.mubr.f32.vlgmr.msra.gmra.mrb[8].mxu0 %v22508_v27  ;;  %v22663_v4 = vpack.c.bf16 %v25046_v39, %v25047_v12  ;;  %v22679_v39 = vpack.c.bf16 %v25056_v32, %v25057_v11  ;;  %v1919_v12 = vld [vmem:[#allocation8] sm:$0x3] }
 0x4ce   :  { %18563 = vmatpush1.bf16.msra.mxu0 %v22163_v41  ;;  %2619 = vmatprep.mubr.f32.mxu0 %v25351_v63  ;;  %v22687_v8 = vrot.slane %v1919_v12, %v25365_v19 }
 0x4cf   :  { %18565 = vmatprep.subr.bf16.mxu0 %v22220_v16  ;;  %25362 = vst [vmem:[#allocation71_spill] sm:$0xff] %v22663_v4  ;;  %25364 = vst [vmem:[#allocation73_spill] sm:$0xff] %v22679_v39  ;;  %v25427_v16 = vand.u32 4294901760, %v22656_v40 }
 0x4d0   :  { %25366 = vst [vmem:[#allocation74_spill] sm:$0xff] %v22687_v8 }
 0x4d2   :  { %18567 = vmatpush1.bf16.msra.mxu0 %v22228_v31 }
 0x4d3   :  { %18569 = vmatprep.subr.bf16.mxu0 %v22284_v51 }
 0x4d6   :  { %18571 = vmatpush1.bf16.msra.mxu0 %v22294_v24 }
 0x4d7   :  { %18573 = vmatprep.subr.bf16.mxu0 %v22356_v5  ;;  %v25379_v5 = vand.u32 4294901760, %v22203_v49 }
 0x4da   :  { %18575 = vmatpush1.bf16.msra.mxu0 %v22366_v35 }
 0x4db   :  { %18673 = vmatprep.subr.bf16.mxu0 %v22596_v55 }
 0x4dd   :  { %2621 = vmatmul.mubr.f32.vlgmr.msra.gmra.mrb[8].mxu0 %v22508_v27 }
 0x4de   :  { %18675 = vmatpush1.bf16.msra.mxu0 %v22613_v9  ;;  %3456 = vmatprep.mubr.f32.mxu0 %v25351_v63 }
 0x4df   :  { %18677 = vmatprep.subr.bf16.mxu0 %v22622_v17 }
 0x4e2   :  { %18679 = vmatpush1.bf16.msra.mxu0 %v22640_v58 }
 0x4e3   :  { %18681 = vmatprep.subr.bf16.mxu0 %v22650_v30 }
 0x4e6   :  { %18683 = vmatpush1.bf16.msra.mxu0 %v22663_v4 }
 0x4e7   :  { %18685 = vmatprep.subr.bf16.mxu0 %v22672_v44 }
 0x4ea   :  { %18687 = vmatpush1.bf16.msra.mxu0 %v22679_v39 }
 0x4ed   :  { %3462 = vmatmul.mubr.f32.vlgmr.msra.gmra.mrb[10].mxu0 %v22520_v43  ;;  %v25367_v43 = vsub.s32 0, %v22095_v36  ;;  %v25370_v36 = vand.u32 4294901760, %v22142_v62 }
 0x4ee   :  { %3465 = vmatprep.mubr.f32.mxu0 %v25351_v63 }
 0x4ef   :  { %v22696_v61 = vrot.slane %v1919_v12, %v25367_v43  ;;  %v25374_v12 = vand.u32 4294901760, %v22149_v28  ;;  %v25376_v43 = vand.u32 4294901760, %v22582_v7 }
 0x4f1   :  { %25368 = vst [vmem:[#allocation75_spill] sm:$0xff] %v22696_v61 }
 0x5b0   :  { %v2622_v6 = vpop.f32.mrb[8].mxu0 }
 0x5b1   :  { %v2624_v15 = vpop.f32.mrb[9].mxu0  ;;  %v20688_v42 = vadd.f32 %v2622_v6, %v22696_v61  ;;  %v22708_v6 = vsub.f32 %v22142_v62, %v25370_v36  ;;  %v22728_v62 = vsub.f32 %v22149_v28, %v25374_v12 }
 0x5b2   :  { %v22690_v47 = vadd.f32 %v2624_v15, %v22687_v8 }
 0x5b3   :  { %v17871_v19 = vmul.f32 -1.442695, %v20688_v42  ;;  %v25371_v42 = vand.u32 4294901760, %v22572_v2  ;;  %v25093_v36 = vand.u32 4294901760, %v22728_v62  ;;  %v25448_v58 = vand.u32 4294901760, %v22708_v6 }
 0x5b4   :  { %21093 = vtanh.f32 %v22690_v47 }
 0x5b5   :  { %21095 = vpow2.f32 %v17871_v19 }
 0x5be   :  { %v21094_v32 = vpop.eup %21093 }
 0x5bf   :  { %2642 = vrot.lane.b32.xlu1 %v21094_v32, %s21376_s23  ;;  %v21096_v37 = vpop.eup %21095  ;;  %v25375_v32 = vand.u32 4294901760, %v22580_v53 }
 0x5c0   :  { %v3463_v11 = vpop.f32.mrb[10].mxu0  ;;  %v2633_v45 = vadd.f32 1.0, %v21096_v37  ;;  %v25373_v37 = vand.u32 4294901760, %v22147_v25 }
 0x5c1   :  { %v3464_v52 = vpop.f32.mrb[11].mxu0  ;;  %v25369_v11 = vand.u32 4294901760, %v22140_v57 }
 0x5c2   :  { %21097 = vrcp.f32 %v2633_v45  ;;  %v22713_v45 = vsub.f32 %v22572_v2, %v25371_v42  ;;  %v22733_v2 = vsub.f32 %v22580_v53, %v25375_v32 }
 0x5c3   :  { %v22703_v52 = vsub.f32 %v22140_v57, %v25369_v11  ;;  %v22723_v57 = vsub.f32 %v22147_v25, %v25373_v37  ;;  %v25074_v25 = vand.u32 4294901760, %v22708_v6 }
 0x5c4   :  { %v25096_v53 = vand.u32 4294901760, %v22733_v2  ;;  %v25450_v9 = vand.u32 4294901760, %v22713_v45 }
 0x5c5   :  { %v25076_v19 = vand.u32 4294901760, %v22703_v52  ;;  %v25088_v28 = vand.u32 4294901760, %v22723_v57  ;;  %v25447_v30 = vand.u32 4294901760, %v22703_v52 }
 0x5c7   :  { %v2802_v32 = vsub.f32 %v22723_v57, %v25088_v28  ;;  %v23092_v17 = vpack.c.bf16 %v25448_v58, %v25447_v30 }
 0x5c9   :  { %v2803_v21 = vand.u32 4294901760, %v2802_v32  ;;  %25449 = vst [vmem:[#allocation98_spill] sm:$0xff] %v23092_v17 }
 0x5cc   :  { %v21098_v15 = vpop.eup %21097 }
 0x5cd   :  { %v2640_v29 = vmul.f32 0.0, %v21098_v15 }
 0x631   :  { %v2643_v8 = vpop.permute.xlu1 %2642 }
 0x632   :  { %v2645_v50 = vmul.f32 %v21098_v15, %v2643_v8  ;;  %v25372_v8 = vand.u32 4294901760, %v22574_v26  ;;  %v25075_v15 = vand.u32 4294901760, %v22713_v45 }
 0x634   :  { %2647 = vrot.lane.b32.xlu0 %v2645_v50, %s21376_s23  ;;  %v22718_v50 = vsub.f32 %v22574_v26, %v25372_v8  ;;  %v22738_v26 = vsub.f32 %v22582_v7, %v25376_v43  ;;  %v2796_v7 = vsub.f32 %v22703_v52, %v25076_v19  ;;  %v2808_v8 = vsub.f32 %v22708_v6, %v25074_v25 }
 0x635   :  { %v3480_v37 = vsub.f32 %v22713_v45, %v25075_v15  ;;  %v2814_v43 = vsub.f32 %v22728_v62, %v25093_v36  ;;  %v3486_v25 = vsub.f32 %v22733_v2, %v25096_v53  ;;  %v22779_v53 = vsub.f32 %v22203_v49, %v25379_v5 }
 0x636   :  { %v25081_v11 = vand.u32 4294901760, %v22718_v50  ;;  %v25097_v42 = vand.u32 4294901760, %v22738_v26  ;;  %v2797_v19 = vand.u32 4294901760, %v2796_v7  ;;  %v2809_v61 = vand.u32 4294901760, %v2808_v8 }
 0x637   :  { %v3481_v60 = vand.u32 4294901760, %v3480_v37  ;;  %v2815_v54 = vand.u32 4294901760, %v2814_v43  ;;  %v3487_v56 = vand.u32 4294901760, %v3486_v25  ;;  %v25100_v5 = vand.u32 4294901760, %v22779_v53 }
 0x638   :  { %v3492_v12 = vsub.f32 %v22718_v50, %v25081_v11  ;;  %v3498_v15 = vsub.f32 %v22738_v26, %v25097_v42  ;;  %v22772_v35 = vpack.c.bf16 %v2809_v61, %v2797_v19  ;;  %v25380_v42 = vand.u32 4294901760, %v22207_v20 }
 0x639   :  { %v22788_v37 = vpack.c.bf16 %v2815_v54, %v2803_v21  ;;  %v25384_v61 = vand.u32 4294901760, %v22584_v1  ;;  %v25459_v30 = vand.u32 4294901760, %v22779_v53 }
 0x63a   :  { %v3493_v11 = vand.u32 4294901760, %v3492_v12  ;;  %v3499_v28 = vand.u32 4294901760, %v3498_v15  ;;  %25377 = vst [vmem:[#allocation76_spill] sm:$0xff] %v22772_v35  ;;  %v22784_v7 = vsub.f32 %v22207_v20, %v25380_v42  ;;  %18593 = vmatprep.subr.bf16.mxu1 %v22772_v35  ;;  %v25385_v20 = vand.u32 4294901760, %v22586_v3 }
 0x63b   :  { %25382 = vst [vmem:[#allocation79_spill] sm:$0xff] %v22788_v37  ;;  %18595 = vmatpush1.bf16.msra.mxu1 %v22788_v37 }
 0x63c   :  { %v22774_v36 = vpack.c.bf16 %v3493_v11, %v3481_v60  ;;  %v22790_v25 = vpack.c.bf16 %v3499_v28, %v3487_v56  ;;  %v22795_v60 = vsub.f32 %v22584_v1, %v25384_v61  ;;  %v25099_v49 = vand.u32 4294901760, %v22784_v7  ;;  %v25386_v56 = vld [vmem:[#allocation19_spill] sm:$0xff]  ;;  %v25388_v1 = vld [vmem:[#allocation20_spill] sm:$0xff] }
 0x63d   :  { %v25387_v54 = vand.u32 4294901760, %v25386_v56  ;;  %v25389_v19 = vand.u32 4294901760, %v25388_v1  ;;  %v2820_v28 = vsub.f32 %v22779_v53, %v25100_v5  ;;  %v25460_v58 = vand.u32 4294901760, %v22784_v7 }
 0x63e   :  { %25378 = vst [vmem:[#allocation77_spill] sm:$0xff] %v22774_v36  ;;  %25383 = vst [vmem:[#allocation80_spill] sm:$0xff] %v22790_v25  ;;  %18689 = vmatprep.subr.bf16.mxu0 %v22774_v36  ;;  %v2832_v42 = vsub.f32 %v22784_v7, %v25099_v49  ;;  %v25395_v36 = vld [vmem:[#allocation27_spill] sm:$0xff] }
 0x63f   :  { %v22809_v21 = vsub.f32 %v25386_v56, %v25387_v54  ;;  %18691 = vmatpush1.bf16.msra.mxu0 %v22790_v25  ;;  %v22818_v15 = vsub.f32 %v25388_v1, %v25389_v19  ;;  %v2821_v54 = vand.u32 4294901760, %v2820_v28  ;;  %v25396_v37 = vand.u32 4294901760, %v25395_v36 }
 0x640   :  { %v2833_v1 = vand.u32 4294901760, %v2832_v42 }
 0x641   :  { %v25105_v32 = vand.u32 4294901760, %v22809_v21  ;;  %v25106_v61 = vand.u32 4294901760, %v22818_v15 }
 0x642   :  { %v22856_v42 = vpack.c.bf16 %v2833_v1, %v2821_v54 }
 0x643   :  { %v2838_v49 = vsub.f32 %v22818_v15, %v25106_v61 }
 0x644   :  { %25392 = vst [vmem:[#allocation19_spill] sm:$0xff] %v22856_v42  ;;  %18597 = vmatprep.subr.bf16.mxu1 %v22856_v42  ;;  %v25410_v42 = vld [vmem:[#allocation34_spill] sm:$0xff] }
 0x6a6   :  { %v2648_v46 = vpop.permute.xlu0 %2647 }
 0x6a7   :  { %v22786_v8 = vadd.f32 %v2648_v46, %v2640_v29  ;;  %v22804_v29 = vsub.f32 %v22586_v3, %v25385_v20  ;;  %v25098_v46 = vand.u32 4294901760, %v22795_v60  ;;  %v25390_v3 = vand.u32 4294901760, %v22600_v59 }
 0x6a8   :  { %v25391_v20 = vand.u32 4294901760, %v22602_v0 }
 0x6a9   :  { %25381 = vst [vmem:[#allocation78_spill] sm:$0xff] %v22786_v8  ;;  %21099 = vtanh.f32 %v22786_v8  ;;  %v22823_v11 = vsub.f32 %v22600_v59, %v25390_v3  ;;  %v25101_v12 = vand.u32 4294901760, %v22804_v29  ;;  %v3504_v43 = vsub.f32 %v22795_v60, %v25098_v46 }
 0x6aa   :  { %v22841_v56 = vsub.f32 %v22602_v0, %v25391_v20  ;;  %v2826_v3 = vsub.f32 %v22809_v21, %v25105_v32 }
 0x6ab   :  { %v25111_v59 = vand.u32 4294901760, %v22823_v11  ;;  %v3516_v19 = vsub.f32 %v22804_v29, %v25101_v12  ;;  %v3505_v46 = vand.u32 4294901760, %v3504_v43  ;;  %v25393_v12 = vld [vmem:[#allocation25_spill] sm:$0xff]  ;;  %v2839_v43 = vand.u32 4294901760, %v2838_v49 }
 0x6ac   :  { %v25113_v28 = vand.u32 4294901760, %v22841_v56  ;;  %v2827_v5 = vand.u32 4294901760, %v2826_v3  ;;  %v25394_v25 = vand.u32 4294901760, %v25393_v12 }
 0x6ad   :  { %v3510_v0 = vsub.f32 %v22823_v11, %v25111_v59  ;;  %v3517_v20 = vand.u32 4294901760, %v3516_v19  ;;  %v22869_v59 = vsub.f32 %v25395_v36, %v25396_v37 }
 0x6ae   :  { %v22861_v8 = vsub.f32 %v25393_v12, %v25394_v25  ;;  %v3522_v61 = vsub.f32 %v22841_v56, %v25113_v28  ;;  %v25398_v25 = vand.u32 4294901760, %v22604_v18  ;;  %v25399_v12 = vand.u32 4294901760, %v22606_v22 }
 0x6af   :  { %v3511_v32 = vand.u32 4294901760, %v3510_v0  ;;  %v22872_v54 = vpack.c.bf16 %v3517_v20, %v3505_v46  ;;  %v22885_v3 = vpack.c.bf16 %v2839_v43, %v2827_v5  ;;  %v25114_v37 = vand.u32 4294901760, %v22869_v59  ;;  %v25401_v0 = vld [vmem:[#allocation28_spill] sm:$0xff]  ;;  %v25403_v5 = vld [vmem:[#allocation29_spill] sm:$0xff] }
 0x6b0   :  { %v25112_v1 = vand.u32 4294901760, %v22861_v8  ;;  %v22878_v49 = vsub.f32 %v22604_v18, %v25398_v25  ;;  %v22883_v19 = vsub.f32 %v22606_v22, %v25399_v12  ;;  %v3523_v36 = vand.u32 4294901760, %v3522_v61 }
 0x6b1   :  { %25397 = vst [vmem:[#allocation20_spill] sm:$0xff] %v22872_v54  ;;  %25400 = vst [vmem:[#allocation25_spill] sm:$0xff] %v22885_v3  ;;  %v25402_v46 = vand.u32 4294901760, %v25401_v0  ;;  %18693 = vmatprep.subr.bf16.mxu0 %v22872_v54  ;;  %v25404_v43 = vand.u32 4294901760, %v25403_v5  ;;  %18599 = vmatpush1.bf16.msra.mxu1 %v22885_v3  ;;  %v25406_v28 = vand.u32 4294901760, %v22626_v34 }
 0x6b2   :  { %v2844_v18 = vsub.f32 %v22861_v8, %v25112_v1  ;;  %v25117_v25 = vand.u32 4294901760, %v22878_v49 }
 0x6b3   :  { %v22891_v20 = vsub.f32 %v25401_v0, %v25402_v46  ;;  %v22902_v61 = vsub.f32 %v25403_v5, %v25404_v43  ;;  %v21100_v12 = vpop.eup %21099  ;;  %v22905_v0 = vpack.c.bf16 %v3523_v36, %v3511_v32  ;;  %v2856_v46 = vsub.f32 %v22869_v59, %v25114_v37 }
 0x6b4   :  { %v22914_v22 = vsub.f32 %v22626_v34, %v25406_v28  ;;  %2653 = vrot.lane.b32.xlu1 %v21100_v12, %s21376_s23  ;;  %v2845_v5 = vand.u32 4294901760, %v2844_v18  ;;  %v3528_v43 = vsub.f32 %v22878_v49, %v25117_v25  ;;  %v25407_v32 = vand.u32 4294901760, %v22883_v19 }
 0x6b5   :  { %25405 = vst [vmem:[#allocation27_spill] sm:$0xff] %v22905_v0  ;;  %v25128_v37 = vand.u32 4294901760, %v22902_v61  ;;  %18695 = vmatpush1.bf16.msra.mxu0 %v22905_v0  ;;  %v2857_v1 = vand.u32 4294901760, %v2856_v46  ;;  %v25408_v54 = vand.u32 4294901760, %v22891_v20  ;;  %v25409_v18 = vand.u32 4294901760, %v22628_v14 }
 0x6b6   :  { %v3540_v36 = vsub.f32 %v22883_v19, %v25407_v32  ;;  %v25134_v28 = vand.u32 4294901760, %v22914_v22  ;;  %v3529_v25 = vand.u32 4294901760, %v3528_v43  ;;  %v25411_v0 = vand.u32 4294901760, %v25410_v42 }
 0x6b7   :  { %v2850_v34 = vsub.f32 %v22891_v20, %v25408_v54  ;;  %v22932_v12 = vsub.f32 %v22628_v14, %v25409_v18  ;;  %v2862_v32 = vsub.f32 %v22902_v61, %v25128_v37  ;;  %v22942_v35 = vpack.c.bf16 %v2857_v1, %v2845_v5  ;;  %v25414_v37 = vld [vmem:[#allocation35_spill] sm:$0xff] }
 0x6b8   :  { %v3541_v3 = vand.u32 4294901760, %v3540_v36  ;;  %v22940_v46 = vsub.f32 %v25410_v42, %v25411_v0  ;;  %v3534_v24 = vsub.f32 %v22914_v22, %v25134_v28  ;;  %v25415_v51 = vand.u32 4294901760, %v25414_v37 }
 0x6b9   :  { %25412 = vst [vmem:[#allocation28_spill] sm:$0xff] %v22942_v35  ;;  %v2851_v54 = vand.u32 4294901760, %v2850_v34  ;;  %v25133_v14 = vand.u32 4294901760, %v22932_v12  ;;  %v2863_v36 = vand.u32 4294901760, %v2862_v32  ;;  %18601 = vmatprep.subr.bf16.mxu1 %v22942_v35  ;;  %v25416_v0 = vand.u32 4294901760, %v22630_v33  ;;  %v25419_v34 = vld [vmem:[#allocation36_spill] sm:$0xff] }
 0x6ba   :  { %v22948_v43 = vpack.c.bf16 %v3541_v3, %v3529_v25  ;;  %v25135_v18 = vand.u32 4294901760, %v22940_v46  ;;  %v22954_v31 = vsub.f32 %v25414_v37, %v25415_v51  ;;  %v3535_v42 = vand.u32 4294901760, %v3534_v24 }
 0x6bb   :  { %v3546_v1 = vsub.f32 %v22932_v12, %v25133_v14  ;;  %v22963_v3 = vsub.f32 %v22630_v33, %v25416_v0  ;;  %v25417_v25 = vand.u32 4294901760, %v22632_v13  ;;  %v22971_v51 = vpack.c.bf16 %v2863_v36, %v2851_v54 }
 0x6bc   :  { %25413 = vst [vmem:[#allocation29_spill] sm:$0xff] %v22948_v43  ;;  %18697 = vmatprep.subr.bf16.mxu0 %v22948_v43  ;;  %v2868_v24 = vsub.f32 %v22940_v46, %v25135_v18  ;;  %v25140_v37 = vand.u32 4294901760, %v22954_v31  ;;  %v25420_v32 = vand.u32 4294901760, %v25419_v34 }
 0x6bd   :  { %v22968_v5 = vsub.f32 %v22632_v13, %v25417_v25  ;;  %25418 = vst [vmem:[#allocation34_spill] sm:$0xff] %v22971_v51  ;;  %v3547_v0 = vand.u32 4294901760, %v3546_v1  ;;  %v25421_v25 = vld [vmem:[#allocation37_spill] sm:$0xff]  ;;  %18603 = vmatpush1.bf16.msra.mxu1 %v22971_v51  ;;  %v25423_v1 = vand.u32 4294901760, %v22654_v48  ;;  %v25425_v13 = vand.u32 4294901760, %v22963_v3 }
 0x6be   :  { %v22980_v33 = vsub.f32 %v25419_v34, %v25420_v32  ;;  %v25422_v28 = vand.u32 4294901760, %v25421_v25  ;;  %v2869_v36 = vand.u32 4294901760, %v2868_v24  ;;  %v2880_v18 = vsub.f32 %v22954_v31, %v25140_v37 }
 0x6bf   :  { %v3556_v32 = vsub.f32 %v22654_v48, %v25423_v1  ;;  %v22997_v14 = vpack.c.bf16 %v3547_v0, %v3535_v42  ;;  %v3568_v48 = vsub.f32 %v22656_v40, %v25427_v16  ;;  %v23014_v1 = vpack.c.bf16 %v22708_v6, %v22703_v52 }
 0x6c0   :  { %v22987_v54 = vsub.f32 %v25421_v25, %v25422_v28  ;;  %v2873_v34 = vand.u32 4294901760, %v22980_v33  ;;  %v3552_v28 = vsub.f32 %v22963_v3, %v25425_v13  ;;  %v25426_v25 = vand.u32 4294901760, %v22968_v5 }
 0x6c1   :  { %25424 = vst [vmem:[#allocation35_spill] sm:$0xff] %v22997_v14  ;;  %v2881_v51 = vand.u32 4294901760, %v2880_v18  ;;  %v3557_v35 = vand.u32 4294901760, %v3556_v32  ;;  %18699 = vmatpush1.bf16.msra.mxu0 %v22997_v14  ;;  %25428 = vst [vmem:[#allocation36_spill] sm:$0xff] %v23014_v1  ;;  %v3569_v38 = vand.u32 4294901760, %v3568_v48  ;;  %v23022_v16 = vpack.c.bf16 %v22718_v50, %v22713_v45 }
 0x6c2   :  { %v3564_v24 = vsub.f32 %v22968_v5, %v25426_v25  ;;  %v2885_v43 = vand.u32 4294901760, %v22987_v54  ;;  %v2874_v37 = vsub.f32 %v22980_v33, %v2873_v34  ;;  %v3553_v42 = vand.u32 4294901760, %v3552_v28 }
 0x6c3   :  { %v23016_v25 = vpack.c.bf16 %v2881_v51, %v2869_v36  ;;  %v3558_v41 = vsub.f32 %v3556_v32, %v3557_v35  ;;  %25431 = vst [vmem:[#allocation82_spill] sm:$0xff] %v23022_v16  ;;  %v23026_v40 = vpack.c.bf16 %v22728_v62, %v22723_v57  ;;  %v23031_v51 = vpack.c.bf16 %v22738_v26, %v22733_v2 }
 0x6c4   :  { %v3565_v0 = vand.u32 4294901760, %v3564_v24  ;;  %v2886_v13 = vsub.f32 %v22987_v54, %v2885_v43  ;;  %v2875_v18 = vand.u32 4294901760, %v2874_v37  ;;  %v3570_v24 = vsub.f32 %v3568_v48, %v3569_v38 }
 0x6c5   :  { %25429 = vst [vmem:[#allocation37_spill] sm:$0xff] %v23016_v25  ;;  %18605 = vmatprep.subr.bf16.mxu1 %v23016_v25  ;;  %v3559_v28 = vand.u32 4294901760, %v3558_v41  ;;  %25432 = vst [vmem:[#allocation83_spill] sm:$0xff] %v23031_v51  ;;  %v23035_v37 = vpack.c.bf16 %v22784_v7, %v22779_v53  ;;  %v23046_v41 = vpack.c.bf16 %v22818_v15, %v22809_v21  ;;  %v25457_v52 = vand.u32 4294901760, %v22738_v26 }
 0x6c6   :  { %v23018_v10 = vpack.c.bf16 %v3565_v0, %v3553_v42  ;;  %v2887_v39 = vand.u32 4294901760, %v2886_v13  ;;  %v23042_v42 = vpack.c.bf16 %v22804_v29, %v22795_v60  ;;  %v23050_v0 = vpack.c.bf16 %v22841_v56, %v22823_v11 }
 0x6c7   :  { %25433 = vst [vmem:[#allocation84_spill] sm:$0xff] %v23035_v37  ;;  %25436 = vst [vmem:[#allocation87_spill] sm:$0xff] %v23046_v41  ;;  %v3571_v13 = vand.u32 4294901760, %v3570_v24  ;;  %v23054_v14 = vpack.c.bf16 %v22869_v59, %v22861_v8  ;;  %v23071_v24 = vpack.c.bf16 %v22954_v31, %v22940_v46  ;;  %v23075_v25 = vpack.c.bf16 %v22968_v5, %v22963_v3 }
 0x6c8   :  { %25430 = vst [vmem:[#allocation81_spill] sm:$0xff] %v23018_v10  ;;  %18701 = vmatprep.subr.bf16.mxu0 %v23018_v10  ;;  %v23038_v36 = vpack.c.bf16 %v2887_v39, %v2875_v18  ;;  %25435 = vst [vmem:[#allocation86_spill] sm:$0xff] %v23042_v42  ;;  %v23058_v39 = vpack.c.bf16 %v22883_v19, %v22878_v49  ;;  %v23062_v18 = vpack.c.bf16 %v22902_v61, %v22891_v20 }
 0x6c9   :  { %25437 = vst [vmem:[#allocation88_spill] sm:$0xff] %v23050_v0  ;;  %25438 = vst [vmem:[#allocation89_spill] sm:$0xff] %v23054_v14  ;;  %v23067_v10 = vpack.c.bf16 %v22932_v12, %v22914_v22  ;;  %v23079_v44 = vpack.c.bf16 %v22987_v54, %v22980_v33  ;;  %v23081_v4 = vpack.c.bf16 %v3571_v13, %v3559_v28  ;;  %v25451_v33 = vand.u32 4294901760, %v22718_v50 }
 0x6ca   :  { %25434 = vst [vmem:[#allocation85_spill] sm:$0xff] %v23038_v36  ;;  %25439 = vst [vmem:[#allocation90_spill] sm:$0xff] %v23058_v39  ;;  %18607 = vmatpush1.bf16.msra.mxu1 %v23038_v36  ;;  %v23084_v36 = vpack.c.bf16 %v3568_v48, %v3556_v32  ;;  %v25453_v28 = vand.u32 4294901760, %v22723_v57  ;;  %v25454_v32 = vand.u32 4294901760, %v22728_v62  ;;  %v25456_v13 = vand.u32 4294901760, %v22733_v2 }
 0x6cb   :  { %25440 = vst [vmem:[#allocation91_spill] sm:$0xff] %v23062_v18  ;;  %25441 = vst [vmem:[#allocation92_spill] sm:$0xff] %v23067_v10  ;;  %18609 = vmatprep.subr.bf16.mxu1 %v23014_v1  ;;  %18703 = vmatpush1.bf16.msra.mxu0 %v23081_v4  ;;  %v23098_v54 = vpack.c.bf16 %v25451_v33, %v25450_v9  ;;  %v23116_v6 = vpack.c.bf16 %v25460_v58, %v25459_v30  ;;  %v25462_v9 = vand.u32 4294901760, %v22795_v60 }
 0x6cc   :  { %25442 = vst [vmem:[#allocation93_spill] sm:$0xff] %v23071_v24  ;;  %25443 = vst [vmem:[#allocation94_spill] sm:$0xff] %v23075_v25  ;;  %18705 = vmatprep.subr.bf16.mxu0 %v23022_v16  ;;  %v23104_v48 = vpack.c.bf16 %v25454_v32, %v25453_v28  ;;  %v23110_v16 = vpack.c.bf16 %v25457_v52, %v25456_v13  ;;  %v25463_v45 = vand.u32 4294901760, %v22804_v29  ;;  %v25465_v57 = vand.u32 4294901760, %v22809_v21 }
 0x6cd   :  { %25444 = vst [vmem:[#allocation95_spill] sm:$0xff] %v23079_v44  ;;  %25445 = vst [vmem:[#allocation96_spill] sm:$0xff] %v23081_v4  ;;  %v25466_v62 = vand.u32 4294901760, %v22818_v15  ;;  %v25468_v26 = vand.u32 4294901760, %v22823_v11  ;;  %v25469_v53 = vand.u32 4294901760, %v22841_v56  ;;  %v25471_v7 = vand.u32 4294901760, %v22861_v8 }
 0x6ce   :  { %25446 = vst [vmem:[#allocation97_spill] sm:$0xff] %v23084_v36  ;;  %25452 = vst [vmem:[#allocation99_spill] sm:$0xff] %v23098_v54  ;;  %v23122_v50 = vpack.c.bf16 %v25463_v45, %v25462_v9  ;;  %v25472_v60 = vand.u32 4294901760, %v22869_v59  ;;  %v25474_v29 = vand.u32 4294901760, %v22878_v49  ;;  %v25475_v21 = vand.u32 4294901760, %v22883_v19 }
 0x6cf   :  { %25455 = vst [vmem:[#allocation100_spill] sm:$0xff] %v23104_v48  ;;  %25458 = vst [vmem:[#allocation101_spill] sm:$0xff] %v23110_v16  ;;  %v23128_v2 = vpack.c.bf16 %v25466_v62, %v25465_v57  ;;  %v23134_v33 = vpack.c.bf16 %v25469_v53, %v25468_v26  ;;  %v25477_v15 = vand.u32 4294901760, %v22891_v20  ;;  %v25478_v11 = vand.u32 4294901760, %v22902_v61  ;;  %v25494_v53 = vld [vmem:[#allocation24_spill] sm:$0xff] }
 0x6d0   :  { %25461 = vst [vmem:[#allocation102_spill] sm:$0xff] %v23116_v6  ;;  %25464 = vst [vmem:[#allocation103_spill] sm:$0xff] %v23122_v50  ;;  %v23140_v28 = vpack.c.bf16 %v25472_v60, %v25471_v7  ;;  %v23146_v32 = vpack.c.bf16 %v25475_v21, %v25474_v29  ;;  %v25480_v56 = vand.u32 4294901760, %v22914_v22  ;;  %v25481_v8 = vand.u32 4294901760, %v22932_v12  ;;  %v25495_v7 = vld [vmem:[#allocation68_spill] sm:$0xff]  ;;  %v25496_v60 = vld [vmem:[#allocation26_spill] sm:$0xff] }
 0x6d1   :  { %25467 = vst [vmem:[#allocation104_spill] sm:$0xff] %v23128_v2  ;;  %25470 = vst [vmem:[#allocation105_spill] sm:$0xff] %v23134_v33  ;;  %v23152_v13 = vpack.c.bf16 %v25478_v11, %v25477_v15  ;;  %v25483_v59 = vand.u32 4294901760, %v22940_v46  ;;  %v25484_v49 = vand.u32 4294901760, %v22954_v31  ;;  %v25486_v19 = vand.u32 4294901760, %v22963_v3  ;;  %v25497_v29 = vld [vmem:[#allocation69_spill] sm:$0xff] }
 0x6d2   :  { %25473 = vst [vmem:[#allocation106_spill] sm:$0xff] %v23140_v28  ;;  %25476 = vst [vmem:[#allocation107_spill] sm:$0xff] %v23146_v32  ;;  %v23158_v52 = vpack.c.bf16 %v25481_v8, %v25480_v56  ;;  %v25487_v20 = vand.u32 4294901760, %v22968_v5  ;;  %v23172_v61 = vpack.c.bf16 %v2885_v43, %v2873_v34  ;;  %v23174_v9 = vpack.c.bf16 %v3569_v38, %v3557_v35  ;;  %v25492_v43 = vld [vmem:[#allocation18_spill] sm:$0xff]  ;;  %v25493_v34 = vld [vmem:[#allocation67_spill] sm:$0xff] }
 0x6d3   :  { %25479 = vst [vmem:[#allocation108_spill] sm:$0xff] %v23152_v13  ;;  %v23164_v30 = vpack.c.bf16 %v25484_v49, %v25483_v59  ;;  %v17872_v22 = vmul.f32 -1.442695, %v22690_v47  ;;  %v25491_v47 = vld [vmem:[#allocation17_spill] sm:$0xff]  ;;  %v25498_v21 = vld [vmem:[#allocation32_spill] sm:$0xff]  ;;  %v25501_v11 = vld [vmem:[#allocation71_spill] sm:$0xff] }
 0x6d4   :  { %25482 = vst [vmem:[#allocation109_spill] sm:$0xff] %v23158_v52  ;;  %v23170_v58 = vpack.c.bf16 %v25487_v20, %v25486_v19  ;;  %25489 = vst [vmem:[#allocation112_spill] sm:$0xff] %v23172_v61  ;;  %v25500_v15 = vld [vmem:[#allocation33_spill] sm:$0xff]  ;;  %v25502_v56 = vld [vmem:[#allocation40_spill] sm:$0xff] }
 0x6d5   :  { %25485 = vst [vmem:[#allocation110_spill] sm:$0xff] %v23164_v30  ;;  %25490 = vst [vmem:[#allocation113_spill] sm:$0xff] %v23174_v9  ;;  %21101 = vpow2.f32 %v17872_v22  ;;  %v25503_v8 = vld [vmem:[#allocation72_spill] sm:$0xff]  ;;  %v25504_v59 = vld [vmem:[#allocation41_spill] sm:$0xff] }
 0x6d6   :  { %25488 = vst [vmem:[#allocation111_spill] sm:$0xff] %v23170_v58  ;;  %v25505_v49 = vld [vmem:[#allocation73_spill] sm:$0xff]  ;;  %v25506_v19 = vld [vmem:[#allocation63_spill] sm:$0xff]  ;;  %v25508_v22 = vld [vmem:[#allocation16_spill] sm:$0xff] }
 0x6d7   :  { %v25507_v20 = vld [vmem:[#allocation15_spill] sm:$0xff] }
 0x6df   :  { %v21102_v12 = vpop.eup %21101 }
 0x6e0   :  { %v2634_v45 = vadd.f32 1.0, %v21102_v12  ;;  %v25509_v12 = vld [vmem:[#allocation22_spill] sm:$0xff] }
 0x6e2   :  { %21103 = vrcp.f32 %v2634_v45  ;;  %v25511_v45 = vld [vmem:[#allocation30_spill] sm:$0xff] }
 0x6ec   :  { %v21104_v46 = vpop.eup %21103 }
 0x726   :  { %v2654_v31 = vpop.permute.xlu1 %2653 }
 0x727   :  { %v2656_v57 = vmul.f32 %v21104_v46, %v2654_v31  ;;  %v25512_v46 = vld [vmem:[#allocation31_spill] sm:$0xff]  ;;  %v25513_v31 = vld [vmem:[#allocation38_spill] sm:$0xff] }
 0x729   :  { %v2690_v62 = vsel %vm117_vm0, %v2656_v57, 0  ;;  %v25514_v57 = vld [vmem:[#allocation39_spill] sm:$0xff] }
 0x72a   :  { %v23178_v3 = vand.u32 4294901760, %v2690_v62 }
 0x72c   :  { %v2785_v5 = vsub.f32 %v2690_v62, %v23178_v3  ;;  %v25515_v62 = vld [vmem:[#allocation42_spill] sm:$0xff] }
 0x72e   :  { %v23181_v26 = vand.u32 4294901760, %v2785_v5 }
 0x730   :  { %v2787_v38 = vsub.f32 %v2785_v5, %v23181_v26 }
 0x732   :  { %v2788_v35 = vand.u32 4294901760, %v2787_v38 }
 0x734   :  { %2789 = vmatmul.mubr.f32.gmra.mrb[16].mxu1 %v2788_v35  ;;  %3471 = vmatmul.mubr.f32.gmra.mrb[12].mxu0 %v2788_v35 }
 0x735   :  { %2937 = vmatprep.mubr.f32.mxu1 %v25351_v63  ;;  %3621 = vmatprep.mubr.f32.mxu0 %v25351_v63 }
 0x738   :  { %2939 = vmatmul.mubr.f32.vlgmr.msra.gmra.mrb[2].mxu1 %v22508_v27  ;;  %3623 = vmatmul.mubr.f32.vlgmr.msra.gmra.mrb[14].mxu0 %v22508_v27 }
 0x739   :  { %18611 = vmatpush1.bf16.msra.mxu1 %v23026_v40  ;;  %18707 = vmatpush1.bf16.msra.mxu0 %v23031_v51 }
 0x73a   :  { %2944 = vmatprep.mubr.f32.mxu1 %v25351_v63  ;;  %18613 = vmatprep.subr.bf16.mxu1 %v23035_v37 }
 0x73b   :  { %3626 = vmatprep.mubr.f32.mxu0 %v25351_v63  ;;  %18709 = vmatprep.subr.bf16.mxu0 %v23042_v42 }
 0x73c   :  { %2946 = vmatmul.mubr.f32.gmra.mrb[18].mxu1 %v23178_v3  ;;  %3628 = vmatmul.mubr.f32.gmra.mrb[12].mxu0 %v23178_v3 }
 0x73d   :  { %18615 = vmatpush1.bf16.msra.mxu1 %v23046_v41  ;;  %18711 = vmatpush1.bf16.msra.mxu0 %v23050_v0 }
 0x73e   :  { %18617 = vmatprep.subr.bf16.mxu1 %v23054_v14  ;;  %18713 = vmatprep.subr.bf16.mxu0 %v23058_v39 }
 0x73f   :  { %3046 = vmatprep.mubr.f32.mxu1 %v25351_v63  ;;  %3730 = vmatprep.mubr.f32.mxu0 %v25351_v63 }
 0x741   :  { %18619 = vmatpush1.bf16.msra.mxu1 %v23062_v18  ;;  %18715 = vmatpush1.bf16.msra.mxu0 %v23067_v10 }
 0x742   :  { %18621 = vmatprep.subr.bf16.mxu1 %v23071_v24  ;;  %18717 = vmatprep.subr.bf16.mxu0 %v23075_v25 }
 0x745   :  { %18623 = vmatpush1.bf16.msra.mxu1 %v23079_v44  ;;  %18719 = vmatpush1.bf16.msra.mxu0 %v23084_v36 }
 0x746   :  { %18625 = vmatprep.subr.bf16.mxu1 %v25491_v47  ;;  %18721 = vmatprep.subr.bf16.mxu0 %v22596_v55 }
 0x748   :  { %3049 = vmatmul.mubr.f32.vlgmr.msra.gmra.mrb[2].mxu1 %v22511_v23  ;;  %3733 = vmatmul.mubr.f32.vlgmr.msra.gmra.mrb[16].mxu0 %v22511_v23  ;;  %v25499_v23 = vld [vmem:[#allocation70_spill] sm:$0xff] }
 0x749   :  { %18627 = vmatpush1.bf16.msra.mxu1 %v25492_v43  ;;  %18723 = vmatpush1.bf16.msra.mxu0 %v25493_v34 }
 0x74a   :  { %3054 = vmatprep.mubr.f32.mxu1 %v25351_v63  ;;  %3736 = vmatprep.mubr.f32.mxu0 %v25351_v63 }
 0x74b   :  { %18629 = vmatprep.subr.bf16.mxu1 %v25494_v53  ;;  %18725 = vmatprep.subr.bf16.mxu0 %v25495_v7 }
 0x74c   :  { %3057 = vmatmul.mubr.f32.gmra.mrb[20].mxu1 %v2785_v5  ;;  %3739 = vmatmul.mubr.f32.gmra.mrb[12].mxu0 %v2785_v5 }
 0x74d   :  { %18631 = vmatpush1.bf16.msra.mxu1 %v25496_v60  ;;  %18727 = vmatpush1.bf16.msra.mxu0 %v25497_v29 }
 0x74e   :  { %18633 = vmatprep.subr.bf16.mxu1 %v25498_v21  ;;  %18729 = vmatprep.subr.bf16.mxu0 %v25499_v23 }
 0x74f   :  { %3141 = vmatprep.mubr.f32.mxu1 %v25351_v63  ;;  %3825 = vmatprep.mubr.f32.mxu0 %v25351_v63 }
 0x751   :  { %18635 = vmatpush1.bf16.msra.mxu1 %v25500_v15  ;;  %18731 = vmatpush1.bf16.msra.mxu0 %v25501_v11 }
 0x752   :  { %18637 = vmatprep.subr.bf16.mxu1 %v25502_v56  ;;  %18733 = vmatprep.subr.bf16.mxu0 %v25503_v8 }
 0x755   :  { %18639 = vmatpush1.bf16.msra.mxu1 %v25504_v59  ;;  %18735 = vmatpush1.bf16.msra.mxu0 %v25505_v49 }
 0x756   :  { %18641 = vmatprep.subr.bf16.mxu1 %v23092_v17  ;;  %18737 = vmatprep.subr.bf16.mxu0 %v23098_v54 }
 0x758   :  { %3145 = vmatmul.mubr.f32.vlgmr.msra.gmra.mrb[2].mxu1 %v25506_v19  ;;  %3829 = vmatmul.mubr.f32.vlgmr.msra.gmra.mrb[18].mxu0 %v25506_v19 }
 0x759   :  { %18643 = vmatpush1.bf16.msra.mxu1 %v23104_v48  ;;  %18739 = vmatpush1.bf16.msra.mxu0 %v23110_v16 }
 0x75a   :  { %3150 = vmatprep.mubr.f32.mxu1 %v25351_v63  ;;  %3832 = vmatprep.mubr.f32.mxu0 %v25351_v63 }
 0x75b   :  { %18645 = vmatprep.subr.bf16.mxu1 %v23116_v6  ;;  %18741 = vmatprep.subr.bf16.mxu0 %v23122_v50 }
 0x75c   :  { %3154 = vmatmul.mubr.f32.gmra.mrb[22].mxu1 %v23181_v26  ;;  %3836 = vmatmul.mubr.f32.gmra.mrb[12].mxu0 %v23181_v26 }
 0x75d   :  { %18647 = vmatpush1.bf16.msra.mxu1 %v23128_v2  ;;  %18743 = vmatpush1.bf16.msra.mxu0 %v23134_v33 }
 0x75e   :  { %18649 = vmatprep.subr.bf16.mxu1 %v23140_v28  ;;  %18745 = vmatprep.subr.bf16.mxu0 %v23146_v32 }
 0x75f   :  { %3270 = vmatprep.mubr.f32.mxu1 %v25351_v63  ;;  %3954 = vmatprep.mubr.f32.mxu0 %v25351_v63 }
 0x761   :  { %18651 = vmatpush1.bf16.msra.mxu1 %v23152_v13  ;;  %18747 = vmatpush1.bf16.msra.mxu0 %v23158_v52 }
 0x762   :  { %18653 = vmatprep.subr.bf16.mxu1 %v23164_v30  ;;  %18749 = vmatprep.subr.bf16.mxu0 %v23170_v58 }
 0x765   :  { %18655 = vmatpush1.bf16.msra.mxu1 %v23172_v61  ;;  %18751 = vmatpush1.bf16.msra.mxu0 %v23174_v9 }
 0x766   :  { %18657 = vmatprep.subr.bf16.mxu1 %v25491_v47  ;;  %18753 = vmatprep.subr.bf16.mxu0 %v22596_v55 }
 0x768   :  { %3272 = vmatmul.mubr.f32.vlgmr.msra.gmra.mrb[2].mxu1 %v22508_v27  ;;  %3956 = vmatmul.mubr.f32.vlgmr.msra.gmra.mrb[20].mxu0 %v22508_v27 }
 0x769   :  { %18659 = vmatpush1.bf16.msra.mxu1 %v25492_v43  ;;  %18755 = vmatpush1.bf16.msra.mxu0 %v25493_v34 }
 0x76a   :  { %3277 = vmatprep.mubr.f32.mxu1 %v25351_v63  ;;  %3959 = vmatprep.mubr.f32.mxu0 %v25351_v63 }
 0x76b   :  { %18661 = vmatprep.subr.bf16.mxu1 %v25494_v53  ;;  %18757 = vmatprep.subr.bf16.mxu0 %v25495_v7 }
 0x76c   :  { %3279 = vmatmul.mubr.f32.gmra.mrb[24].mxu1 %v23178_v3  ;;  %3961 = vmatmul.mubr.f32.gmra.mrb[12].mxu0 %v23178_v3 }
 0x76d   :  { %18663 = vmatpush1.bf16.msra.mxu1 %v25496_v60  ;;  %18759 = vmatpush1.bf16.msra.mxu0 %v25497_v29 }
 0x76e   :  { %18665 = vmatprep.subr.bf16.mxu1 %v25498_v21  ;;  %18761 = vmatprep.subr.bf16.mxu0 %v25499_v23 }
 0x76f   :  { %3363 = vmatprep.mubr.f32.mxu1 %v25351_v63  ;;  %4047 = vmatprep.mubr.f32.mxu0 %v25351_v63 }
 0x771   :  { %18667 = vmatpush1.bf16.msra.mxu1 %v25500_v15  ;;  %18763 = vmatpush1.bf16.msra.mxu0 %v25501_v11 }
 0x772   :  { %18669 = vmatprep.subr.bf16.mxu1 %v25502_v56  ;;  %18765 = vmatprep.subr.bf16.mxu0 %v25503_v8 }
 0x775   :  { %18671 = vmatpush1.bf16.msra.mxu1 %v25504_v59  ;;  %18767 = vmatpush1.bf16.msra.mxu0 %v25505_v49 }
 0x776   :  { %18769 = vmatprep.subr.bf16.mxu0 %v25507_v20  ;;  %18865 = vmatprep.subr.bf16.mxu1 %v25491_v47 }
 0x778   :  { %3365 = vmatmul.mubr.f32.vlgmr.msra.gmra.mrb[2].mxu1 %v22508_v27  ;;  %4049 = vmatmul.mubr.f32.vlgmr.msra.gmra.mrb[22].mxu0 %v22508_v27  ;;  %v25510_v27 = vld [vmem:[#allocation23_spill] sm:$0xff] }
 0x779   :  { %3370 = vmatprep.mubr.f32.mxu1 %v25351_v63  ;;  %4052 = vmatprep.mubr.f32.mxu0 %v25351_v63 }
 0x77a   :  { %18771 = vmatpush1.bf16.msra.mxu0 %v25508_v22  ;;  %18867 = vmatpush1.bf16.msra.mxu1 %v25492_v43 }
 0x77b   :  { %18773 = vmatprep.subr.bf16.mxu0 %v25509_v12  ;;  %18869 = vmatprep.subr.bf16.mxu1 %v25494_v53 }
 0x77c   :  { %3372 = vmatmul.mubr.f32.gmra.mrb[26].mxu1 %v23178_v3  ;;  %4054 = vmatmul.mubr.f32.gmra.mrb[12].mxu0 %v23178_v3  ;;  %v25516_v3 = vld [vmem:[#allocation76_spill] sm:$0xff] }
 0x77d   :  { %4175 = vmatprep.mubr.f32.mxu0 %v25351_v63  ;;  %4857 = vmatprep.mubr.f32.mxu1 %v25351_v63 }
 0x77e   :  { %18775 = vmatpush1.bf16.msra.mxu0 %v25510_v27  ;;  %18871 = vmatpush1.bf16.msra.mxu1 %v25496_v60 }
 0x77f   :  { %18777 = vmatprep.subr.bf16.mxu0 %v25511_v45  ;;  %18873 = vmatprep.subr.bf16.mxu1 %v25498_v21 }
 0x782   :  { %18779 = vmatpush1.bf16.msra.mxu0 %v25512_v46  ;;  %18875 = vmatpush1.bf16.msra.mxu1 %v25500_v15 }
 0x783   :  { %18781 = vmatprep.subr.bf16.mxu0 %v25513_v31  ;;  %18877 = vmatprep.subr.bf16.mxu1 %v25502_v56 }
 0x786   :  { %18783 = vmatpush1.bf16.msra.mxu0 %v25514_v57  ;;  %18879 = vmatpush1.bf16.msra.mxu1 %v25504_v59 }
 0x787   :  { %18785 = vmatprep.subr.bf16.mxu0 %v25515_v62  ;;  %18881 = vmatprep.subr.bf16.mxu1 %v25516_v3 }
 0x807   :  { %v2790_v5 = vpop.f32.mrb[16].mxu1 }
 0x808   :  { %v2791_v26 = vpop.f32.mrb[17].mxu1 }
 0x80b   :  { %v3624_v38 = vpop.f32.mrb[14].mxu0 }
 0x80c   :  { %v3625_v35 = vpop.f32.mrb[15].mxu0  ;;  %v25517_v38 = vld [vmem:[#allocation13_spill] sm:$0xff] }
 0x80f   :  { %v2947_v19 = vpop.f32.mrb[18].mxu1 }
 0x810   :  { %v2948_v9 = vpop.f32.mrb[19].mxu1 }
 0x81b   :  { %v3734_v58 = vpop.f32.mrb[16].mxu0 }
 0x81c   :  { %v3735_v52 = vpop.f32.mrb[17].mxu0 }
 0x81f   :  { %v3058_v32 = vpop.f32.mrb[20].mxu1 }
 0x820   :  { %v3059_v33 = vpop.f32.mrb[21].mxu1  ;;  %v25519_v32 = vld [vmem:[#allocation21_spill] sm:$0xff] }
 0x82b   :  { %v3830_v50 = vpop.f32.mrb[18].mxu0 }
 0x82c   :  { %v3831_v16 = vpop.f32.mrb[19].mxu0  ;;  %v25518_v50 = vld [vmem:[#allocation14_spill] sm:$0xff] }
 0x82f   :  { %v3155_v54 = vpop.f32.mrb[22].mxu1 }
 0x830   :  { %v3156_v36 = vpop.f32.mrb[23].mxu1 }
 0x83b   :  { %v3957_v25 = vpop.f32.mrb[20].mxu0 }
 0x83c   :  { %v3958_v10 = vpop.f32.mrb[21].mxu0 }
 0x83f   :  { %v3280_v39 = vpop.f32.mrb[24].mxu1 }
 0x840   :  { %v3281_v62 = vpop.f32.mrb[25].mxu1 }
 0x84b   :  { %v3366_v0 = vpop.f32.mrb[2].mxu1  ;;  %v4050_v3 = vpop.f32.mrb[22].mxu0 }
 0x84c   :  { %v3368_v5 = vpop.f32.mrb[3].mxu1  ;;  %v4051_v26 = vpop.f32.mrb[23].mxu0  ;;  %v20674_v16 = vadd.f32 %v3366_v0, %v25518_v50 }
 0x84d   :  { %v20675_v35 = vadd.f32 %v3368_v5, %v25517_v38 }
 0x84e   :  { %v17873_v54 = vmul.f32 -1.442695, %v20674_v16 }
 0x84f   :  { %21105 = vtanh.f32 %v20675_v35  ;;  %v3373_v9 = vpop.f32.mrb[26].mxu1  ;;  %v17874_v0 = vmul.f32 -1.442695, %v20675_v35 }
 0x850   :  { %v3374_v58 = vpop.f32.mrb[27].mxu1  ;;  %21107 = vpow2.f32 %v17873_v54 }
 0x859   :  { %v21106_v52 = vpop.eup %21105 }
 0x85a   :  { %4077 = vrot.lane.b32.xlu0 %v21106_v52, %s21376_s23  ;;  %v21108_v25 = vpop.eup %21107 }
 0x85b   :  { %v4068_v10 = vadd.f32 1.0, %v21108_v25 }
 0x85d   :  { %21109 = vrcp.f32 %v4068_v10 }
 0x867   :  { %v21110_v36 = vpop.eup %21109 }
 0x868   :  { %v4075_v62 = vmul.f32 %v21110_v36, %v25519_v32  ;;  %v25522_v32 = vld [vmem:[#allocation43_spill] sm:$0xff] }
 0x8cc   :  { %v4078_v39 = vpop.permute.xlu0 %4077 }
 0x8cd   :  { %v4080_v33 = vmul.f32 %v21110_v36, %v4078_v39 }
 0x8cf   :  { %4082 = vrot.lane.b32.xlu1 %v4080_v33, %s21376_s23  ;;  %v25521_v33 = vld [vmem:[#allocation64_spill] sm:$0xff] }
 0x941   :  { %v4083_v3 = vpop.permute.xlu1 %4082 }
 0x942   :  { %v23309_v19 = vadd.f32 %v4083_v3, %v4075_v62  ;;  %v25523_v62 = vld [vmem:[#allocation79_spill] sm:$0xff] }
 0x943   :  { %v25524_v3 = vld [vmem:[#allocation19_spill] sm:$0xff] }
 0x944   :  { %25520 = vst [vmem:[#allocation63_spill] sm:$0xff] %v23309_v19  ;;  %21111 = vtanh.f32 %v23309_v19  ;;  %v25554_v19 = vld [vmem:[#allocation78_spill] sm:$0xff] }
 0x945   :  { %21113 = vpow2.f32 %v17874_v0  ;;  %v25526_v0 = vld [vmem:[#allocation45_spill] sm:$0xff] }
 0x94e   :  { %v21112_v5 = vpop.eup %21111 }
 0x94f   :  { %4088 = vrot.lane.b32.xlu0 %v21112_v5, %s21376_s23  ;;  %v21114_v26 = vpop.eup %21113  ;;  %v25525_v5 = vld [vmem:[#allocation44_spill] sm:$0xff] }
 0x950   :  { %v4069_v9 = vadd.f32 1.0, %v21114_v26  ;;  %v25527_v26 = vld [vmem:[#allocation25_spill] sm:$0xff] }
 0x952   :  { %21115 = vrcp.f32 %v4069_v9  ;;  %v25528_v9 = vld [vmem:[#allocation28_spill] sm:$0xff] }
 0x95c   :  { %v21116_v58 = vpop.eup %21115 }
 0x9c1   :  { %v4089_v52 = vpop.permute.xlu0 %4088 }
 0x9c2   :  { %v4091_v16 = vmul.f32 %v21116_v58, %v4089_v52  ;;  %v25529_v58 = vld [vmem:[#allocation46_spill] sm:$0xff]  ;;  %v25530_v52 = vld [vmem:[#allocation47_spill] sm:$0xff] }
 0x9c4   :  { %v4093_v54 = vsel %vm117_vm0, %v4091_v16, 0  ;;  %v25531_v16 = vld [vmem:[#allocation34_spill] sm:$0xff] }
 0x9c5   :  { %v23314_v25 = vand.u32 4294901760, %v4093_v54 }
 0x9c7   :  { %v23317_v10 = vsub.f32 %v4093_v54, %v23314_v25  ;;  %v25532_v54 = vld [vmem:[#allocation37_spill] sm:$0xff] }
 0x9c9   :  { %v23320_v36 = vand.u32 4294901760, %v23317_v10 }
 0x9cb   :  { %v4179_v35 = vsub.f32 %v23317_v10, %v23320_v36 }
 0x9cd   :  { %v23324_v39 = vand.u32 4294901760, %v4179_v35  ;;  %v25533_v35 = vld [vmem:[#allocation49_spill] sm:$0xff] }
 0x9cf   :  { %4181 = vmatmul.mubr.f32.vlgmr.msra.gmra.mrb[12].mxu0 %v23324_v39  ;;  %4863 = vmatmul.mubr.f32.vlgmr.msra.gmra.mrb[4].mxu1 %v23324_v39 }
 0x9d0   :  { %18787 = vmatpush1.bf16.msra.mxu0 %v25521_v33  ;;  %4331 = vmatprep.mubr.f32.mxu0 %v25351_v63 }
 0x9d1   :  { %18789 = vmatprep.subr.bf16.mxu0 %v25522_v32  ;;  %18883 = vmatpush1.bf16.msra.mxu1 %v25523_v62  ;;  %v25535_v62 = vld [vmem:[#allocation85_spill] sm:$0xff] }
 0x9d2   :  { %18885 = vmatprep.subr.bf16.mxu1 %v25524_v3  ;;  %4868 = vmatprep.mubr.f32.mxu1 %v25351_v63  ;;  %v25534_v3 = vld [vmem:[#allocation48_spill] sm:$0xff] }
 0x9d4   :  { %18791 = vmatpush1.bf16.msra.mxu0 %v25525_v5 }
 0x9d5   :  { %18793 = vmatprep.subr.bf16.mxu0 %v25526_v0  ;;  %18887 = vmatpush1.bf16.msra.mxu1 %v25527_v26  ;;  %v25536_v26 = vld [vmem:[#allocation65_spill] sm:$0xff] }
 0x9d6   :  { %18889 = vmatprep.subr.bf16.mxu1 %v25528_v9  ;;  %v25537_v9 = vld [vmem:[#allocation50_spill] sm:$0xff] }
 0x9d8   :  { %18795 = vmatpush1.bf16.msra.mxu0 %v25529_v58 }
 0x9d9   :  { %18797 = vmatprep.subr.bf16.mxu0 %v25530_v52  ;;  %18891 = vmatpush1.bf16.msra.mxu1 %v25531_v16  ;;  %v25538_v52 = vld [vmem:[#allocation51_spill] sm:$0xff]  ;;  %v25539_v16 = vld [vmem:[#allocation52_spill] sm:$0xff] }
 0x9da   :  { %18893 = vmatprep.subr.bf16.mxu1 %v25532_v54  ;;  %v25540_v54 = vld [vmem:[#allocation53_spill] sm:$0xff] }
 0x9dc   :  { %18799 = vmatpush1.bf16.msra.mxu0 %v25533_v35  ;;  %v25541_v35 = vld [vmem:[#allocation54_spill] sm:$0xff] }
 0x9dd   :  { %18801 = vmatprep.subr.bf16.mxu0 %v25534_v3  ;;  %18895 = vmatpush1.bf16.msra.mxu1 %v25535_v62  ;;  %v25542_v3 = vld [vmem:[#allocation55_spill] sm:$0xff]  ;;  %v25544_v62 = vld [vmem:[#allocation66_spill] sm:$0xff] }
 0x9de   :  { %18897 = vmatprep.subr.bf16.mxu1 %v23014_v1  ;;  %v25543_v1 = vld [vmem:[#allocation56_spill] sm:$0xff] }
 0x9df   :  { %4333 = vmatmul.mubr.f32.vlgmr.msra.gmra.mrb[12].mxu0 %v23314_v25 }
 0x9e0   :  { %18803 = vmatpush1.bf16.msra.mxu0 %v25536_v26  ;;  %4435 = vmatprep.mubr.f32.mxu0 %v25351_v63 }
 0x9e1   :  { %18805 = vmatprep.subr.bf16.mxu0 %v25537_v9  ;;  %v25550_v9 = vld [vmem:[#allocation62_spill] sm:$0xff] }
 0x9e4   :  { %18807 = vmatpush1.bf16.msra.mxu0 %v25538_v52  ;;  %v25549_v52 = vld [vmem:[#allocation61_spill] sm:$0xff] }
 0x9e5   :  { %18809 = vmatprep.subr.bf16.mxu0 %v25539_v16  ;;  %v25548_v16 = vld [vmem:[#allocation60_spill] sm:$0xff] }
 0x9e8   :  { %18811 = vmatpush1.bf16.msra.mxu0 %v25540_v54  ;;  %v25547_v54 = vld [vmem:[#allocation59_spill] sm:$0xff] }
 0x9e9   :  { %18813 = vmatprep.subr.bf16.mxu0 %v25541_v35  ;;  %v25546_v35 = vld [vmem:[#allocation58_spill] sm:$0xff] }
 0x9ec   :  { %18815 = vmatpush1.bf16.msra.mxu0 %v25542_v3  ;;  %v25545_v3 = vld [vmem:[#allocation57_spill] sm:$0xff] }
 0x9ed   :  { %18817 = vmatprep.subr.bf16.mxu0 %v25507_v20 }
 0x9ef   :  { %4438 = vmatmul.mubr.f32.vlgmr.msra.gmra.mrb[12].mxu0 %v23317_v10 }
 0x9f0   :  { %18819 = vmatpush1.bf16.msra.mxu0 %v25508_v22  ;;  %4524 = vmatprep.mubr.f32.mxu0 %v25351_v63 }
 0x9f1   :  { %18821 = vmatprep.subr.bf16.mxu0 %v25509_v12 }
 0x9f4   :  { %18823 = vmatpush1.bf16.msra.mxu0 %v25510_v27 }
 0x9f5   :  { %18825 = vmatprep.subr.bf16.mxu0 %v25511_v45 }
 0x9f8   :  { %18827 = vmatpush1.bf16.msra.mxu0 %v25512_v46 }
 0x9f9   :  { %18829 = vmatprep.subr.bf16.mxu0 %v25513_v31 }
 0x9fc   :  { %18831 = vmatpush1.bf16.msra.mxu0 %v25514_v57 }
 0x9fd   :  { %18833 = vmatprep.subr.bf16.mxu0 %v25543_v1 }
 0x9ff   :  { %4528 = vmatmul.mubr.f32.vlgmr.msra.gmra.mrb[12].mxu0 %v23320_v36 }
 0xa00   :  { %18835 = vmatpush1.bf16.msra.mxu0 %v25544_v62  ;;  %4646 = vmatprep.mubr.f32.mxu0 %v25351_v63  ;;  %v25553_v62 = vld [vmem:[#allocation75_spill] sm:$0xff] }
 0xa01   :  { %18837 = vmatprep.subr.bf16.mxu0 %v25545_v3 }
 0xa04   :  { %18839 = vmatpush1.bf16.msra.mxu0 %v25546_v35 }
 0xa05   :  { %18841 = vmatprep.subr.bf16.mxu0 %v25547_v54  ;;  %v25552_v54 = vld [vmem:[#allocation74_spill] sm:$0xff] }
 0xa08   :  { %18843 = vmatpush1.bf16.msra.mxu0 %v25548_v16 }
 0xa09   :  { %18845 = vmatprep.subr.bf16.mxu0 %v25549_v52 }
 0xa0c   :  { %18847 = vmatpush1.bf16.msra.mxu0 %v25550_v9  ;;  %v25551_v9 = vld [vmem:[#allocation77_spill] sm:$0xff] }
 0xa0d   :  { %18849 = vmatprep.subr.bf16.mxu0 %v25507_v20 }
 0xa0f   :  { %4648 = vmatmul.mubr.f32.vlgmr.msra.gmra.mrb[12].mxu0 %v23314_v25 }
 0xa10   :  { %18851 = vmatpush1.bf16.msra.mxu0 %v25508_v22  ;;  %4734 = vmatprep.mubr.f32.mxu0 %v25351_v63 }
 0xa11   :  { %18853 = vmatprep.subr.bf16.mxu0 %v25509_v12 }
 0xa14   :  { %18855 = vmatpush1.bf16.msra.mxu0 %v25510_v27 }
 0xa15   :  { %18857 = vmatprep.subr.bf16.mxu0 %v25511_v45 }
 0xa18   :  { %18859 = vmatpush1.bf16.msra.mxu0 %v25512_v46 }
 0xa19   :  { %18861 = vmatprep.subr.bf16.mxu0 %v25513_v31 }
 0xa1c   :  { %18863 = vmatpush1.bf16.msra.mxu0 %v25514_v57 }
 0xa1d   :  { %19249 = vmatprep.subr.bf16.mxu0 %v22596_v55 }
 0xa1f   :  { %4736 = vmatmul.mubr.f32.vlgmr.msra.gmra.mrb[12].mxu0 %v23314_v25 }
 0xa20   :  { %19251 = vmatpush1.bf16.msra.mxu0 %v25493_v34  ;;  %7626 = vmatprep.mubr.f32.mxu0 %v25351_v63 }
 0xa21   :  { %19253 = vmatprep.subr.bf16.mxu0 %v25495_v7 }
 0xa24   :  { %19255 = vmatpush1.bf16.msra.mxu0 %v25497_v29 }
 0xa25   :  { %19257 = vmatprep.subr.bf16.mxu0 %v25499_v23 }
 0xa28   :  { %19259 = vmatpush1.bf16.msra.mxu0 %v25501_v11 }
 0xa29   :  { %19261 = vmatprep.subr.bf16.mxu0 %v25503_v8 }
 0xa2c   :  { %19263 = vmatpush1.bf16.msra.mxu0 %v25505_v49 }
 0xa2d   :  { %19265 = vmatprep.subr.bf16.mxu0 %v25551_v9 }
 0xaf2   :  { %v4737_v52 = vpop.f32.mrb[12].mxu0 }
 0xaf3   :  { %v4739_v16 = vpop.f32.mrb[13].mxu0  ;;  %v4742_v1 = vadd.f32 %v4737_v52, %v25553_v62 }
 0xaf4   :  { %v4743_v35 = vadd.f32 %v4739_v16, %v25552_v54 }
 0xaf5   :  { %v17875_v26 = vmul.f32 -1.442695, %v4742_v1 }
 0xaf6   :  { %21117 = vtanh.f32 %v4743_v35  ;;  %v17876_v1 = vmul.f32 -1.442695, %v4743_v35  ;;  %v25555_v35 = vld [vmem:[#allocation80_spill] sm:$0xff] }
 0xaf7   :  { %21119 = vpow2.f32 %v17875_v26 }
 0xb00   :  { %v21118_v3 = vpop.eup %21117 }
 0xb01   :  { %4759 = vrot.lane.b32.xlu1 %v21118_v3, %s21376_s23  ;;  %v21120_v58 = vpop.eup %21119 }
 0xb02   :  { %v4750_v0 = vadd.f32 1.0, %v21120_v58 }
 0xb04   :  { %21121 = vrcp.f32 %v4750_v0 }
 0xb0e   :  { %v21122_v5 = vpop.eup %21121 }
 0xb0f   :  { %v4757_v50 = vmul.f32 %v21122_v5, %v25554_v19 }
 0xb73   :  { %v4760_v32 = vpop.permute.xlu1 %4759 }
 0xb74   :  { %v4762_v33 = vmul.f32 %v21122_v5, %v4760_v32 }
 0xb76   :  { %4764 = vrot.lane.b32.xlu0 %v4762_v33, %s21376_s23 }
 0xbe8   :  { %v4765_v38 = vpop.permute.xlu0 %4764 }
 0xbe9   :  { %v23401_v16 = vadd.f32 %v4765_v38, %v4757_v50 }
 0xbeb   :  { %21123 = vtanh.f32 %v23401_v16 }
 0xbec   :  { %21125 = vpow2.f32 %v17876_v1  ;;  %v25557_v1 = vld [vmem:[#allocation27_spill] sm:$0xff] }
 0xbf5   :  { %v21124_v3 = vpop.eup %21123 }
 0xbf6   :  { %4770 = vrot.lane.b32.xlu1 %v21124_v3, %s21376_s23  ;;  %v21126_v26 = vpop.eup %21125  ;;  %v25556_v3 = vld [vmem:[#allocation20_spill] sm:$0xff] }
 0xbf7   :  { %v4751_v58 = vadd.f32 1.0, %v21126_v26  ;;  %v25558_v26 = vld [vmem:[#allocation29_spill] sm:$0xff] }
 0xbf9   :  { %21127 = vrcp.f32 %v4751_v58  ;;  %v25559_v58 = vld [vmem:[#allocation35_spill] sm:$0xff] }
 0xc03   :  { %v21128_v0 = vpop.eup %21127 }
 0xc68   :  { %v4771_v52 = vpop.permute.xlu1 %4770 }
 0xc69   :  { %v4773_v32 = vmul.f32 %v21128_v0, %v4771_v52  ;;  %v25560_v0 = vld [vmem:[#allocation81_spill] sm:$0xff]  ;;  %v25562_v52 = vld [vmem:[#allocation88_spill] sm:$0xff] }
 0xc6b   :  { %v4775_v33 = vsel %vm117_vm0, %v4773_v32, 0  ;;  %v25563_v32 = vld [vmem:[#allocation90_spill] sm:$0xff] }
 0xc6c   :  { %v23406_v62 = vand.u32 4294901760, %v4775_v33 }
 0xc6e   :  { %v23409_v38 = vsub.f32 %v4775_v33, %v23406_v62  ;;  %v25564_v33 = vld [vmem:[#allocation92_spill] sm:$0xff] }
 0xc70   :  { %v23412_v50 = vand.u32 4294901760, %v23409_v38 }
 0xc72   :  { %v4872_v19 = vsub.f32 %v23409_v38, %v23412_v50 }
 0xc74   :  { %v23416_v5 = vand.u32 4294901760, %v4872_v19  ;;  %v25565_v19 = vld [vmem:[#allocation94_spill] sm:$0xff] }
 0xc76   :  { %4874 = vmatmul.mubr.f32.gmra.mrb[28].mxu1 %v23416_v5 }
 0xc77   :  { %5022 = vmatprep.mubr.f32.mxu1 %v25351_v63 }
 0xc7a   :  { %5024 = vmatmul.mubr.f32.vlgmr.msra.gmra.mrb[4].mxu1 %v23314_v25 }
 0xc7b   :  { %18899 = vmatpush1.bf16.msra.mxu1 %v23026_v40  ;;  %5029 = vmatprep.mubr.f32.mxu1 %v25351_v63 }
 0xc7c   :  { %18901 = vmatprep.subr.bf16.mxu1 %v23035_v37 }
 0xc7e   :  { %5031 = vmatmul.mubr.f32.gmra.mrb[30].mxu1 %v23406_v62 }
 0xc7f   :  { %18903 = vmatpush1.bf16.msra.mxu1 %v23046_v41  ;;  %5131 = vmatprep.mubr.f32.mxu1 %v25351_v63 }
 0xc80   :  { %18905 = vmatprep.subr.bf16.mxu1 %v23054_v14 }
 0xc83   :  { %18907 = vmatpush1.bf16.msra.mxu1 %v23062_v18 }
 0xc84   :  { %18909 = vmatprep.subr.bf16.mxu1 %v23071_v24 }
 0xc87   :  { %18911 = vmatpush1.bf16.msra.mxu1 %v23079_v44 }
 0xc88   :  { %18913 = vmatprep.subr.bf16.mxu1 %v25491_v47 }
 0xc8a   :  { %5134 = vmatmul.mubr.f32.vlgmr.msra.gmra.mrb[4].mxu1 %v23317_v10 }
 0xc8b   :  { %18915 = vmatpush1.bf16.msra.mxu1 %v25492_v43  ;;  %5139 = vmatprep.mubr.f32.mxu1 %v25351_v63 }
 0xc8c   :  { %18917 = vmatprep.subr.bf16.mxu1 %v25494_v53 }
 0xc8e   :  { %5142 = vmatmul.mubr.f32.gmra.mrb[32].mxu1 %v23409_v38 }
 0xc8f   :  { %18919 = vmatpush1.bf16.msra.mxu1 %v25496_v60  ;;  %5226 = vmatprep.mubr.f32.mxu1 %v25351_v63 }
 0xc90   :  { %18921 = vmatprep.subr.bf16.mxu1 %v25498_v21 }
 0xc93   :  { %18923 = vmatpush1.bf16.msra.mxu1 %v25500_v15 }
 0xc94   :  { %18925 = vmatprep.subr.bf16.mxu1 %v25502_v56 }
 0xc97   :  { %18927 = vmatpush1.bf16.msra.mxu1 %v25504_v59 }
 0xc98   :  { %18929 = vmatprep.subr.bf16.mxu1 %v23092_v17 }
 0xc9a   :  { %5230 = vmatmul.mubr.f32.vlgmr.msra.gmra.mrb[4].mxu1 %v23320_v36 }
 0xc9b   :  { %18931 = vmatpush1.bf16.msra.mxu1 %v23104_v48  ;;  %5235 = vmatprep.mubr.f32.mxu1 %v25351_v63 }
 0xc9c   :  { %18933 = vmatprep.subr.bf16.mxu1 %v23116_v6 }
 0xc9e   :  { %5239 = vmatmul.mubr.f32.gmra.mrb[34].mxu1 %v23412_v50 }
 0xc9f   :  { %18935 = vmatpush1.bf16.msra.mxu1 %v23128_v2  ;;  %5355 = vmatprep.mubr.f32.mxu1 %v25351_v63  ;;  %v25574_v2 = vld [vmem:[#allocation113_spill] sm:$0xff] }
 0xca0   :  { %18937 = vmatprep.subr.bf16.mxu1 %v23140_v28  ;;  %v25573_v28 = vld [vmem:[#allocation111_spill] sm:$0xff] }
 0xca3   :  { %18939 = vmatpush1.bf16.msra.mxu1 %v23152_v13  ;;  %v25572_v13 = vld [vmem:[#allocation109_spill] sm:$0xff] }
 0xca4   :  { %18941 = vmatprep.subr.bf16.mxu1 %v23164_v30  ;;  %v25571_v30 = vld [vmem:[#allocation107_spill] sm:$0xff] }
 0xca7   :  { %18943 = vmatpush1.bf16.msra.mxu1 %v23172_v61  ;;  %v25570_v61 = vld [vmem:[#allocation105_spill] sm:$0xff] }
 0xca8   :  { %18945 = vmatprep.subr.bf16.mxu1 %v25491_v47 }
 0xcaa   :  { %5357 = vmatmul.mubr.f32.vlgmr.msra.gmra.mrb[4].mxu1 %v23314_v25 }
 0xcab   :  { %18947 = vmatpush1.bf16.msra.mxu1 %v25492_v43  ;;  %5362 = vmatprep.mubr.f32.mxu1 %v25351_v63 }
 0xcac   :  { %18949 = vmatprep.subr.bf16.mxu1 %v25494_v53 }
 0xcae   :  { %5364 = vmatmul.mubr.f32.gmra.mrb[36].mxu1 %v23406_v62 }
 0xcaf   :  { %18951 = vmatpush1.bf16.msra.mxu1 %v25496_v60  ;;  %5448 = vmatprep.mubr.f32.mxu1 %v25351_v63 }
 0xcb0   :  { %18953 = vmatprep.subr.bf16.mxu1 %v25498_v21 }
 0xcb3   :  { %18955 = vmatpush1.bf16.msra.mxu1 %v25500_v15 }
 0xcb4   :  { %18957 = vmatprep.subr.bf16.mxu1 %v25502_v56 }
 0xcb7   :  { %18959 = vmatpush1.bf16.msra.mxu1 %v25504_v59 }
 0xcb8   :  { %18961 = vmatprep.subr.bf16.mxu1 %v22596_v55 }
 0xcba   :  { %5450 = vmatmul.mubr.f32.vlgmr.msra.gmra.mrb[4].mxu1 %v23314_v25 }
 0xcbb   :  { %18963 = vmatpush1.bf16.msra.mxu1 %v25493_v34  ;;  %5455 = vmatprep.mubr.f32.mxu1 %v25351_v63 }
 0xcbc   :  { %18965 = vmatprep.subr.bf16.mxu1 %v25495_v7 }
 0xcbe   :  { %5457 = vmatmul.mubr.f32.gmra.mrb[38].mxu1 %v23406_v62 }
 0xcbf   :  { %18967 = vmatpush1.bf16.msra.mxu1 %v25497_v29  ;;  %5541 = vmatprep.mubr.f32.mxu1 %v25351_v63 }
 0xcc0   :  { %18969 = vmatprep.subr.bf16.mxu1 %v25499_v23 }
 0xcc3   :  { %18971 = vmatpush1.bf16.msra.mxu1 %v25501_v11 }
 0xcc4   :  { %18973 = vmatprep.subr.bf16.mxu1 %v25503_v8 }
 0xcc7   :  { %18975 = vmatpush1.bf16.msra.mxu1 %v25505_v49 }
 0xcc8   :  { %18977 = vmatprep.subr.bf16.mxu1 %v25551_v9  ;;  %v25568_v9 = vld [vmem:[#allocation101_spill] sm:$0xff] }
 0xcca   :  { %5547 = vmatmul.mubr.f32.vlgmr.msra.gmra.mrb[40].mxu1 %v23324_v39  ;;  %v25561_v39 = vld [vmem:[#allocation82_spill] sm:$0xff] }
 0xccb   :  { %18979 = vmatpush1.bf16.msra.mxu1 %v25555_v35  ;;  %5550 = vmatprep.mubr.f32.mxu1 %v25351_v63 }
 0xccc   :  { %18981 = vmatprep.subr.bf16.mxu1 %v25556_v3 }
 0xcce   :  { %5556 = vmatmul.mubr.f32.gmra.mrb[42].mxu1 %v23416_v5  ;;  %v25566_v5 = vld [vmem:[#allocation97_spill] sm:$0xff] }
 0xccf   :  { %18983 = vmatpush1.bf16.msra.mxu1 %v25557_v1  ;;  %5706 = vmatprep.mubr.f32.mxu1 %v25351_v63 }
 0xcd0   :  { %18985 = vmatprep.subr.bf16.mxu1 %v25558_v26 }
 0xcd3   :  { %18987 = vmatpush1.bf16.msra.mxu1 %v25559_v58 }
 0xcd4   :  { %18989 = vmatprep.subr.bf16.mxu1 %v25560_v0 }
 0xcd7   :  { %18991 = vmatpush1.bf16.msra.mxu1 %v23081_v4 }
 0xcd8   :  { %18993 = vmatprep.subr.bf16.mxu1 %v25561_v39 }
 0xcda   :  { %5708 = vmatmul.mubr.f32.vlgmr.msra.gmra.mrb[44].mxu1 %v23314_v25 }
 0xcdb   :  { %18995 = vmatpush1.bf16.msra.mxu1 %v23031_v51  ;;  %5711 = vmatprep.mubr.f32.mxu1 %v25351_v63 }
 0xcdc   :  { %18997 = vmatprep.subr.bf16.mxu1 %v23042_v42 }
 0xcde   :  { %5713 = vmatmul.mubr.f32.gmra.mrb[42].mxu1 %v23406_v62 }
 0xcdf   :  { %18999 = vmatpush1.bf16.msra.mxu1 %v25562_v52  ;;  %5815 = vmatprep.mubr.f32.mxu1 %v25351_v63 }
 0xce0   :  { %19001 = vmatprep.subr.bf16.mxu1 %v25563_v32 }
 0xce3   :  { %19003 = vmatpush1.bf16.msra.mxu1 %v25564_v33 }
 0xce4   :  { %19005 = vmatprep.subr.bf16.mxu1 %v25565_v19 }
 0xce7   :  { %19007 = vmatpush1.bf16.msra.mxu1 %v25566_v5 }
 0xce8   :  { %19009 = vmatprep.subr.bf16.mxu1 %v22596_v55 }
 0xcea   :  { %5818 = vmatmul.mubr.f32.vlgmr.msra.gmra.mrb[46].mxu1 %v23317_v10  ;;  %v25567_v10 = vld [vmem:[#allocation99_spill] sm:$0xff] }
 0xceb   :  { %19011 = vmatpush1.bf16.msra.mxu1 %v25493_v34  ;;  %5821 = vmatprep.mubr.f32.mxu1 %v25351_v63 }
 0xcec   :  { %19013 = vmatprep.subr.bf16.mxu1 %v25495_v7 }
 0xcee   :  { %5824 = vmatmul.mubr.f32.gmra.mrb[42].mxu1 %v23409_v38  ;;  %v25569_v38 = vld [vmem:[#allocation103_spill] sm:$0xff] }
 0xcef   :  { %19015 = vmatpush1.bf16.msra.mxu1 %v25497_v29  ;;  %5910 = vmatprep.mubr.f32.mxu1 %v25351_v63 }
 0xcf0   :  { %19017 = vmatprep.subr.bf16.mxu1 %v25499_v23 }
 0xcf3   :  { %19019 = vmatpush1.bf16.msra.mxu1 %v25501_v11 }
 0xcf4   :  { %19021 = vmatprep.subr.bf16.mxu1 %v25503_v8 }
 0xcf7   :  { %19023 = vmatpush1.bf16.msra.mxu1 %v25505_v49 }
 0xcf8   :  { %19025 = vmatprep.subr.bf16.mxu1 %v25567_v10  ;;  %v25576_v10 = vld [vmem:[#allocation13_spill] sm:$0xff] }
 0xcfa   :  { %5914 = vmatmul.mubr.f32.vlgmr.msra.gmra.mrb[48].mxu1 %v23320_v36 }
 0xcfb   :  { %19027 = vmatpush1.bf16.msra.mxu1 %v25568_v9  ;;  %5917 = vmatprep.mubr.f32.mxu1 %v25351_v63 }
 0xcfc   :  { %19029 = vmatprep.subr.bf16.mxu1 %v25569_v38 }
 0xcfe   :  { %5921 = vmatmul.mubr.f32.gmra.mrb[42].mxu1 %v23412_v50 }
 0xcff   :  { %19031 = vmatpush1.bf16.msra.mxu1 %v25570_v61  ;;  %6039 = vmatprep.mubr.f32.mxu1 %v25351_v63 }
 0xd00   :  { %19033 = vmatprep.subr.bf16.mxu1 %v25571_v30 }
 0xd03   :  { %19035 = vmatpush1.bf16.msra.mxu1 %v25572_v13 }
 0xd04   :  { %19037 = vmatprep.subr.bf16.mxu1 %v25573_v28 }
 0xd07   :  { %19039 = vmatpush1.bf16.msra.mxu1 %v25574_v2 }
 0xd08   :  { %19041 = vmatprep.subr.bf16.mxu1 %v22596_v55 }
 0xd0a   :  { %6041 = vmatmul.mubr.f32.vlgmr.msra.gmra.mrb[50].mxu1 %v23314_v25 }
 0xd0b   :  { %19043 = vmatpush1.bf16.msra.mxu1 %v25493_v34  ;;  %6044 = vmatprep.mubr.f32.mxu1 %v25351_v63 }
 0xd0c   :  { %19045 = vmatprep.subr.bf16.mxu1 %v25495_v7 }
 0xd0e   :  { %6046 = vmatmul.mubr.f32.gmra.mrb[42].mxu1 %v23406_v62 }
 0xd0f   :  { %19047 = vmatpush1.bf16.msra.mxu1 %v25497_v29  ;;  %6132 = vmatprep.mubr.f32.mxu1 %v25351_v63 }
 0xd10   :  { %19049 = vmatprep.subr.bf16.mxu1 %v25499_v23 }
 0xd13   :  { %19051 = vmatpush1.bf16.msra.mxu1 %v25501_v11 }
 0xd14   :  { %19053 = vmatprep.subr.bf16.mxu1 %v25503_v8 }
 0xd17   :  { %19055 = vmatpush1.bf16.msra.mxu1 %v25505_v49 }
 0xd18   :  { %19057 = vmatprep.subr.bf16.mxu1 %v25507_v20 }
 0xd1a   :  { %6134 = vmatmul.mubr.f32.vlgmr.msra.gmra.mrb[52].mxu1 %v23314_v25  ;;  %v25575_v25 = vld [vmem:[#allocation42_spill] sm:$0xff] }
 0xd1b   :  { %6137 = vmatprep.mubr.f32.mxu1 %v25351_v63  ;;  %19059 = vmatpush1.bf16.msra.mxu1 %v25508_v22 }
 0xd1c   :  { %19061 = vmatprep.subr.bf16.mxu1 %v25509_v12 }
 0xd1e   :  { %6139 = vmatmul.mubr.f32.gmra.mrb[42].mxu1 %v23406_v62 }
 0xd1f   :  { %19063 = vmatpush1.bf16.msra.mxu1 %v25510_v27  ;;  %6260 = vmatprep.mubr.f32.mxu1 %v25351_v63 }
 0xd20   :  { %19065 = vmatprep.subr.bf16.mxu1 %v25511_v45 }
 0xd23   :  { %19067 = vmatpush1.bf16.msra.mxu1 %v25512_v46 }
 0xd24   :  { %19069 = vmatprep.subr.bf16.mxu1 %v25513_v31 }
 0xd27   :  { %19071 = vmatpush1.bf16.msra.mxu1 %v25514_v57 }
 0xd28   :  { %19073 = vmatprep.subr.bf16.mxu1 %v25575_v25  ;;  %v25577_v25 = vld [vmem:[#allocation14_spill] sm:$0xff] }
 0xd49   :  { %v4875_v36 = vpop.f32.mrb[28].mxu1 }
 0xd4a   :  { %v4876_v50 = vpop.f32.mrb[29].mxu1 }
 0xd51   :  { %v5032_v2 = vpop.f32.mrb[30].mxu1 }
 0xd52   :  { %v5033_v28 = vpop.f32.mrb[31].mxu1 }
 0xd61   :  { %v5143_v13 = vpop.f32.mrb[32].mxu1 }
 0xd62   :  { %v5144_v62 = vpop.f32.mrb[33].mxu1 }
 0xd71   :  { %v5240_v30 = vpop.f32.mrb[34].mxu1 }
 0xd72   :  { %v5241_v61 = vpop.f32.mrb[35].mxu1 }
 0xd81   :  { %v5365_v38 = vpop.f32.mrb[36].mxu1 }
 0xd82   :  { %v5366_v6 = vpop.f32.mrb[37].mxu1 }
 0xd8d   :  { %v5451_v9 = vpop.f32.mrb[4].mxu1 }
 0xd8e   :  { %v5453_v48 = vpop.f32.mrb[5].mxu1  ;;  %v20676_v23 = vadd.f32 %v5451_v9, %v25577_v25 }
 0xd8f   :  { %v20677_v17 = vadd.f32 %v5453_v48, %v25576_v10 }
 0xd90   :  { %v17877_v10 = vmul.f32 -1.442695, %v20676_v23 }
 0xd91   :  { %21129 = vtanh.f32 %v20677_v17  ;;  %v5458_v49 = vpop.f32.mrb[38].mxu1 }
 0xd92   :  { %v5459_v8 = vpop.f32.mrb[39].mxu1  ;;  %21131 = vpow2.f32 %v17877_v10 }
 0xd9b   :  { %v21130_v11 = vpop.eup %21129 }
 0xd9c   :  { %6162 = vrot.lane.b32.xlu0 %v21130_v11, %s21376_s23  ;;  %v21132_v8 = vpop.eup %21131 }
 0xd9d   :  { %v5548_v36 = vpop.f32.mrb[40].mxu1  ;;  %v6153_v49 = vadd.f32 1.0, %v21132_v8 }
 0xd9e   :  { %v5549_v50 = vpop.f32.mrb[41].mxu1 }
 0xd9f   :  { %21133 = vrcp.f32 %v6153_v49 }
 0xda9   :  { %v21134_v11 = vpop.eup %21133 }
 0xdad   :  { %v5709_v2 = vpop.f32.mrb[44].mxu1 }
 0xdae   :  { %v5710_v28 = vpop.f32.mrb[45].mxu1  ;;  %v25578_v2 = vld [vmem:[#allocation63_spill] sm:$0xff] }
 0xdaf   :  { %v6160_v28 = vmul.f32 %v21134_v11, %v25578_v2  ;;  %v25581_v2 = vld [vmem:[#allocation44_spill] sm:$0xff] }
 0xdbd   :  { %v5819_v13 = vpop.f32.mrb[46].mxu1 }
 0xdbe   :  { %v5820_v62 = vpop.f32.mrb[47].mxu1 }
 0xdcd   :  { %v5915_v30 = vpop.f32.mrb[48].mxu1 }
 0xdce   :  { %v5916_v61 = vpop.f32.mrb[49].mxu1 }
 0xddd   :  { %v6042_v38 = vpop.f32.mrb[50].mxu1 }
 0xdde   :  { %v6043_v6 = vpop.f32.mrb[51].mxu1 }
 0xded   :  { %v6135_v29 = vpop.f32.mrb[52].mxu1 }
 0xdee   :  { %v6136_v48 = vpop.f32.mrb[53].mxu1  ;;  %v17878_v29 = vmul.f32 -1.442695, %v20677_v17 }
 0xe0e   :  { %v6163_v36 = vpop.permute.xlu0 %6162 }
 0xe0f   :  { %v6165_v50 = vmul.f32 %v21134_v11, %v6163_v36  ;;  %v25579_v36 = vld [vmem:[#allocation64_spill] sm:$0xff] }
 0xe11   :  { %6167 = vrot.lane.b32.xlu1 %v6165_v50, %s21376_s23  ;;  %v25580_v50 = vld [vmem:[#allocation43_spill] sm:$0xff] }
 0xe83   :  { %v6168_v13 = vpop.permute.xlu1 %6167 }
 0xe84   :  { %v23557_v62 = vadd.f32 %v6168_v13, %v6160_v28  ;;  %v25582_v28 = vld [vmem:[#allocation45_spill] sm:$0xff]  ;;  %v25583_v13 = vld [vmem:[#allocation46_spill] sm:$0xff] }
 0xe86   :  { %21135 = vtanh.f32 %v23557_v62 }
 0xe87   :  { %21137 = vpow2.f32 %v17878_v29  ;;  %v25585_v29 = vld [vmem:[#allocation49_spill] sm:$0xff] }
 0xe90   :  { %v21136_v9 = vpop.eup %21135 }
 0xe91   :  { %6173 = vrot.lane.b32.xlu0 %v21136_v9, %s21376_s23  ;;  %v21138_v23 = vpop.eup %21137  ;;  %v25584_v9 = vld [vmem:[#allocation47_spill] sm:$0xff] }
 0xe92   :  { %v6154_v10 = vadd.f32 1.0, %v21138_v23  ;;  %v25586_v23 = vld [vmem:[#allocation48_spill] sm:$0xff] }
 0xe94   :  { %21139 = vrcp.f32 %v6154_v10  ;;  %v25587_v10 = vld [vmem:[#allocation65_spill] sm:$0xff] }
 0xe9e   :  { %v21140_v30 = vpop.eup %21139 }
 0xf03   :  { %v6174_v61 = vpop.permute.xlu0 %6173 }
 0xf04   :  { %v6176_v38 = vmul.f32 %v21140_v30, %v6174_v61  ;;  %v25588_v30 = vld [vmem:[#allocation50_spill] sm:$0xff]  ;;  %v25589_v61 = vld [vmem:[#allocation51_spill] sm:$0xff] }
 0xf06   :  { %v6178_v6 = vsel %vm117_vm0, %v6176_v38, 0  ;;  %v25590_v38 = vld [vmem:[#allocation52_spill] sm:$0xff] }
 0xf07   :  { %v23562_v48 = vand.u32 4294901760, %v6178_v6 }
 0xf09   :  { %v23565_v8 = vsub.f32 %v6178_v6, %v23562_v48  ;;  %v25591_v6 = vld [vmem:[#allocation53_spill] sm:$0xff] }
 0xf0b   :  { %v23568_v49 = vand.u32 4294901760, %v23565_v8 }
 0xf0d   :  { %v6264_v17 = vsub.f32 %v23565_v8, %v23568_v49 }
 0xf0f   :  { %v23572_v11 = vand.u32 4294901760, %v6264_v17  ;;  %v25592_v17 = vld [vmem:[#allocation54_spill] sm:$0xff] }
 0xf11   :  { %6266 = vmatmul.mubr.f32.vlgmr.msra.gmra.mrb[42].mxu1 %v23572_v11  ;;  %7632 = vmatmul.mubr.f32.vlgmr.msra.gmra.mrb[24].mxu0 %v23572_v11 }
 0xf12   :  { %19075 = vmatpush1.bf16.msra.mxu1 %v25579_v36  ;;  %6416 = vmatprep.mubr.f32.mxu1 %v25351_v63 }
 0xf13   :  { %19077 = vmatprep.subr.bf16.mxu1 %v25580_v50  ;;  %19267 = vmatpush1.bf16.msra.mxu0 %v25555_v35  ;;  %v25600_v35 = vld [vmem:[#allocation61_spill] sm:$0xff] }
 0xf14   :  { %19269 = vmatprep.subr.bf16.mxu0 %v25556_v3  ;;  %7635 = vmatprep.mubr.f32.mxu0 %v25351_v63  ;;  %v25599_v3 = vld [vmem:[#allocation60_spill] sm:$0xff] }
 0xf16   :  { %19079 = vmatpush1.bf16.msra.mxu1 %v25581_v2 }
 0xf17   :  { %19081 = vmatprep.subr.bf16.mxu1 %v25582_v28  ;;  %19271 = vmatpush1.bf16.msra.mxu0 %v25557_v1  ;;  %v25598_v1 = vld [vmem:[#allocation59_spill] sm:$0xff] }
 0xf18   :  { %19273 = vmatprep.subr.bf16.mxu0 %v25558_v26  ;;  %v25597_v26 = vld [vmem:[#allocation58_spill] sm:$0xff] }
 0xf1a   :  { %19083 = vmatpush1.bf16.msra.mxu1 %v25583_v13 }
 0xf1b   :  { %19085 = vmatprep.subr.bf16.mxu1 %v25584_v9  ;;  %19275 = vmatpush1.bf16.msra.mxu0 %v25559_v58  ;;  %v25596_v58 = vld [vmem:[#allocation57_spill] sm:$0xff] }
 0xf1c   :  { %19277 = vmatprep.subr.bf16.mxu0 %v25560_v0  ;;  %v25593_v0 = vld [vmem:[#allocation55_spill] sm:$0xff] }
 0xf1e   :  { %19087 = vmatpush1.bf16.msra.mxu1 %v25585_v29 }
 0xf1f   :  { %19089 = vmatprep.subr.bf16.mxu1 %v25586_v23  ;;  %19279 = vmatpush1.bf16.msra.mxu0 %v23081_v4  ;;  %v25595_v4 = vld [vmem:[#allocation66_spill] sm:$0xff]  ;;  %v25611_v23 = vld [vmem:[#allocation75_spill] sm:$0xff] }
 0xf20   :  { %19281 = vmatprep.subr.bf16.mxu0 %v25561_v39  ;;  %v25594_v39 = vld [vmem:[#allocation56_spill] sm:$0xff] }
 0xf21   :  { %6418 = vmatmul.mubr.f32.vlgmr.msra.gmra.mrb[42].mxu1 %v23562_v48 }
 0xf22   :  { %19091 = vmatpush1.bf16.msra.mxu1 %v25587_v10  ;;  %6520 = vmatprep.mubr.f32.mxu1 %v25351_v63 }
 0xf23   :  { %19093 = vmatprep.subr.bf16.mxu1 %v25588_v30 }
 0xf26   :  { %19095 = vmatpush1.bf16.msra.mxu1 %v25589_v61 }
 0xf27   :  { %19097 = vmatprep.subr.bf16.mxu1 %v25590_v38 }
 0xf2a   :  { %19099 = vmatpush1.bf16.msra.mxu1 %v25591_v6 }
 0xf2b   :  { %19101 = vmatprep.subr.bf16.mxu1 %v25592_v17  ;;  %v25610_v17 = vld [vmem:[#allocation36_spill] sm:$0xff] }
 0xf2e   :  { %19103 = vmatpush1.bf16.msra.mxu1 %v25593_v0  ;;  %v25601_v0 = vld [vmem:[#allocation62_spill] sm:$0xff] }
 0xf2f   :  { %19105 = vmatprep.subr.bf16.mxu1 %v25507_v20 }
 0xf31   :  { %6523 = vmatmul.mubr.f32.vlgmr.msra.gmra.mrb[42].mxu1 %v23565_v8 }
 0xf32   :  { %19107 = vmatpush1.bf16.msra.mxu1 %v25508_v22  ;;  %6609 = vmatprep.mubr.f32.mxu1 %v25351_v63 }
 0xf33   :  { %19109 = vmatprep.subr.bf16.mxu1 %v25509_v12 }
 0xf36   :  { %19111 = vmatpush1.bf16.msra.mxu1 %v25510_v27 }
 0xf37   :  { %19113 = vmatprep.subr.bf16.mxu1 %v25511_v45 }
 0xf3a   :  { %19115 = vmatpush1.bf16.msra.mxu1 %v25512_v46 }
 0xf3b   :  { %19117 = vmatprep.subr.bf16.mxu1 %v25513_v31 }
 0xf3e   :  { %19119 = vmatpush1.bf16.msra.mxu1 %v25514_v57 }
 0xf3f   :  { %19121 = vmatprep.subr.bf16.mxu1 %v25594_v39  ;;  %v25609_v39 = vld [vmem:[#allocation85_spill] sm:$0xff] }
 0xf41   :  { %6613 = vmatmul.mubr.f32.vlgmr.msra.gmra.mrb[42].mxu1 %v23568_v49 }
 0xf42   :  { %19123 = vmatpush1.bf16.msra.mxu1 %v25595_v4  ;;  %6731 = vmatprep.mubr.f32.mxu1 %v25351_v63  ;;  %v25608_v4 = vld [vmem:[#allocation37_spill] sm:$0xff] }
 0xf43   :  { %19125 = vmatprep.subr.bf16.mxu1 %v25596_v58  ;;  %v25607_v58 = vld [vmem:[#allocation34_spill] sm:$0xff] }
 0xf46   :  { %19127 = vmatpush1.bf16.msra.mxu1 %v25597_v26  ;;  %v25606_v26 = vld [vmem:[#allocation28_spill] sm:$0xff] }
 0xf47   :  { %19129 = vmatprep.subr.bf16.mxu1 %v25598_v1  ;;  %v25605_v1 = vld [vmem:[#allocation25_spill] sm:$0xff] }
 0xf4a   :  { %19131 = vmatpush1.bf16.msra.mxu1 %v25599_v3  ;;  %v25604_v3 = vld [vmem:[#allocation19_spill] sm:$0xff] }
 0xf4b   :  { %19133 = vmatprep.subr.bf16.mxu1 %v25600_v35  ;;  %v25603_v35 = vld [vmem:[#allocation79_spill] sm:$0xff] }
 0xf4e   :  { %19135 = vmatpush1.bf16.msra.mxu1 %v25601_v0  ;;  %v25602_v0 = vld [vmem:[#allocation76_spill] sm:$0xff] }
 0xf4f   :  { %19137 = vmatprep.subr.bf16.mxu1 %v25507_v20 }
 0xf51   :  { %6733 = vmatmul.mubr.f32.vlgmr.msra.gmra.mrb[42].mxu1 %v23562_v48 }
 0xf52   :  { %19139 = vmatpush1.bf16.msra.mxu1 %v25508_v22  ;;  %6819 = vmatprep.mubr.f32.mxu1 %v25351_v63 }
 0xf53   :  { %19141 = vmatprep.subr.bf16.mxu1 %v25509_v12 }
 0xf56   :  { %19143 = vmatpush1.bf16.msra.mxu1 %v25510_v27 }
 0xf57   :  { %19145 = vmatprep.subr.bf16.mxu1 %v25511_v45 }
 0xf5a   :  { %19147 = vmatpush1.bf16.msra.mxu1 %v25512_v46 }
 0xf5b   :  { %19149 = vmatprep.subr.bf16.mxu1 %v25513_v31 }
 0xf5e   :  { %19151 = vmatpush1.bf16.msra.mxu1 %v25514_v57 }
 0xf5f   :  { %19153 = vmatprep.subr.bf16.mxu1 %v25491_v47 }
 0xf61   :  { %6821 = vmatmul.mubr.f32.vlgmr.msra.gmra.mrb[42].mxu1 %v23562_v48 }
 0xf62   :  { %19155 = vmatpush1.bf16.msra.mxu1 %v25492_v43  ;;  %6942 = vmatprep.mubr.f32.mxu1 %v25351_v63 }
 0xf63   :  { %19157 = vmatprep.subr.bf16.mxu1 %v25494_v53 }
 0xf66   :  { %19159 = vmatpush1.bf16.msra.mxu1 %v25496_v60 }
 0xf67   :  { %19161 = vmatprep.subr.bf16.mxu1 %v25498_v21 }
 0xf6a   :  { %19163 = vmatpush1.bf16.msra.mxu1 %v25500_v15 }
 0xf6b   :  { %19165 = vmatprep.subr.bf16.mxu1 %v25502_v56 }
 0xf6e   :  { %19167 = vmatpush1.bf16.msra.mxu1 %v25504_v59 }
 0xf6f   :  { %19169 = vmatprep.subr.bf16.mxu1 %v25602_v0 }
 0xf71   :  { %6948 = vmatmul.mubr.f32.vlgmr.msra.gmra.mrb[6].mxu1 %v23572_v11 }
 0xf72   :  { %19171 = vmatpush1.bf16.msra.mxu1 %v25603_v35  ;;  %6953 = vmatprep.mubr.f32.mxu1 %v25351_v63 }
 0xf73   :  { %19173 = vmatprep.subr.bf16.mxu1 %v25604_v3 }
 0xf76   :  { %19175 = vmatpush1.bf16.msra.mxu1 %v25605_v1 }
 0xf77   :  { %19177 = vmatprep.subr.bf16.mxu1 %v25606_v26 }
 0xf7a   :  { %19179 = vmatpush1.bf16.msra.mxu1 %v25607_v58 }
 0xf7b   :  { %19181 = vmatprep.subr.bf16.mxu1 %v25608_v4 }
 0xf7e   :  { %19183 = vmatpush1.bf16.msra.mxu1 %v25609_v39 }
 0xf7f   :  { %19185 = vmatprep.subr.bf16.mxu1 %v25610_v17 }
 0xfe4   :  { %v7633_v6 = vpop.f32.mrb[24].mxu0 }
 0xfe5   :  { %v7634_v11 = vpop.f32.mrb[25].mxu0 }
0x1034   :  { %v6822_v38 = vpop.f32.mrb[42].mxu1 }
0x1035   :  { %v6824_v61 = vpop.f32.mrb[43].mxu1  ;;  %v6827_v29 = vadd.f32 %v6822_v38, %v25611_v23 }
0x1036   :  { %v6828_v30 = vadd.f32 %v6824_v61, %v25552_v54 }
0x1037   :  { %v17879_v9 = vmul.f32 -1.442695, %v6827_v29 }
0x1038   :  { %21141 = vtanh.f32 %v6828_v30  ;;  %v17880_v29 = vmul.f32 -1.442695, %v6828_v30  ;;  %v25612_v30 = vld [vmem:[#allocation69_spill] sm:$0xff] }
0x1039   :  { %21143 = vpow2.f32 %v17879_v9 }
0x1042   :  { %v21142_v10 = vpop.eup %21141 }
0x1043   :  { %6844 = vrot.lane.b32.xlu1 %v21142_v10, %s21376_s23  ;;  %v21144_v58 = vpop.eup %21143 }
0x1044   :  { %v6835_v4 = vadd.f32 1.0, %v21144_v58 }
0x1046   :  { %21145 = vrcp.f32 %v6835_v4 }
0x1050   :  { %v21146_v39 = vpop.eup %21145 }
0x1051   :  { %v6842_v6 = vmul.f32 %v21146_v39, %v23401_v16 }
0x10b5   :  { %v6845_v13 = vpop.permute.xlu1 %6844 }
0x10b6   :  { %v6847_v17 = vmul.f32 %v21146_v39, %v6845_v13 }
0x10b8   :  { %6849 = vrot.lane.b32.xlu0 %v6847_v17, %s21376_s23 }
0x112a   :  { %v6850_v11 = vpop.permute.xlu0 %6849 }
0x112b   :  { %v23659_v61 = vadd.f32 %v6850_v11, %v6842_v6 }
0x112d   :  { %21147 = vtanh.f32 %v23659_v61 }
0x112e   :  { %21149 = vpow2.f32 %v17880_v29  ;;  %v25615_v29 = vld [vmem:[#allocation72_spill] sm:$0xff] }
0x1137   :  { %v21148_v10 = vpop.eup %21147 }
0x1138   :  { %6855 = vrot.lane.b32.xlu1 %v21148_v10, %s21376_s23  ;;  %v21150_v9 = vpop.eup %21149  ;;  %v25614_v10 = vld [vmem:[#allocation71_spill] sm:$0xff] }
0x1139   :  { %v6836_v58 = vadd.f32 1.0, %v21150_v9  ;;  %v25616_v9 = vld [vmem:[#allocation73_spill] sm:$0xff] }
0x113b   :  { %21151 = vrcp.f32 %v6836_v58  ;;  %v25617_v58 = vld [vmem:[#allocation98_spill] sm:$0xff] }
0x1145   :  { %v21152_v4 = vpop.eup %21151 }
0x11aa   :  { %v6856_v38 = vpop.permute.xlu1 %6855 }
0x11ab   :  { %v6858_v13 = vmul.f32 %v21152_v4, %v6856_v38  ;;  %v25618_v4 = vld [vmem:[#allocation99_spill] sm:$0xff]  ;;  %v25619_v38 = vld [vmem:[#allocation100_spill] sm:$0xff] }
0x11ad   :  { %v6860_v17 = vsel %vm117_vm0, %v6858_v13, 0  ;;  %v25620_v13 = vld [vmem:[#allocation101_spill] sm:$0xff] }
0x11ae   :  { %v23664_v23 = vand.u32 4294901760, %v6860_v17 }
0x11b0   :  { %v6955_v16 = vsub.f32 %v6860_v17, %v23664_v23  ;;  %v25621_v17 = vld [vmem:[#allocation102_spill] sm:$0xff] }
0x11b2   :  { %v23667_v39 = vand.u32 4294901760, %v6955_v16 }
0x11b4   :  { %v6957_v6 = vsub.f32 %v6955_v16, %v23667_v39 }
0x11b6   :  { %v6958_v11 = vand.u32 4294901760, %v6957_v6  ;;  %v25623_v6 = vld [vmem:[#allocation104_spill] sm:$0xff] }
0x11b8   :  { %6959 = vmatmul.mubr.f32.gmra.mrb[54].mxu1 %v6958_v11  ;;  %7641 = vmatmul.mubr.f32.gmra.mrb[26].mxu0 %v6958_v11  ;;  %v25624_v11 = vld [vmem:[#allocation105_spill] sm:$0xff] }
0x11b9   :  { %7107 = vmatprep.mubr.f32.mxu1 %v25351_v63  ;;  %7791 = vmatprep.mubr.f32.mxu0 %v25351_v63 }
0x11bc   :  { %7109 = vmatmul.mubr.f32.vlgmr.msra.gmra.mrb[6].mxu1 %v23562_v48  ;;  %7793 = vmatmul.mubr.f32.vlgmr.msra.gmra.mrb[28].mxu0 %v23562_v48 }
0x11bd   :  { %19187 = vmatpush1.bf16.msra.mxu1 %v23026_v40  ;;  %19283 = vmatpush1.bf16.msra.mxu0 %v23031_v51 }
0x11be   :  { %7114 = vmatprep.mubr.f32.mxu1 %v25351_v63  ;;  %19189 = vmatprep.subr.bf16.mxu1 %v23035_v37 }
0x11bf   :  { %7796 = vmatprep.mubr.f32.mxu0 %v25351_v63  ;;  %19285 = vmatprep.subr.bf16.mxu0 %v23042_v42 }
0x11c0   :  { %7116 = vmatmul.mubr.f32.gmra.mrb[56].mxu1 %v23664_v23  ;;  %7798 = vmatmul.mubr.f32.gmra.mrb[26].mxu0 %v23664_v23 }
0x11c1   :  { %19191 = vmatpush1.bf16.msra.mxu1 %v23046_v41  ;;  %19287 = vmatpush1.bf16.msra.mxu0 %v25562_v52 }
0x11c2   :  { %19193 = vmatprep.subr.bf16.mxu1 %v23054_v14  ;;  %19289 = vmatprep.subr.bf16.mxu0 %v25563_v32 }
0x11c3   :  { %7216 = vmatprep.mubr.f32.mxu1 %v25351_v63  ;;  %7900 = vmatprep.mubr.f32.mxu0 %v25351_v63 }
0x11c5   :  { %19195 = vmatpush1.bf16.msra.mxu1 %v23062_v18  ;;  %19291 = vmatpush1.bf16.msra.mxu0 %v25564_v33 }
0x11c6   :  { %19197 = vmatprep.subr.bf16.mxu1 %v23071_v24  ;;  %19293 = vmatprep.subr.bf16.mxu0 %v25565_v19 }
0x11c9   :  { %19199 = vmatpush1.bf16.msra.mxu1 %v23079_v44  ;;  %19295 = vmatpush1.bf16.msra.mxu0 %v25566_v5 }
0x11ca   :  { %19201 = vmatprep.subr.bf16.mxu1 %v25491_v47  ;;  %19297 = vmatprep.subr.bf16.mxu0 %v22596_v55 }
0x11cc   :  { %7219 = vmatmul.mubr.f32.vlgmr.msra.gmra.mrb[6].mxu1 %v23565_v8  ;;  %7903 = vmatmul.mubr.f32.vlgmr.msra.gmra.mrb[30].mxu0 %v23565_v8  ;;  %v25613_v8 = vld [vmem:[#allocation70_spill] sm:$0xff] }
0x11cd   :  { %19203 = vmatpush1.bf16.msra.mxu1 %v25492_v43  ;;  %19299 = vmatpush1.bf16.msra.mxu0 %v25493_v34 }
0x11ce   :  { %7224 = vmatprep.mubr.f32.mxu1 %v25351_v63  ;;  %7906 = vmatprep.mubr.f32.mxu0 %v25351_v63 }
0x11cf   :  { %19205 = vmatprep.subr.bf16.mxu1 %v25494_v53  ;;  %19301 = vmatprep.subr.bf16.mxu0 %v25495_v7 }
0x11d0   :  { %7227 = vmatmul.mubr.f32.gmra.mrb[58].mxu1 %v6955_v16  ;;  %7909 = vmatmul.mubr.f32.gmra.mrb[26].mxu0 %v6955_v16  ;;  %v25622_v16 = vld [vmem:[#allocation103_spill] sm:$0xff] }
0x11d1   :  { %19207 = vmatpush1.bf16.msra.mxu1 %v25496_v60  ;;  %19303 = vmatpush1.bf16.msra.mxu0 %v25612_v30 }
0x11d2   :  { %19209 = vmatprep.subr.bf16.mxu1 %v25498_v21  ;;  %19305 = vmatprep.subr.bf16.mxu0 %v25613_v8 }
0x11d3   :  { %7311 = vmatprep.mubr.f32.mxu1 %v25351_v63  ;;  %7995 = vmatprep.mubr.f32.mxu0 %v25351_v63 }
0x11d5   :  { %19211 = vmatpush1.bf16.msra.mxu1 %v25500_v15  ;;  %19307 = vmatpush1.bf16.msra.mxu0 %v25614_v10 }
0x11d6   :  { %19213 = vmatprep.subr.bf16.mxu1 %v25502_v56  ;;  %19309 = vmatprep.subr.bf16.mxu0 %v25615_v29 }
0x11d9   :  { %19215 = vmatpush1.bf16.msra.mxu1 %v25504_v59  ;;  %19311 = vmatpush1.bf16.msra.mxu0 %v25616_v9 }
0x11da   :  { %19217 = vmatprep.subr.bf16.mxu1 %v25617_v58  ;;  %19313 = vmatprep.subr.bf16.mxu0 %v25618_v4  ;;  %v25630_v4 = vld [vmem:[#allocation111_spill] sm:$0xff] }
0x11dc   :  { %7315 = vmatmul.mubr.f32.vlgmr.msra.gmra.mrb[6].mxu1 %v23568_v49  ;;  %7999 = vmatmul.mubr.f32.vlgmr.msra.gmra.mrb[32].mxu0 %v23568_v49  ;;  %v25625_v49 = vld [vmem:[#allocation106_spill] sm:$0xff] }
0x11dd   :  { %19219 = vmatpush1.bf16.msra.mxu1 %v25619_v38  ;;  %19315 = vmatpush1.bf16.msra.mxu0 %v25620_v13  ;;  %v25626_v38 = vld [vmem:[#allocation107_spill] sm:$0xff]  ;;  %v25627_v13 = vld [vmem:[#allocation108_spill] sm:$0xff] }
0x11de   :  { %7320 = vmatprep.mubr.f32.mxu1 %v25351_v63  ;;  %8002 = vmatprep.mubr.f32.mxu0 %v25351_v63 }
0x11df   :  { %19221 = vmatprep.subr.bf16.mxu1 %v25621_v17  ;;  %19317 = vmatprep.subr.bf16.mxu0 %v25622_v16  ;;  %v25628_v17 = vld [vmem:[#allocation109_spill] sm:$0xff]  ;;  %v25629_v16 = vld [vmem:[#allocation110_spill] sm:$0xff] }
0x11e0   :  { %7324 = vmatmul.mubr.f32.gmra.mrb[60].mxu1 %v23667_v39  ;;  %8006 = vmatmul.mubr.f32.gmra.mrb[26].mxu0 %v23667_v39  ;;  %v25631_v39 = vld [vmem:[#allocation112_spill] sm:$0xff] }
0x11e1   :  { %19223 = vmatpush1.bf16.msra.mxu1 %v25623_v6  ;;  %19319 = vmatpush1.bf16.msra.mxu0 %v25624_v11  ;;  %v25632_v6 = vld [vmem:[#allocation113_spill] sm:$0xff] }
0x11e2   :  { %19225 = vmatprep.subr.bf16.mxu1 %v25625_v49  ;;  %19321 = vmatprep.subr.bf16.mxu0 %v25626_v38 }
0x11e3   :  { %7440 = vmatprep.mubr.f32.mxu1 %v25351_v63  ;;  %8124 = vmatprep.mubr.f32.mxu0 %v25351_v63 }
0x11e5   :  { %19227 = vmatpush1.bf16.msra.mxu1 %v25627_v13  ;;  %19323 = vmatpush1.bf16.msra.mxu0 %v25628_v17 }
0x11e6   :  { %19229 = vmatprep.subr.bf16.mxu1 %v25629_v16  ;;  %19325 = vmatprep.subr.bf16.mxu0 %v25630_v4 }
0x11e9   :  { %19231 = vmatpush1.bf16.msra.mxu1 %v25631_v39  ;;  %19327 = vmatpush1.bf16.msra.mxu0 %v25632_v6 }
0x11ea   :  { %19233 = vmatprep.subr.bf16.mxu1 %v25491_v47  ;;  %19329 = vmatprep.subr.bf16.mxu0 %v22596_v55 }
0x11ec   :  { %7442 = vmatmul.mubr.f32.vlgmr.msra.gmra.mrb[6].mxu1 %v23562_v48  ;;  %8126 = vmatmul.mubr.f32.vlgmr.msra.gmra.mrb[34].mxu0 %v23562_v48 }
0x11ed   :  { %19235 = vmatpush1.bf16.msra.mxu1 %v25492_v43  ;;  %19331 = vmatpush1.bf16.msra.mxu0 %v25493_v34 }
0x11ee   :  { %7447 = vmatprep.mubr.f32.mxu1 %v25351_v63  ;;  %8129 = vmatprep.mubr.f32.mxu0 %v25351_v63 }
0x11ef   :  { %19237 = vmatprep.subr.bf16.mxu1 %v25494_v53  ;;  %19333 = vmatprep.subr.bf16.mxu0 %v25495_v7 }
0x11f0   :  { %7449 = vmatmul.mubr.f32.gmra.mrb[62].mxu1 %v23664_v23  ;;  %8131 = vmatmul.mubr.f32.gmra.mrb[26].mxu0 %v23664_v23 }
0x11f1   :  { %19239 = vmatpush1.bf16.msra.mxu1 %v25496_v60  ;;  %19335 = vmatpush1.bf16.msra.mxu0 %v25612_v30 }
0x11f2   :  { %19241 = vmatprep.subr.bf16.mxu1 %v25498_v21  ;;  %19337 = vmatprep.subr.bf16.mxu0 %v25613_v8 }
0x11f3   :  { %7533 = vmatprep.mubr.f32.mxu1 %v25351_v63  ;;  %8217 = vmatprep.mubr.f32.mxu0 %v25351_v63 }
0x11f5   :  { %19243 = vmatpush1.bf16.msra.mxu1 %v25500_v15  ;;  %19339 = vmatpush1.bf16.msra.mxu0 %v25614_v10 }
0x11f6   :  { %19245 = vmatprep.subr.bf16.mxu1 %v25502_v56  ;;  %19341 = vmatprep.subr.bf16.mxu0 %v25615_v29 }
0x11f9   :  { %19247 = vmatpush1.bf16.msra.mxu1 %v25504_v59  ;;  %19343 = vmatpush1.bf16.msra.mxu0 %v25616_v9 }
0x11fa   :  { %19345 = vmatprep.subr.bf16.mxu0 %v25507_v20  ;;  %19441 = vmatprep.subr.bf16.mxu1 %v25491_v47 }
0x11fc   :  { %7535 = vmatmul.mubr.f32.vlgmr.msra.gmra.mrb[6].mxu1 %v23562_v48  ;;  %8219 = vmatmul.mubr.f32.vlgmr.msra.gmra.mrb[36].mxu0 %v23562_v48  ;;  %v25633_v48 = vld [vmem:[#allocation42_spill] sm:$0xff] }
0x11fd   :  { %7540 = vmatprep.mubr.f32.mxu1 %v25351_v63  ;;  %8222 = vmatprep.mubr.f32.mxu0 %v25351_v63 }
0x11fe   :  { %19347 = vmatpush1.bf16.msra.mxu0 %v25508_v22  ;;  %19443 = vmatpush1.bf16.msra.mxu1 %v25492_v43 }
0x11ff   :  { %19349 = vmatprep.subr.bf16.mxu0 %v25509_v12  ;;  %19445 = vmatprep.subr.bf16.mxu1 %v25494_v53 }
0x1200   :  { %7542 = vmatmul.mubr.f32.gmra.mrb[64].mxu1 %v23664_v23  ;;  %8224 = vmatmul.mubr.f32.gmra.mrb[26].mxu0 %v23664_v23 }
0x1201   :  { %8345 = vmatprep.mubr.f32.mxu0 %v25351_v63  ;;  %9027 = vmatprep.mubr.f32.mxu1 %v25351_v63 }
0x1202   :  { %19351 = vmatpush1.bf16.msra.mxu0 %v25510_v27  ;;  %19447 = vmatpush1.bf16.msra.mxu1 %v25496_v60 }
0x1203   :  { %19353 = vmatprep.subr.bf16.mxu0 %v25511_v45  ;;  %19449 = vmatprep.subr.bf16.mxu1 %v25498_v21 }
0x1206   :  { %19355 = vmatpush1.bf16.msra.mxu0 %v25512_v46  ;;  %19451 = vmatpush1.bf16.msra.mxu1 %v25500_v15 }
0x1207   :  { %19357 = vmatprep.subr.bf16.mxu0 %v25513_v31  ;;  %19453 = vmatprep.subr.bf16.mxu1 %v25502_v56 }
0x120a   :  { %19359 = vmatpush1.bf16.msra.mxu0 %v25514_v57  ;;  %19455 = vmatpush1.bf16.msra.mxu1 %v25504_v59 }
0x120b   :  { %19361 = vmatprep.subr.bf16.mxu0 %v25633_v48  ;;  %19457 = vmatprep.subr.bf16.mxu1 %v25602_v0 }
0x128b   :  { %v6960_v23 = vpop.f32.mrb[54].mxu1 }
0x128c   :  { %v6961_v6 = vpop.f32.mrb[55].mxu1 }
0x128f   :  { %v7794_v39 = vpop.f32.mrb[28].mxu0 }
0x1290   :  { %v7795_v4 = vpop.f32.mrb[29].mxu0  ;;  %v25634_v39 = vld [vmem:[#allocation13_spill] sm:$0xff] }
0x1293   :  { %v7117_v16 = vpop.f32.mrb[56].mxu1 }
0x1294   :  { %v7118_v17 = vpop.f32.mrb[57].mxu1 }
0x129f   :  { %v7904_v13 = vpop.f32.mrb[30].mxu0 }
0x12a0   :  { %v7905_v38 = vpop.f32.mrb[31].mxu0 }
0x12a3   :  { %v7228_v49 = vpop.f32.mrb[58].mxu1 }
0x12a4   :  { %v7229_v11 = vpop.f32.mrb[59].mxu1 }
0x12af   :  { %v8000_v58 = vpop.f32.mrb[32].mxu0 }
0x12b0   :  { %v8001_v56 = vpop.f32.mrb[33].mxu0 }
0x12b3   :  { %v7325_v15 = vpop.f32.mrb[60].mxu1 }
0x12b4   :  { %v7326_v21 = vpop.f32.mrb[61].mxu1 }
0x12bf   :  { %v8127_v60 = vpop.f32.mrb[34].mxu0 }
0x12c0   :  { %v8128_v59 = vpop.f32.mrb[35].mxu0 }
0x12c3   :  { %v7450_v53 = vpop.f32.mrb[62].mxu1 }
0x12c4   :  { %v7451_v48 = vpop.f32.mrb[63].mxu1 }
0x12cf   :  { %v7536_v43 = vpop.f32.mrb[6].mxu1  ;;  %v8220_v0 = vpop.f32.mrb[36].mxu0 }
0x12d0   :  { %v7538_v23 = vpop.f32.mrb[7].mxu1  ;;  %v8221_v6 = vpop.f32.mrb[37].mxu0  ;;  %v20678_v56 = vadd.f32 %v7536_v43, %v25577_v25 }
0x12d1   :  { %v20679_v4 = vadd.f32 %v7538_v23, %v25634_v39 }
0x12d2   :  { %v17881_v15 = vmul.f32 -1.442695, %v20678_v56 }
0x12d3   :  { %21153 = vtanh.f32 %v20679_v4  ;;  %v7543_v17 = vpop.f32.mrb[64].mxu1  ;;  %v17882_v43 = vmul.f32 -1.442695, %v20679_v4 }
0x12d4   :  { %v7544_v13 = vpop.f32.mrb[65].mxu1  ;;  %21155 = vpow2.f32 %v17881_v15 }
0x12dd   :  { %v21154_v38 = vpop.eup %21153 }
0x12de   :  { %8247 = vrot.lane.b32.xlu0 %v21154_v38, %s21376_s23  ;;  %v21156_v60 = vpop.eup %21155 }
0x12df   :  { %v8238_v21 = vadd.f32 1.0, %v21156_v60 }
0x12e1   :  { %21157 = vrcp.f32 %v8238_v21  ;;  %v25635_v21 = vld [vmem:[#allocation46_spill] sm:$0xff] }
0x12eb   :  { %v21158_v53 = vpop.eup %21157 }
0x12ec   :  { %v8245_v58 = vmul.f32 %v21158_v53, %v23557_v62 }
0x1350   :  { %v8248_v59 = vpop.permute.xlu0 %8247 }
0x1351   :  { %v8250_v0 = vmul.f32 %v21158_v53, %v8248_v59  ;;  %v25636_v53 = vld [vmem:[#allocation47_spill] sm:$0xff]  ;;  %v25637_v59 = vld [vmem:[#allocation34_spill] sm:$0xff] }
0x1353   :  { %8252 = vrot.lane.b32.xlu1 %v8250_v0, %s21376_s23  ;;  %v25638_v0 = vld [vmem:[#allocation37_spill] sm:$0xff] }
0x13c5   :  { %v8253_v16 = vpop.permute.xlu1 %8252 }
0x13c6   :  { %v23795_v11 = vadd.f32 %v8253_v16, %v8245_v58  ;;  %v25639_v58 = vld [vmem:[#allocation49_spill] sm:$0xff]  ;;  %v25640_v16 = vld [vmem:[#allocation48_spill] sm:$0xff] }
0x13c8   :  { %21159 = vtanh.f32 %v23795_v11 }
0x13c9   :  { %21161 = vpow2.f32 %v17882_v43  ;;  %v25642_v43 = vld [vmem:[#allocation36_spill] sm:$0xff] }
0x13d2   :  { %v21160_v49 = vpop.eup %21159 }
0x13d3   :  { %8258 = vrot.lane.b32.xlu0 %v21160_v49, %s21376_s23  ;;  %v21162_v48 = vpop.eup %21161  ;;  %v25641_v49 = vld [vmem:[#allocation85_spill] sm:$0xff] }
0x13d4   :  { %v8239_v23 = vadd.f32 1.0, %v21162_v48  ;;  %v25643_v48 = vld [vmem:[#allocation65_spill] sm:$0xff] }
0x13d6   :  { %21163 = vrcp.f32 %v8239_v23  ;;  %v25644_v23 = vld [vmem:[#allocation50_spill] sm:$0xff] }
0x13e0   :  { %v21164_v6 = vpop.eup %21163 }
0x1445   :  { %v8259_v17 = vpop.permute.xlu0 %8258 }
0x1446   :  { %v8261_v13 = vmul.f32 %v21164_v6, %v8259_v17  ;;  %v25645_v6 = vld [vmem:[#allocation51_spill] sm:$0xff]  ;;  %v25646_v17 = vld [vmem:[#allocation52_spill] sm:$0xff] }
0x1448   :  { %v8263_v38 = vsel %vm117_vm0, %v8261_v13, 0  ;;  %v25647_v13 = vld [vmem:[#allocation53_spill] sm:$0xff] }
0x1449   :  { %v23800_v56 = vand.u32 4294901760, %v8263_v38 }
0x144b   :  { %v23803_v62 = vsub.f32 %v8263_v38, %v23800_v56  ;;  %v25648_v38 = vld [vmem:[#allocation54_spill] sm:$0xff] }
0x144d   :  { %v23806_v15 = vand.u32 4294901760, %v23803_v62 }
0x144f   :  { %v8349_v4 = vsub.f32 %v23803_v62, %v23806_v15 }
0x1451   :  { %v23810_v60 = vand.u32 4294901760, %v8349_v4  ;;  %v25649_v4 = vld [vmem:[#allocation55_spill] sm:$0xff] }
0x1453   :  { %8351 = vmatmul.mubr.f32.vlgmr.msra.gmra.mrb[26].mxu0 %v23810_v60  ;;  %9033 = vmatmul.mubr.f32.vlgmr.msra.gmra.mrb[8].mxu1 %v23810_v60 }
0x1454   :  { %19363 = vmatpush1.bf16.msra.mxu0 %v25579_v36  ;;  %8501 = vmatprep.mubr.f32.mxu0 %v25351_v63 }
0x1455   :  { %19365 = vmatprep.subr.bf16.mxu0 %v25580_v50  ;;  %19459 = vmatpush1.bf16.msra.mxu1 %v25603_v35 }
0x1456   :  { %19461 = vmatprep.subr.bf16.mxu1 %v25604_v3  ;;  %9038 = vmatprep.mubr.f32.mxu1 %v25351_v63 }
0x1458   :  { %19367 = vmatpush1.bf16.msra.mxu0 %v25581_v2 }
0x1459   :  { %19369 = vmatprep.subr.bf16.mxu0 %v25582_v28  ;;  %19463 = vmatpush1.bf16.msra.mxu1 %v25605_v1 }
0x145a   :  { %19465 = vmatprep.subr.bf16.mxu1 %v25606_v26 }
0x145c   :  { %19371 = vmatpush1.bf16.msra.mxu0 %v25635_v21 }
0x145d   :  { %19373 = vmatprep.subr.bf16.mxu0 %v25636_v53  ;;  %19467 = vmatpush1.bf16.msra.mxu1 %v25637_v59 }
0x145e   :  { %19469 = vmatprep.subr.bf16.mxu1 %v25638_v0 }
0x1460   :  { %19375 = vmatpush1.bf16.msra.mxu0 %v25639_v58  ;;  %v25667_v58 = vld [vmem:[#allocation75_spill] sm:$0xff] }
0x1461   :  { %19377 = vmatprep.subr.bf16.mxu0 %v25640_v16  ;;  %19471 = vmatpush1.bf16.msra.mxu1 %v25641_v49  ;;  %v25666_v49 = vld [vmem:[#allocation82_spill] sm:$0xff] }
0x1462   :  { %19473 = vmatprep.subr.bf16.mxu1 %v25642_v43  ;;  %v25657_v43 = vld [vmem:[#allocation62_spill] sm:$0xff] }
0x1463   :  { %8503 = vmatmul.mubr.f32.vlgmr.msra.gmra.mrb[26].mxu0 %v23800_v56 }
0x1464   :  { %19379 = vmatpush1.bf16.msra.mxu0 %v25643_v48  ;;  %8605 = vmatprep.mubr.f32.mxu0 %v25351_v63  ;;  %v25656_v48 = vld [vmem:[#allocation61_spill] sm:$0xff] }
0x1465   :  { %19381 = vmatprep.subr.bf16.mxu0 %v25644_v23  ;;  %v25655_v23 = vld [vmem:[#allocation60_spill] sm:$0xff] }
0x1468   :  { %19383 = vmatpush1.bf16.msra.mxu0 %v25645_v6  ;;  %v25654_v6 = vld [vmem:[#allocation59_spill] sm:$0xff] }
0x1469   :  { %19385 = vmatprep.subr.bf16.mxu0 %v25646_v17  ;;  %v25653_v17 = vld [vmem:[#allocation58_spill] sm:$0xff] }
0x146c   :  { %19387 = vmatpush1.bf16.msra.mxu0 %v25647_v13  ;;  %v25652_v13 = vld [vmem:[#allocation57_spill] sm:$0xff] }
0x146d   :  { %19389 = vmatprep.subr.bf16.mxu0 %v25648_v38  ;;  %v25651_v38 = vld [vmem:[#allocation66_spill] sm:$0xff] }
0x1470   :  { %19391 = vmatpush1.bf16.msra.mxu0 %v25649_v4  ;;  %v25650_v4 = vld [vmem:[#allocation56_spill] sm:$0xff] }
0x1471   :  { %19393 = vmatprep.subr.bf16.mxu0 %v25507_v20 }
0x1473   :  { %8608 = vmatmul.mubr.f32.vlgmr.msra.gmra.mrb[26].mxu0 %v23803_v62 }
0x1474   :  { %19395 = vmatpush1.bf16.msra.mxu0 %v25508_v22  ;;  %8694 = vmatprep.mubr.f32.mxu0 %v25351_v63 }
0x1475   :  { %19397 = vmatprep.subr.bf16.mxu0 %v25509_v12 }
0x1478   :  { %19399 = vmatpush1.bf16.msra.mxu0 %v25510_v27 }
0x1479   :  { %19401 = vmatprep.subr.bf16.mxu0 %v25511_v45 }
0x147c   :  { %19403 = vmatpush1.bf16.msra.mxu0 %v25512_v46 }
0x147d   :  { %19405 = vmatprep.subr.bf16.mxu0 %v25513_v31 }
0x1480   :  { %19407 = vmatpush1.bf16.msra.mxu0 %v25514_v57 }
0x1481   :  { %19409 = vmatprep.subr.bf16.mxu0 %v25650_v4  ;;  %v25665_v4 = vld [vmem:[#allocation96_spill] sm:$0xff] }
0x1483   :  { %8698 = vmatmul.mubr.f32.vlgmr.msra.gmra.mrb[26].mxu0 %v23806_v15 }
0x1484   :  { %19411 = vmatpush1.bf16.msra.mxu0 %v25651_v38  ;;  %8816 = vmatprep.mubr.f32.mxu0 %v25351_v63  ;;  %v25664_v38 = vld [vmem:[#allocation81_spill] sm:$0xff] }
0x1485   :  { %19413 = vmatprep.subr.bf16.mxu0 %v25652_v13  ;;  %v25663_v13 = vld [vmem:[#allocation35_spill] sm:$0xff] }
0x1488   :  { %19415 = vmatpush1.bf16.msra.mxu0 %v25653_v17  ;;  %v25662_v17 = vld [vmem:[#allocation29_spill] sm:$0xff] }
0x1489   :  { %19417 = vmatprep.subr.bf16.mxu0 %v25654_v6  ;;  %v25661_v6 = vld [vmem:[#allocation27_spill] sm:$0xff] }
0x148c   :  { %19419 = vmatpush1.bf16.msra.mxu0 %v25655_v23  ;;  %v25660_v23 = vld [vmem:[#allocation20_spill] sm:$0xff] }
0x148d   :  { %19421 = vmatprep.subr.bf16.mxu0 %v25656_v48  ;;  %v25659_v48 = vld [vmem:[#allocation80_spill] sm:$0xff] }
0x1490   :  { %19423 = vmatpush1.bf16.msra.mxu0 %v25657_v43  ;;  %v25658_v43 = vld [vmem:[#allocation77_spill] sm:$0xff] }
0x1491   :  { %19425 = vmatprep.subr.bf16.mxu0 %v25507_v20 }
0x1493   :  { %8818 = vmatmul.mubr.f32.vlgmr.msra.gmra.mrb[26].mxu0 %v23800_v56 }
0x1494   :  { %19427 = vmatpush1.bf16.msra.mxu0 %v25508_v22  ;;  %8904 = vmatprep.mubr.f32.mxu0 %v25351_v63 }
0x1495   :  { %19429 = vmatprep.subr.bf16.mxu0 %v25509_v12 }
0x1498   :  { %19431 = vmatpush1.bf16.msra.mxu0 %v25510_v27 }
0x1499   :  { %19433 = vmatprep.subr.bf16.mxu0 %v25511_v45 }
0x149c   :  { %19435 = vmatpush1.bf16.msra.mxu0 %v25512_v46 }
0x149d   :  { %19437 = vmatprep.subr.bf16.mxu0 %v25513_v31 }
0x14a0   :  { %19439 = vmatpush1.bf16.msra.mxu0 %v25514_v57 }
0x14a1   :  { %19537 = vmatprep.subr.bf16.mxu0 %v22596_v55 }
0x14a3   :  { %8906 = vmatmul.mubr.f32.vlgmr.msra.gmra.mrb[26].mxu0 %v23800_v56 }
0x14a4   :  { %19539 = vmatpush1.bf16.msra.mxu0 %v25493_v34  ;;  %9711 = vmatprep.mubr.f32.mxu0 %v25351_v63 }
0x14a5   :  { %19541 = vmatprep.subr.bf16.mxu0 %v25495_v7 }
0x14a8   :  { %19543 = vmatpush1.bf16.msra.mxu0 %v25612_v30 }
0x14a9   :  { %19545 = vmatprep.subr.bf16.mxu0 %v25613_v8 }
0x14ac   :  { %19547 = vmatpush1.bf16.msra.mxu0 %v25614_v10 }
0x14ad   :  { %19549 = vmatprep.subr.bf16.mxu0 %v25615_v29 }
0x14b0   :  { %19551 = vmatpush1.bf16.msra.mxu0 %v25616_v9 }
0x14b1   :  { %19553 = vmatprep.subr.bf16.mxu0 %v25658_v43 }
0x14b3   :  { %9717 = vmatmul.mubr.f32.vlgmr.msra.gmra.mrb[38].mxu0 %v23810_v60 }
0x14b4   :  { %19555 = vmatpush1.bf16.msra.mxu0 %v25659_v48  ;;  %9720 = vmatprep.mubr.f32.mxu0 %v25351_v63 }
0x14b5   :  { %19557 = vmatprep.subr.bf16.mxu0 %v25660_v23 }
0x14b8   :  { %19559 = vmatpush1.bf16.msra.mxu0 %v25661_v6 }
0x14b9   :  { %19561 = vmatprep.subr.bf16.mxu0 %v25662_v17 }
0x14bc   :  { %19563 = vmatpush1.bf16.msra.mxu0 %v25663_v13 }
0x14bd   :  { %19565 = vmatprep.subr.bf16.mxu0 %v25664_v38 }
0x14c0   :  { %19567 = vmatpush1.bf16.msra.mxu0 %v25665_v4 }
0x14c1   :  { %19569 = vmatprep.subr.bf16.mxu0 %v25666_v49 }
0x1576   :  { %v8907_v43 = vpop.f32.mrb[26].mxu0 }
0x1577   :  { %v8909_v60 = vpop.f32.mrb[27].mxu0  ;;  %v8912_v17 = vadd.f32 %v8907_v43, %v25667_v58 }
0x1578   :  { %v8913_v48 = vadd.f32 %v8909_v60, %v25552_v54 }
0x1579   :  { %v17883_v0 = vmul.f32 -1.442695, %v8912_v17 }
0x157a   :  { %21165 = vtanh.f32 %v8913_v48  ;;  %v17884_v43 = vmul.f32 -1.442695, %v8913_v48  ;;  %v25668_v48 = vld [vmem:[#allocation18_spill] sm:$0xff] }
0x157b   :  { %21167 = vpow2.f32 %v17883_v0 }
0x1584   :  { %v21166_v16 = vpop.eup %21165 }
0x1585   :  { %8929 = vrot.lane.b32.xlu1 %v21166_v16, %s21376_s23  ;;  %v21168_v13 = vpop.eup %21167 }
0x1586   :  { %v9718_v23 = vpop.f32.mrb[38].mxu0  ;;  %v8920_v38 = vadd.f32 1.0, %v21168_v13 }
0x1587   :  { %v9719_v6 = vpop.f32.mrb[39].mxu0 }
0x1588   :  { %21169 = vrcp.f32 %v8920_v38 }
0x1592   :  { %v21170_v4 = vpop.eup %21169 }
0x1593   :  { %v8927_v60 = vmul.f32 %v21170_v4, %v23659_v61 }
0x15f7   :  { %v8930_v59 = vpop.permute.xlu1 %8929 }
0x15f8   :  { %v8932_v49 = vmul.f32 %v21170_v4, %v8930_v59 }
0x15fa   :  { %8934 = vrot.lane.b32.xlu0 %v8932_v49, %s21376_s23 }
0x166c   :  { %v8935_v54 = vpop.permute.xlu0 %8934 }
0x166d   :  { %v23897_v53 = vadd.f32 %v8935_v54, %v8927_v60  ;;  %v25669_v60 = vld [vmem:[#allocation24_spill] sm:$0xff] }
0x166f   :  { %21171 = vtanh.f32 %v23897_v53 }
0x1670   :  { %21173 = vpow2.f32 %v17884_v43  ;;  %v25671_v43 = vld [vmem:[#allocation32_spill] sm:$0xff] }
0x1679   :  { %v21172_v16 = vpop.eup %21171 }
0x167a   :  { %8940 = vrot.lane.b32.xlu1 %v21172_v16, %s21376_s23  ;;  %v21174_v0 = vpop.eup %21173  ;;  %v25670_v16 = vld [vmem:[#allocation26_spill] sm:$0xff] }
0x167b   :  { %v8921_v23 = vadd.f32 1.0, %v21174_v0  ;;  %v25673_v0 = vld [vmem:[#allocation40_spill] sm:$0xff] }
0x167d   :  { %21175 = vrcp.f32 %v8921_v23  ;;  %v25674_v23 = vld [vmem:[#allocation41_spill] sm:$0xff] }
0x1687   :  { %v21176_v6 = vpop.eup %21175 }
0x16ec   :  { %v8941_v17 = vpop.permute.xlu1 %8940 }
0x16ed   :  { %v8943_v59 = vmul.f32 %v21176_v6, %v8941_v17  ;;  %v25675_v6 = vld [vmem:[#allocation98_spill] sm:$0xff]  ;;  %v25676_v17 = vld [vmem:[#allocation99_spill] sm:$0xff] }
0x16ef   :  { %v8945_v49 = vsel %vm117_vm0, %v8943_v59, 0  ;;  %v25677_v59 = vld [vmem:[#allocation100_spill] sm:$0xff] }
0x16f0   :  { %v23902_v13 = vand.u32 4294901760, %v8945_v49 }
0x16f2   :  { %v9040_v54 = vsub.f32 %v8945_v49, %v23902_v13  ;;  %v25678_v49 = vld [vmem:[#allocation101_spill] sm:$0xff] }
0x16f4   :  { %v23905_v61 = vand.u32 4294901760, %v9040_v54 }
0x16f6   :  { %v9042_v38 = vsub.f32 %v9040_v54, %v23905_v61 }
0x16f8   :  { %v9043_v4 = vand.u32 4294901760, %v9042_v38  ;;  %v25680_v38 = vld [vmem:[#allocation103_spill] sm:$0xff] }
0x16fa   :  { %9044 = vmatmul.mubr.f32.gmra.mrb[66].mxu1 %v9043_v4  ;;  %9726 = vmatmul.mubr.f32.gmra.mrb[40].mxu0 %v9043_v4  ;;  %v25681_v4 = vld [vmem:[#allocation104_spill] sm:$0xff] }
0x16fb   :  { %9192 = vmatprep.mubr.f32.mxu1 %v25351_v63  ;;  %9876 = vmatprep.mubr.f32.mxu0 %v25351_v63 }
0x16fe   :  { %9194 = vmatmul.mubr.f32.vlgmr.msra.gmra.mrb[8].mxu1 %v23800_v56  ;;  %9878 = vmatmul.mubr.f32.vlgmr.msra.gmra.mrb[42].mxu0 %v23800_v56 }
0x16ff   :  { %19475 = vmatpush1.bf16.msra.mxu1 %v23026_v40  ;;  %19571 = vmatpush1.bf16.msra.mxu0 %v23031_v51 }
0x1700   :  { %9199 = vmatprep.mubr.f32.mxu1 %v25351_v63  ;;  %19477 = vmatprep.subr.bf16.mxu1 %v23035_v37 }
0x1701   :  { %9881 = vmatprep.mubr.f32.mxu0 %v25351_v63  ;;  %19573 = vmatprep.subr.bf16.mxu0 %v23042_v42 }
0x1702   :  { %9201 = vmatmul.mubr.f32.gmra.mrb[68].mxu1 %v23902_v13  ;;  %9883 = vmatmul.mubr.f32.gmra.mrb[40].mxu0 %v23902_v13 }
0x1703   :  { %19479 = vmatpush1.bf16.msra.mxu1 %v23046_v41  ;;  %19575 = vmatpush1.bf16.msra.mxu0 %v25562_v52 }
0x1704   :  { %19481 = vmatprep.subr.bf16.mxu1 %v23054_v14  ;;  %19577 = vmatprep.subr.bf16.mxu0 %v25563_v32 }
0x1705   :  { %9301 = vmatprep.mubr.f32.mxu1 %v25351_v63  ;;  %9985 = vmatprep.mubr.f32.mxu0 %v25351_v63 }
0x1707   :  { %19483 = vmatpush1.bf16.msra.mxu1 %v23062_v18  ;;  %19579 = vmatpush1.bf16.msra.mxu0 %v25564_v33 }
0x1708   :  { %19485 = vmatprep.subr.bf16.mxu1 %v23071_v24  ;;  %19581 = vmatprep.subr.bf16.mxu0 %v25565_v19 }
0x170b   :  { %19487 = vmatpush1.bf16.msra.mxu1 %v23079_v44  ;;  %19583 = vmatpush1.bf16.msra.mxu0 %v25566_v5 }
0x170c   :  { %19489 = vmatprep.subr.bf16.mxu1 %v25491_v47  ;;  %19585 = vmatprep.subr.bf16.mxu0 %v22596_v55 }
0x170e   :  { %9304 = vmatmul.mubr.f32.vlgmr.msra.gmra.mrb[8].mxu1 %v23803_v62  ;;  %9988 = vmatmul.mubr.f32.vlgmr.msra.gmra.mrb[44].mxu0 %v23803_v62  ;;  %v25672_v62 = vld [vmem:[#allocation33_spill] sm:$0xff] }
0x170f   :  { %19491 = vmatpush1.bf16.msra.mxu1 %v25668_v48  ;;  %19587 = vmatpush1.bf16.msra.mxu0 %v25493_v34 }
0x1710   :  { %9309 = vmatprep.mubr.f32.mxu1 %v25351_v63  ;;  %9991 = vmatprep.mubr.f32.mxu0 %v25351_v63 }
0x1711   :  { %19493 = vmatprep.subr.bf16.mxu1 %v25669_v60  ;;  %19589 = vmatprep.subr.bf16.mxu0 %v25495_v7 }
0x1712   :  { %9312 = vmatmul.mubr.f32.gmra.mrb[70].mxu1 %v9040_v54  ;;  %9994 = vmatmul.mubr.f32.gmra.mrb[40].mxu0 %v9040_v54  ;;  %v25679_v54 = vld [vmem:[#allocation102_spill] sm:$0xff] }
0x1713   :  { %19495 = vmatpush1.bf16.msra.mxu1 %v25670_v16  ;;  %19591 = vmatpush1.bf16.msra.mxu0 %v25612_v30 }
0x1714   :  { %19497 = vmatprep.subr.bf16.mxu1 %v25671_v43  ;;  %19593 = vmatprep.subr.bf16.mxu0 %v25613_v8 }
0x1715   :  { %9396 = vmatprep.mubr.f32.mxu1 %v25351_v63  ;;  %10080 = vmatprep.mubr.f32.mxu0 %v25351_v63 }
0x1717   :  { %19499 = vmatpush1.bf16.msra.mxu1 %v25672_v62  ;;  %19595 = vmatpush1.bf16.msra.mxu0 %v25614_v10 }
0x1718   :  { %19501 = vmatprep.subr.bf16.mxu1 %v25673_v0  ;;  %19597 = vmatprep.subr.bf16.mxu0 %v25615_v29 }
0x171b   :  { %19503 = vmatpush1.bf16.msra.mxu1 %v25674_v23  ;;  %19599 = vmatpush1.bf16.msra.mxu0 %v25616_v9 }
0x171c   :  { %19505 = vmatprep.subr.bf16.mxu1 %v25675_v6  ;;  %19601 = vmatprep.subr.bf16.mxu0 %v25676_v17  ;;  %v25682_v17 = vld [vmem:[#allocation105_spill] sm:$0xff]  ;;  %v25688_v6 = vld [vmem:[#allocation111_spill] sm:$0xff] }
0x171e   :  { %9400 = vmatmul.mubr.f32.vlgmr.msra.gmra.mrb[8].mxu1 %v23806_v15  ;;  %10084 = vmatmul.mubr.f32.vlgmr.msra.gmra.mrb[46].mxu0 %v23806_v15  ;;  %v25683_v15 = vld [vmem:[#allocation106_spill] sm:$0xff] }
0x171f   :  { %19507 = vmatpush1.bf16.msra.mxu1 %v25677_v59  ;;  %19603 = vmatpush1.bf16.msra.mxu0 %v25678_v49  ;;  %v25684_v59 = vld [vmem:[#allocation107_spill] sm:$0xff]  ;;  %v25685_v49 = vld [vmem:[#allocation108_spill] sm:$0xff] }
0x1720   :  { %9405 = vmatprep.mubr.f32.mxu1 %v25351_v63  ;;  %10087 = vmatprep.mubr.f32.mxu0 %v25351_v63 }
0x1721   :  { %19509 = vmatprep.subr.bf16.mxu1 %v25679_v54  ;;  %19605 = vmatprep.subr.bf16.mxu0 %v25680_v38  ;;  %v25686_v54 = vld [vmem:[#allocation109_spill] sm:$0xff]  ;;  %v25687_v38 = vld [vmem:[#allocation110_spill] sm:$0xff] }
0x1722   :  { %9409 = vmatmul.mubr.f32.gmra.mrb[72].mxu1 %v23905_v61  ;;  %10091 = vmatmul.mubr.f32.gmra.mrb[40].mxu0 %v23905_v61  ;;  %v25689_v61 = vld [vmem:[#allocation112_spill] sm:$0xff] }
0x1723   :  { %19511 = vmatpush1.bf16.msra.mxu1 %v25681_v4  ;;  %19607 = vmatpush1.bf16.msra.mxu0 %v25682_v17  ;;  %v25690_v4 = vld [vmem:[#allocation113_spill] sm:$0xff] }
0x1724   :  { %19513 = vmatprep.subr.bf16.mxu1 %v25683_v15  ;;  %19609 = vmatprep.subr.bf16.mxu0 %v25684_v59 }
0x1725   :  { %9525 = vmatprep.mubr.f32.mxu1 %v25351_v63  ;;  %10209 = vmatprep.mubr.f32.mxu0 %v25351_v63 }
0x1727   :  { %19515 = vmatpush1.bf16.msra.mxu1 %v25685_v49  ;;  %19611 = vmatpush1.bf16.msra.mxu0 %v25686_v54 }
0x1728   :  { %19517 = vmatprep.subr.bf16.mxu1 %v25687_v38  ;;  %19613 = vmatprep.subr.bf16.mxu0 %v25688_v6 }
0x172b   :  { %19519 = vmatpush1.bf16.msra.mxu1 %v25689_v61  ;;  %19615 = vmatpush1.bf16.msra.mxu0 %v25690_v4 }
0x172c   :  { %19521 = vmatprep.subr.bf16.mxu1 %v25491_v47  ;;  %19617 = vmatprep.subr.bf16.mxu0 %v22596_v55 }
0x172e   :  { %9527 = vmatmul.mubr.f32.vlgmr.msra.gmra.mrb[8].mxu1 %v23800_v56  ;;  %10211 = vmatmul.mubr.f32.vlgmr.msra.gmra.mrb[48].mxu0 %v23800_v56 }
0x172f   :  { %19523 = vmatpush1.bf16.msra.mxu1 %v25668_v48  ;;  %19619 = vmatpush1.bf16.msra.mxu0 %v25493_v34 }
0x1730   :  { %9532 = vmatprep.mubr.f32.mxu1 %v25351_v63  ;;  %10214 = vmatprep.mubr.f32.mxu0 %v25351_v63 }
0x1731   :  { %19525 = vmatprep.subr.bf16.mxu1 %v25669_v60  ;;  %19621 = vmatprep.subr.bf16.mxu0 %v25495_v7 }
0x1732   :  { %9534 = vmatmul.mubr.f32.gmra.mrb[74].mxu1 %v23902_v13  ;;  %10216 = vmatmul.mubr.f32.gmra.mrb[40].mxu0 %v23902_v13 }
0x1733   :  { %19527 = vmatpush1.bf16.msra.mxu1 %v25670_v16  ;;  %19623 = vmatpush1.bf16.msra.mxu0 %v25612_v30 }
0x1734   :  { %19529 = vmatprep.subr.bf16.mxu1 %v25671_v43  ;;  %19625 = vmatprep.subr.bf16.mxu0 %v25613_v8 }
0x1735   :  { %9618 = vmatprep.mubr.f32.mxu1 %v25351_v63  ;;  %10302 = vmatprep.mubr.f32.mxu0 %v25351_v63 }
0x1737   :  { %19531 = vmatpush1.bf16.msra.mxu1 %v25672_v62  ;;  %19627 = vmatpush1.bf16.msra.mxu0 %v25614_v10 }
0x1738   :  { %19533 = vmatprep.subr.bf16.mxu1 %v25673_v0  ;;  %19629 = vmatprep.subr.bf16.mxu0 %v25615_v29 }
0x173b   :  { %19535 = vmatpush1.bf16.msra.mxu1 %v25674_v23  ;;  %19631 = vmatpush1.bf16.msra.mxu0 %v25616_v9 }
0x173c   :  { %19633 = vmatprep.subr.bf16.mxu0 %v25507_v20  ;;  %19729 = vmatprep.subr.bf16.mxu1 %v25491_v47 }
0x173e   :  { %9620 = vmatmul.mubr.f32.vlgmr.msra.gmra.mrb[8].mxu1 %v23800_v56  ;;  %10304 = vmatmul.mubr.f32.vlgmr.msra.gmra.mrb[50].mxu0 %v23800_v56  ;;  %v25691_v56 = vld [vmem:[#allocation42_spill] sm:$0xff] }
0x173f   :  { %9625 = vmatprep.mubr.f32.mxu1 %v25351_v63  ;;  %10307 = vmatprep.mubr.f32.mxu0 %v25351_v63 }
0x1740   :  { %19635 = vmatpush1.bf16.msra.mxu0 %v25508_v22  ;;  %19731 = vmatpush1.bf16.msra.mxu1 %v25668_v48 }
0x1741   :  { %19637 = vmatprep.subr.bf16.mxu0 %v25509_v12  ;;  %19733 = vmatprep.subr.bf16.mxu1 %v25669_v60 }
0x1742   :  { %9627 = vmatmul.mubr.f32.gmra.mrb[76].mxu1 %v23902_v13  ;;  %10309 = vmatmul.mubr.f32.gmra.mrb[40].mxu0 %v23902_v13  ;;  %v25692_v13 = vld [vmem:[#allocation76_spill] sm:$0xff] }
0x1743   :  { %10430 = vmatprep.mubr.f32.mxu0 %v25351_v63  ;;  %11112 = vmatprep.mubr.f32.mxu1 %v25351_v63 }
0x1744   :  { %19639 = vmatpush1.bf16.msra.mxu0 %v25510_v27  ;;  %19735 = vmatpush1.bf16.msra.mxu1 %v25670_v16 }
0x1745   :  { %19641 = vmatprep.subr.bf16.mxu0 %v25511_v45  ;;  %19737 = vmatprep.subr.bf16.mxu1 %v25671_v43 }
0x1748   :  { %19643 = vmatpush1.bf16.msra.mxu0 %v25512_v46  ;;  %19739 = vmatpush1.bf16.msra.mxu1 %v25672_v62 }
0x1749   :  { %19645 = vmatprep.subr.bf16.mxu0 %v25513_v31  ;;  %19741 = vmatprep.subr.bf16.mxu1 %v25673_v0 }
0x174c   :  { %19647 = vmatpush1.bf16.msra.mxu0 %v25514_v57  ;;  %19743 = vmatpush1.bf16.msra.mxu1 %v25674_v23 }
0x174d   :  { %19649 = vmatprep.subr.bf16.mxu0 %v25691_v56  ;;  %19745 = vmatprep.subr.bf16.mxu1 %v25692_v13 }
0x17cd   :  { %v9045_v4 = vpop.f32.mrb[66].mxu1 }
0x17ce   :  { %v9046_v61 = vpop.f32.mrb[67].mxu1 }
0x17d1   :  { %v9879_v6 = vpop.f32.mrb[42].mxu0 }
0x17d2   :  { %v9880_v38 = vpop.f32.mrb[43].mxu0 }
0x17d5   :  { %v9202_v54 = vpop.f32.mrb[68].mxu1 }
0x17d6   :  { %v9203_v49 = vpop.f32.mrb[69].mxu1 }
0x17e1   :  { %v9989_v59 = vpop.f32.mrb[44].mxu0 }
0x17e2   :  { %v9990_v15 = vpop.f32.mrb[45].mxu0 }
0x17e5   :  { %v9313_v17 = vpop.f32.mrb[70].mxu1 }
0x17e6   :  { %v9314_v62 = vpop.f32.mrb[71].mxu1 }
0x17f1   :  { %v10085_v43 = vpop.f32.mrb[46].mxu0 }
0x17f2   :  { %v10086_v0 = vpop.f32.mrb[47].mxu0 }
0x17f5   :  { %v9410_v16 = vpop.f32.mrb[72].mxu1 }
0x17f6   :  { %v9411_v60 = vpop.f32.mrb[73].mxu1 }
0x1801   :  { %v10212_v48 = vpop.f32.mrb[48].mxu0 }
0x1802   :  { %v10213_v23 = vpop.f32.mrb[49].mxu0 }
0x1805   :  { %v9535_v47 = vpop.f32.mrb[74].mxu1 }
0x1806   :  { %v9536_v56 = vpop.f32.mrb[75].mxu1 }
0x1811   :  { %v9621_v5 = vpop.f32.mrb[8].mxu1  ;;  %v10305_v13 = vpop.f32.mrb[50].mxu0 }
0x1812   :  { %v9623_v4 = vpop.f32.mrb[9].mxu1  ;;  %v10306_v61 = vpop.f32.mrb[51].mxu0  ;;  %v20680_v43 = vadd.f32 %v9621_v5, %v25577_v25 }
0x1813   :  { %v20681_v6 = vadd.f32 %v9623_v4, %v25634_v39 }
0x1814   :  { %v17885_v16 = vmul.f32 -1.442695, %v20680_v43 }
0x1815   :  { %21177 = vtanh.f32 %v20681_v6  ;;  %v9628_v49 = vpop.f32.mrb[76].mxu1  ;;  %v17886_v5 = vmul.f32 -1.442695, %v20681_v6 }
0x1816   :  { %v9629_v59 = vpop.f32.mrb[77].mxu1  ;;  %21179 = vpow2.f32 %v17885_v16 }
0x181f   :  { %v21178_v54 = vpop.eup %21177 }
0x1820   :  { %10332 = vrot.lane.b32.xlu0 %v21178_v54, %s21376_s23  ;;  %v21180_v48 = vpop.eup %21179 }
0x1821   :  { %v10323_v60 = vadd.f32 1.0, %v21180_v48  ;;  %v25693_v48 = vld [vmem:[#allocation47_spill] sm:$0xff] }
0x1823   :  { %21181 = vrcp.f32 %v10323_v60  ;;  %v25694_v60 = vld [vmem:[#allocation34_spill] sm:$0xff] }
0x182d   :  { %v21182_v47 = vpop.eup %21181 }
0x182e   :  { %v10330_v23 = vmul.f32 %v21182_v47, %v23795_v11 }
0x1892   :  { %v10333_v62 = vpop.permute.xlu0 %10332 }
0x1893   :  { %v10335_v0 = vmul.f32 %v21182_v47, %v10333_v62  ;;  %v25695_v47 = vld [vmem:[#allocation37_spill] sm:$0xff] }
0x1894   :  { %v25696_v62 = vld [vmem:[#allocation49_spill] sm:$0xff] }
0x1895   :  { %10337 = vrot.lane.b32.xlu1 %v10335_v0, %s21376_s23  ;;  %v25697_v0 = vld [vmem:[#allocation48_spill] sm:$0xff] }
0x1907   :  { %v10338_v17 = vpop.permute.xlu1 %10337 }
0x1908   :  { %v24033_v38 = vadd.f32 %v10338_v17, %v10330_v23  ;;  %v25698_v23 = vld [vmem:[#allocation85_spill] sm:$0xff]  ;;  %v25699_v17 = vld [vmem:[#allocation36_spill] sm:$0xff] }
0x190a   :  { %21183 = vtanh.f32 %v24033_v38 }
0x190b   :  { %21185 = vpow2.f32 %v17886_v5  ;;  %v25701_v5 = vld [vmem:[#allocation50_spill] sm:$0xff] }
0x1914   :  { %v21184_v15 = vpop.eup %21183 }
0x1915   :  { %10343 = vrot.lane.b32.xlu0 %v21184_v15, %s21376_s23  ;;  %v21186_v56 = vpop.eup %21185  ;;  %v25700_v15 = vld [vmem:[#allocation65_spill] sm:$0xff] }
0x1916   :  { %v10324_v13 = vadd.f32 1.0, %v21186_v56  ;;  %v25702_v56 = vld [vmem:[#allocation51_spill] sm:$0xff] }
0x1918   :  { %21187 = vrcp.f32 %v10324_v13  ;;  %v25703_v13 = vld [vmem:[#allocation52_spill] sm:$0xff] }
0x1922   :  { %v21188_v4 = vpop.eup %21187 }
0x1987   :  { %v10344_v61 = vpop.permute.xlu0 %10343 }
0x1988   :  { %v10346_v49 = vmul.f32 %v21188_v4, %v10344_v61  ;;  %v25704_v4 = vld [vmem:[#allocation53_spill] sm:$0xff]  ;;  %v25705_v61 = vld [vmem:[#allocation54_spill] sm:$0xff] }
0x198a   :  { %v10348_v59 = vsel %vm117_vm0, %v10346_v49, 0  ;;  %v25706_v49 = vld [vmem:[#allocation55_spill] sm:$0xff] }
0x198b   :  { %v24038_v54 = vand.u32 4294901760, %v10348_v59 }
0x198d   :  { %v24041_v11 = vsub.f32 %v10348_v59, %v24038_v54  ;;  %v25707_v59 = vld [vmem:[#allocation56_spill] sm:$0xff] }
0x198f   :  { %v24044_v43 = vand.u32 4294901760, %v24041_v11 }
0x1991   :  { %v10434_v6 = vsub.f32 %v24041_v11, %v24044_v43 }
0x1993   :  { %v24048_v16 = vand.u32 4294901760, %v10434_v6  ;;  %v25708_v6 = vld [vmem:[#allocation66_spill] sm:$0xff] }
0x1995   :  { %10436 = vmatmul.mubr.f32.vlgmr.msra.gmra.mrb[40].mxu0 %v24048_v16  ;;  %11118 = vmatmul.mubr.f32.vlgmr.msra.gmra.mrb[10].mxu1 %v24048_v16 }
0x1996   :  { %19651 = vmatpush1.bf16.msra.mxu0 %v25579_v36  ;;  %10586 = vmatprep.mubr.f32.mxu0 %v25351_v63 }
0x1997   :  { %19653 = vmatprep.subr.bf16.mxu0 %v25580_v50  ;;  %19747 = vmatpush1.bf16.msra.mxu1 %v25603_v35 }
0x1998   :  { %19749 = vmatprep.subr.bf16.mxu1 %v25604_v3  ;;  %11123 = vmatprep.mubr.f32.mxu1 %v25351_v63 }
0x199a   :  { %19655 = vmatpush1.bf16.msra.mxu0 %v25581_v2 }
0x199b   :  { %19657 = vmatprep.subr.bf16.mxu0 %v25582_v28  ;;  %19751 = vmatpush1.bf16.msra.mxu1 %v25605_v1 }
0x199c   :  { %19753 = vmatprep.subr.bf16.mxu1 %v25606_v26 }
0x199e   :  { %19659 = vmatpush1.bf16.msra.mxu0 %v25635_v21 }
0x199f   :  { %19661 = vmatprep.subr.bf16.mxu0 %v25693_v48  ;;  %19755 = vmatpush1.bf16.msra.mxu1 %v25694_v60 }
0x19a0   :  { %19757 = vmatprep.subr.bf16.mxu1 %v25695_v47 }
0x19a2   :  { %19663 = vmatpush1.bf16.msra.mxu0 %v25696_v62 }
0x19a3   :  { %19665 = vmatprep.subr.bf16.mxu0 %v25697_v0  ;;  %19759 = vmatpush1.bf16.msra.mxu1 %v25698_v23 }
0x19a4   :  { %19761 = vmatprep.subr.bf16.mxu1 %v25699_v17  ;;  %v25724_v17 = vld [vmem:[#allocation74_spill] sm:$0xff] }
0x19a5   :  { %10588 = vmatmul.mubr.f32.vlgmr.msra.gmra.mrb[40].mxu0 %v24038_v54 }
0x19a6   :  { %19667 = vmatpush1.bf16.msra.mxu0 %v25700_v15  ;;  %10690 = vmatprep.mubr.f32.mxu0 %v25351_v63  ;;  %v25723_v15 = vld [vmem:[#allocation82_spill] sm:$0xff] }
0x19a7   :  { %19669 = vmatprep.subr.bf16.mxu0 %v25701_v5  ;;  %v25714_v5 = vld [vmem:[#allocation62_spill] sm:$0xff] }
0x19aa   :  { %19671 = vmatpush1.bf16.msra.mxu0 %v25702_v56  ;;  %v25713_v56 = vld [vmem:[#allocation61_spill] sm:$0xff] }
0x19ab   :  { %19673 = vmatprep.subr.bf16.mxu0 %v25703_v13  ;;  %v25712_v13 = vld [vmem:[#allocation60_spill] sm:$0xff] }
0x19ae   :  { %19675 = vmatpush1.bf16.msra.mxu0 %v25704_v4  ;;  %v25711_v4 = vld [vmem:[#allocation59_spill] sm:$0xff] }
0x19af   :  { %19677 = vmatprep.subr.bf16.mxu0 %v25705_v61  ;;  %v25710_v61 = vld [vmem:[#allocation58_spill] sm:$0xff] }
0x19b2   :  { %19679 = vmatpush1.bf16.msra.mxu0 %v25706_v49  ;;  %v25709_v49 = vld [vmem:[#allocation57_spill] sm:$0xff] }
0x19b3   :  { %19681 = vmatprep.subr.bf16.mxu0 %v25507_v20 }
0x19b5   :  { %10693 = vmatmul.mubr.f32.vlgmr.msra.gmra.mrb[40].mxu0 %v24041_v11 }
0x19b6   :  { %19683 = vmatpush1.bf16.msra.mxu0 %v25508_v22  ;;  %10779 = vmatprep.mubr.f32.mxu0 %v25351_v63 }
0x19b7   :  { %19685 = vmatprep.subr.bf16.mxu0 %v25509_v12 }
0x19ba   :  { %19687 = vmatpush1.bf16.msra.mxu0 %v25510_v27 }
0x19bb   :  { %19689 = vmatprep.subr.bf16.mxu0 %v25511_v45 }
0x19be   :  { %19691 = vmatpush1.bf16.msra.mxu0 %v25512_v46 }
0x19bf   :  { %19693 = vmatprep.subr.bf16.mxu0 %v25513_v31 }
0x19c2   :  { %19695 = vmatpush1.bf16.msra.mxu0 %v25514_v57 }
0x19c3   :  { %19697 = vmatprep.subr.bf16.mxu0 %v25707_v59  ;;  %v25722_v59 = vld [vmem:[#allocation96_spill] sm:$0xff] }
0x19c5   :  { %10783 = vmatmul.mubr.f32.vlgmr.msra.gmra.mrb[40].mxu0 %v24044_v43 }
0x19c6   :  { %19699 = vmatpush1.bf16.msra.mxu0 %v25708_v6  ;;  %10901 = vmatprep.mubr.f32.mxu0 %v25351_v63  ;;  %v25721_v6 = vld [vmem:[#allocation81_spill] sm:$0xff] }
0x19c7   :  { %19701 = vmatprep.subr.bf16.mxu0 %v25709_v49  ;;  %v25720_v49 = vld [vmem:[#allocation35_spill] sm:$0xff] }
0x19ca   :  { %19703 = vmatpush1.bf16.msra.mxu0 %v25710_v61  ;;  %v25719_v61 = vld [vmem:[#allocation29_spill] sm:$0xff] }
0x19cb   :  { %19705 = vmatprep.subr.bf16.mxu0 %v25711_v4  ;;  %v25718_v4 = vld [vmem:[#allocation27_spill] sm:$0xff] }
0x19ce   :  { %19707 = vmatpush1.bf16.msra.mxu0 %v25712_v13  ;;  %v25717_v13 = vld [vmem:[#allocation20_spill] sm:$0xff] }
0x19cf   :  { %19709 = vmatprep.subr.bf16.mxu0 %v25713_v56  ;;  %v25716_v56 = vld [vmem:[#allocation80_spill] sm:$0xff] }
0x19d2   :  { %19711 = vmatpush1.bf16.msra.mxu0 %v25714_v5  ;;  %v25715_v5 = vld [vmem:[#allocation77_spill] sm:$0xff] }
0x19d3   :  { %19713 = vmatprep.subr.bf16.mxu0 %v25507_v20 }
0x19d5   :  { %10903 = vmatmul.mubr.f32.vlgmr.msra.gmra.mrb[40].mxu0 %v24038_v54 }
0x19d6   :  { %19715 = vmatpush1.bf16.msra.mxu0 %v25508_v22  ;;  %10989 = vmatprep.mubr.f32.mxu0 %v25351_v63 }
0x19d7   :  { %19717 = vmatprep.subr.bf16.mxu0 %v25509_v12 }
0x19da   :  { %19719 = vmatpush1.bf16.msra.mxu0 %v25510_v27 }
0x19db   :  { %19721 = vmatprep.subr.bf16.mxu0 %v25511_v45 }
0x19de   :  { %19723 = vmatpush1.bf16.msra.mxu0 %v25512_v46 }
0x19df   :  { %19725 = vmatprep.subr.bf16.mxu0 %v25513_v31 }
0x19e2   :  { %19727 = vmatpush1.bf16.msra.mxu0 %v25514_v57 }
0x19e3   :  { %19825 = vmatprep.subr.bf16.mxu0 %v22596_v55 }
0x19e5   :  { %10991 = vmatmul.mubr.f32.vlgmr.msra.gmra.mrb[40].mxu0 %v24038_v54 }
0x19e6   :  { %19827 = vmatpush1.bf16.msra.mxu0 %v25493_v34  ;;  %11796 = vmatprep.mubr.f32.mxu0 %v25351_v63 }
0x19e7   :  { %19829 = vmatprep.subr.bf16.mxu0 %v25495_v7 }
0x19ea   :  { %19831 = vmatpush1.bf16.msra.mxu0 %v25612_v30 }
0x19eb   :  { %19833 = vmatprep.subr.bf16.mxu0 %v25613_v8 }
0x19ee   :  { %19835 = vmatpush1.bf16.msra.mxu0 %v25614_v10 }
0x19ef   :  { %19837 = vmatprep.subr.bf16.mxu0 %v25615_v29 }
0x19f2   :  { %19839 = vmatpush1.bf16.msra.mxu0 %v25616_v9 }
0x19f3   :  { %19841 = vmatprep.subr.bf16.mxu0 %v25715_v5 }
0x19f5   :  { %11802 = vmatmul.mubr.f32.vlgmr.msra.gmra.mrb[52].mxu0 %v24048_v16 }
0x19f6   :  { %19843 = vmatpush1.bf16.msra.mxu0 %v25716_v56  ;;  %11805 = vmatprep.mubr.f32.mxu0 %v25351_v63 }
0x19f7   :  { %19845 = vmatprep.subr.bf16.mxu0 %v25717_v13 }
0x19fa   :  { %19847 = vmatpush1.bf16.msra.mxu0 %v25718_v4 }
0x19fb   :  { %19849 = vmatprep.subr.bf16.mxu0 %v25719_v61 }
0x19fe   :  { %19851 = vmatpush1.bf16.msra.mxu0 %v25720_v49 }
0x19ff   :  { %19853 = vmatprep.subr.bf16.mxu0 %v25721_v6 }
0x1a02   :  { %19855 = vmatpush1.bf16.msra.mxu0 %v25722_v59 }
0x1a03   :  { %19857 = vmatprep.subr.bf16.mxu0 %v25723_v15 }
0x1ab8   :  { %v10992_v5 = vpop.f32.mrb[40].mxu0 }
0x1ab9   :  { %v10994_v16 = vpop.f32.mrb[41].mxu0  ;;  %v10997_v61 = vadd.f32 %v10992_v5, %v25667_v58 }
0x1aba   :  { %v10998_v56 = vadd.f32 %v10994_v16, %v25724_v17 }
0x1abb   :  { %v17887_v0 = vmul.f32 -1.442695, %v10997_v61 }
0x1abc   :  { %21189 = vtanh.f32 %v10998_v56  ;;  %v17888_v5 = vmul.f32 -1.442695, %v10998_v56  ;;  %v25725_v56 = vld [vmem:[#allocation97_spill] sm:$0xff] }
0x1abd   :  { %21191 = vpow2.f32 %v17887_v0 }
0x1ac6   :  { %v21190_v23 = vpop.eup %21189 }
0x1ac7   :  { %11014 = vrot.lane.b32.xlu1 %v21190_v23, %s21376_s23  ;;  %v21192_v49 = vpop.eup %21191 }
0x1ac8   :  { %v11803_v13 = vpop.f32.mrb[52].mxu0  ;;  %v11005_v6 = vadd.f32 1.0, %v21192_v49 }
0x1ac9   :  { %v11804_v4 = vpop.f32.mrb[53].mxu0 }
0x1aca   :  { %21193 = vrcp.f32 %v11005_v6 }
0x1ad4   :  { %v21194_v59 = vpop.eup %21193 }
0x1ad5   :  { %v11012_v16 = vmul.f32 %v21194_v59, %v23897_v53 }
0x1b39   :  { %v11015_v62 = vpop.permute.xlu1 %11014 }
0x1b3a   :  { %v11017_v15 = vmul.f32 %v21194_v59, %v11015_v62 }
0x1b3c   :  { %11019 = vrot.lane.b32.xlu0 %v11017_v15, %s21376_s23 }
0x1bae   :  { %v11020_v17 = vpop.permute.xlu0 %11019 }
0x1baf   :  { %v24135_v47 = vadd.f32 %v11020_v17, %v11012_v16  ;;  %v25726_v16 = vld [vmem:[#allocation17_spill] sm:$0xff] }
0x1bb1   :  { %21195 = vtanh.f32 %v24135_v47 }
0x1bb2   :  { %21197 = vpow2.f32 %v17888_v5  ;;  %v25728_v5 = vld [vmem:[#allocation24_spill] sm:$0xff] }
0x1bbb   :  { %v21196_v23 = vpop.eup %21195 }
0x1bbc   :  { %11025 = vrot.lane.b32.xlu1 %v21196_v23, %s21376_s23  ;;  %v21198_v0 = vpop.eup %21197  ;;  %v25727_v23 = vld [vmem:[#allocation18_spill] sm:$0xff] }
0x1bbd   :  { %v11006_v13 = vadd.f32 1.0, %v21198_v0  ;;  %v25729_v0 = vld [vmem:[#allocation26_spill] sm:$0xff] }
0x1bbf   :  { %21199 = vrcp.f32 %v11006_v13  ;;  %v25730_v13 = vld [vmem:[#allocation32_spill] sm:$0xff] }
0x1bc9   :  { %v21200_v4 = vpop.eup %21199 }
0x1c2e   :  { %v11026_v61 = vpop.permute.xlu1 %11025 }
0x1c2f   :  { %v11028_v62 = vmul.f32 %v21200_v4, %v11026_v61  ;;  %v25732_v4 = vld [vmem:[#allocation40_spill] sm:$0xff]  ;;  %v25733_v61 = vld [vmem:[#allocation41_spill] sm:$0xff] }
0x1c31   :  { %v11030_v15 = vsel %vm117_vm0, %v11028_v62, 0  ;;  %v25734_v62 = vld [vmem:[#allocation98_spill] sm:$0xff] }
0x1c32   :  { %v24140_v49 = vand.u32 4294901760, %v11030_v15 }
0x1c34   :  { %v11125_v53 = vsub.f32 %v11030_v15, %v24140_v49  ;;  %v25735_v15 = vld [vmem:[#allocation99_spill] sm:$0xff] }
0x1c36   :  { %v24143_v17 = vand.u32 4294901760, %v11125_v53 }
0x1c38   :  { %v11127_v59 = vsub.f32 %v11125_v53, %v24143_v17 }
0x1c3a   :  { %v11128_v6 = vand.u32 4294901760, %v11127_v59  ;;  %v25737_v59 = vld [vmem:[#allocation101_spill] sm:$0xff] }
0x1c3c   :  { %11129 = vmatmul.mubr.f32.gmra.mrb[78].mxu1 %v11128_v6  ;;  %11811 = vmatmul.mubr.f32.gmra.mrb[54].mxu0 %v11128_v6  ;;  %v25738_v6 = vld [vmem:[#allocation102_spill] sm:$0xff] }
0x1c3d   :  { %11277 = vmatprep.mubr.f32.mxu1 %v25351_v63  ;;  %11961 = vmatprep.mubr.f32.mxu0 %v25351_v63 }
0x1c40   :  { %11279 = vmatmul.mubr.f32.vlgmr.msra.gmra.mrb[10].mxu1 %v24038_v54  ;;  %11963 = vmatmul.mubr.f32.vlgmr.msra.gmra.mrb[56].mxu0 %v24038_v54 }
0x1c41   :  { %19763 = vmatpush1.bf16.msra.mxu1 %v23026_v40  ;;  %19859 = vmatpush1.bf16.msra.mxu0 %v23031_v51 }
0x1c42   :  { %11284 = vmatprep.mubr.f32.mxu1 %v25351_v63  ;;  %19765 = vmatprep.subr.bf16.mxu1 %v23035_v37 }
0x1c43   :  { %11966 = vmatprep.mubr.f32.mxu0 %v25351_v63  ;;  %19861 = vmatprep.subr.bf16.mxu0 %v23042_v42  ;;  %v25749_v42 = vld [vmem:[#allocation113_spill] sm:$0xff] }
0x1c44   :  { %11286 = vmatmul.mubr.f32.gmra.mrb[80].mxu1 %v24140_v49  ;;  %11968 = vmatmul.mubr.f32.gmra.mrb[54].mxu0 %v24140_v49 }
0x1c45   :  { %19767 = vmatpush1.bf16.msra.mxu1 %v23046_v41  ;;  %19863 = vmatpush1.bf16.msra.mxu0 %v25562_v52  ;;  %v25747_v52 = vld [vmem:[#allocation111_spill] sm:$0xff] }
0x1c46   :  { %19769 = vmatprep.subr.bf16.mxu1 %v23054_v14  ;;  %19865 = vmatprep.subr.bf16.mxu0 %v25563_v32  ;;  %v25745_v32 = vld [vmem:[#allocation109_spill] sm:$0xff] }
0x1c47   :  { %11386 = vmatprep.mubr.f32.mxu1 %v25351_v63  ;;  %12070 = vmatprep.mubr.f32.mxu0 %v25351_v63 }
0x1c49   :  { %19771 = vmatpush1.bf16.msra.mxu1 %v23062_v18  ;;  %19867 = vmatpush1.bf16.msra.mxu0 %v25564_v33  ;;  %v25743_v33 = vld [vmem:[#allocation107_spill] sm:$0xff] }
0x1c4a   :  { %19773 = vmatprep.subr.bf16.mxu1 %v23071_v24  ;;  %19869 = vmatprep.subr.bf16.mxu0 %v25565_v19  ;;  %v25741_v19 = vld [vmem:[#allocation105_spill] sm:$0xff] }
0x1c4d   :  { %19775 = vmatpush1.bf16.msra.mxu1 %v23079_v44  ;;  %19871 = vmatpush1.bf16.msra.mxu0 %v25725_v56  ;;  %v25739_v56 = vld [vmem:[#allocation103_spill] sm:$0xff] }
0x1c4e   :  { %19777 = vmatprep.subr.bf16.mxu1 %v25726_v16  ;;  %19873 = vmatprep.subr.bf16.mxu0 %v22596_v55 }
0x1c50   :  { %11389 = vmatmul.mubr.f32.vlgmr.msra.gmra.mrb[10].mxu1 %v24041_v11  ;;  %12073 = vmatmul.mubr.f32.vlgmr.msra.gmra.mrb[58].mxu0 %v24041_v11  ;;  %v25731_v11 = vld [vmem:[#allocation33_spill] sm:$0xff] }
0x1c51   :  { %19779 = vmatpush1.bf16.msra.mxu1 %v25727_v23  ;;  %19875 = vmatpush1.bf16.msra.mxu0 %v25493_v34 }
0x1c52   :  { %11394 = vmatprep.mubr.f32.mxu1 %v25351_v63  ;;  %12076 = vmatprep.mubr.f32.mxu0 %v25351_v63 }
0x1c53   :  { %19781 = vmatprep.subr.bf16.mxu1 %v25728_v5  ;;  %19877 = vmatprep.subr.bf16.mxu0 %v25495_v7 }
0x1c54   :  { %11397 = vmatmul.mubr.f32.gmra.mrb[82].mxu1 %v11125_v53  ;;  %12079 = vmatmul.mubr.f32.gmra.mrb[54].mxu0 %v11125_v53  ;;  %v25736_v53 = vld [vmem:[#allocation100_spill] sm:$0xff] }
0x1c55   :  { %19783 = vmatpush1.bf16.msra.mxu1 %v25729_v0  ;;  %19879 = vmatpush1.bf16.msra.mxu0 %v25612_v30 }
0x1c56   :  { %19785 = vmatprep.subr.bf16.mxu1 %v25730_v13  ;;  %19881 = vmatprep.subr.bf16.mxu0 %v25613_v8 }
0x1c57   :  { %11481 = vmatprep.mubr.f32.mxu1 %v25351_v63  ;;  %12165 = vmatprep.mubr.f32.mxu0 %v25351_v63 }
0x1c59   :  { %19787 = vmatpush1.bf16.msra.mxu1 %v25731_v11  ;;  %19883 = vmatpush1.bf16.msra.mxu0 %v25614_v10 }
0x1c5a   :  { %19789 = vmatprep.subr.bf16.mxu1 %v25732_v4  ;;  %19885 = vmatprep.subr.bf16.mxu0 %v25615_v29 }
0x1c5d   :  { %19791 = vmatpush1.bf16.msra.mxu1 %v25733_v61  ;;  %19887 = vmatpush1.bf16.msra.mxu0 %v25616_v9 }
0x1c5e   :  { %19793 = vmatprep.subr.bf16.mxu1 %v25734_v62  ;;  %19889 = vmatprep.subr.bf16.mxu0 %v25735_v15  ;;  %v25740_v15 = vld [vmem:[#allocation104_spill] sm:$0xff] }
0x1c60   :  { %11485 = vmatmul.mubr.f32.vlgmr.msra.gmra.mrb[10].mxu1 %v24044_v43  ;;  %12169 = vmatmul.mubr.f32.vlgmr.msra.gmra.mrb[60].mxu0 %v24044_v43  ;;  %v25742_v43 = vld [vmem:[#allocation106_spill] sm:$0xff] }
0x1c61   :  { %19795 = vmatpush1.bf16.msra.mxu1 %v25736_v53  ;;  %19891 = vmatpush1.bf16.msra.mxu0 %v25737_v59  ;;  %v25744_v59 = vld [vmem:[#allocation108_spill] sm:$0xff] }
0x1c62   :  { %11490 = vmatprep.mubr.f32.mxu1 %v25351_v63  ;;  %12172 = vmatprep.mubr.f32.mxu0 %v25351_v63 }
0x1c63   :  { %19797 = vmatprep.subr.bf16.mxu1 %v25738_v6  ;;  %19893 = vmatprep.subr.bf16.mxu0 %v25739_v56  ;;  %v25746_v56 = vld [vmem:[#allocation110_spill] sm:$0xff] }
0x1c64   :  { %11494 = vmatmul.mubr.f32.gmra.mrb[84].mxu1 %v24143_v17  ;;  %12176 = vmatmul.mubr.f32.gmra.mrb[54].mxu0 %v24143_v17  ;;  %v25748_v17 = vld [vmem:[#allocation112_spill] sm:$0xff] }
0x1c65   :  { %19799 = vmatpush1.bf16.msra.mxu1 %v25740_v15  ;;  %19895 = vmatpush1.bf16.msra.mxu0 %v25741_v19 }
0x1c66   :  { %19801 = vmatprep.subr.bf16.mxu1 %v25742_v43  ;;  %19897 = vmatprep.subr.bf16.mxu0 %v25743_v33 }
0x1c67   :  { %11610 = vmatprep.mubr.f32.mxu1 %v25351_v63  ;;  %12294 = vmatprep.mubr.f32.mxu0 %v25351_v63 }
0x1c69   :  { %19803 = vmatpush1.bf16.msra.mxu1 %v25744_v59  ;;  %19899 = vmatpush1.bf16.msra.mxu0 %v25745_v32 }
0x1c6a   :  { %19805 = vmatprep.subr.bf16.mxu1 %v25746_v56  ;;  %19901 = vmatprep.subr.bf16.mxu0 %v25747_v52 }
0x1c6d   :  { %19807 = vmatpush1.bf16.msra.mxu1 %v25748_v17  ;;  %19903 = vmatpush1.bf16.msra.mxu0 %v25749_v42 }
0x1c6e   :  { %19809 = vmatprep.subr.bf16.mxu1 %v25726_v16  ;;  %19905 = vmatprep.subr.bf16.mxu0 %v22596_v55 }
0x1c70   :  { %11612 = vmatmul.mubr.f32.vlgmr.msra.gmra.mrb[10].mxu1 %v24038_v54  ;;  %12296 = vmatmul.mubr.f32.vlgmr.msra.gmra.mrb[62].mxu0 %v24038_v54 }
0x1c71   :  { %19811 = vmatpush1.bf16.msra.mxu1 %v25727_v23  ;;  %19907 = vmatpush1.bf16.msra.mxu0 %v25493_v34 }
0x1c72   :  { %11617 = vmatprep.mubr.f32.mxu1 %v25351_v63  ;;  %12299 = vmatprep.mubr.f32.mxu0 %v25351_v63 }
0x1c73   :  { %19813 = vmatprep.subr.bf16.mxu1 %v25728_v5  ;;  %19909 = vmatprep.subr.bf16.mxu0 %v25495_v7 }
0x1c74   :  { %11619 = vmatmul.mubr.f32.gmra.mrb[86].mxu1 %v24140_v49  ;;  %12301 = vmatmul.mubr.f32.gmra.mrb[54].mxu0 %v24140_v49 }
0x1c75   :  { %19815 = vmatpush1.bf16.msra.mxu1 %v25729_v0  ;;  %19911 = vmatpush1.bf16.msra.mxu0 %v25612_v30 }
0x1c76   :  { %19817 = vmatprep.subr.bf16.mxu1 %v25730_v13  ;;  %19913 = vmatprep.subr.bf16.mxu0 %v25613_v8 }
0x1c77   :  { %11703 = vmatprep.mubr.f32.mxu1 %v25351_v63  ;;  %12387 = vmatprep.mubr.f32.mxu0 %v25351_v63 }
0x1c79   :  { %19819 = vmatpush1.bf16.msra.mxu1 %v25731_v11  ;;  %19915 = vmatpush1.bf16.msra.mxu0 %v25614_v10 }
0x1c7a   :  { %19821 = vmatprep.subr.bf16.mxu1 %v25732_v4  ;;  %19917 = vmatprep.subr.bf16.mxu0 %v25615_v29 }
0x1c7d   :  { %19823 = vmatpush1.bf16.msra.mxu1 %v25733_v61  ;;  %19919 = vmatpush1.bf16.msra.mxu0 %v25616_v9 }
0x1c7e   :  { %19921 = vmatprep.subr.bf16.mxu0 %v25507_v20  ;;  %20017 = vmatprep.subr.bf16.mxu1 %v25726_v16 }
0x1c80   :  { %11705 = vmatmul.mubr.f32.vlgmr.msra.gmra.mrb[10].mxu1 %v24038_v54  ;;  %12389 = vmatmul.mubr.f32.vlgmr.msra.gmra.mrb[64].mxu0 %v24038_v54  ;;  %v25750_v54 = vld [vmem:[#allocation42_spill] sm:$0xff] }
0x1c81   :  { %11710 = vmatprep.mubr.f32.mxu1 %v25351_v63  ;;  %12392 = vmatprep.mubr.f32.mxu0 %v25351_v63 }
0x1c82   :  { %19923 = vmatpush1.bf16.msra.mxu0 %v25508_v22  ;;  %20019 = vmatpush1.bf16.msra.mxu1 %v25727_v23 }
0x1c83   :  { %19925 = vmatprep.subr.bf16.mxu0 %v25509_v12  ;;  %20021 = vmatprep.subr.bf16.mxu1 %v25728_v5 }
0x1c84   :  { %11712 = vmatmul.mubr.f32.gmra.mrb[88].mxu1 %v24140_v49  ;;  %12394 = vmatmul.mubr.f32.gmra.mrb[54].mxu0 %v24140_v49  ;;  %v25751_v49 = vld [vmem:[#allocation76_spill] sm:$0xff] }
0x1c85   :  { %12515 = vmatprep.mubr.f32.mxu0 %v25351_v63  ;;  %13197 = vmatprep.mubr.f32.mxu1 %v25351_v63 }
0x1c86   :  { %19927 = vmatpush1.bf16.msra.mxu0 %v25510_v27  ;;  %20023 = vmatpush1.bf16.msra.mxu1 %v25729_v0 }
0x1c87   :  { %19929 = vmatprep.subr.bf16.mxu0 %v25511_v45  ;;  %20025 = vmatprep.subr.bf16.mxu1 %v25730_v13 }
0x1c8a   :  { %19931 = vmatpush1.bf16.msra.mxu0 %v25512_v46  ;;  %20027 = vmatpush1.bf16.msra.mxu1 %v25731_v11 }
0x1c8b   :  { %19933 = vmatprep.subr.bf16.mxu0 %v25513_v31  ;;  %20029 = vmatprep.subr.bf16.mxu1 %v25732_v4 }
0x1c8e   :  { %19935 = vmatpush1.bf16.msra.mxu0 %v25514_v57  ;;  %20031 = vmatpush1.bf16.msra.mxu1 %v25733_v61 }
0x1c8f   :  { %19937 = vmatprep.subr.bf16.mxu0 %v25750_v54  ;;  %20033 = vmatprep.subr.bf16.mxu1 %v25751_v49 }
0x1d0f   :  { %v11130_v42 = vpop.f32.mrb[78].mxu1 }
0x1d10   :  { %v11131_v52 = vpop.f32.mrb[79].mxu1 }
0x1d13   :  { %v11964_v32 = vpop.f32.mrb[56].mxu0 }
0x1d14   :  { %v11965_v33 = vpop.f32.mrb[57].mxu0 }
0x1d17   :  { %v11287_v19 = vpop.f32.mrb[80].mxu1 }
0x1d18   :  { %v11288_v51 = vpop.f32.mrb[81].mxu1 }
0x1d23   :  { %v12074_v17 = vpop.f32.mrb[58].mxu0 }
0x1d24   :  { %v12075_v56 = vpop.f32.mrb[59].mxu0 }
0x1d27   :  { %v11398_v59 = vpop.f32.mrb[82].mxu1 }
0x1d28   :  { %v11399_v43 = vpop.f32.mrb[83].mxu1 }
0x1d33   :  { %v12170_v15 = vpop.f32.mrb[60].mxu0 }
0x1d34   :  { %v12171_v6 = vpop.f32.mrb[61].mxu0 }
0x1d37   :  { %v11495_v53 = vpop.f32.mrb[84].mxu1 }
0x1d38   :  { %v11496_v62 = vpop.f32.mrb[85].mxu1 }
0x1d43   :  { %v12297_v4 = vpop.f32.mrb[62].mxu0 }
0x1d44   :  { %v12298_v61 = vpop.f32.mrb[63].mxu0 }
0x1d47   :  { %v11620_v11 = vpop.f32.mrb[86].mxu1 }
0x1d48   :  { %v11621_v54 = vpop.f32.mrb[87].mxu1 }
0x1d53   :  { %v11706_v13 = vpop.f32.mrb[10].mxu1  ;;  %v12390_v49 = vpop.f32.mrb[64].mxu0 }
0x1d54   :  { %v11708_v42 = vpop.f32.mrb[11].mxu1  ;;  %v12391_v52 = vpop.f32.mrb[65].mxu0  ;;  %v20682_v56 = vadd.f32 %v11706_v13, %v25577_v25 }
0x1d55   :  { %v20683_v32 = vadd.f32 %v11708_v42, %v25634_v39 }
0x1d56   :  { %v17889_v15 = vmul.f32 -1.442695, %v20682_v56 }
0x1d57   :  { %21201 = vtanh.f32 %v20683_v32  ;;  %v11713_v51 = vpop.f32.mrb[88].mxu1  ;;  %v17890_v13 = vmul.f32 -1.442695, %v20683_v32 }
0x1d58   :  { %v11714_v33 = vpop.f32.mrb[89].mxu1  ;;  %21203 = vpow2.f32 %v17889_v15 }
0x1d61   :  { %v21202_v19 = vpop.eup %21201 }
0x1d62   :  { %12417 = vrot.lane.b32.xlu0 %v21202_v19, %s21376_s23  ;;  %v21204_v4 = vpop.eup %21203 }
0x1d63   :  { %v12408_v61 = vadd.f32 1.0, %v21204_v4  ;;  %v25752_v4 = vld [vmem:[#allocation37_spill] sm:$0xff] }
0x1d65   :  { %21205 = vrcp.f32 %v12408_v61  ;;  %v25753_v61 = vld [vmem:[#allocation49_spill] sm:$0xff] }
0x1d6f   :  { %v21206_v11 = vpop.eup %21205 }
0x1d70   :  { %v12415_v59 = vmul.f32 %v21206_v11, %v24033_v38 }
0x1dd4   :  { %v12418_v62 = vpop.permute.xlu0 %12417 }
0x1dd5   :  { %v12420_v53 = vmul.f32 %v21206_v11, %v12418_v62  ;;  %v25754_v11 = vld [vmem:[#allocation48_spill] sm:$0xff]  ;;  %v25755_v62 = vld [vmem:[#allocation85_spill] sm:$0xff] }
0x1dd7   :  { %12422 = vrot.lane.b32.xlu1 %v12420_v53, %s21376_s23  ;;  %v25756_v53 = vld [vmem:[#allocation36_spill] sm:$0xff] }
0x1e49   :  { %v12423_v6 = vpop.permute.xlu1 %12422 }
0x1e4a   :  { %v24271_v43 = vadd.f32 %v12423_v6, %v12415_v59  ;;  %v25757_v59 = vld [vmem:[#allocation65_spill] sm:$0xff]  ;;  %v25758_v6 = vld [vmem:[#allocation50_spill] sm:$0xff] }
0x1e4c   :  { %21207 = vtanh.f32 %v24271_v43 }
0x1e4d   :  { %21209 = vpow2.f32 %v17890_v13  ;;  %v25760_v13 = vld [vmem:[#allocation52_spill] sm:$0xff] }
0x1e56   :  { %v21208_v17 = vpop.eup %21207 }
0x1e57   :  { %12428 = vrot.lane.b32.xlu0 %v21208_v17, %s21376_s23  ;;  %v21210_v54 = vpop.eup %21209  ;;  %v25759_v17 = vld [vmem:[#allocation51_spill] sm:$0xff] }
0x1e58   :  { %v12409_v49 = vadd.f32 1.0, %v21210_v54  ;;  %v25761_v54 = vld [vmem:[#allocation53_spill] sm:$0xff] }
0x1e5a   :  { %21211 = vrcp.f32 %v12409_v49  ;;  %v25762_v49 = vld [vmem:[#allocation54_spill] sm:$0xff] }
0x1e64   :  { %v21212_v42 = vpop.eup %21211 }
0x1ec9   :  { %v12429_v52 = vpop.permute.xlu0 %12428 }
0x1eca   :  { %v12431_v51 = vmul.f32 %v21212_v42, %v12429_v52  ;;  %v25763_v42 = vld [vmem:[#allocation55_spill] sm:$0xff]  ;;  %v25764_v52 = vld [vmem:[#allocation56_spill] sm:$0xff] }
0x1ecc   :  { %v12433_v33 = vsel %vm117_vm0, %v12431_v51, 0  ;;  %v25765_v51 = vld [vmem:[#allocation66_spill] sm:$0xff] }
0x1ecd   :  { %v24276_v19 = vand.u32 4294901760, %v12433_v33 }
0x1ecf   :  { %v24279_v38 = vsub.f32 %v12433_v33, %v24276_v19  ;;  %v25766_v33 = vld [vmem:[#allocation57_spill] sm:$0xff] }
0x1ed1   :  { %v24282_v56 = vand.u32 4294901760, %v24279_v38 }
0x1ed3   :  { %v12519_v32 = vsub.f32 %v24279_v38, %v24282_v56 }
0x1ed5   :  { %v24286_v15 = vand.u32 4294901760, %v12519_v32  ;;  %v25767_v32 = vld [vmem:[#allocation58_spill] sm:$0xff] }
0x1ed7   :  { %12521 = vmatmul.mubr.f32.vlgmr.msra.gmra.mrb[54].mxu0 %v24286_v15  ;;  %13203 = vmatmul.mubr.f32.vlgmr.msra.gmra.mrb[12].mxu1 %v24286_v15 }
0x1ed8   :  { %19939 = vmatpush1.bf16.msra.mxu0 %v25579_v36  ;;  %12671 = vmatprep.mubr.f32.mxu0 %v25351_v63 }
0x1ed9   :  { %19941 = vmatprep.subr.bf16.mxu0 %v25580_v50  ;;  %20035 = vmatpush1.bf16.msra.mxu1 %v25603_v35  ;;  %v25773_v35 = vld [vmem:[#allocation74_spill] sm:$0xff] }
0x1eda   :  { %20037 = vmatprep.subr.bf16.mxu1 %v25604_v3  ;;  %13208 = vmatprep.mubr.f32.mxu1 %v25351_v63 }
0x1edc   :  { %19943 = vmatpush1.bf16.msra.mxu0 %v25581_v2 }
0x1edd   :  { %19945 = vmatprep.subr.bf16.mxu0 %v25582_v28  ;;  %20039 = vmatpush1.bf16.msra.mxu1 %v25605_v1 }
0x1ede   :  { %20041 = vmatprep.subr.bf16.mxu1 %v25606_v26  ;;  %v25772_v26 = vld [vmem:[#allocation77_spill] sm:$0xff] }
0x1ee0   :  { %19947 = vmatpush1.bf16.msra.mxu0 %v25635_v21 }
0x1ee1   :  { %19949 = vmatprep.subr.bf16.mxu0 %v25693_v48  ;;  %20043 = vmatpush1.bf16.msra.mxu1 %v25694_v60  ;;  %v25771_v60 = vld [vmem:[#allocation62_spill] sm:$0xff] }
0x1ee2   :  { %20045 = vmatprep.subr.bf16.mxu1 %v25752_v4  ;;  %v25770_v4 = vld [vmem:[#allocation61_spill] sm:$0xff] }
0x1ee4   :  { %19951 = vmatpush1.bf16.msra.mxu0 %v25753_v61 }
0x1ee5   :  { %19953 = vmatprep.subr.bf16.mxu0 %v25754_v11  ;;  %20047 = vmatpush1.bf16.msra.mxu1 %v25755_v62  ;;  %v25769_v62 = vld [vmem:[#allocation60_spill] sm:$0xff] }
0x1ee6   :  { %20049 = vmatprep.subr.bf16.mxu1 %v25756_v53  ;;  %v25768_v53 = vld [vmem:[#allocation59_spill] sm:$0xff] }
0x1ee7   :  { %12673 = vmatmul.mubr.f32.vlgmr.msra.gmra.mrb[54].mxu0 %v24276_v19 }
0x1ee8   :  { %19955 = vmatpush1.bf16.msra.mxu0 %v25757_v59  ;;  %12775 = vmatprep.mubr.f32.mxu0 %v25351_v63 }
0x1ee9   :  { %19957 = vmatprep.subr.bf16.mxu0 %v25758_v6 }
0x1eec   :  { %19959 = vmatpush1.bf16.msra.mxu0 %v25759_v17 }
0x1eed   :  { %19961 = vmatprep.subr.bf16.mxu0 %v25760_v13 }
0x1ef0   :  { %19963 = vmatpush1.bf16.msra.mxu0 %v25761_v54 }
0x1ef1   :  { %19965 = vmatprep.subr.bf16.mxu0 %v25762_v49 }
0x1ef4   :  { %19967 = vmatpush1.bf16.msra.mxu0 %v25763_v42 }
0x1ef5   :  { %19969 = vmatprep.subr.bf16.mxu0 %v25507_v20 }
0x1ef7   :  { %12778 = vmatmul.mubr.f32.vlgmr.msra.gmra.mrb[54].mxu0 %v24279_v38 }
0x1ef8   :  { %19971 = vmatpush1.bf16.msra.mxu0 %v25508_v22  ;;  %12864 = vmatprep.mubr.f32.mxu0 %v25351_v63 }
0x1ef9   :  { %19973 = vmatprep.subr.bf16.mxu0 %v25509_v12 }
0x1efc   :  { %19975 = vmatpush1.bf16.msra.mxu0 %v25510_v27 }
0x1efd   :  { %19977 = vmatprep.subr.bf16.mxu0 %v25511_v45 }
0x1f00   :  { %19979 = vmatpush1.bf16.msra.mxu0 %v25512_v46 }
0x1f01   :  { %19981 = vmatprep.subr.bf16.mxu0 %v25513_v31 }
0x1f04   :  { %19983 = vmatpush1.bf16.msra.mxu0 %v25514_v57 }
0x1f05   :  { %19985 = vmatprep.subr.bf16.mxu0 %v25764_v52 }
0x1f07   :  { %12868 = vmatmul.mubr.f32.vlgmr.msra.gmra.mrb[54].mxu0 %v24282_v56 }
0x1f08   :  { %19987 = vmatpush1.bf16.msra.mxu0 %v25765_v51  ;;  %12986 = vmatprep.mubr.f32.mxu0 %v25351_v63 }
0x1f09   :  { %19989 = vmatprep.subr.bf16.mxu0 %v25766_v33 }
0x1f0c   :  { %19991 = vmatpush1.bf16.msra.mxu0 %v25767_v32 }
0x1f0d   :  { %19993 = vmatprep.subr.bf16.mxu0 %v25768_v53 }
0x1f10   :  { %19995 = vmatpush1.bf16.msra.mxu0 %v25769_v62 }
0x1f11   :  { %19997 = vmatprep.subr.bf16.mxu0 %v25770_v4 }
0x1f14   :  { %19999 = vmatpush1.bf16.msra.mxu0 %v25771_v60 }
0x1f15   :  { %20001 = vmatprep.subr.bf16.mxu0 %v25507_v20 }
0x1f17   :  { %12988 = vmatmul.mubr.f32.vlgmr.msra.gmra.mrb[54].mxu0 %v24276_v19 }
0x1f18   :  { %20003 = vmatpush1.bf16.msra.mxu0 %v25508_v22  ;;  %13074 = vmatprep.mubr.f32.mxu0 %v25351_v63 }
0x1f19   :  { %20005 = vmatprep.subr.bf16.mxu0 %v25509_v12 }
0x1f1c   :  { %20007 = vmatpush1.bf16.msra.mxu0 %v25510_v27 }
0x1f1d   :  { %20009 = vmatprep.subr.bf16.mxu0 %v25511_v45 }
0x1f20   :  { %20011 = vmatpush1.bf16.msra.mxu0 %v25512_v46 }
0x1f21   :  { %20013 = vmatprep.subr.bf16.mxu0 %v25513_v31 }
0x1f24   :  { %20015 = vmatpush1.bf16.msra.mxu0 %v25514_v57 }
0x1f25   :  { %20401 = vmatprep.subr.bf16.mxu0 %v22596_v55 }
0x1f27   :  { %13076 = vmatmul.mubr.f32.vlgmr.msra.gmra.mrb[54].mxu0 %v24276_v19 }
0x1f28   :  { %20403 = vmatpush1.bf16.msra.mxu0 %v25493_v34  ;;  %15966 = vmatprep.mubr.f32.mxu0 %v25351_v63 }
0x1f29   :  { %20405 = vmatprep.subr.bf16.mxu0 %v25495_v7 }
0x1f2c   :  { %20407 = vmatpush1.bf16.msra.mxu0 %v25612_v30 }
0x1f2d   :  { %20409 = vmatprep.subr.bf16.mxu0 %v25613_v8 }
0x1f30   :  { %20411 = vmatpush1.bf16.msra.mxu0 %v25614_v10 }
0x1f31   :  { %20413 = vmatprep.subr.bf16.mxu0 %v25615_v29 }
0x1f34   :  { %20415 = vmatpush1.bf16.msra.mxu0 %v25616_v9 }
0x1f35   :  { %20417 = vmatprep.subr.bf16.mxu0 %v25772_v26 }
0x1ffa   :  { %v13077_v1 = vpop.f32.mrb[54].mxu0 }
0x1ffb   :  { %v13079_v3 = vpop.f32.mrb[55].mxu0  ;;  %v13082_v62 = vadd.f32 %v13077_v1, %v25667_v58 }
0x1ffc   :  { %v13083_v60 = vadd.f32 %v13079_v3, %v25773_v35 }
0x1ffd   :  { %v17891_v53 = vmul.f32 -1.442695, %v13082_v62 }
0x1ffe   :  { %21213 = vtanh.f32 %v13083_v60  ;;  %v17892_v1 = vmul.f32 -1.442695, %v13083_v60 }
0x1fff   :  { %21215 = vpow2.f32 %v17891_v53 }
0x2008   :  { %v21214_v4 = vpop.eup %21213 }
0x2009   :  { %13099 = vrot.lane.b32.xlu1 %v21214_v4, %s21376_s23  ;;  %v21216_v32 = vpop.eup %21215 }
0x200a   :  { %v13090_v33 = vadd.f32 1.0, %v21216_v32 }
0x200c   :  { %21217 = vrcp.f32 %v13090_v33 }
0x2016   :  { %v21218_v51 = vpop.eup %21217 }
0x2017   :  { %v13097_v49 = vmul.f32 %v21218_v51, %v24135_v47 }
0x207b   :  { %v13100_v52 = vpop.permute.xlu1 %13099 }
0x207c   :  { %v13102_v42 = vmul.f32 %v21218_v51, %v13100_v52  ;;  %v25774_v51 = vld [vmem:[#allocation32_spill] sm:$0xff] }
0x207e   :  { %13104 = vrot.lane.b32.xlu0 %v13102_v42, %s21376_s23 }
0x20f0   :  { %v13105_v54 = vpop.permute.xlu0 %13104 }
0x20f1   :  { %v24363_v3 = vadd.f32 %v13105_v54, %v13097_v49 }
0x20f3   :  { %21219 = vtanh.f32 %v24363_v3 }
0x20f4   :  { %21221 = vpow2.f32 %v17892_v1  ;;  %v25776_v1 = vld [vmem:[#allocation40_spill] sm:$0xff] }
0x20fd   :  { %v21220_v4 = vpop.eup %21219 }
0x20fe   :  { %13110 = vrot.lane.b32.xlu1 %v21220_v4, %s21376_s23  ;;  %v21222_v62 = vpop.eup %21221  ;;  %v25775_v4 = vld [vmem:[#allocation33_spill] sm:$0xff] }
0x20ff   :  { %v13091_v53 = vadd.f32 1.0, %v21222_v62  ;;  %v25777_v62 = vld [vmem:[#allocation41_spill] sm:$0xff] }
0x2101   :  { %21223 = vrcp.f32 %v13091_v53  ;;  %v25778_v53 = vld [vmem:[#allocation98_spill] sm:$0xff] }
0x210b   :  { %v21224_v33 = vpop.eup %21223 }
0x2170   :  { %v13111_v32 = vpop.permute.xlu1 %13110 }
0x2171   :  { %v13113_v52 = vmul.f32 %v21224_v33, %v13111_v32  ;;  %v25779_v33 = vld [vmem:[#allocation100_spill] sm:$0xff]  ;;  %v25780_v32 = vld [vmem:[#allocation102_spill] sm:$0xff] }
0x2173   :  { %v13115_v42 = vsel %vm117_vm0, %v13113_v52, 0  ;;  %v25781_v52 = vld [vmem:[#allocation104_spill] sm:$0xff] }
0x2174   :  { %v24368_v58 = vand.u32 4294901760, %v13115_v42 }
0x2176   :  { %v24371_v47 = vsub.f32 %v13115_v42, %v24368_v58  ;;  %v25782_v42 = vld [vmem:[#allocation106_spill] sm:$0xff] }
0x2178   :  { %v24374_v54 = vand.u32 4294901760, %v24371_v47 }
0x217a   :  { %v13212_v60 = vsub.f32 %v24371_v47, %v24374_v54 }
0x217c   :  { %v24378_v49 = vand.u32 4294901760, %v13212_v60  ;;  %v25783_v60 = vld [vmem:[#allocation108_spill] sm:$0xff] }
0x217e   :  { %13214 = vmatmul.mubr.f32.gmra.mrb[90].mxu1 %v24378_v49 }
0x217f   :  { %13362 = vmatprep.mubr.f32.mxu1 %v25351_v63 }
0x2182   :  { %13364 = vmatmul.mubr.f32.vlgmr.msra.gmra.mrb[12].mxu1 %v24276_v19 }
0x2183   :  { %20051 = vmatpush1.bf16.msra.mxu1 %v23026_v40  ;;  %13369 = vmatprep.mubr.f32.mxu1 %v25351_v63 }
0x2184   :  { %20053 = vmatprep.subr.bf16.mxu1 %v23035_v37  ;;  %v25800_v37 = vld [vmem:[#allocation97_spill] sm:$0xff] }
0x2186   :  { %13371 = vmatmul.mubr.f32.gmra.mrb[92].mxu1 %v24368_v58 }
0x2187   :  { %20055 = vmatpush1.bf16.msra.mxu1 %v23046_v41  ;;  %13471 = vmatprep.mubr.f32.mxu1 %v25351_v63  ;;  %v25799_v41 = vld [vmem:[#allocation94_spill] sm:$0xff] }
0x2188   :  { %20057 = vmatprep.subr.bf16.mxu1 %v23054_v14  ;;  %v25798_v14 = vld [vmem:[#allocation92_spill] sm:$0xff] }
0x218b   :  { %20059 = vmatpush1.bf16.msra.mxu1 %v23062_v18  ;;  %v25797_v18 = vld [vmem:[#allocation90_spill] sm:$0xff] }
0x218c   :  { %20061 = vmatprep.subr.bf16.mxu1 %v23071_v24  ;;  %v25796_v24 = vld [vmem:[#allocation88_spill] sm:$0xff] }
0x218f   :  { %20063 = vmatpush1.bf16.msra.mxu1 %v23079_v44  ;;  %v25784_v44 = vld [vmem:[#allocation110_spill] sm:$0xff] }
0x2190   :  { %20065 = vmatprep.subr.bf16.mxu1 %v25726_v16 }
0x2192   :  { %13474 = vmatmul.mubr.f32.vlgmr.msra.gmra.mrb[12].mxu1 %v24279_v38 }
0x2193   :  { %20067 = vmatpush1.bf16.msra.mxu1 %v25727_v23  ;;  %13479 = vmatprep.mubr.f32.mxu1 %v25351_v63 }
0x2194   :  { %20069 = vmatprep.subr.bf16.mxu1 %v25728_v5 }
0x2196   :  { %13482 = vmatmul.mubr.f32.gmra.mrb[94].mxu1 %v24371_v47 }
0x2197   :  { %20071 = vmatpush1.bf16.msra.mxu1 %v25729_v0  ;;  %13566 = vmatprep.mubr.f32.mxu1 %v25351_v63 }
0x2198   :  { %20073 = vmatprep.subr.bf16.mxu1 %v25774_v51 }
0x219b   :  { %20075 = vmatpush1.bf16.msra.mxu1 %v25775_v4 }
0x219c   :  { %20077 = vmatprep.subr.bf16.mxu1 %v25776_v1 }
0x219f   :  { %20079 = vmatpush1.bf16.msra.mxu1 %v25777_v62 }
0x21a0   :  { %20081 = vmatprep.subr.bf16.mxu1 %v25778_v53  ;;  %v25785_v53 = vld [vmem:[#allocation112_spill] sm:$0xff] }
0x21a2   :  { %13570 = vmatmul.mubr.f32.vlgmr.msra.gmra.mrb[12].mxu1 %v24282_v56 }
0x21a3   :  { %20083 = vmatpush1.bf16.msra.mxu1 %v25779_v33  ;;  %13575 = vmatprep.mubr.f32.mxu1 %v25351_v63  ;;  %v25794_v33 = vld [vmem:[#allocation83_spill] sm:$0xff] }
0x21a4   :  { %20085 = vmatprep.subr.bf16.mxu1 %v25780_v32  ;;  %v25791_v32 = vld [vmem:[#allocation81_spill] sm:$0xff] }
0x21a6   :  { %13579 = vmatmul.mubr.f32.gmra.mrb[96].mxu1 %v24374_v54 }
0x21a7   :  { %20087 = vmatpush1.bf16.msra.mxu1 %v25781_v52  ;;  %13695 = vmatprep.mubr.f32.mxu1 %v25351_v63  ;;  %v25790_v52 = vld [vmem:[#allocation35_spill] sm:$0xff] }
0x21a8   :  { %20089 = vmatprep.subr.bf16.mxu1 %v25782_v42  ;;  %v25789_v42 = vld [vmem:[#allocation29_spill] sm:$0xff] }
0x21ab   :  { %20091 = vmatpush1.bf16.msra.mxu1 %v25783_v60  ;;  %v25788_v60 = vld [vmem:[#allocation27_spill] sm:$0xff] }
0x21ac   :  { %20093 = vmatprep.subr.bf16.mxu1 %v25784_v44  ;;  %v25787_v44 = vld [vmem:[#allocation20_spill] sm:$0xff] }
0x21af   :  { %20095 = vmatpush1.bf16.msra.mxu1 %v25785_v53  ;;  %v25786_v53 = vld [vmem:[#allocation80_spill] sm:$0xff] }
0x21b0   :  { %20097 = vmatprep.subr.bf16.mxu1 %v25726_v16 }
0x21b2   :  { %13697 = vmatmul.mubr.f32.vlgmr.msra.gmra.mrb[12].mxu1 %v24276_v19 }
0x21b3   :  { %20099 = vmatpush1.bf16.msra.mxu1 %v25727_v23  ;;  %13702 = vmatprep.mubr.f32.mxu1 %v25351_v63 }
0x21b4   :  { %20101 = vmatprep.subr.bf16.mxu1 %v25728_v5 }
0x21b6   :  { %13704 = vmatmul.mubr.f32.gmra.mrb[98].mxu1 %v24368_v58 }
0x21b7   :  { %20103 = vmatpush1.bf16.msra.mxu1 %v25729_v0  ;;  %13788 = vmatprep.mubr.f32.mxu1 %v25351_v63 }
0x21b8   :  { %20105 = vmatprep.subr.bf16.mxu1 %v25774_v51 }
0x21bb   :  { %20107 = vmatpush1.bf16.msra.mxu1 %v25775_v4 }
0x21bc   :  { %20109 = vmatprep.subr.bf16.mxu1 %v25776_v1 }
0x21bf   :  { %20111 = vmatpush1.bf16.msra.mxu1 %v25777_v62 }
0x21c0   :  { %20113 = vmatprep.subr.bf16.mxu1 %v22596_v55 }
0x21c2   :  { %13790 = vmatmul.mubr.f32.vlgmr.msra.gmra.mrb[12].mxu1 %v24276_v19 }
0x21c3   :  { %20115 = vmatpush1.bf16.msra.mxu1 %v25493_v34  ;;  %13795 = vmatprep.mubr.f32.mxu1 %v25351_v63 }
0x21c4   :  { %20117 = vmatprep.subr.bf16.mxu1 %v25495_v7 }
0x21c6   :  { %13797 = vmatmul.mubr.f32.gmra.mrb[100].mxu1 %v24368_v58 }
0x21c7   :  { %20119 = vmatpush1.bf16.msra.mxu1 %v25612_v30  ;;  %13881 = vmatprep.mubr.f32.mxu1 %v25351_v63 }
0x21c8   :  { %20121 = vmatprep.subr.bf16.mxu1 %v25613_v8 }
0x21cb   :  { %20123 = vmatpush1.bf16.msra.mxu1 %v25614_v10 }
0x21cc   :  { %20125 = vmatprep.subr.bf16.mxu1 %v25615_v29 }
0x21cf   :  { %20127 = vmatpush1.bf16.msra.mxu1 %v25616_v9 }
0x21d0   :  { %20129 = vmatprep.subr.bf16.mxu1 %v25772_v26  ;;  %v25792_v26 = vld [vmem:[#allocation96_spill] sm:$0xff] }
0x21d2   :  { %13887 = vmatmul.mubr.f32.vlgmr.msra.gmra.mrb[102].mxu1 %v24286_v15  ;;  %v25793_v15 = vld [vmem:[#allocation82_spill] sm:$0xff] }
0x21d3   :  { %20131 = vmatpush1.bf16.msra.mxu1 %v25786_v53  ;;  %13890 = vmatprep.mubr.f32.mxu1 %v25351_v63 }
0x21d4   :  { %20133 = vmatprep.subr.bf16.mxu1 %v25787_v44 }
0x21d6   :  { %13896 = vmatmul.mubr.f32.gmra.mrb[104].mxu1 %v24378_v49  ;;  %v25795_v49 = vld [vmem:[#allocation86_spill] sm:$0xff] }
0x21d7   :  { %20135 = vmatpush1.bf16.msra.mxu1 %v25788_v60  ;;  %14046 = vmatprep.mubr.f32.mxu1 %v25351_v63 }
0x21d8   :  { %20137 = vmatprep.subr.bf16.mxu1 %v25789_v42 }
0x21db   :  { %20139 = vmatpush1.bf16.msra.mxu1 %v25790_v52 }
0x21dc   :  { %20141 = vmatprep.subr.bf16.mxu1 %v25791_v32 }
0x21df   :  { %20143 = vmatpush1.bf16.msra.mxu1 %v25792_v26 }
0x21e0   :  { %20145 = vmatprep.subr.bf16.mxu1 %v25793_v15 }
0x21e2   :  { %14048 = vmatmul.mubr.f32.vlgmr.msra.gmra.mrb[106].mxu1 %v24276_v19 }
0x21e3   :  { %20147 = vmatpush1.bf16.msra.mxu1 %v25794_v33  ;;  %14051 = vmatprep.mubr.f32.mxu1 %v25351_v63 }
0x21e4   :  { %20149 = vmatprep.subr.bf16.mxu1 %v25795_v49 }
0x21e6   :  { %14053 = vmatmul.mubr.f32.gmra.mrb[104].mxu1 %v24368_v58 }
0x21e7   :  { %20151 = vmatpush1.bf16.msra.mxu1 %v25796_v24  ;;  %14155 = vmatprep.mubr.f32.mxu1 %v25351_v63  ;;  %v25807_v24 = vld [vmem:[#allocation111_spill] sm:$0xff] }
0x21e8   :  { %20153 = vmatprep.subr.bf16.mxu1 %v25797_v18  ;;  %v25806_v18 = vld [vmem:[#allocation109_spill] sm:$0xff] }
0x21eb   :  { %20155 = vmatpush1.bf16.msra.mxu1 %v25798_v14  ;;  %v25805_v14 = vld [vmem:[#allocation107_spill] sm:$0xff] }
0x21ec   :  { %20157 = vmatprep.subr.bf16.mxu1 %v25799_v41  ;;  %v25804_v41 = vld [vmem:[#allocation105_spill] sm:$0xff] }
0x21ef   :  { %20159 = vmatpush1.bf16.msra.mxu1 %v25800_v37  ;;  %v25802_v37 = vld [vmem:[#allocation101_spill] sm:$0xff] }
0x21f0   :  { %20161 = vmatprep.subr.bf16.mxu1 %v22596_v55 }
0x21f2   :  { %14158 = vmatmul.mubr.f32.vlgmr.msra.gmra.mrb[108].mxu1 %v24279_v38  ;;  %v25801_v38 = vld [vmem:[#allocation99_spill] sm:$0xff] }
0x21f3   :  { %20163 = vmatpush1.bf16.msra.mxu1 %v25493_v34  ;;  %14161 = vmatprep.mubr.f32.mxu1 %v25351_v63 }
0x21f4   :  { %20165 = vmatprep.subr.bf16.mxu1 %v25495_v7 }
0x21f6   :  { %14164 = vmatmul.mubr.f32.gmra.mrb[104].mxu1 %v24371_v47  ;;  %v25803_v47 = vld [vmem:[#allocation103_spill] sm:$0xff] }
0x21f7   :  { %20167 = vmatpush1.bf16.msra.mxu1 %v25612_v30  ;;  %14250 = vmatprep.mubr.f32.mxu1 %v25351_v63 }
0x21f8   :  { %20169 = vmatprep.subr.bf16.mxu1 %v25613_v8 }
0x21fb   :  { %20171 = vmatpush1.bf16.msra.mxu1 %v25614_v10 }
0x21fc   :  { %20173 = vmatprep.subr.bf16.mxu1 %v25615_v29 }
0x21ff   :  { %20175 = vmatpush1.bf16.msra.mxu1 %v25616_v9 }
0x2200   :  { %20177 = vmatprep.subr.bf16.mxu1 %v25801_v38  ;;  %v25808_v38 = vld [vmem:[#allocation113_spill] sm:$0xff] }
0x2202   :  { %14254 = vmatmul.mubr.f32.vlgmr.msra.gmra.mrb[110].mxu1 %v24282_v56 }
0x2203   :  { %20179 = vmatpush1.bf16.msra.mxu1 %v25802_v37  ;;  %14257 = vmatprep.mubr.f32.mxu1 %v25351_v63 }
0x2204   :  { %20181 = vmatprep.subr.bf16.mxu1 %v25803_v47 }
0x2206   :  { %14261 = vmatmul.mubr.f32.gmra.mrb[104].mxu1 %v24374_v54 }
0x2207   :  { %20183 = vmatpush1.bf16.msra.mxu1 %v25804_v41  ;;  %14379 = vmatprep.mubr.f32.mxu1 %v25351_v63 }
0x2208   :  { %20185 = vmatprep.subr.bf16.mxu1 %v25805_v14 }
0x220b   :  { %20187 = vmatpush1.bf16.msra.mxu1 %v25806_v18 }
0x220c   :  { %20189 = vmatprep.subr.bf16.mxu1 %v25807_v24 }
0x220f   :  { %20191 = vmatpush1.bf16.msra.mxu1 %v25808_v38 }
0x2210   :  { %20193 = vmatprep.subr.bf16.mxu1 %v22596_v55 }
0x2212   :  { %14381 = vmatmul.mubr.f32.vlgmr.msra.gmra.mrb[112].mxu1 %v24276_v19 }
0x2213   :  { %20195 = vmatpush1.bf16.msra.mxu1 %v25493_v34  ;;  %14384 = vmatprep.mubr.f32.mxu1 %v25351_v63 }
0x2214   :  { %20197 = vmatprep.subr.bf16.mxu1 %v25495_v7 }
0x2216   :  { %14386 = vmatmul.mubr.f32.gmra.mrb[104].mxu1 %v24368_v58 }
0x2217   :  { %20199 = vmatpush1.bf16.msra.mxu1 %v25612_v30  ;;  %14472 = vmatprep.mubr.f32.mxu1 %v25351_v63 }
0x2218   :  { %20201 = vmatprep.subr.bf16.mxu1 %v25613_v8 }
0x221b   :  { %20203 = vmatpush1.bf16.msra.mxu1 %v25614_v10 }
0x221c   :  { %20205 = vmatprep.subr.bf16.mxu1 %v25615_v29 }
0x221f   :  { %20207 = vmatpush1.bf16.msra.mxu1 %v25616_v9 }
0x2220   :  { %20209 = vmatprep.subr.bf16.mxu1 %v25507_v20 }
0x2222   :  { %14474 = vmatmul.mubr.f32.vlgmr.msra.gmra.mrb[114].mxu1 %v24276_v19  ;;  %v25809_v19 = vld [vmem:[#allocation42_spill] sm:$0xff] }
0x2223   :  { %14477 = vmatprep.mubr.f32.mxu1 %v25351_v63  ;;  %20211 = vmatpush1.bf16.msra.mxu1 %v25508_v22 }
0x2224   :  { %20213 = vmatprep.subr.bf16.mxu1 %v25509_v12 }
0x2226   :  { %14479 = vmatmul.mubr.f32.gmra.mrb[104].mxu1 %v24368_v58 }
0x2227   :  { %20215 = vmatpush1.bf16.msra.mxu1 %v25510_v27  ;;  %14600 = vmatprep.mubr.f32.mxu1 %v25351_v63 }
0x2228   :  { %20217 = vmatprep.subr.bf16.mxu1 %v25511_v45 }
0x222b   :  { %20219 = vmatpush1.bf16.msra.mxu1 %v25512_v46 }
0x222c   :  { %20221 = vmatprep.subr.bf16.mxu1 %v25513_v31 }
0x222f   :  { %20223 = vmatpush1.bf16.msra.mxu1 %v25514_v57 }
0x2230   :  { %20225 = vmatprep.subr.bf16.mxu1 %v25809_v19 }
0x2251   :  { %v13215_v56 = vpop.f32.mrb[90].mxu1 }
0x2252   :  { %v13216_v54 = vpop.f32.mrb[91].mxu1 }
0x2259   :  { %v13372_v38 = vpop.f32.mrb[92].mxu1 }
0x225a   :  { %v13373_v24 = vpop.f32.mrb[93].mxu1 }
0x2269   :  { %v13483_v18 = vpop.f32.mrb[94].mxu1 }
0x226a   :  { %v13484_v58 = vpop.f32.mrb[95].mxu1 }
0x2279   :  { %v13580_v14 = vpop.f32.mrb[96].mxu1 }
0x227a   :  { %v13581_v41 = vpop.f32.mrb[97].mxu1 }
0x2289   :  { %v13705_v47 = vpop.f32.mrb[98].mxu1 }
0x228a   :  { %v13706_v37 = vpop.f32.mrb[99].mxu1 }
0x2295   :  { %v13791_v9 = vpop.f32.mrb[12].mxu1 }
0x2296   :  { %v13793_v29 = vpop.f32.mrb[13].mxu1  ;;  %v20684_v19 = vadd.f32 %v13791_v9, %v25577_v25 }
0x2297   :  { %v20685_v10 = vadd.f32 %v13793_v29, %v25634_v39 }
0x2298   :  { %v17893_v39 = vmul.f32 -1.442695, %v20684_v19 }
0x2299   :  { %21225 = vtanh.f32 %v20685_v10  ;;  %v13798_v8 = vpop.f32.mrb[100].mxu1 }
0x229a   :  { %v13799_v30 = vpop.f32.mrb[101].mxu1  ;;  %21227 = vpow2.f32 %v17893_v39 }
0x22a3   :  { %v21226_v7 = vpop.eup %21225 }
0x22a4   :  { %14502 = vrot.lane.b32.xlu0 %v21226_v7, %s21376_s23  ;;  %v21228_v30 = vpop.eup %21227 }
0x22a5   :  { %v13888_v56 = vpop.f32.mrb[102].mxu1  ;;  %v14493_v8 = vadd.f32 1.0, %v21228_v30 }
0x22a6   :  { %v13889_v54 = vpop.f32.mrb[103].mxu1 }
0x22a7   :  { %21229 = vrcp.f32 %v14493_v8  ;;  %v25818_v8 = vld [vmem:[#allocation60_spill] sm:$0xff] }
0x22b1   :  { %v21230_v7 = vpop.eup %21229 }
0x22b5   :  { %v14049_v38 = vpop.f32.mrb[106].mxu1 }
0x22b6   :  { %v14050_v24 = vpop.f32.mrb[107].mxu1  ;;  %v14500_v38 = vmul.f32 %v21230_v7, %v24271_v43 }
0x22c5   :  { %v14159_v18 = vpop.f32.mrb[108].mxu1 }
0x22c6   :  { %v14160_v58 = vpop.f32.mrb[109].mxu1 }
0x22d5   :  { %v14255_v14 = vpop.f32.mrb[110].mxu1 }
0x22d6   :  { %v14256_v41 = vpop.f32.mrb[111].mxu1 }
0x22e5   :  { %v14382_v47 = vpop.f32.mrb[112].mxu1 }
0x22e6   :  { %v14383_v37 = vpop.f32.mrb[113].mxu1 }
0x22f5   :  { %v14475_v34 = vpop.f32.mrb[114].mxu1 }
0x22f6   :  { %v14476_v29 = vpop.f32.mrb[115].mxu1  ;;  %v17894_v34 = vmul.f32 -1.442695, %v20685_v10 }
0x2316   :  { %v14503_v56 = vpop.permute.xlu0 %14502 }
0x2317   :  { %v14505_v54 = vmul.f32 %v21230_v7, %v14503_v56  ;;  %v25819_v7 = vld [vmem:[#allocation61_spill] sm:$0xff]  ;;  %v25820_v56 = vld [vmem:[#allocation62_spill] sm:$0xff] }
0x2319   :  { %14507 = vrot.lane.b32.xlu1 %v14505_v54, %s21376_s23  ;;  %v25821_v54 = vld [vmem:[#allocation76_spill] sm:$0xff] }
0x238b   :  { %v14508_v24 = vpop.permute.xlu1 %14507 }
0x238c   :  { %v24519_v18 = vadd.f32 %v14508_v24, %v14500_v38  ;;  %v25822_v38 = vld [vmem:[#allocation79_spill] sm:$0xff] }
0x238d   :  { %v25823_v24 = vld [vmem:[#allocation19_spill] sm:$0xff] }
0x238e   :  { %21231 = vtanh.f32 %v24519_v18 }
0x238f   :  { %21233 = vpow2.f32 %v17894_v34  ;;  %v25825_v34 = vld [vmem:[#allocation28_spill] sm:$0xff] }
0x2398   :  { %v21232_v9 = vpop.eup %21231 }
0x2399   :  { %14513 = vrot.lane.b32.xlu0 %v21232_v9, %s21376_s23  ;;  %v21234_v39 = vpop.eup %21233  ;;  %v25824_v9 = vld [vmem:[#allocation25_spill] sm:$0xff] }
0x239a   :  { %v14494_v19 = vadd.f32 1.0, %v21234_v39  ;;  %v25826_v39 = vld [vmem:[#allocation34_spill] sm:$0xff] }
0x239c   :  { %21235 = vrcp.f32 %v14494_v19  ;;  %v25827_v19 = vld [vmem:[#allocation37_spill] sm:$0xff] }
0x23a6   :  { %v21236_v58 = vpop.eup %21235 }
0x240b   :  { %v14514_v14 = vpop.permute.xlu0 %14513 }
0x240c   :  { %v14516_v41 = vmul.f32 %v21236_v58, %v14514_v14  ;;  %v25828_v58 = vld [vmem:[#allocation85_spill] sm:$0xff]  ;;  %v25829_v14 = vld [vmem:[#allocation36_spill] sm:$0xff] }
0x240e   :  { %v14518_v47 = vsel %vm117_vm0, %v14516_v41, 0 }
0x240f   :  { %v24524_v37 = vand.u32 4294901760, %v14518_v47 }
0x2411   :  { %v24527_v43 = vsub.f32 %v14518_v47, %v24524_v37 }
0x2413   :  { %v24530_v29 = vand.u32 4294901760, %v24527_v43 }
0x2415   :  { %v14604_v10 = vsub.f32 %v24527_v43, %v24530_v29 }
0x2417   :  { %v24534_v30 = vand.u32 4294901760, %v14604_v10 }
0x2419   :  { %14606 = vmatmul.mubr.f32.vlgmr.msra.gmra.mrb[104].mxu1 %v24534_v30  ;;  %15972 = vmatmul.mubr.f32.vlgmr.msra.gmra.mrb[66].mxu0 %v24534_v30 }
0x241a   :  { %20227 = vmatpush1.bf16.msra.mxu1 %v25579_v36  ;;  %14756 = vmatprep.mubr.f32.mxu1 %v25351_v63 }
0x241b   :  { %20229 = vmatprep.subr.bf16.mxu1 %v25580_v50  ;;  %20419 = vmatpush1.bf16.msra.mxu0 %v25786_v53  ;;  %v25811_v53 = vld [vmem:[#allocation54_spill] sm:$0xff] }
0x241c   :  { %20421 = vmatprep.subr.bf16.mxu0 %v25787_v44  ;;  %15975 = vmatprep.mubr.f32.mxu0 %v25351_v63  ;;  %v25810_v44 = vld [vmem:[#allocation53_spill] sm:$0xff] }
0x241e   :  { %20231 = vmatpush1.bf16.msra.mxu1 %v25581_v2 }
0x241f   :  { %20233 = vmatprep.subr.bf16.mxu1 %v25582_v28  ;;  %20423 = vmatpush1.bf16.msra.mxu0 %v25788_v60  ;;  %v25815_v60 = vld [vmem:[#allocation57_spill] sm:$0xff] }
0x2420   :  { %20425 = vmatprep.subr.bf16.mxu0 %v25789_v42  ;;  %v25814_v42 = vld [vmem:[#allocation66_spill] sm:$0xff] }
0x2422   :  { %20235 = vmatpush1.bf16.msra.mxu1 %v25635_v21 }
0x2423   :  { %20237 = vmatprep.subr.bf16.mxu1 %v25693_v48  ;;  %20427 = vmatpush1.bf16.msra.mxu0 %v25790_v52  ;;  %v25813_v52 = vld [vmem:[#allocation56_spill] sm:$0xff] }
0x2424   :  { %20429 = vmatprep.subr.bf16.mxu0 %v25791_v32  ;;  %v25812_v32 = vld [vmem:[#allocation55_spill] sm:$0xff] }
0x2426   :  { %20239 = vmatpush1.bf16.msra.mxu1 %v25753_v61 }
0x2427   :  { %20241 = vmatprep.subr.bf16.mxu1 %v25754_v11  ;;  %20431 = vmatpush1.bf16.msra.mxu0 %v25792_v26  ;;  %v25816_v26 = vld [vmem:[#allocation58_spill] sm:$0xff] }
0x2428   :  { %20433 = vmatprep.subr.bf16.mxu0 %v25793_v15  ;;  %v25817_v15 = vld [vmem:[#allocation59_spill] sm:$0xff] }
0x2429   :  { %14758 = vmatmul.mubr.f32.vlgmr.msra.gmra.mrb[104].mxu1 %v24524_v37 }
0x242a   :  { %20243 = vmatpush1.bf16.msra.mxu1 %v25757_v59  ;;  %14860 = vmatprep.mubr.f32.mxu1 %v25351_v63 }
0x242b   :  { %20245 = vmatprep.subr.bf16.mxu1 %v25758_v6 }
0x242e   :  { %20247 = vmatpush1.bf16.msra.mxu1 %v25759_v17 }
0x242f   :  { %20249 = vmatprep.subr.bf16.mxu1 %v25760_v13 }
0x2432   :  { %20251 = vmatpush1.bf16.msra.mxu1 %v25810_v44 }
0x2433   :  { %20253 = vmatprep.subr.bf16.mxu1 %v25811_v53 }
0x2436   :  { %20255 = vmatpush1.bf16.msra.mxu1 %v25812_v32 }
0x2437   :  { %20257 = vmatprep.subr.bf16.mxu1 %v25507_v20 }
0x2439   :  { %14863 = vmatmul.mubr.f32.vlgmr.msra.gmra.mrb[104].mxu1 %v24527_v43 }
0x243a   :  { %20259 = vmatpush1.bf16.msra.mxu1 %v25508_v22  ;;  %14949 = vmatprep.mubr.f32.mxu1 %v25351_v63 }
0x243b   :  { %20261 = vmatprep.subr.bf16.mxu1 %v25509_v12 }
0x243e   :  { %20263 = vmatpush1.bf16.msra.mxu1 %v25510_v27 }
0x243f   :  { %20265 = vmatprep.subr.bf16.mxu1 %v25511_v45 }
0x2442   :  { %20267 = vmatpush1.bf16.msra.mxu1 %v25512_v46 }
0x2443   :  { %20269 = vmatprep.subr.bf16.mxu1 %v25513_v31 }
0x2446   :  { %20271 = vmatpush1.bf16.msra.mxu1 %v25514_v57 }
0x2447   :  { %20273 = vmatprep.subr.bf16.mxu1 %v25813_v52 }
0x2449   :  { %14953 = vmatmul.mubr.f32.vlgmr.msra.gmra.mrb[104].mxu1 %v24530_v29 }
0x244a   :  { %20275 = vmatpush1.bf16.msra.mxu1 %v25814_v42  ;;  %15071 = vmatprep.mubr.f32.mxu1 %v25351_v63 }
0x244b   :  { %20277 = vmatprep.subr.bf16.mxu1 %v25815_v60 }
0x244e   :  { %20279 = vmatpush1.bf16.msra.mxu1 %v25816_v26 }
0x244f   :  { %20281 = vmatprep.subr.bf16.mxu1 %v25817_v15 }
0x2452   :  { %20283 = vmatpush1.bf16.msra.mxu1 %v25818_v8 }
0x2453   :  { %20285 = vmatprep.subr.bf16.mxu1 %v25819_v7 }
0x2456   :  { %20287 = vmatpush1.bf16.msra.mxu1 %v25820_v56 }
0x2457   :  { %20289 = vmatprep.subr.bf16.mxu1 %v25507_v20 }
0x2459   :  { %15073 = vmatmul.mubr.f32.vlgmr.msra.gmra.mrb[104].mxu1 %v24524_v37 }
0x245a   :  { %20291 = vmatpush1.bf16.msra.mxu1 %v25508_v22  ;;  %15159 = vmatprep.mubr.f32.mxu1 %v25351_v63 }
0x245b   :  { %20293 = vmatprep.subr.bf16.mxu1 %v25509_v12 }
0x245e   :  { %20295 = vmatpush1.bf16.msra.mxu1 %v25510_v27 }
0x245f   :  { %20297 = vmatprep.subr.bf16.mxu1 %v25511_v45 }
0x2462   :  { %20299 = vmatpush1.bf16.msra.mxu1 %v25512_v46 }
0x2463   :  { %20301 = vmatprep.subr.bf16.mxu1 %v25513_v31 }
0x2466   :  { %20303 = vmatpush1.bf16.msra.mxu1 %v25514_v57 }
0x2467   :  { %20305 = vmatprep.subr.bf16.mxu1 %v25726_v16 }
0x2469   :  { %15161 = vmatmul.mubr.f32.vlgmr.msra.gmra.mrb[104].mxu1 %v24524_v37 }
0x246a   :  { %20307 = vmatpush1.bf16.msra.mxu1 %v25727_v23  ;;  %15282 = vmatprep.mubr.f32.mxu1 %v25351_v63 }
0x246b   :  { %20309 = vmatprep.subr.bf16.mxu1 %v25728_v5 }
0x246e   :  { %20311 = vmatpush1.bf16.msra.mxu1 %v25729_v0 }
0x246f   :  { %20313 = vmatprep.subr.bf16.mxu1 %v25774_v51 }
0x2472   :  { %20315 = vmatpush1.bf16.msra.mxu1 %v25775_v4 }
0x2473   :  { %20317 = vmatprep.subr.bf16.mxu1 %v25776_v1 }
0x2476   :  { %20319 = vmatpush1.bf16.msra.mxu1 %v25777_v62 }
0x2477   :  { %20321 = vmatprep.subr.bf16.mxu1 %v25821_v54 }
0x2479   :  { %15288 = vmatmul.mubr.f32.vlgmr.msra.gmra.mrb[14].mxu1 %v24534_v30 }
0x247a   :  { %20323 = vmatpush1.bf16.msra.mxu1 %v25822_v38  ;;  %15293 = vmatprep.mubr.f32.mxu1 %v25351_v63 }
0x247b   :  { %20325 = vmatprep.subr.bf16.mxu1 %v25823_v24  ;;  %v25830_v24 = vld [vmem:[#allocation75_spill] sm:$0xff] }
0x247e   :  { %20327 = vmatpush1.bf16.msra.mxu1 %v25824_v9 }
0x247f   :  { %20329 = vmatprep.subr.bf16.mxu1 %v25825_v34 }
0x2482   :  { %20331 = vmatpush1.bf16.msra.mxu1 %v25826_v39 }
0x2483   :  { %20333 = vmatprep.subr.bf16.mxu1 %v25827_v19 }
0x2486   :  { %20335 = vmatpush1.bf16.msra.mxu1 %v25828_v58 }
0x2487   :  { %20337 = vmatprep.subr.bf16.mxu1 %v25829_v14 }
0x24ec   :  { %v15973_v41 = vpop.f32.mrb[66].mxu0 }
0x24ed   :  { %v15974_v47 = vpop.f32.mrb[67].mxu0 }
0x253c   :  { %v15162_v10 = vpop.f32.mrb[104].mxu1 }
0x253d   :  { %v15164_v30 = vpop.f32.mrb[105].mxu1  ;;  %v15167_v9 = vadd.f32 %v15162_v10, %v25830_v24 }
0x253e   :  { %v15168_v54 = vadd.f32 %v15164_v30, %v25773_v35 }
0x253f   :  { %v17895_v34 = vmul.f32 -1.442695, %v15167_v9 }
0x2540   :  { %21237 = vtanh.f32 %v15168_v54  ;;  %v17896_v10 = vmul.f32 -1.442695, %v15168_v54  ;;  %v25831_v54 = vld [vmem:[#allocation84_spill] sm:$0xff] }
0x2541   :  { %21239 = vpow2.f32 %v17895_v34 }
0x254a   :  { %v21238_v38 = vpop.eup %21237 }
0x254b   :  { %15184 = vrot.lane.b32.xlu1 %v21238_v38, %s21376_s23  ;;  %v21240_v39 = vpop.eup %21239 }
0x254c   :  { %v15175_v19 = vadd.f32 1.0, %v21240_v39 }
0x254e   :  { %21241 = vrcp.f32 %v15175_v19 }
0x2558   :  { %v21242_v58 = vpop.eup %21241 }
0x2559   :  { %v15182_v41 = vmul.f32 %v21242_v58, %v24363_v3 }
0x25bd   :  { %v15185_v56 = vpop.permute.xlu1 %15184 }
0x25be   :  { %v15187_v14 = vmul.f32 %v21242_v58, %v15185_v56 }
0x25c0   :  { %15189 = vrot.lane.b32.xlu0 %v15187_v14, %s21376_s23 }
0x2632   :  { %v15190_v47 = vpop.permute.xlu0 %15189 }
0x2633   :  { %v24621_v30 = vadd.f32 %v15190_v47, %v15182_v41 }
0x2635   :  { %21243 = vtanh.f32 %v24621_v30 }
0x2636   :  { %21245 = vpow2.f32 %v17896_v10  ;;  %v25833_v10 = vld [vmem:[#allocation88_spill] sm:$0xff] }
0x263f   :  { %v21244_v38 = vpop.eup %21243 }
0x2640   :  { %15195 = vrot.lane.b32.xlu1 %v21244_v38, %s21376_s23  ;;  %v21246_v9 = vpop.eup %21245  ;;  %v25832_v38 = vld [vmem:[#allocation87_spill] sm:$0xff] }
0x2641   :  { %v15176_v34 = vadd.f32 1.0, %v21246_v9  ;;  %v25834_v9 = vld [vmem:[#allocation89_spill] sm:$0xff] }
0x2643   :  { %21247 = vrcp.f32 %v15176_v34  ;;  %v25837_v34 = vld [vmem:[#allocation92_spill] sm:$0xff] }
0x264d   :  { %v21248_v39 = vpop.eup %21247 }
0x26b2   :  { %v15196_v19 = vpop.permute.xlu1 %15195 }
0x26b3   :  { %v15198_v56 = vmul.f32 %v21248_v39, %v15196_v19  ;;  %v25839_v39 = vld [vmem:[#allocation94_spill] sm:$0xff]  ;;  %v25840_v19 = vld [vmem:[#allocation95_spill] sm:$0xff] }
0x26b5   :  { %v15200_v14 = vsel %vm117_vm0, %v15198_v56, 0  ;;  %v25841_v56 = vld [vmem:[#allocation97_spill] sm:$0xff] }
0x26b6   :  { %v24626_v24 = vand.u32 4294901760, %v15200_v14 }
0x26b8   :  { %v15295_v3 = vsub.f32 %v15200_v14, %v24626_v24  ;;  %v25842_v14 = vld [vmem:[#allocation67_spill] sm:$0xff] }
0x26ba   :  { %v24629_v58 = vand.u32 4294901760, %v15295_v3 }
0x26bc   :  { %v15297_v41 = vsub.f32 %v15295_v3, %v24629_v58 }
0x26be   :  { %v15298_v47 = vand.u32 4294901760, %v15297_v41  ;;  %v25843_v41 = vld [vmem:[#allocation68_spill] sm:$0xff] }
0x26c0   :  { %15299 = vmatmul.mubr.f32.gmra.mrb[116].mxu1 %v15298_v47  ;;  %15981 = vmatmul.mubr.f32.gmra.mrb[68].mxu0 %v15298_v47  ;;  %v25844_v47 = vld [vmem:[#allocation69_spill] sm:$0xff] }
0x26c1   :  { %15447 = vmatprep.mubr.f32.mxu1 %v25351_v63  ;;  %16131 = vmatprep.mubr.f32.mxu0 %v25351_v63 }
0x26c4   :  { %15449 = vmatmul.mubr.f32.vlgmr.msra.gmra.mrb[14].mxu1 %v24524_v37  ;;  %16133 = vmatmul.mubr.f32.vlgmr.msra.gmra.mrb[70].mxu0 %v24524_v37 }
0x26c5   :  { %20339 = vmatpush1.bf16.msra.mxu1 %v23026_v40  ;;  %20435 = vmatpush1.bf16.msra.mxu0 %v25794_v33  ;;  %v25835_v40 = vld [vmem:[#allocation90_spill] sm:$0xff]  ;;  %v25836_v33 = vld [vmem:[#allocation91_spill] sm:$0xff] }
0x26c6   :  { %15454 = vmatprep.mubr.f32.mxu1 %v25351_v63  ;;  %20341 = vmatprep.subr.bf16.mxu1 %v25831_v54  ;;  %v25846_v54 = vld [vmem:[#allocation71_spill] sm:$0xff] }
0x26c7   :  { %16136 = vmatprep.mubr.f32.mxu0 %v25351_v63  ;;  %20437 = vmatprep.subr.bf16.mxu0 %v25795_v49  ;;  %v25838_v49 = vld [vmem:[#allocation93_spill] sm:$0xff] }
0x26c8   :  { %15456 = vmatmul.mubr.f32.gmra.mrb[118].mxu1 %v24626_v24  ;;  %16138 = vmatmul.mubr.f32.gmra.mrb[68].mxu0 %v24626_v24 }
0x26c9   :  { %20343 = vmatpush1.bf16.msra.mxu1 %v25832_v38  ;;  %20439 = vmatpush1.bf16.msra.mxu0 %v25833_v10  ;;  %v25847_v38 = vld [vmem:[#allocation72_spill] sm:$0xff]  ;;  %v25849_v10 = vld [vmem:[#allocation98_spill] sm:$0xff] }
0x26ca   :  { %20345 = vmatprep.subr.bf16.mxu1 %v25834_v9  ;;  %20441 = vmatprep.subr.bf16.mxu0 %v25835_v40  ;;  %v25850_v9 = vld [vmem:[#allocation99_spill] sm:$0xff]  ;;  %v25851_v40 = vld [vmem:[#allocation100_spill] sm:$0xff] }
0x26cb   :  { %15556 = vmatprep.mubr.f32.mxu1 %v25351_v63  ;;  %16240 = vmatprep.mubr.f32.mxu0 %v25351_v63 }
0x26cd   :  { %20347 = vmatpush1.bf16.msra.mxu1 %v25836_v33  ;;  %20443 = vmatpush1.bf16.msra.mxu0 %v25837_v34  ;;  %v25852_v33 = vld [vmem:[#allocation101_spill] sm:$0xff]  ;;  %v25853_v34 = vld [vmem:[#allocation102_spill] sm:$0xff] }
0x26ce   :  { %20349 = vmatprep.subr.bf16.mxu1 %v25838_v49  ;;  %20445 = vmatprep.subr.bf16.mxu0 %v25839_v39  ;;  %v25854_v49 = vld [vmem:[#allocation103_spill] sm:$0xff]  ;;  %v25855_v39 = vld [vmem:[#allocation104_spill] sm:$0xff] }
0x26d1   :  { %20351 = vmatpush1.bf16.msra.mxu1 %v25840_v19  ;;  %20447 = vmatpush1.bf16.msra.mxu0 %v25841_v56  ;;  %v25856_v19 = vld [vmem:[#allocation105_spill] sm:$0xff]  ;;  %v25858_v56 = vld [vmem:[#allocation107_spill] sm:$0xff] }
0x26d2   :  { %20353 = vmatprep.subr.bf16.mxu1 %v25726_v16  ;;  %20449 = vmatprep.subr.bf16.mxu0 %v22596_v55 }
0x26d4   :  { %15559 = vmatmul.mubr.f32.vlgmr.msra.gmra.mrb[14].mxu1 %v24527_v43  ;;  %16243 = vmatmul.mubr.f32.vlgmr.msra.gmra.mrb[72].mxu0 %v24527_v43  ;;  %v25845_v43 = vld [vmem:[#allocation70_spill] sm:$0xff] }
0x26d5   :  { %20355 = vmatpush1.bf16.msra.mxu1 %v25727_v23  ;;  %20451 = vmatpush1.bf16.msra.mxu0 %v25842_v14 }
0x26d6   :  { %15564 = vmatprep.mubr.f32.mxu1 %v25351_v63  ;;  %16246 = vmatprep.mubr.f32.mxu0 %v25351_v63 }
0x26d7   :  { %20357 = vmatprep.subr.bf16.mxu1 %v25728_v5  ;;  %20453 = vmatprep.subr.bf16.mxu0 %v25843_v41 }
0x26d8   :  { %15567 = vmatmul.mubr.f32.gmra.mrb[120].mxu1 %v15295_v3  ;;  %16249 = vmatmul.mubr.f32.gmra.mrb[68].mxu0 %v15295_v3  ;;  %v25848_v3 = vld [vmem:[#allocation73_spill] sm:$0xff] }
0x26d9   :  { %20359 = vmatpush1.bf16.msra.mxu1 %v25729_v0  ;;  %20455 = vmatpush1.bf16.msra.mxu0 %v25844_v47 }
0x26da   :  { %20361 = vmatprep.subr.bf16.mxu1 %v25774_v51  ;;  %20457 = vmatprep.subr.bf16.mxu0 %v25845_v43 }
0x26db   :  { %15651 = vmatprep.mubr.f32.mxu1 %v25351_v63  ;;  %16335 = vmatprep.mubr.f32.mxu0 %v25351_v63 }
0x26dd   :  { %20363 = vmatpush1.bf16.msra.mxu1 %v25775_v4  ;;  %20459 = vmatpush1.bf16.msra.mxu0 %v25846_v54 }
0x26de   :  { %20365 = vmatprep.subr.bf16.mxu1 %v25776_v1  ;;  %20461 = vmatprep.subr.bf16.mxu0 %v25847_v38 }
0x26e1   :  { %20367 = vmatpush1.bf16.msra.mxu1 %v25777_v62  ;;  %20463 = vmatpush1.bf16.msra.mxu0 %v25848_v3 }
0x26e2   :  { %20369 = vmatprep.subr.bf16.mxu1 %v25849_v10  ;;  %20465 = vmatprep.subr.bf16.mxu0 %v25850_v9  ;;  %v25859_v10 = vld [vmem:[#allocation108_spill] sm:$0xff]  ;;  %v25860_v9 = vld [vmem:[#allocation109_spill] sm:$0xff] }
0x26e4   :  { %15655 = vmatmul.mubr.f32.vlgmr.msra.gmra.mrb[14].mxu1 %v24530_v29  ;;  %16339 = vmatmul.mubr.f32.vlgmr.msra.gmra.mrb[74].mxu0 %v24530_v29  ;;  %v25857_v29 = vld [vmem:[#allocation106_spill] sm:$0xff] }
0x26e5   :  { %20371 = vmatpush1.bf16.msra.mxu1 %v25851_v40  ;;  %20467 = vmatpush1.bf16.msra.mxu0 %v25852_v33  ;;  %v25861_v40 = vld [vmem:[#allocation110_spill] sm:$0xff]  ;;  %v25862_v33 = vld [vmem:[#allocation111_spill] sm:$0xff] }
0x26e6   :  { %15660 = vmatprep.mubr.f32.mxu1 %v25351_v63  ;;  %16342 = vmatprep.mubr.f32.mxu0 %v25351_v63 }
0x26e7   :  { %20373 = vmatprep.subr.bf16.mxu1 %v25853_v34  ;;  %20469 = vmatprep.subr.bf16.mxu0 %v25854_v49  ;;  %v25864_v34 = vld [vmem:[#allocation113_spill] sm:$0xff] }
0x26e8   :  { %15664 = vmatmul.mubr.f32.gmra.mrb[122].mxu1 %v24629_v58  ;;  %16346 = vmatmul.mubr.f32.gmra.mrb[68].mxu0 %v24629_v58  ;;  %v25863_v58 = vld [vmem:[#allocation112_spill] sm:$0xff] }
0x26e9   :  { %20375 = vmatpush1.bf16.msra.mxu1 %v25855_v39  ;;  %20471 = vmatpush1.bf16.msra.mxu0 %v25856_v19 }
0x26ea   :  { %20377 = vmatprep.subr.bf16.mxu1 %v25857_v29  ;;  %20473 = vmatprep.subr.bf16.mxu0 %v25858_v56 }
0x26eb   :  { %15780 = vmatprep.mubr.f32.mxu1 %v25351_v63  ;;  %16464 = vmatprep.mubr.f32.mxu0 %v25351_v63 }
0x26ed   :  { %20379 = vmatpush1.bf16.msra.mxu1 %v25859_v10  ;;  %20475 = vmatpush1.bf16.msra.mxu0 %v25860_v9  ;;  %v25866_v10 = vld [vmem:[#allocation13_spill] sm:$0xff] }
0x26ee   :  { %20381 = vmatprep.subr.bf16.mxu1 %v25861_v40  ;;  %20477 = vmatprep.subr.bf16.mxu0 %v25862_v33 }
0x26f1   :  { %20383 = vmatpush1.bf16.msra.mxu1 %v25863_v58  ;;  %20479 = vmatpush1.bf16.msra.mxu0 %v25864_v34 }
0x26f2   :  { %20385 = vmatprep.subr.bf16.mxu1 %v25726_v16  ;;  %20481 = vmatprep.subr.bf16.mxu0 %v22596_v55  ;;  %v25865_v55 = vld [vmem:[#allocation42_spill] sm:$0xff] }
0x26f4   :  { %15782 = vmatmul.mubr.f32.vlgmr.msra.gmra.mrb[14].mxu1 %v24524_v37  ;;  %16466 = vmatmul.mubr.f32.vlgmr.msra.gmra.mrb[76].mxu0 %v24524_v37 }
0x26f5   :  { %20387 = vmatpush1.bf16.msra.mxu1 %v25727_v23  ;;  %20483 = vmatpush1.bf16.msra.mxu0 %v25842_v14 }
0x26f6   :  { %15787 = vmatprep.mubr.f32.mxu1 %v25351_v63  ;;  %16469 = vmatprep.mubr.f32.mxu0 %v25351_v63 }
0x26f7   :  { %20389 = vmatprep.subr.bf16.mxu1 %v25728_v5  ;;  %20485 = vmatprep.subr.bf16.mxu0 %v25843_v41 }
0x26f8   :  { %15789 = vmatmul.mubr.f32.gmra.mrb[124].mxu1 %v24626_v24  ;;  %16471 = vmatmul.mubr.f32.gmra.mrb[68].mxu0 %v24626_v24 }
0x26f9   :  { %20391 = vmatpush1.bf16.msra.mxu1 %v25729_v0  ;;  %20487 = vmatpush1.bf16.msra.mxu0 %v25844_v47 }
0x26fa   :  { %20393 = vmatprep.subr.bf16.mxu1 %v25774_v51  ;;  %20489 = vmatprep.subr.bf16.mxu0 %v25845_v43 }
0x26fb   :  { %15873 = vmatprep.mubr.f32.mxu1 %v25351_v63  ;;  %16557 = vmatprep.mubr.f32.mxu0 %v25351_v63 }
0x26fd   :  { %20395 = vmatpush1.bf16.msra.mxu1 %v25775_v4  ;;  %20491 = vmatpush1.bf16.msra.mxu0 %v25846_v54 }
0x26fe   :  { %20397 = vmatprep.subr.bf16.mxu1 %v25776_v1  ;;  %20493 = vmatprep.subr.bf16.mxu0 %v25847_v38 }
0x2701   :  { %20399 = vmatpush1.bf16.msra.mxu1 %v25777_v62  ;;  %20495 = vmatpush1.bf16.msra.mxu0 %v25848_v3 }
0x2702   :  { %20497 = vmatprep.subr.bf16.mxu0 %v25507_v20 }
0x2704   :  { %15875 = vmatmul.mubr.f32.vlgmr.msra.gmra.mrb[14].mxu1 %v24524_v37  ;;  %16559 = vmatmul.mubr.f32.vlgmr.msra.gmra.mrb[78].mxu0 %v24524_v37 }
0x2705   :  { %15880 = vmatprep.mubr.f32.mxu1 %v25351_v63  ;;  %16562 = vmatprep.mubr.f32.mxu0 %v25351_v63 }
0x2706   :  { %20499 = vmatpush1.bf16.msra.mxu0 %v25508_v22 }
0x2707   :  { %20501 = vmatprep.subr.bf16.mxu0 %v25509_v12 }
0x2708   :  { %15882 = vmatmul.mubr.f32.gmra.mrb[126].mxu1 %v24626_v24  ;;  %16564 = vmatmul.mubr.f32.gmra.mrb[68].mxu0 %v24626_v24 }
0x2709   :  { %16685 = vmatprep.mubr.f32.mxu0 %v25351_v63 }
0x270a   :  { %20503 = vmatpush1.bf16.msra.mxu0 %v25510_v27 }
0x270b   :  { %20505 = vmatprep.subr.bf16.mxu0 %v25511_v45 }
0x270e   :  { %20507 = vmatpush1.bf16.msra.mxu0 %v25512_v46 }
0x270f   :  { %20509 = vmatprep.subr.bf16.mxu0 %v25513_v31 }
0x2712   :  { %20511 = vmatpush1.bf16.msra.mxu0 %v25514_v57 }
0x2713   :  { %20513 = vmatprep.subr.bf16.mxu0 %v25865_v55 }
0x2793   :  { %v15300_v16 = vpop.f32.mrb[116].mxu1 }
0x2794   :  { %v15301_v23 = vpop.f32.mrb[117].mxu1 }
0x2797   :  { %v16134_v5 = vpop.f32.mrb[70].mxu0 }
0x2798   :  { %v16135_v0 = vpop.f32.mrb[71].mxu0 }
0x279b   :  { %v15457_v51 = vpop.f32.mrb[118].mxu1 }
0x279c   :  { %v15458_v4 = vpop.f32.mrb[119].mxu1 }
0x27a7   :  { %v16244_v1 = vpop.f32.mrb[72].mxu0 }
0x27a8   :  { %v16245_v62 = vpop.f32.mrb[73].mxu0 }
0x27ab   :  { %v15568_v37 = vpop.f32.mrb[120].mxu1 }
0x27ac   :  { %v15569_v24 = vpop.f32.mrb[121].mxu1 }
0x27b7   :  { %v16340_v14 = vpop.f32.mrb[74].mxu0 }
0x27b8   :  { %v16341_v41 = vpop.f32.mrb[75].mxu0 }
0x27bb   :  { %v15665_v47 = vpop.f32.mrb[122].mxu1 }
0x27bc   :  { %v15666_v43 = vpop.f32.mrb[123].mxu1 }
0x27c7   :  { %v16467_v54 = vpop.f32.mrb[76].mxu0 }
0x27c8   :  { %v16468_v38 = vpop.f32.mrb[77].mxu0 }
0x27cb   :  { %v15790_v3 = vpop.f32.mrb[124].mxu1 }
0x27cc   :  { %v15791_v49 = vpop.f32.mrb[125].mxu1 }
0x27d7   :  { %v15876_v39 = vpop.f32.mrb[14].mxu1  ;;  %v16560_v19 = vpop.f32.mrb[78].mxu0 }
0x27d8   :  { %v15878_v29 = vpop.f32.mrb[15].mxu1  ;;  %v16561_v56 = vpop.f32.mrb[79].mxu0  ;;  %v20686_v34 = vadd.f32 %v15876_v39, %v25577_v25 }
0x27d9   :  { %v20687_v9 = vadd.f32 %v15878_v29, %v25866_v10  ;;  %v17290_v56 = vld [vmem:[%s24942_s8 + $0x30] sm:$0xff]  ;;  %v17291_v10 = vld [vmem:[%s24942_s8 + $0x38] sm:$0xff] }
0x27da   :  { %v17897_v55 = vmul.f32 -1.442695, %v20686_v34 }
0x27db   :  { %21249 = vtanh.f32 %v20687_v9  ;;  %v15883_v40 = vpop.f32.mrb[126].mxu1  ;;  %v17898_v24 = vmul.f32 -1.442695, %v20687_v9  ;;  %v17321_v9 = vand.u32 4294901760, %v17290_v56 }
0x27dc   :  { %v15884_v33 = vpop.f32.mrb[127].mxu1  ;;  %21251 = vpow2.f32 %v17897_v55  ;;  %v17324_v40 = vand.u32 4294901760, %v17291_v10 }
0x27e5   :  { %v21250_v58 = vpop.eup %21249 }
0x27e6   :  { %16587 = vrot.lane.b32.xlu0 %v21250_v58, %s21376_s23  ;;  %v21252_v16 = vpop.eup %21251 }
0x27e7   :  { %v16578_v23 = vadd.f32 1.0, %v21252_v16 }
0x27e9   :  { %21253 = vrcp.f32 %v16578_v23 }
0x27f3   :  { %v21254_v5 = vpop.eup %21253 }
0x27f4   :  { %v16585_v4 = vmul.f32 %v21254_v5, %v24519_v18 }
0x2858   :  { %v16588_v0 = vpop.permute.xlu0 %16587 }
0x2859   :  { %v16590_v51 = vmul.f32 %v21254_v5, %v16588_v0  ;;  %v24852_v5 = vpack.c.bf16 %v17324_v40, %v17321_v9  ;;  %v24854_v0 = vsub.f32 %v17290_v56, %v17321_v9 }
0x285b   :  { %16592 = vrot.lane.b32.xlu1 %v16590_v51, %s21376_s23  ;;  %v24856_v51 = vsub.f32 %v17291_v10, %v17324_v40 }
0x28cd   :  { %v16593_v1 = vpop.permute.xlu1 %16592 }
0x28ce   :  { %v16595_v62 = vadd.f32 %v16593_v1, %v16585_v4 }
0x28d0   :  { %21255 = vtanh.f32 %v16595_v62 }
0x28d1   :  { %21257 = vpow2.f32 %v17898_v24 }
0x28da   :  { %v21256_v37 = vpop.eup %21255 }
0x28db   :  { %16598 = vrot.lane.b32.xlu0 %v21256_v37, %s21376_s23  ;;  %v21258_v25 = vpop.eup %21257 }
0x28dc   :  { %v16579_v14 = vadd.f32 1.0, %v21258_v25 }
0x28de   :  { %21259 = vrcp.f32 %v16579_v14 }
0x28e8   :  { %v21260_v41 = vpop.eup %21259 }
0x294d   :  { %v16599_v47 = vpop.permute.xlu0 %16598 }
0x294e   :  { %v16601_v43 = vmul.f32 %v21260_v41, %v16599_v47 }
0x2950   :  { %v16603_v54 = vsel %vm117_vm0, %v16601_v43, 0 }
0x2951   :  { %v16686_v38 = vand.u32 4294901760, %v16603_v54 }
0x2953   :  { %v16687_v3 = vsub.f32 %v16603_v54, %v16686_v38 }
0x2955   :  { %v16688_v49 = vand.u32 4294901760, %v16687_v3 }
0x2957   :  { %v16689_v18 = vsub.f32 %v16687_v3, %v16688_v49 }
0x2959   :  { %v16690_v39 = vand.u32 4294901760, %v16689_v18 }
0x295b   :  { %16691 = vmatmul.mubr.f32.vlgmr.msra.gmra.mrb[68].mxu0 %v16690_v39 }
0x295c   :  { %20515 = vmatpush1.bf16.msra.mxu0 %v25579_v36  ;;  %16841 = vmatprep.mubr.f32.mxu0 %v25351_v63  ;;  %v25867_v36 = vld [vmem:[#allocation62_spill] sm:$0xff] }
0x295d   :  { %20517 = vmatprep.subr.bf16.mxu0 %v25580_v50 }
0x2960   :  { %20519 = vmatpush1.bf16.msra.mxu0 %v25581_v2 }
0x2961   :  { %20521 = vmatprep.subr.bf16.mxu0 %v25582_v28 }
0x2964   :  { %20523 = vmatpush1.bf16.msra.mxu0 %v25635_v21 }
0x2965   :  { %20525 = vmatprep.subr.bf16.mxu0 %v25693_v48  ;;  %v17285_v48 = vld [vmem:[%s24942_s8 + $0x8] sm:$0xff] }
0x2968   :  { %20527 = vmatpush1.bf16.msra.mxu0 %v25753_v61  ;;  %v21377_v61 = vmov 0.0|0.0  }
0x2969   :  { %20529 = vmatprep.subr.bf16.mxu0 %v25754_v11 }
0x296b   :  { %16843 = vmatmul.mubr.f32.vlgmr.msra.gmra.mrb[68].mxu0 %v16686_v38 }
0x296c   :  { %20531 = vmatpush1.bf16.msra.mxu0 %v25757_v59  ;;  %16945 = vmatprep.mubr.f32.mxu0 %v25351_v63  ;;  %v17306_v59 = vand.u32 4294901760, %v17285_v48 }
0x296d   :  { %20533 = vmatprep.subr.bf16.mxu0 %v25758_v6 }
0x2970   :  { %20535 = vmatpush1.bf16.msra.mxu0 %v25759_v17 }
0x2971   :  { %20537 = vmatprep.subr.bf16.mxu0 %v25760_v13  ;;  %v24811_v13 = vsub.f32 %v17285_v48, %v17306_v59 }
0x2973   :  { %v17395_v58 = vand.u32 4294901760, %v24811_v13 }
0x2974   :  { %20539 = vmatpush1.bf16.msra.mxu0 %v25810_v44  ;;  %v17286_v44 = vld [vmem:[%s24942_s8 + $0x10] sm:$0xff] }
0x2975   :  { %20541 = vmatprep.subr.bf16.mxu0 %v25811_v53  ;;  %v17287_v53 = vld [vmem:[%s24942_s8 + $0x18] sm:$0xff]  ;;  %v17396_v1 = vsub.f32 %v24811_v13, %v17395_v58 }
0x2977   :  { %v17397_v25 = vand.u32 4294901760, %v17396_v1 }
0x2978   :  { %20543 = vmatpush1.bf16.msra.mxu0 %v25812_v32  ;;  %v17309_v32 = vand.u32 4294901760, %v17286_v44 }
0x2979   :  { %20545 = vmatprep.subr.bf16.mxu0 %v25507_v20 }
0x297a   :  { %v24844_v34 = vsub.f32 %v17286_v44, %v17309_v32 }
0x297b   :  { %16948 = vmatmul.mubr.f32.vlgmr.msra.gmra.mrb[68].mxu0 %v16687_v3 }
0x297c   :  { %20547 = vmatpush1.bf16.msra.mxu0 %v25508_v22  ;;  %17034 = vmatprep.mubr.f32.mxu0 %v25351_v63  ;;  %v17402_v62 = vand.u32 4294901760, %v24844_v34 }
0x297d   :  { %20549 = vmatprep.subr.bf16.mxu0 %v25509_v12 }
0x297e   :  { %v17403_v41 = vsub.f32 %v24844_v34, %v17402_v62 }
0x2980   :  { %20551 = vmatpush1.bf16.msra.mxu0 %v25510_v27  ;;  %v17404_v54 = vand.u32 4294901760, %v17403_v41 }
0x2981   :  { %20553 = vmatprep.subr.bf16.mxu0 %v25511_v45 }
0x2984   :  { %20555 = vmatpush1.bf16.msra.mxu0 %v25512_v46 }
0x2985   :  { %20557 = vmatprep.subr.bf16.mxu0 %v25513_v31 }
0x2988   :  { %20559 = vmatpush1.bf16.msra.mxu0 %v25514_v57 }
0x2989   :  { %20561 = vmatprep.subr.bf16.mxu0 %v25813_v52  ;;  %v17312_v52 = vand.u32 4294901760, %v17287_v53 }
0x298b   :  { %17038 = vmatmul.mubr.f32.vlgmr.msra.gmra.mrb[68].mxu0 %v16688_v49  ;;  %v24846_v55 = vsub.f32 %v17287_v53, %v17312_v52 }
0x298c   :  { %20563 = vmatpush1.bf16.msra.mxu0 %v25814_v42  ;;  %17156 = vmatprep.mubr.f32.mxu0 %v25351_v63 }
0x298d   :  { %20565 = vmatprep.subr.bf16.mxu0 %v25815_v60  ;;  %v17409_v37 = vand.u32 4294901760, %v24846_v55 }
0x298f   :  { %v17410_v47 = vsub.f32 %v24846_v55, %v17409_v37  ;;  %v20644_v44 = vpack.c.bf16 %v17409_v37, %v17402_v62 }
0x2990   :  { %20567 = vmatpush1.bf16.msra.mxu0 %v25816_v26  ;;  %v24822_v26 = vpack.c.bf16 %v17312_v52, %v17309_v32 }
0x2991   :  { %20569 = vmatprep.subr.bf16.mxu0 %v25817_v15 }
0x2994   :  { %20571 = vmatpush1.bf16.msra.mxu0 %v25818_v8  ;;  %v17288_v8 = vld [vmem:[%s24942_s8 + $0x20] sm:$0xff] }
0x2995   :  { %20573 = vmatprep.subr.bf16.mxu0 %v25819_v7  ;;  %v17289_v7 = vld [vmem:[%s24942_s8 + $0x28] sm:$0xff]  ;;  %v17315_v19 = vand.u32 4294901760, %v17288_v8 }
0x2996   :  { %v17318_v29 = vand.u32 4294901760, %v17289_v7 }
0x2997   :  { %v24848_v16 = vsub.f32 %v17288_v8, %v17315_v19 }
0x2998   :  { %20575 = vmatpush1.bf16.msra.mxu0 %v25867_v36  ;;  %v24850_v23 = vsub.f32 %v17289_v7, %v17318_v29 }
0x2999   :  { %20577 = vmatprep.subr.bf16.mxu0 %v25507_v20  ;;  %v17416_v3 = vand.u32 4294901760, %v24848_v16 }
0x299a   :  { %v17423_v49 = vand.u32 4294901760, %v24850_v23  ;;  %v20623_v48 = vpack.c.bf16 %v24850_v23, %v24848_v16 }
0x299b   :  { %17158 = vmatmul.mubr.f32.vlgmr.msra.gmra.mrb[68].mxu0 %v16686_v38  ;;  %v17417_v39 = vsub.f32 %v24848_v16, %v17416_v3 }
0x299c   :  { %20579 = vmatpush1.bf16.msra.mxu0 %v25508_v22  ;;  %17244 = vmatprep.mubr.f32.mxu0 %v25351_v63  ;;  %v17424_v36 = vsub.f32 %v24850_v23, %v17423_v49  ;;  %v20647_v53 = vpack.c.bf16 %v17423_v49, %v17416_v3 }
0x299d   :  { %20581 = vmatprep.subr.bf16.mxu0 %v25509_v12  ;;  %v25868_v12 = vld [vmem:[#allocation75_spill] sm:$0xff] }
0x29a0   :  { %20583 = vmatpush1.bf16.msra.mxu0 %v25510_v27 }
0x29a1   :  { %20585 = vmatprep.subr.bf16.mxu0 %v25511_v45 }
0x29a4   :  { %20587 = vmatpush1.bf16.msra.mxu0 %v25512_v46 }
0x29a5   :  { %20589 = vmatprep.subr.bf16.mxu0 %v25513_v31 }
0x29a8   :  { %20591 = vmatpush1.bf16.msra.mxu0 %v25514_v57 }
0x29a9   :  { %20592 = vmatprep.subr.bf16.mxu0 %v21377_v61 }
0x29ab   :  { %17246 = vmatmul.mubr.f32.vlgmr.msra.gmra.mrb[68].mxu0 %v16686_v38  ;;  %v17411_v38 = vand.u32 4294901760, %v17410_v47 }
0x29ac   :  { %18238 = vmatprep.mubr.msk.f32.mxu0 %vm21378_vm2, %v25351_v63 }
0x29ad   :  { %v20608_v18 = vpack.c.bf16 %v17411_v38, %v17404_v54 }
0x2a7e   :  { %v17247_v50 = vpop.f32.mrb[68].mxu0 }
0x2a7f   :  { %v17249_v20 = vpop.f32.mrb[69].mxu0  ;;  %v17252_v27 = vadd.f32 %v17247_v50, %v25868_v12  ;;  %v17418_v50 = vand.u32 4294901760, %v17417_v39  ;;  %v17437_v12 = vand.u32 4294901760, %v24856_v51 }
0x2a80   :  { %v24794_v2 = vadd.f32 %v17249_v20, %v25773_v35  ;;  %v17284_v35 = vld [vmem:[%s24942_s8] sm:$0xff]  ;;  %v17425_v20 = vand.u32 4294901760, %v17424_v36 }
0x2a81   :  { %v17899_v45 = vmul.f32 -1.442695, %v17252_v27  ;;  %v17303_v11 = vand.u32 4294901760, %v17284_v35 }
0x2a82   :  { %21261 = vtanh.f32 %v24794_v2  ;;  %v20611_v27 = vpack.c.bf16 %v17425_v20, %v17418_v50  ;;  %v17900_v52 = vmul.f32 -1.442695, %v24794_v2  ;;  %v17901_v2 = vld [vmem:[%s24943_s9] ss:$0 sm:$0xff] }
0x2a83   :  { %21263 = vpow2.f32 %v17899_v45  ;;  %v24807_v6 = vpack.c.bf16 %v17306_v59, %v17303_v11  ;;  %v24809_v17 = vsub.f32 %v17284_v35, %v17303_v11  ;;  %v20620_v35 = vpack.c.bf16 %v24846_v55, %v24844_v34 }
0x2a84   :  { %v20626_v11 = vpack.c.bf16 %v24856_v51, %v24854_v0 }
0x2a85   :  { %20594 = vmatpush3.bf16.msra.mxu0 %v24807_v6  ;;  %v17388_v33 = vand.u32 4294901760, %v24809_v17 }
0x2a86   :  { %20595 = vmatprep.subr.bf16.mxu0 %v21377_v61 }
0x2a87   :  { %v17389_v4 = vsub.f32 %v24809_v17, %v17388_v33  ;;  %v20641_v59 = vpack.c.bf16 %v17395_v58, %v17388_v33 }
0x2a89   :  { %20597 = vmatpush3.bf16.msra.mxu0 %v24822_v26  ;;  %v17390_v24 = vand.u32 4294901760, %v17389_v4 }
0x2a8a   :  { %20598 = vmatprep.subr.bf16.mxu0 %v21377_v61 }
0x2a8b   :  { %v20605_v43 = vpack.c.bf16 %v17397_v25, %v17390_v24 }
0x2a8c   :  { %v21262_v22 = vpop.eup %21261 }
0x2a8d   :  { %17269 = vrot.lane.b32.xlu1 %v21262_v22, %s21376_s23  ;;  %v21264_v46 = vpop.eup %21263  ;;  %v17430_v22 = vand.u32 4294901760, %v24854_v0 }
0x2a8e   :  { %v17260_v28 = vadd.f32 1.0, %v21264_v46  ;;  %v17438_v46 = vsub.f32 %v24856_v51, %v17437_v12 }
0x2a8f   :  { %v17431_v45 = vsub.f32 %v24854_v0, %v17430_v22  ;;  %v20650_v32 = vpack.c.bf16 %v17437_v12, %v17430_v22 }
0x2a90   :  { %21265 = vrcp.f32 %v17260_v28 }
0x2a91   :  { %v17432_v28 = vand.u32 4294901760, %v17431_v45 }
0x2a9a   :  { %v21266_v31 = vpop.eup %21265 }
0x2a9b   :  { %v17267_v42 = vmul.f32 %v21266_v31, %v24621_v30  ;;  %v24832_v30 = vpack.c.bf16 %v17318_v29, %v17315_v19 }
0x2a9d   :  { %20600 = vmatpush3.bf16.msra.mxu0 %v24832_v30 }
0x2a9e   :  { %20601 = vmatprep.subr.bf16.mxu0 %v21377_v61 }
0x2aa1   :  { %20603 = vmatpush3.bf16.msra.mxu0 %v24852_v5 }
0x2aa2   :  { %20604 = vmatprep.subr.bf16.mxu0 %v21377_v61 }
0x2aff   :  { %v17270_v57 = vpop.permute.xlu1 %17269 }
0x2b00   :  { %v17272_v21 = vmul.f32 %v21266_v31, %v17270_v57  ;;  %v17439_v31 = vand.u32 4294901760, %v17438_v46 }
0x2b02   :  { %17274 = vrot.lane.b32.xlu0 %v17272_v21, %s21376_s23  ;;  %v20614_v57 = vpack.c.bf16 %v17439_v31, %v17432_v28  ;;  %v20617_v21 = vpack.c.bf16 %v24811_v13, %v24809_v17 }
0x2b74   :  { %v17275_v60 = vpop.permute.xlu0 %17274 }
0x2b75   :  { %v17277_v15 = vadd.f32 %v17275_v60, %v17267_v42 }
0x2b77   :  { %21267 = vtanh.f32 %v17277_v15 }
0x2b78   :  { %21269 = vpow2.f32 %v17900_v52 }
0x2b81   :  { %v21268_v14 = vpop.eup %21267 }
0x2b82   :  { %17280 = vrot.lane.b32.xlu1 %v21268_v14, %s21376_s23  ;;  %v21270_v42 = vpop.eup %21269 }
0x2b83   :  { %v17261_v60 = vadd.f32 1.0, %v21270_v42 }
0x2b85   :  { %21271 = vrcp.f32 %v17261_v60 }
0x2b8f   :  { %v21272_v17 = vpop.eup %21271 }
0x2bf4   :  { %v17281_v13 = vpop.permute.xlu1 %17280 }
0x2bf5   :  { %v17283_v15 = vmul.f32 %v21272_v17, %v17281_v13 }
0x2bf7   :  { %v17300_v8 = vsel %vm117_vm0, %v17283_v15, 0 }
0x2bf8   :  { %v17375_v7 = vand.u32 4294901760, %v17300_v8 }
0x2bfa   :  { %v17376_v19 = vsub.f32 %v17300_v8, %v17375_v7 }
0x2bfc   :  { %v17377_v29 = vand.u32 4294901760, %v17376_v19 }
0x2bfe   :  { %v17378_v56 = vsub.f32 %v17376_v19, %v17377_v29 }
0x2c00   :  { %v17379_v10 = vand.u32 4294901760, %v17378_v56 }
0x2c02   :  { %18239 = vmatmul.mubr.f32.vlgmr.msra.gmra.mrb[80].mxu0 %v17379_v10 }
0x2c03   :  { %20606 = vmatpush3.bf16.msra.mxu0 %v20605_v43  ;;  %18257 = vmatprep.mubr.msk.f32.mxu0 %vm21378_vm2, %v25351_v63 }
0x2c04   :  { %20607 = vmatprep.subr.bf16.mxu0 %v21377_v61 }
0x2c07   :  { %20609 = vmatpush3.bf16.msra.mxu0 %v20608_v18 }
0x2c08   :  { %20610 = vmatprep.subr.bf16.mxu0 %v21377_v61 }
0x2c0b   :  { %20612 = vmatpush3.bf16.msra.mxu0 %v20611_v27 }
0x2c0c   :  { %20613 = vmatprep.subr.bf16.mxu0 %v21377_v61 }
0x2c0f   :  { %20615 = vmatpush3.bf16.msra.mxu0 %v20614_v57 }
0x2c10   :  { %20616 = vmatprep.subr.bf16.mxu0 %v21377_v61 }
0x2c12   :  { %18258 = vmatmul.mubr.f32.vlgmr.msra.gmra.mrb[80].mxu0 %v17375_v7 }
0x2c13   :  { %20618 = vmatpush3.bf16.msra.mxu0 %v20617_v21  ;;  %18276 = vmatprep.mubr.msk.f32.mxu0 %vm21378_vm2, %v25351_v63 }
0x2c14   :  { %20619 = vmatprep.subr.bf16.mxu0 %v21377_v61 }
0x2c17   :  { %20621 = vmatpush3.bf16.msra.mxu0 %v20620_v35 }
0x2c18   :  { %20622 = vmatprep.subr.bf16.mxu0 %v21377_v61 }
0x2c1b   :  { %20624 = vmatpush3.bf16.msra.mxu0 %v20623_v48 }
0x2c1c   :  { %20625 = vmatprep.subr.bf16.mxu0 %v21377_v61 }
0x2c1f   :  { %20627 = vmatpush3.bf16.msra.mxu0 %v20626_v11 }
0x2c20   :  { %20628 = vmatprep.subr.bf16.mxu0 %v21377_v61 }
0x2c22   :  { %18277 = vmatmul.mubr.f32.vlgmr.msra.gmra.mrb[80].mxu0 %v17376_v19 }
0x2c23   :  { %20630 = vmatpush3.bf16.msra.mxu0 %v24807_v6  ;;  %18295 = vmatprep.mubr.msk.f32.mxu0 %vm21378_vm2, %v25351_v63 }
0x2c24   :  { %20631 = vmatprep.subr.bf16.mxu0 %v21377_v61 }
0x2c27   :  { %20633 = vmatpush3.bf16.msra.mxu0 %v24822_v26 }
0x2c28   :  { %20634 = vmatprep.subr.bf16.mxu0 %v21377_v61 }
0x2c2b   :  { %20636 = vmatpush3.bf16.msra.mxu0 %v24832_v30 }
0x2c2c   :  { %20637 = vmatprep.subr.bf16.mxu0 %v21377_v61 }
0x2c2f   :  { %20639 = vmatpush3.bf16.msra.mxu0 %v24852_v5 }
0x2c30   :  { %20640 = vmatprep.subr.bf16.mxu0 %v21377_v61 }
0x2c32   :  { %18296 = vmatmul.mubr.f32.vlgmr.msra.gmra.mrb[80].mxu0 %v17377_v29 }
0x2c33   :  { %20642 = vmatpush3.bf16.msra.mxu0 %v20641_v59  ;;  %18314 = vmatprep.mubr.msk.f32.mxu0 %vm21378_vm2, %v25351_v63 }
0x2c34   :  { %20643 = vmatprep.subr.bf16.mxu0 %v21377_v61 }
0x2c37   :  { %20645 = vmatpush3.bf16.msra.mxu0 %v20644_v44 }
0x2c38   :  { %20646 = vmatprep.subr.bf16.mxu0 %v21377_v61 }
0x2c3b   :  { %20648 = vmatpush3.bf16.msra.mxu0 %v20647_v53 }
0x2c3c   :  { %20649 = vmatprep.subr.bf16.mxu0 %v21377_v61 }
0x2c3f   :  { %20651 = vmatpush3.bf16.msra.mxu0 %v20650_v32 }
0x2c40   :  { %20652 = vmatprep.subr.bf16.mxu0 %v21377_v61 }
0x2c42   :  { %18315 = vmatmul.mubr.f32.vlgmr.msra.gmra.mrb[80].mxu0 %v17375_v7 }
0x2c43   :  { %20654 = vmatpush3.bf16.msra.mxu0 %v24807_v6  ;;  %18333 = vmatprep.mubr.msk.f32.mxu0 %vm21378_vm2, %v25351_v63 }
0x2c44   :  { %20655 = vmatprep.subr.bf16.mxu0 %v21377_v61 }
0x2c47   :  { %20657 = vmatpush3.bf16.msra.mxu0 %v24822_v26  ;;  %v17902_v26 = vld [vmem:[%s24944_s10] ss:$0 sm:$0xff] }
0x2c48   :  { %20658 = vmatprep.subr.bf16.mxu0 %v21377_v61 }
0x2c4b   :  { %20660 = vmatpush3.bf16.msra.mxu0 %v24832_v30 }
0x2c4c   :  { %20661 = vmatprep.subr.bf16.mxu0 %v21377_v61  ;;  %v17903_v61 = vld [vmem:[#allocation2] ss:$0 sm:$0xff] }
0x2c4f   :  { %20663 = vmatpush3.bf16.msra.mxu0 %v24852_v5 }
0x2c52   :  { %18334 = vmatmul.mubr.f32.vlgmr.msra.gmra.mrb[80].mxu0 %v17375_v7 }
0x2d25   :  { %v17835_v6 = vpop.f32.mrb[80].mxu0 }
0x2d26   :  { %v20690_v9 = vadd.f32 %v17901_v2, %v17835_v6  ;;  %v18335_v63 = vpop.f32.mrb[81].mxu0 }
0x2d28   :  { %v17839_v40 = vmax.f32 %v20690_v9, 0.0 }
0x2d2a   :  { %v17847_v33 = vmul.f32 %v17902_v26, %v17839_v40 }
0x2d2c   :  { %v17848_v30 = vsel %vm1008_vm1, %v17847_v33, 0.0 }
0x2d2d   :  { %17849 = vadd.xlane.f32.xlu0 %v17848_v30 }
0x2dba   :  { %v17850_v58 = vpop.xlane.xlu0 %17849 }
0x2dbb   :  { %v17858_v34 = vadd.f32 %v17903_v61, %v17850_v58 }
0x2dbd   :  { %17860 = vst.msk [vmem:[%s24946_s12] sm:$0xff] %vm17859_vm3, %v17858_v34 }
0x2dbe   :  { %17865 = vsyncpa [#allocation4], 1 }
0x2dbf   :  { %17866 = vsyncpa [#allocation6], 1 }
0x2dc0   :  { %17867 = vsyncpa [#allocation9], 1 }

</bundles_post_ra>
